<compile_context>
chip_gen: v6e
topology: v6e:2x2x1
jax: 0.10.0
libtpu: 0.0.40
codegen_flags: <defaults>
</compile_context>

<pallas_src>
import functools

import jax
import jax.numpy as jnp
from jax.experimental import pallas as pl
from jax.experimental.pallas import tpu as pltpu

_SQRT2 = 1.4142135623730951


def _gelu_exact(x):
    # PyTorch nn.GELU() default = exact erf formulation (computed in f32).
    return 0.5 * x * (1.0 + jax.lax.erf(x / _SQRT2))


def _fc12_kernel(x_ref, w1_ref, b1_ref, w2_ref, b2_ref, h2_ref):
    # h2 = GELU(GELU(x @ w1 + b1) @ w2 + b2); single grid step, weights
    # streamed exactly once.
    x = x_ref[...].astype(jnp.bfloat16)
    h1 = jnp.dot(x, w1_ref[...], preferred_element_type=jnp.float32) + b1_ref[...]
    h1 = _gelu_exact(h1).astype(jnp.bfloat16)
    h2 = jnp.dot(h1, w2_ref[...], preferred_element_type=jnp.float32) + b2_ref[...]
    h2_ref[...] = _gelu_exact(h2).astype(h2_ref.dtype)


def _fc3_kernel(h2_ref, w3_ref, b3_ref, o_ref, *, tn):
    # One OUT tile: out = h2 @ w3[:, tile] + b3[tile].  b3 is resident; slice
    # the current tile with a lane-aligned dynamic window.
    start = pl.multiple_of(pl.program_id(0) * tn, 128)
    b3 = b3_ref[:, pl.ds(start, tn)]
    out = jnp.dot(h2_ref[...], w3_ref[...], preferred_element_type=jnp.float32) + b3
    o_ref[...] = out.astype(o_ref.dtype)


def single_view_to_3d_point(feat, params, n_points):
    """feat: (B, 512) float32. Returns (B, n_points, 3) float32."""
    B, F = feat.shape
    w1, b1, w2, b2, w3, b3 = params
    H1 = w1.shape[1]
    H2 = w2.shape[1]
    OUT = w3.shape[1]
    assert OUT == 3 * n_points

    # Pad batch to a multiple of 16 (bf16 vreg packs (16, 128) sublanes).
    B_pad = max(16, ((B + 15) // 16) * 16)
    if B_pad != B:
        feat = jnp.pad(feat, ((0, B_pad - B), (0, 0)))

    # ---------------- Phase 1: fc1 + fc2 (weights streamed once) ----------
    cost_a = pl.CostEstimate(
        flops=2 * B_pad * (F * H1 + H1 * H2),
        transcendentals=B_pad * (H1 + H2),
        bytes_accessed=(feat.size * 4 + w1.size * 2 + b1.size * 4
                        + w2.size * 2 + b2.size * 4 + B_pad * H2 * 2),
    )
    h2 = pl.pallas_call(
        _fc12_kernel,
        out_shape=jax.ShapeDtypeStruct((B_pad, H2), jnp.bfloat16),
        grid_spec=pltpu.PrefetchScalarGridSpec(
            num_scalar_prefetch=0,
            grid=(1,),
            in_specs=[
                pl.BlockSpec((B_pad, F), lambda n: (0, 0)),   # feat
                pl.BlockSpec((F, H1),   lambda n: (0, 0)),    # w1
                pl.BlockSpec((1, H1),   lambda n: (0, 0)),    # b1
                pl.BlockSpec((H1, H2),  lambda n: (0, 0)),    # w2
                pl.BlockSpec((1, H2),   lambda n: (0, 0)),    # b2
            ],
            out_specs=pl.BlockSpec((B_pad, H2), lambda n: (0, 0)),
        ),
        compiler_params=pltpu.CompilerParams(
            dimension_semantics=("arbitrary",),
            vmem_limit_bytes=32 << 20,
        ),
        cost_estimate=cost_a,
    )(feat, w1, b1, w2, b2)

    # ---------------- Phase 2: fc3, tiled over the output dimension -------
    # Minimal lane padding first (no wasted w3 bytes), then pick the largest
    # TN whose tile count is even (balanced across v7x's 2 TensorCores).
    OUT_pad = pl.cdiv(OUT, 128) * 128
    cands = [t for t in (512, 384, 256, 128) if OUT_pad % t == 0]
    even = [t for t in cands if (OUT_pad // t) % 2 == 0]
    TN = even[0] if even else cands[0]
    n_tiles = OUT_pad // TN

    if OUT_pad != OUT:
        w3 = jnp.pad(w3, ((0, 0), (0, OUT_pad - OUT)))
        b3 = jnp.pad(b3, ((0, 0), (0, OUT_pad - OUT)))

    cost_b = pl.CostEstimate(
        flops=2 * B_pad * H2 * OUT_pad,
        transcendentals=0,
        bytes_accessed=(B_pad * H2 * 2 + w3.size * 2 + b3.size * 4
                        + B_pad * OUT_pad * 4),
    )
    out = pl.pallas_call(
        functools.partial(_fc3_kernel, tn=TN),
        out_shape=jax.ShapeDtypeStruct((B_pad, OUT_pad), jnp.float32),
        grid_spec=pltpu.PrefetchScalarGridSpec(
            num_scalar_prefetch=0,
            grid=(n_tiles,),
            in_specs=[
                pl.BlockSpec((B_pad, H2),  lambda n: (0, 0)),   # h2: resident (64 KiB)
                pl.BlockSpec((H2, TN),     lambda n: (0, n)),   # w3: tiled, pipelined
                pl.BlockSpec((1, OUT_pad), lambda n: (0, 0)),   # b3: resident (6 KiB)
            ],
            out_specs=pl.BlockSpec((B_pad, TN), lambda n: (0, n)),
        ),
        compiler_params=pltpu.CompilerParams(
            dimension_semantics=("parallel",),   # even tile count -> balanced 2-TC split
            vmem_limit_bytes=32 << 20,
        ),
        cost_estimate=cost_b,
    )(h2, w3, b3)

    return out[:B, :OUT].reshape(B, n_points, 3)


def init_params(key, n_points):
    """Deterministic init mimicking nn.Linear's U(-1/sqrt(fan_in), 1/sqrt(fan_in)).

    Weights are stored bf16 (MXU-native, halves HBM traffic); biases stay f32.
    """
    dims = [(512, 1024), (1024, 2048), (2048, 3 * n_points)]
    params = []
    keys = jax.random.split(key, 2 * len(dims))
    for i, (fan_in, fan_out) in enumerate(dims):
        bound = 1.0 / jnp.sqrt(jnp.float32(fan_in))
        w = jax.random.uniform(keys[2 * i], (fan_in, fan_out), jnp.float32,
                               minval=-bound, maxval=bound).astype(jnp.bfloat16)
        b = jax.random.uniform(keys[2 * i + 1], (1, fan_out), jnp.float32,
                               minval=-bound, maxval=bound)
        params += [w, b]
    return tuple(params)


def reference_point(feat, params, n_points):
    """Pure-JAX reference performing the same bf16-weight / f32-accumulate math."""
    w1, b1, w2, b2, w3, b3 = params
    x = feat.astype(jnp.bfloat16)
    h = jnp.dot(x, w1, preferred_element_type=jnp.float32) + b1
    h = _gelu_exact(h).astype(jnp.bfloat16)
    h = jnp.dot(h, w2, preferred_element_type=jnp.float32) + b2
    h = _gelu_exact(h).astype(jnp.bfloat16)
    out = jnp.dot(h, w3, preferred_element_type=jnp.float32) + b3
    return out.reshape(feat.shape[0], n_points, 3)


if __name__ == "__main__":
    key = jax.random.PRNGKey(0)
    k_feat, k_param = jax.random.split(key)

    B = 2
    n_points = 500  # OUT = 1500 -> padded to 1536, TN=384, 4 tiles: exercises grid + padding

    # args.load_feat=True -> "images" are already the 512-d encoded features.
    feat = jax.random.normal(k_feat, (B, 512), jnp.float32)
    params = init_params(k_param, n_points)

    pc_pred = single_view_to_3d_point(feat, params, n_points)
    pc_pred = jax.block_until_ready(pc_pred)

    ref = reference_point(feat, params, n_points)
    assert pc_pred.shape == (B, n_points, 3)
    assert jnp.allclose(pc_pred, ref, atol=1e-2, rtol=1e-2)

    print("KERNEL_OK")
</pallas_src>

<mosaic_0001>
module attributes {stable_mosaic.version = 11 : i64} {
  func.func @_fc12_kernel(%arg0: i32, %arg1: memref<16x512xf32, #tpu.memory_space<vmem>>, %arg2: memref<512x1024xbf16, #tpu.memory_space<vmem>>, %arg3: memref<1x1024xf32, #tpu.memory_space<vmem>>, %arg4: memref<1024x2048xbf16, #tpu.memory_space<vmem>>, %arg5: memref<1x2048xf32, #tpu.memory_space<vmem>>, %arg6: memref<16x2048xbf16, #tpu.memory_space<vmem>>) attributes {dimension_semantics = [#tpu.dimension_semantics<arbitrary>], iteration_bounds = array<i64: 1>, scalar_prefetch = 0 : i64, scratch_operands = 0 : i64, tpu.core_type = #tpu.core_type<tc>, window_params = [{pipeline_mode = #tpu.pipeline_mode<synchronous>, transform_indices = @transform_0, window_bounds = array<i64: 16, 512>}, {pipeline_mode = #tpu.pipeline_mode<synchronous>, transform_indices = @transform_1, window_bounds = array<i64: 512, 1024>}, {pipeline_mode = #tpu.pipeline_mode<synchronous>, transform_indices = @transform_2, window_bounds = array<i64: 1, 1024>}, {pipeline_mode = #tpu.pipeline_mode<synchronous>, transform_indices = @transform_3, window_bounds = array<i64: 1024, 2048>}, {pipeline_mode = #tpu.pipeline_mode<synchronous>, transform_indices = @transform_4, window_bounds = array<i64: 1, 2048>}, {pipeline_mode = #tpu.pipeline_mode<synchronous>, transform_indices = @transform_5, window_bounds = array<i64: 16, 2048>}]} {
    %c0 = arith.constant 0 : index
    %c0_0 = arith.constant 0 : index
    %0 = vector.load %arg1[%c0, %c0_0] : memref<16x512xf32, #tpu.memory_space<vmem>>, vector<16x512xf32>
    %1 = arith.truncf %0 : vector<16x512xf32> to vector<16x512xbf16>
    %c0_1 = arith.constant 0 : index
    %c0_2 = arith.constant 0 : index
    %2 = vector.load %arg2[%c0_1, %c0_2] : memref<512x1024xbf16, #tpu.memory_space<vmem>>, vector<512x1024xbf16>
    %cst = arith.constant dense<0.000000e+00> : vector<16x1024xf32>
    %3 = tpu.matmul %1, %2, %cst {dimension_numbers = #tpu.dot_dimension_numbers<[1], [0], [0], [1], [0, 0, 1, 1], [], []>} : vector<16x512xbf16>, vector<512x1024xbf16>, vector<16x1024xf32> -> vector<16x1024xf32>
    %c0_3 = arith.constant 0 : index
    %c0_4 = arith.constant 0 : index
    %4 = vector.load %arg3[%c0_3, %c0_4] : memref<1x1024xf32, #tpu.memory_space<vmem>>, vector<1x1024xf32>
    %5 = vector.broadcast %4 : vector<1x1024xf32> to vector<16x1024xf32>
    %6 = arith.addf %3, %5 : vector<16x1024xf32>
    %cst_5 = arith.constant 5.000000e-01 : f32
    %7 = vector.broadcast %cst_5 : f32 to vector<16x1024xf32>
    %8 = arith.mulf %7, %6 : vector<16x1024xf32>
    %cst_6 = arith.constant 1.41421354 : f32
    %9 = vector.broadcast %cst_6 : f32 to vector<16x1024xf32>
    %10 = arith.divf %6, %9 : vector<16x1024xf32>
    %11 = math.erf %10 : vector<16x1024xf32>
    %cst_7 = arith.constant 1.000000e+00 : f32
    %12 = vector.broadcast %cst_7 : f32 to vector<16x1024xf32>
    %13 = arith.addf %12, %11 : vector<16x1024xf32>
    %14 = arith.mulf %8, %13 : vector<16x1024xf32>
    %15 = arith.truncf %14 : vector<16x1024xf32> to vector<16x1024xbf16>
    %c0_8 = arith.constant 0 : index
    %c0_9 = arith.constant 0 : index
    %16 = vector.load %arg4[%c0_8, %c0_9] : memref<1024x2048xbf16, #tpu.memory_space<vmem>>, vector<1024x2048xbf16>
    %cst_10 = arith.constant dense<0.000000e+00> : vector<16x2048xf32>
    %17 = tpu.matmul %15, %16, %cst_10 {dimension_numbers = #tpu.dot_dimension_numbers<[1], [0], [0], [1], [0, 0, 1, 1], [], []>} : vector<16x1024xbf16>, vector<1024x2048xbf16>, vector<16x2048xf32> -> vector<16x2048xf32>
    %c0_11 = arith.constant 0 : index
    %c0_12 = arith.constant 0 : index
    %18 = vector.load %arg5[%c0_11, %c0_12] : memref<1x2048xf32, #tpu.memory_space<vmem>>, vector<1x2048xf32>
    %19 = vector.broadcast %18 : vector<1x2048xf32> to vector<16x2048xf32>
    %20 = arith.addf %17, %19 : vector<16x2048xf32>
    %cst_13 = arith.constant 5.000000e-01 : f32
    %21 = vector.broadcast %cst_13 : f32 to vector<16x2048xf32>
    %22 = arith.mulf %21, %20 : vector<16x2048xf32>
    %cst_14 = arith.constant 1.41421354 : f32
    %23 = vector.broadcast %cst_14 : f32 to vector<16x2048xf32>
    %24 = arith.divf %20, %23 : vector<16x2048xf32>
    %25 = math.erf %24 : vector<16x2048xf32>
    %cst_15 = arith.constant 1.000000e+00 : f32
    %26 = vector.broadcast %cst_15 : f32 to vector<16x2048xf32>
    %27 = arith.addf %26, %25 : vector<16x2048xf32>
    %28 = arith.mulf %22, %27 : vector<16x2048xf32>
    %29 = arith.truncf %28 : vector<16x2048xf32> to vector<16x2048xbf16>
    %c0_16 = arith.constant 0 : index
    %c0_17 = arith.constant 0 : index
    %30 = vector.load %arg6[%c0_16, %c0_17] : memref<16x2048xbf16, #tpu.memory_space<vmem>>, vector<16x2048xbf16>
    tpu.vector_store %arg6[%c0_16, %c0_17], %29 {strides = array<i32>} : memref<16x2048xbf16, #tpu.memory_space<vmem>>, vector<16x2048xbf16>,
    return
  }
  func.func @transform_0(%arg0: i32) -> (i32, i32) {
    %c0_i32 = arith.constant 0 : i32
    %c0_i32_0 = arith.constant 0 : i32
    %c0_i32_1 = arith.constant 0 : i32
    return %c0_i32, %c0_i32_0 : i32, i32
  }
  func.func @transform_1(%arg0: i32) -> (i32, i32) {
    %c0_i32 = arith.constant 0 : i32
    %c0_i32_0 = arith.constant 0 : i32
    %c0_i32_1 = arith.constant 0 : i32
    return %c0_i32, %c0_i32_0 : i32, i32
  }
  func.func @transform_2(%arg0: i32) -> (i32, i32) {
    %c0_i32 = arith.constant 0 : i32
    %c0_i32_0 = arith.constant 0 : i32
    %c0_i32_1 = arith.constant 0 : i32
    return %c0_i32, %c0_i32_0 : i32, i32
  }
  func.func @transform_3(%arg0: i32) -> (i32, i32) {
    %c0_i32 = arith.constant 0 : i32
    %c0_i32_0 = arith.constant 0 : i32
    %c0_i32_1 = arith.constant 0 : i32
    return %c0_i32, %c0_i32_0 : i32, i32
  }
  func.func @transform_4(%arg0: i32) -> (i32, i32) {
    %c0_i32 = arith.constant 0 : i32
    %c0_i32_0 = arith.constant 0 : i32
    %c0_i32_1 = arith.constant 0 : i32
    return %c0_i32, %c0_i32_0 : i32, i32
  }
  func.func @transform_5(%arg0: i32) -> (i32, i32) {
    %c0_i32 = arith.constant 0 : i32
    %c0_i32_0 = arith.constant 0 : i32
    %c0_i32_1 = arith.constant 0 : i32
    return %c0_i32, %c0_i32_0 : i32, i32
  }
}

</mosaic_0001>

<bundles_post_ra>
// kernel: tpu_custom_call.1
= control target key start
LH: loop header
LB: loop body
LE: loop exit
PB: predicated region body
PF: predicated region fallthrough
CT: control target
= control target key end

     0   :  { %10 = vsyncpa [#allocation3], 0  ;;  %s11955_s0 = inlined_call_operand.hbm [shape: f32[16,512], index: 0, kind: input, shape index: {}]   ;;  %s11956_s1 = inlined_call_operand.hbm [shape: bf16[512,1024], index: 1, kind: input, shape index: {}]   ;;  %s11957_s2 = inlined_call_operand.hbm [shape: f32[1,1024], index: 2, kind: input, shape index: {}]   ;;  %s11958_s3 = inlined_call_operand.hbm [shape: bf16[1024,2048], index: 3, kind: input, shape index: {}]   ;;  %s11959_s4 = inlined_call_operand.hbm [shape: f32[1,2048], index: 4, kind: input, shape index: {}]   ;;  %s11960_s5 = inlined_call_operand.hbm [shape: bf16[16,2048], index: 5, kind: output, shape index: {}]  }
   0x1   :  { %11 = vsyncpa [#allocation6], 0 }
   0x2   :  { %12 = vsyncpa [#allocation9], 0 }
   0x3   :  { %13 = vsyncpa [#allocation4], 0  ;;  %s11552_s18 = smov [#allocation5]   ;;  %s11553_s20 = smov [#allocation8]  }
   0x4   :  { %s31_s19 = sshll.u32 %s11552_s18, 4  ;;  %s53_s21 = sshll.u32 %s11553_s20, 4  ;;  %s32_s19 = int_to_ptr.vmem [resolvable:$true] %s31_s19  ;;  %s54_s21 = int_to_ptr.vmem [resolvable:$true] %s53_s21 }
   0x5   :  { %s11432_s22 = scalar_lea.vmem %s32_s19, 32768  ;;  %p11437_p1 = scmp.lt.s32.totalorder %s32_s19, %s32_s19 }
   0x6   :  { %p11433_p0 = scmp.ne.s32.totalorder %s32_s19, %s11432_s22  ;;  %p11438_p2 = scmp.lt.s32.totalorder %s11432_s22, %s11432_s22 }
   0x8   :  { %p11439_p3 = por %p11438_p2, %p11437_p1 }
   0xa   :  { %p11440_p4 = pnand %p11439_p3, %p11433_p0 }
   0xc   :  { %11443 = shalt.err (!%p11440_p4)
}
   0xd   :  { %s11554_s23 = smov 512   ;;  %s11555_s24 = smov 32  }
   0xe   :  { %37 = dma.hbm_to_vmem [thread:$0]  %s11956_s1, 32768, %s32_s19, [#allocation6], %s11554_s23, %s11554_s23, %s11555_s24  }
   0xf   :  { %s11452_s27 = scalar_lea.vmem %s54_s21, 131072  ;;  %p11457_p6 = scmp.lt.s32.totalorder %s54_s21, %s54_s21 }
  0x10   :  { %p11453_p5 = scmp.ne.s32.totalorder %s54_s21, %s11452_s27  ;;  %p11458_p7 = scmp.lt.s32.totalorder %s11452_s27, %s11452_s27 }
  0x12   :  { %p11459_p8 = por %p11458_p7, %p11457_p6 }
  0x14   :  { %p11460_p9 = pnand %p11459_p8, %p11453_p5 }
  0x16   :  { %11463 = shalt.err (!%p11460_p9)
}
  0x17   :  { %s11556_s28 = smov 1024   ;;  %s11557_s29 = smov 64  }
  0x18   :  { %59 = dma.hbm_to_vmem [thread:$0]  %s11958_s3, 131072, %s54_s21, [#allocation9], %s11556_s28, %s11556_s28, %s11557_s29  }
  0x19   :  { %s11558_s7 = smov [#allocation2]   ;;  %s11559_s9 = smov [#allocation7]  }
  0x1a   :  { %s19_s8 = sshll.u32 %s11558_s7, 4  ;;  %s44_s1 = sshll.u32 %s11559_s9, 4  ;;  %s20_s8 = int_to_ptr.vmem [resolvable:$true] %s19_s8  ;;  %s45_s1 = int_to_ptr.vmem [resolvable:$true] %s44_s1 }
  0x1b   :  { %s11472_s10 = scalar_lea.vmem %s20_s8, 1024  ;;  %p11477_p11 = scmp.lt.s32.totalorder %s20_s8, %s20_s8 }
  0x1c   :  { %p11473_p10 = scmp.ne.s32.totalorder %s20_s8, %s11472_s10  ;;  %p11478_p12 = scmp.lt.s32.totalorder %s11472_s10, %s11472_s10 }
  0x1e   :  { %p11479_p13 = por %p11478_p12, %p11477_p11 }
  0x20   :  { %p11480_p0 = pnand %p11479_p13, %p11473_p10 }
  0x22   :  { %11483 = shalt.err (!%p11480_p0)
}
  0x23   :  { %25 = dma.hbm_to_vmem [thread:$0]  %s11955_s0, 1024, %s20_s8, [#allocation3], %s11554_s23, %s11554_s23, %s11555_s24  }
  0x24   :  { %s11492_s13 = scalar_lea.vmem %s45_s1, 128  ;;  %p11497_p2 = scmp.lt.s32.totalorder %s45_s1, %s45_s1 }
  0x25   :  { %p11493_p1 = scmp.ne.s32.totalorder %s45_s1, %s11492_s13  ;;  %p11498_p3 = scmp.lt.s32.totalorder %s11492_s13, %s11492_s13 }
  0x27   :  { %p11499_p4 = por %p11498_p3, %p11497_p2 }
  0x29   :  { %p11500_p5 = pnand %p11499_p4, %p11493_p1 }
  0x2b   :  { %11503 = shalt.err (!%p11500_p5)
}
  0x2c   :  { %47 = dma.hbm_to_vmem [thread:$0]  %s11957_s2, 128, %s45_s1, [#allocation6]  }
  0x2d   :  { %s11560_s15 = smov [#allocation10]  }
  0x2e   :  { %s66_s16 = sshll.u32 %s11560_s15, 4  ;;  %s67_s16 = int_to_ptr.vmem [resolvable:$true] %s66_s16 }
  0x2f   :  { %s11512_s17 = scalar_lea.vmem %s67_s16, 256  ;;  %p11517_p7 = scmp.lt.s32.totalorder %s67_s16, %s67_s16 }
  0x30   :  { %p11513_p6 = scmp.ne.s32.totalorder %s67_s16, %s11512_s17  ;;  %p11518_p8 = scmp.lt.s32.totalorder %s11512_s17, %s11512_s17 }
  0x32   :  { %p11519_p9 = por %p11518_p8, %p11517_p7 }
  0x34   :  { %p11520_p10 = pnand %p11519_p9, %p11513_p6 }
  0x36   :  { %11523 = shalt.err (!%p11520_p10)
}
  0x37   :  { %69 = dma.hbm_to_vmem [thread:$0]  %s11959_s4, 256, %s67_s16, [#allocation9]  }
  0x38   :  { %11544 = dma.done.wait [#allocation3], 1024  }
  0x39   :  { %11545 = vsyncadd [#allocation3], 4294966272 }
  0x3a   :  { %11546 = dma.done.wait [#allocation6], 32896  }
  0x3b   :  { %11547 = vsyncadd [#allocation6], 4294934400 }
  0x3c   :  { %11548 = dma.done.wait [#allocation9], 131328  }
  0x3d   :  { %11549 = vsyncadd [#allocation9], 4294835968  ;;  %v153_v0 = vld [vmem:[#allocation5 + $0x1c0] sm:$0xff]  ;;  %v86_v54 = vld [vmem:[#allocation2 + $0x8] sm:$0xff]  ;;  %s11561_s2 = smov [#allocation11]  }
  0x3e   :  { %v157_v1 = vld [vmem:[#allocation5 + $0x1e0] sm:$0xff]  ;;  %v90_v55 = vld [vmem:[#allocation2 + $0x28] sm:$0xff]  ;;  %v88_v59 = vld [vmem:[#allocation2 + $0x18] sm:$0xff]  ;;  %s9989_s4 = sshll.u32 %s11561_s2, 4  ;;  %s9990_s4 = int_to_ptr.vmem [resolvable:$true] %s9989_s4 }
  0x3f   :  { %v281_v2 = vld [vmem:[#allocation5 + $0x5c0] sm:$0xff]  ;;  %v10060_v3 = vcombine.high %v153_v0, %v157_v1  ;;  %v10059_v5 = vcombine.low %v153_v0, %v157_v1  ;;  %v11610_v58 = vpack.c.bf16 %v90_v55, %v86_v54  ;;  %v92_v60 = vld [vmem:[#allocation2 + $0x38] sm:$0xff]  ;;  %s11524_s19 = scalar_lea.vmem %s9990_s4, 2048  ;;  %p11529_p12 = scmp.lt.s32.totalorder %s9990_s4, %s9990_s4 }
  0x40   :  { %v285_v4 = vld [vmem:[#allocation5 + $0x5e0] sm:$0xff]  ;;  %v11612_v63 = vpack.c.bf16 %v92_v60, %v88_v59  ;;  %p11525_p11 = scmp.ne.s32.totalorder %s9990_s4, %s11524_s19  ;;  %p11530_p13 = scmp.lt.s32.totalorder %s11524_s19, %s11524_s19 }
  0x41   :  { %v145_v6 = vld [vmem:[#allocation5 + $0x180] sm:$0xff]  ;;  %v10188_v8 = vcombine.high %v281_v2, %v285_v4  ;;  %v10187_v9 = vcombine.low %v281_v2, %v285_v4  ;;  %1675 = vmatprep.subr.bf16.mxu0 %v10060_v3  ;;  %1707 = vmatprep.mubr.bf16.mxu0 %v11610_v58 }
  0x42   :  { %v149_v7 = vld [vmem:[#allocation5 + $0x1a0] sm:$0xff]  ;;  %1676 = vmatpush1.bf16.msra.mxu0 %v10059_v5  ;;  %1750 = vmatprep.mubr.bf16.mxu1 %v11612_v63  ;;  %p11531_p0 = por %p11530_p13, %p11529_p12 }
  0x43   :  { %v10052_v10 = vcombine.high %v145_v6, %v149_v7  ;;  %v273_v11 = vld [vmem:[#allocation5 + $0x580] sm:$0xff]  ;;  %1718 = vmatprep.subr.bf16.mxu1 %v10188_v8  ;;  %v10051_v18 = vcombine.low %v145_v6, %v149_v7 }
  0x44   :  { %v277_v12 = vld [vmem:[#allocation5 + $0x5a0] sm:$0xff]  ;;  %1719 = vmatpush1.bf16.msra.mxu1 %v10187_v9  ;;  %p11532_p1 = pnand %p11531_p0, %p11525_p11 }
  0x45   :  { %v137_v13 = vld [vmem:[#allocation5 + $0x140] sm:$0xff]  ;;  %v10180_v14 = vcombine.high %v273_v11, %v277_v12  ;;  %1677 = vmatprep.subr.bf16.mxu0 %v10052_v10  ;;  %v10179_v19 = vcombine.low %v273_v11, %v277_v12 }
  0x46   :  { %v141_v15 = vld [vmem:[#allocation5 + $0x160] sm:$0xff]  ;;  %1678 = vmatpush1.bf16.msra.mxu0 %v10051_v18 }
  0x47   :  { %v265_v16 = vld [vmem:[#allocation5 + $0x540] sm:$0xff]  ;;  %v10044_v20 = vcombine.high %v137_v13, %v141_v15  ;;  %1720 = vmatprep.subr.bf16.mxu1 %v10180_v14  ;;  %v10043_v26 = vcombine.low %v137_v13, %v141_v15 }
  0x48   :  { %v269_v17 = vld [vmem:[#allocation5 + $0x560] sm:$0xff]  ;;  %1721 = vmatpush1.bf16.msra.mxu1 %v10179_v19 }
  0x49   :  { %v10172_v21 = vcombine.high %v265_v16, %v269_v17  ;;  %v129_v22 = vld [vmem:[#allocation5 + $0x100] sm:$0xff]  ;;  %1679 = vmatprep.subr.bf16.mxu0 %v10044_v20  ;;  %v10171_v27 = vcombine.low %v265_v16, %v269_v17 }
  0x4a   :  { %v133_v23 = vld [vmem:[#allocation5 + $0x120] sm:$0xff]  ;;  %1680 = vmatpush1.bf16.msra.mxu0 %v10043_v26 }
  0x4b   :  { %v257_v24 = vld [vmem:[#allocation5 + $0x500] sm:$0xff]  ;;  %v10036_v28 = vcombine.high %v129_v22, %v133_v23  ;;  %1722 = vmatprep.subr.bf16.mxu1 %v10172_v21  ;;  %v10035_v34 = vcombine.low %v129_v22, %v133_v23 }
  0x4c   :  { %v261_v25 = vld [vmem:[#allocation5 + $0x520] sm:$0xff]  ;;  %1723 = vmatpush1.bf16.msra.mxu1 %v10171_v27 }
  0x4d   :  { %v10164_v29 = vcombine.high %v257_v24, %v261_v25  ;;  %v121_v30 = vld [vmem:[#allocation5 + $0xc0] sm:$0xff]  ;;  %1681 = vmatprep.subr.bf16.mxu0 %v10036_v28  ;;  %v10163_v35 = vcombine.low %v257_v24, %v261_v25 }
  0x4e   :  { %v125_v31 = vld [vmem:[#allocation5 + $0xe0] sm:$0xff]  ;;  %1682 = vmatpush1.bf16.msra.mxu0 %v10035_v34 }
  0x4f   :  { %v249_v32 = vld [vmem:[#allocation5 + $0x4c0] sm:$0xff]  ;;  %v10028_v36 = vcombine.high %v121_v30, %v125_v31  ;;  %1724 = vmatprep.subr.bf16.mxu1 %v10164_v29  ;;  %v10027_v42 = vcombine.low %v121_v30, %v125_v31 }
  0x50   :  { %v253_v33 = vld [vmem:[#allocation5 + $0x4e0] sm:$0xff]  ;;  %1725 = vmatpush1.bf16.msra.mxu1 %v10163_v35 }
  0x51   :  { %v10156_v37 = vcombine.high %v249_v32, %v253_v33  ;;  %v113_v38 = vld [vmem:[#allocation5 + $0x80] sm:$0xff]  ;;  %1683 = vmatprep.subr.bf16.mxu0 %v10028_v36  ;;  %v10155_v43 = vcombine.low %v249_v32, %v253_v33 }
  0x52   :  { %v117_v39 = vld [vmem:[#allocation5 + $0xa0] sm:$0xff]  ;;  %1684 = vmatpush1.bf16.msra.mxu0 %v10027_v42 }
  0x53   :  { %v241_v40 = vld [vmem:[#allocation5 + $0x480] sm:$0xff]  ;;  %v10020_v44 = vcombine.high %v113_v38, %v117_v39  ;;  %1726 = vmatprep.subr.bf16.mxu1 %v10156_v37  ;;  %v10019_v50 = vcombine.low %v113_v38, %v117_v39 }
  0x54   :  { %v245_v41 = vld [vmem:[#allocation5 + $0x4a0] sm:$0xff]  ;;  %1727 = vmatpush1.bf16.msra.mxu1 %v10155_v43 }
  0x55   :  { %v10148_v45 = vcombine.high %v241_v40, %v245_v41  ;;  %v105_v46 = vld [vmem:[#allocation5 + $0x40] sm:$0xff]  ;;  %1685 = vmatprep.subr.bf16.mxu0 %v10020_v44  ;;  %v10147_v51 = vcombine.low %v241_v40, %v245_v41 }
  0x56   :  { %v109_v47 = vld [vmem:[#allocation5 + $0x60] sm:$0xff]  ;;  %1686 = vmatpush1.bf16.msra.mxu0 %v10019_v50 }
  0x57   :  { %v233_v48 = vld [vmem:[#allocation5 + $0x440] sm:$0xff]  ;;  %v10012_v52 = vcombine.high %v105_v46, %v109_v47  ;;  %1728 = vmatprep.subr.bf16.mxu1 %v10148_v45  ;;  %v10011_v0 = vcombine.low %v105_v46, %v109_v47 }
  0x58   :  { %v237_v49 = vld [vmem:[#allocation5 + $0x460] sm:$0xff]  ;;  %1729 = vmatpush1.bf16.msra.mxu1 %v10147_v51 }
  0x59   :  { %v97_v53 = vld [vmem:[#allocation5] sm:$0xff]  ;;  %v10140_v56 = vcombine.high %v233_v48, %v237_v49  ;;  %1687 = vmatprep.subr.bf16.mxu0 %v10012_v52  ;;  %v10139_v1 = vcombine.low %v233_v48, %v237_v49 }
  0x5a   :  { %v101_v57 = vld [vmem:[#allocation5 + $0x20] sm:$0xff]  ;;  %1688 = vmatpush1.bf16.msra.mxu0 %v10011_v0 }
  0x5b   :  { %v225_v61 = vld [vmem:[#allocation5 + $0x400] sm:$0xff]  ;;  %v10004_v2 = vcombine.high %v97_v53, %v101_v57  ;;  %1730 = vmatprep.subr.bf16.mxu1 %v10140_v56  ;;  %v10003_v8 = vcombine.low %v97_v53, %v101_v57 }
  0x5c   :  { %v229_v62 = vld [vmem:[#allocation5 + $0x420] sm:$0xff]  ;;  %1731 = vmatpush1.bf16.msra.mxu1 %v10139_v1 }
  0x5d   :  { %v10132_v3 = vcombine.high %v225_v61, %v229_v62  ;;  %v217_v4 = vld [vmem:[#allocation5 + $0x3c0] sm:$0xff]  ;;  %1689 = vmatprep.subr.bf16.mxu0 %v10004_v2  ;;  %v10131_v9 = vcombine.low %v225_v61, %v229_v62 }
  0x5e   :  { %v221_v5 = vld [vmem:[#allocation5 + $0x3e0] sm:$0xff]  ;;  %1690 = vmatpush1.bf16.msra.mxu0 %v10003_v8  ;;  %v282_v8 = vld [vmem:[#allocation5 + $0x5c8] sm:$0xff] }
  0x5f   :  { %v345_v6 = vld [vmem:[#allocation5 + $0x7c0] sm:$0xff]  ;;  %v10124_v10 = vcombine.high %v217_v4, %v221_v5  ;;  %1732 = vmatprep.subr.bf16.mxu1 %v10132_v3  ;;  %v10123_v16 = vcombine.low %v217_v4, %v221_v5 }
  0x60   :  { %v349_v7 = vld [vmem:[#allocation5 + $0x7e0] sm:$0xff]  ;;  %1733 = vmatpush1.bf16.msra.mxu1 %v10131_v9  ;;  %v286_v9 = vld [vmem:[#allocation5 + $0x5e8] sm:$0xff] }
  0x61   :  { %v10252_v11 = vcombine.high %v345_v6, %v349_v7  ;;  %v209_v12 = vld [vmem:[#allocation5 + $0x380] sm:$0xff]  ;;  %1691 = vmatprep.subr.bf16.mxu0 %v10124_v10  ;;  %v10251_v17 = vcombine.low %v345_v6, %v349_v7  ;;  %v154_v6 = vld [vmem:[#allocation5 + $0x1c8] sm:$0xff] }
  0x62   :  { %v213_v13 = vld [vmem:[#allocation5 + $0x3a0] sm:$0xff]  ;;  %1692 = vmatpush2.bf16.msra.mxu0 %v10123_v16  ;;  %v158_v7 = vld [vmem:[#allocation5 + $0x1e8] sm:$0xff] }
  0x63   :  { %v337_v14 = vld [vmem:[#allocation5 + $0x780] sm:$0xff]  ;;  %v10116_v18 = vcombine.high %v209_v12, %v213_v13  ;;  %1734 = vmatprep.subr.bf16.mxu1 %v10252_v11  ;;  %v10115_v24 = vcombine.low %v209_v12, %v213_v13  ;;  %v10062_v16 = vcombine.high %v154_v6, %v158_v7 }
  0x64   :  { %v341_v15 = vld [vmem:[#allocation5 + $0x7a0] sm:$0xff]  ;;  %1735 = vmatpush2.bf16.msra.mxu1 %v10251_v17  ;;  %v10190_v17 = vcombine.high %v282_v8, %v286_v9 }
  0x65   :  { %v10244_v19 = vcombine.high %v337_v14, %v341_v15  ;;  %v201_v20 = vld [vmem:[#allocation5 + $0x340] sm:$0xff]  ;;  %1693 = vmatprep.subr.bf16.mxu0 %v10116_v18  ;;  %v10243_v25 = vcombine.low %v337_v14, %v341_v15  ;;  %v87_v14 = vld [vmem:[#allocation2 + $0x10] sm:$0xff]  ;;  %v146_v18 = vld [vmem:[#allocation5 + $0x188] sm:$0xff] }
  0x66   :  { %v205_v21 = vld [vmem:[#allocation5 + $0x360] sm:$0xff]  ;;  %1694 = vmatpush2.bf16.msra.mxu0 %v10115_v24  ;;  %v91_v15 = vld [vmem:[#allocation2 + $0x30] sm:$0xff]  ;;  %v10061_v24 = vcombine.low %v154_v6, %v158_v7  ;;  %v98_v6 = vld [vmem:[#allocation5 + $0x8] sm:$0xff] }
  0x67   :  { %v329_v22 = vld [vmem:[#allocation5 + $0x740] sm:$0xff]  ;;  %v10108_v26 = vcombine.high %v201_v20, %v205_v21  ;;  %1736 = vmatprep.subr.bf16.mxu1 %v10244_v19  ;;  %v10107_v32 = vcombine.low %v201_v20, %v205_v21  ;;  %v150_v19 = vld [vmem:[#allocation5 + $0x1a8] sm:$0xff] }
  0x68   :  { %v333_v23 = vld [vmem:[#allocation5 + $0x760] sm:$0xff]  ;;  %1737 = vmatpush2.bf16.msra.mxu1 %v10243_v25  ;;  %v274_v21 = vld [vmem:[#allocation5 + $0x588] sm:$0xff]  ;;  %v10189_v25 = vcombine.low %v282_v8, %v286_v9 }
  0x69   :  { %v10236_v27 = vcombine.high %v329_v22, %v333_v23  ;;  %v193_v28 = vld [vmem:[#allocation5 + $0x300] sm:$0xff]  ;;  %1695 = vmatprep.subr.bf16.mxu0 %v10108_v26  ;;  %v10235_v33 = vcombine.low %v329_v22, %v333_v23  ;;  %v278_v22 = vld [vmem:[#allocation5 + $0x5a8] sm:$0xff]  ;;  %v11618_v23 = vpack.c.bf16 %v91_v15, %v87_v14  ;;  %v10054_v26 = vcombine.high %v146_v18, %v150_v19 }
  0x6a   :  { %v197_v29 = vld [vmem:[#allocation5 + $0x320] sm:$0xff]  ;;  %1696 = vmatpush2.bf16.msra.mxu0 %v10107_v32  ;;  %v10053_v32 = vcombine.low %v146_v18, %v150_v19  ;;  %v102_v7 = vld [vmem:[#allocation5 + $0x28] sm:$0xff] }
  0x6b   :  { %v321_v30 = vld [vmem:[#allocation5 + $0x700] sm:$0xff]  ;;  %v10100_v34 = vcombine.high %v193_v28, %v197_v29  ;;  %1738 = vmatprep.subr.bf16.mxu1 %v10236_v27  ;;  %v10099_v40 = vcombine.low %v193_v28, %v197_v29  ;;  %v10182_v27 = vcombine.high %v274_v21, %v278_v22  ;;  %v138_v28 = vld [vmem:[#allocation5 + $0x148] sm:$0xff]  ;;  %v10005_v18 = vcombine.low %v98_v6, %v102_v7 }
  0x6c   :  { %v325_v31 = vld [vmem:[#allocation5 + $0x720] sm:$0xff]  ;;  %1739 = vmatpush2.bf16.msra.mxu1 %v10235_v33  ;;  %v142_v29 = vld [vmem:[#allocation5 + $0x168] sm:$0xff]  ;;  %v10181_v33 = vcombine.low %v274_v21, %v278_v22 }
  0x6d   :  { %v10228_v35 = vcombine.high %v321_v30, %v325_v31  ;;  %v185_v36 = vld [vmem:[#allocation5 + $0x2c0] sm:$0xff]  ;;  %1697 = vmatprep.subr.bf16.mxu0 %v10100_v34  ;;  %v10227_v41 = vcombine.low %v321_v30, %v325_v31  ;;  %v266_v30 = vld [vmem:[#allocation5 + $0x548] sm:$0xff]  ;;  %v10046_v34 = vcombine.high %v138_v28, %v142_v29 }
  0x6e   :  { %v189_v37 = vld [vmem:[#allocation5 + $0x2e0] sm:$0xff]  ;;  %1698 = vmatpush2.bf16.msra.mxu0 %v10099_v40  ;;  %v270_v31 = vld [vmem:[#allocation5 + $0x568] sm:$0xff]  ;;  %v10045_v40 = vcombine.low %v138_v28, %v142_v29 }
  0x6f   :  { %v313_v38 = vld [vmem:[#allocation5 + $0x6c0] sm:$0xff]  ;;  %v10092_v42 = vcombine.high %v185_v36, %v189_v37  ;;  %1740 = vmatprep.subr.bf16.mxu1 %v10228_v35  ;;  %v10091_v48 = vcombine.low %v185_v36, %v189_v37  ;;  %v10174_v35 = vcombine.high %v266_v30, %v270_v31  ;;  %v130_v36 = vld [vmem:[#allocation5 + $0x108] sm:$0xff] }
  0x70   :  { %v317_v39 = vld [vmem:[#allocation5 + $0x6e0] sm:$0xff]  ;;  %1741 = vmatpush2.bf16.msra.mxu1 %v10227_v41  ;;  %v134_v37 = vld [vmem:[#allocation5 + $0x128] sm:$0xff]  ;;  %v10173_v41 = vcombine.low %v266_v30, %v270_v31 }
  0x71   :  { %v10220_v43 = vcombine.high %v313_v38, %v317_v39  ;;  %v177_v44 = vld [vmem:[#allocation5 + $0x280] sm:$0xff]  ;;  %1699 = vmatprep.subr.bf16.mxu0 %v10092_v42  ;;  %v10219_v49 = vcombine.low %v313_v38, %v317_v39  ;;  %v258_v38 = vld [vmem:[#allocation5 + $0x508] sm:$0xff]  ;;  %v10038_v42 = vcombine.high %v130_v36, %v134_v37 }
  0x72   :  { %v181_v45 = vld [vmem:[#allocation5 + $0x2a0] sm:$0xff]  ;;  %1700 = vmatpush2.bf16.msra.mxu0 %v10091_v48  ;;  %v262_v39 = vld [vmem:[#allocation5 + $0x528] sm:$0xff]  ;;  %v10037_v48 = vcombine.low %v130_v36, %v134_v37 }
  0x73   :  { %v305_v46 = vld [vmem:[#allocation5 + $0x680] sm:$0xff]  ;;  %v10084_v50 = vcombine.high %v177_v44, %v181_v45  ;;  %1742 = vmatprep.subr.bf16.mxu1 %v10220_v43  ;;  %v10083_v56 = vcombine.low %v177_v44, %v181_v45  ;;  %v10166_v43 = vcombine.high %v258_v38, %v262_v39  ;;  %v122_v44 = vld [vmem:[#allocation5 + $0xc8] sm:$0xff] }
  0x74   :  { %v309_v47 = vld [vmem:[#allocation5 + $0x6a0] sm:$0xff]  ;;  %1743 = vmatpush2.bf16.msra.mxu1 %v10219_v49  ;;  %v126_v45 = vld [vmem:[#allocation5 + $0xe8] sm:$0xff]  ;;  %v10165_v49 = vcombine.low %v258_v38, %v262_v39 }
  0x75   :  { %v10212_v51 = vcombine.high %v305_v46, %v309_v47  ;;  %v169_v52 = vld [vmem:[#allocation5 + $0x240] sm:$0xff]  ;;  %1701 = vmatprep.subr.bf16.mxu0 %v10084_v50  ;;  %v10211_v57 = vcombine.low %v305_v46, %v309_v47  ;;  %v250_v46 = vld [vmem:[#allocation5 + $0x4c8] sm:$0xff]  ;;  %v10030_v50 = vcombine.high %v122_v44, %v126_v45 }
  0x76   :  { %v173_v53 = vld [vmem:[#allocation5 + $0x260] sm:$0xff]  ;;  %1702 = vmatpush2.bf16.msra.mxu0 %v10083_v56  ;;  %v254_v47 = vld [vmem:[#allocation5 + $0x4e8] sm:$0xff]  ;;  %v10029_v56 = vcombine.low %v122_v44, %v126_v45 }
  0x77   :  { %v297_v54 = vld [vmem:[#allocation5 + $0x640] sm:$0xff]  ;;  %v10076_v59 = vcombine.high %v169_v52, %v173_v53  ;;  %1744 = vmatprep.subr.bf16.mxu1 %v10212_v51  ;;  %v10075_v2 = vcombine.low %v169_v52, %v173_v53  ;;  %v10158_v51 = vcombine.high %v250_v46, %v254_v47  ;;  %v114_v52 = vld [vmem:[#allocation5 + $0x88] sm:$0xff] }
  0x78   :  { %v301_v55 = vld [vmem:[#allocation5 + $0x660] sm:$0xff]  ;;  %1745 = vmatpush2.bf16.msra.mxu1 %v10211_v57  ;;  %v118_v53 = vld [vmem:[#allocation5 + $0xa8] sm:$0xff]  ;;  %v10157_v57 = vcombine.low %v250_v46, %v254_v47 }
  0x79   :  { %v10204_v60 = vcombine.high %v297_v54, %v301_v55  ;;  %v161_v61 = vld [vmem:[#allocation5 + $0x200] sm:$0xff]  ;;  %1703 = vmatprep.subr.bf16.mxu0 %v10076_v59  ;;  %v10203_v3 = vcombine.low %v297_v54, %v301_v55  ;;  %v242_v54 = vld [vmem:[#allocation5 + $0x488] sm:$0xff]  ;;  %v10022_v59 = vcombine.high %v114_v52, %v118_v53 }
  0x7a   :  { %v165_v62 = vld [vmem:[#allocation5 + $0x220] sm:$0xff]  ;;  %1704 = vmatpush2.bf16.msra.mxu0 %v10075_v2  ;;  %v246_v55 = vld [vmem:[#allocation5 + $0x4a8] sm:$0xff]  ;;  %v10021_v2 = vcombine.low %v114_v52, %v118_v53 }
  0x7b   :  { %v289_v0 = vld [vmem:[#allocation5 + $0x600] sm:$0xff]  ;;  %v10068_v4 = vcombine.high %v161_v61, %v165_v62  ;;  %1746 = vmatprep.subr.bf16.mxu1 %v10204_v60  ;;  %v10067_v10 = vcombine.low %v161_v61, %v165_v62  ;;  %v10150_v60 = vcombine.high %v242_v54, %v246_v55  ;;  %v106_v61 = vld [vmem:[#allocation5 + $0x48] sm:$0xff] }
  0x7c   :  { %v293_v1 = vld [vmem:[#allocation5 + $0x620] sm:$0xff]  ;;  %1747 = vmatpush2.bf16.msra.mxu1 %v10203_v3  ;;  %v110_v62 = vld [vmem:[#allocation5 + $0x68] sm:$0xff]  ;;  %v10149_v3 = vcombine.low %v242_v54, %v246_v55 }
  0x7d   :  { %v10196_v5 = vcombine.high %v289_v0, %v293_v1  ;;  %v85_v11 = vld [vmem:[#allocation2] sm:$0xff]  ;;  %1705 = vmatprep.subr.bf16.mxu0 %v10068_v4  ;;  %v10195_v13 = vcombine.low %v289_v0, %v293_v1  ;;  %v234_v0 = vld [vmem:[#allocation5 + $0x448] sm:$0xff]  ;;  %v10014_v4 = vcombine.high %v106_v61, %v110_v62 }
  0x7e   :  { %v89_v12 = vld [vmem:[#allocation2 + $0x20] sm:$0xff]  ;;  %1706 = vmatpush2.bf16.msra.mxu0 %v10067_v10  ;;  %v238_v1 = vld [vmem:[#allocation5 + $0x468] sm:$0xff]  ;;  %v10013_v10 = vcombine.low %v106_v61, %v110_v62 }
  0x7f   :  { %1748 = vmatprep.subr.bf16.mxu1 %v10196_v5  ;;  %v11616_v20 = vpack.c.bf16 %v89_v12, %v85_v11  ;;  %1761 = vmatprep.subr.bf16.mxu0 %v10062_v16  ;;  %v10142_v5 = vcombine.high %v234_v0, %v238_v1  ;;  %v226_v8 = vld [vmem:[#allocation5 + $0x408] sm:$0xff]  ;;  %v10141_v11 = vcombine.low %v234_v0, %v238_v1 }
  0x80   :  { %1749 = vmatpush2.bf16.msra.mxu1 %v10195_v13  ;;  %v230_v9 = vld [vmem:[#allocation5 + $0x428] sm:$0xff]  ;;  %v10006_v12 = vcombine.high %v98_v6, %v102_v7 }
  0x81   :  { %1804 = vmatprep.subr.bf16.mxu1 %v10190_v17  ;;  %1708 = vmatmul.mubr.bf16.vlgmr.msra.gmra.mxu0 %v11616_v20  ;;  %v10134_v13 = vcombine.high %v226_v8, %v230_v9  ;;  %v218_v14 = vld [vmem:[#allocation5 + $0x3c8] sm:$0xff]  ;;  %v10133_v19 = vcombine.low %v226_v8, %v230_v9 }
  0x82   :  { %1762 = vmatpush1.bf16.msra.mxu0 %v10061_v24  ;;  %1793 = vmatprep.mubr.bf16.mxu0 %v11610_v58  ;;  %v222_v15 = vld [vmem:[#allocation5 + $0x3e8] sm:$0xff] }
  0x83   :  { %1751 = vmatmul.mubr.bf16.vlgmr.msra.gmra.mxu1 %v11618_v23  ;;  %1763 = vmatprep.subr.bf16.mxu0 %v10054_v26  ;;  %v346_v16 = vld [vmem:[#allocation5 + $0x7c8] sm:$0xff]  ;;  %v10126_v21 = vcombine.high %v218_v14, %v222_v15  ;;  %v10125_v28 = vcombine.low %v218_v14, %v222_v15 }
  0x84   :  { %1805 = vmatpush1.bf16.msra.mxu1 %v10189_v25  ;;  %1836 = vmatprep.mubr.bf16.mxu1 %v11612_v63  ;;  %v350_v17 = vld [vmem:[#allocation5 + $0x7e8] sm:$0xff] }
  0x85   :  { %1806 = vmatprep.subr.bf16.mxu1 %v10182_v27  ;;  %v10254_v22 = vcombine.high %v346_v16, %v350_v17  ;;  %v210_v24 = vld [vmem:[#allocation5 + $0x388] sm:$0xff]  ;;  %v10253_v29 = vcombine.low %v346_v16, %v350_v17 }
  0x86   :  { %1764 = vmatpush1.bf16.msra.mxu0 %v10053_v32  ;;  %v214_v25 = vld [vmem:[#allocation5 + $0x3a8] sm:$0xff] }
  0x87   :  { %1765 = vmatprep.subr.bf16.mxu0 %v10046_v34  ;;  %v338_v26 = vld [vmem:[#allocation5 + $0x788] sm:$0xff]  ;;  %v10118_v30 = vcombine.high %v210_v24, %v214_v25  ;;  %v10117_v36 = vcombine.low %v210_v24, %v214_v25 }
  0x88   :  { %1807 = vmatpush1.bf16.msra.mxu1 %v10181_v33  ;;  %v342_v27 = vld [vmem:[#allocation5 + $0x7a8] sm:$0xff] }
  0x89   :  { %1808 = vmatprep.subr.bf16.mxu1 %v10174_v35  ;;  %v10246_v31 = vcombine.high %v338_v26, %v342_v27  ;;  %v202_v32 = vld [vmem:[#allocation5 + $0x348] sm:$0xff]  ;;  %v10245_v37 = vcombine.low %v338_v26, %v342_v27 }
  0x8a   :  { %1766 = vmatpush1.bf16.msra.mxu0 %v10045_v40  ;;  %v206_v33 = vld [vmem:[#allocation5 + $0x368] sm:$0xff] }
  0x8b   :  { %1767 = vmatprep.subr.bf16.mxu0 %v10038_v42  ;;  %v330_v34 = vld [vmem:[#allocation5 + $0x748] sm:$0xff]  ;;  %v10110_v38 = vcombine.high %v202_v32, %v206_v33  ;;  %v10109_v44 = vcombine.low %v202_v32, %v206_v33 }
  0x8c   :  { %1809 = vmatpush1.bf16.msra.mxu1 %v10173_v41  ;;  %v334_v35 = vld [vmem:[#allocation5 + $0x768] sm:$0xff] }
  0x8d   :  { %1810 = vmatprep.subr.bf16.mxu1 %v10166_v43  ;;  %v10238_v39 = vcombine.high %v330_v34, %v334_v35  ;;  %v194_v40 = vld [vmem:[#allocation5 + $0x308] sm:$0xff]  ;;  %v10237_v45 = vcombine.low %v330_v34, %v334_v35 }
  0x8e   :  { %1768 = vmatpush1.bf16.msra.mxu0 %v10037_v48  ;;  %v198_v41 = vld [vmem:[#allocation5 + $0x328] sm:$0xff] }
  0x8f   :  { %1769 = vmatprep.subr.bf16.mxu0 %v10030_v50  ;;  %v322_v42 = vld [vmem:[#allocation5 + $0x708] sm:$0xff]  ;;  %v10102_v46 = vcombine.high %v194_v40, %v198_v41  ;;  %v10101_v52 = vcombine.low %v194_v40, %v198_v41 }
  0x90   :  { %1811 = vmatpush1.bf16.msra.mxu1 %v10165_v49  ;;  %v326_v43 = vld [vmem:[#allocation5 + $0x728] sm:$0xff] }
  0x91   :  { %1812 = vmatprep.subr.bf16.mxu1 %v10158_v51  ;;  %v10230_v47 = vcombine.high %v322_v42, %v326_v43  ;;  %v186_v48 = vld [vmem:[#allocation5 + $0x2c8] sm:$0xff]  ;;  %v10229_v53 = vcombine.low %v322_v42, %v326_v43 }
  0x92   :  { %1770 = vmatpush1.bf16.msra.mxu0 %v10029_v56  ;;  %v190_v49 = vld [vmem:[#allocation5 + $0x2e8] sm:$0xff] }
  0x93   :  { %1771 = vmatprep.subr.bf16.mxu0 %v10022_v59  ;;  %v314_v50 = vld [vmem:[#allocation5 + $0x6c8] sm:$0xff]  ;;  %v10094_v54 = vcombine.high %v186_v48, %v190_v49  ;;  %v10093_v61 = vcombine.low %v186_v48, %v190_v49 }
  0x94   :  { %1813 = vmatpush1.bf16.msra.mxu1 %v10157_v57  ;;  %v318_v51 = vld [vmem:[#allocation5 + $0x6e8] sm:$0xff] }
  0x95   :  { %1814 = vmatprep.subr.bf16.mxu1 %v10150_v60  ;;  %v10222_v55 = vcombine.high %v314_v50, %v318_v51  ;;  %v178_v56 = vld [vmem:[#allocation5 + $0x288] sm:$0xff]  ;;  %v10221_v62 = vcombine.low %v314_v50, %v318_v51 }
  0x96   :  { %1772 = vmatpush1.bf16.msra.mxu0 %v10021_v2  ;;  %v182_v57 = vld [vmem:[#allocation5 + $0x2a8] sm:$0xff] }
  0x97   :  { %1773 = vmatprep.subr.bf16.mxu0 %v10014_v4  ;;  %v306_v59 = vld [vmem:[#allocation5 + $0x688] sm:$0xff]  ;;  %v10086_v0 = vcombine.high %v178_v56, %v182_v57  ;;  %v10085_v6 = vcombine.low %v178_v56, %v182_v57 }
  0x98   :  { %1815 = vmatpush1.bf16.msra.mxu1 %v10149_v3  ;;  %v310_v60 = vld [vmem:[#allocation5 + $0x6a8] sm:$0xff] }
  0x99   :  { %1816 = vmatprep.subr.bf16.mxu1 %v10142_v5  ;;  %v10214_v1 = vcombine.high %v306_v59, %v310_v60  ;;  %v170_v2 = vld [vmem:[#allocation5 + $0x248] sm:$0xff]  ;;  %v10213_v7 = vcombine.low %v306_v59, %v310_v60 }
  0x9a   :  { %1774 = vmatpush1.bf16.msra.mxu0 %v10013_v10  ;;  %v174_v3 = vld [vmem:[#allocation5 + $0x268] sm:$0xff] }
  0x9b   :  { %1775 = vmatprep.subr.bf16.mxu0 %v10006_v12  ;;  %v298_v4 = vld [vmem:[#allocation5 + $0x648] sm:$0xff]  ;;  %v10078_v8 = vcombine.high %v170_v2, %v174_v3  ;;  %v10077_v14 = vcombine.low %v170_v2, %v174_v3 }
  0x9c   :  { %1817 = vmatpush1.bf16.msra.mxu1 %v10141_v11  ;;  %v302_v5 = vld [vmem:[#allocation5 + $0x668] sm:$0xff] }
  0x9d   :  { %1818 = vmatprep.subr.bf16.mxu1 %v10134_v13  ;;  %v10206_v9 = vcombine.high %v298_v4, %v302_v5  ;;  %v162_v10 = vld [vmem:[#allocation5 + $0x208] sm:$0xff]  ;;  %v10205_v15 = vcombine.low %v298_v4, %v302_v5 }
  0x9e   :  { %1776 = vmatpush1.bf16.msra.mxu0 %v10005_v18  ;;  %v166_v11 = vld [vmem:[#allocation5 + $0x228] sm:$0xff]  ;;  %v155_v18 = vld [vmem:[#allocation5 + $0x1d0] sm:$0xff] }
  0x9f   :  { %1777 = vmatprep.subr.bf16.mxu0 %v10126_v21  ;;  %v290_v12 = vld [vmem:[#allocation5 + $0x608] sm:$0xff]  ;;  %v10070_v16 = vcombine.high %v162_v10, %v166_v11  ;;  %v283_v21 = vld [vmem:[#allocation5 + $0x5d0] sm:$0xff]  ;;  %v10069_v24 = vcombine.low %v162_v10, %v166_v11 }
  0xa0   :  { %1819 = vmatpush1.bf16.msra.mxu1 %v10133_v19  ;;  %v294_v13 = vld [vmem:[#allocation5 + $0x628] sm:$0xff]  ;;  %v159_v19 = vld [vmem:[#allocation5 + $0x1f0] sm:$0xff] }
  0xa1   :  { %1820 = vmatprep.subr.bf16.mxu1 %v10254_v22  ;;  %v10198_v17 = vcombine.high %v290_v12, %v294_v13  ;;  %v287_v22 = vld [vmem:[#allocation5 + $0x5f0] sm:$0xff]  ;;  %v10197_v25 = vcombine.low %v290_v12, %v294_v13  ;;  %v10064_v26 = vcombine.high %v155_v18, %v159_v19  ;;  %v10063_v32 = vcombine.low %v155_v18, %v159_v19 }
  0xa2   :  { %1778 = vmatpush2.bf16.msra.mxu0 %v10125_v28  ;;  %v10192_v27 = vcombine.high %v283_v21, %v287_v22  ;;  %v147_v28 = vld [vmem:[#allocation5 + $0x190] sm:$0xff]  ;;  %v10191_v33 = vcombine.low %v283_v21, %v287_v22 }
  0xa3   :  { %1779 = vmatprep.subr.bf16.mxu0 %v10118_v30  ;;  %v275_v30 = vld [vmem:[#allocation5 + $0x590] sm:$0xff] }
  0xa4   :  { %1821 = vmatpush2.bf16.msra.mxu1 %v10253_v29  ;;  %v151_v29 = vld [vmem:[#allocation5 + $0x1b0] sm:$0xff] }
  0xa5   :  { %1822 = vmatprep.subr.bf16.mxu1 %v10246_v31  ;;  %v279_v31 = vld [vmem:[#allocation5 + $0x5b0] sm:$0xff]  ;;  %v10056_v34 = vcombine.high %v147_v28, %v151_v29  ;;  %v10055_v40 = vcombine.low %v147_v28, %v151_v29 }
  0xa6   :  { %1780 = vmatpush2.bf16.msra.mxu0 %v10117_v36  ;;  %v10184_v35 = vcombine.high %v275_v30, %v279_v31  ;;  %v139_v36 = vld [vmem:[#allocation5 + $0x150] sm:$0xff]  ;;  %v10183_v41 = vcombine.low %v275_v30, %v279_v31 }
  0xa7   :  { %1781 = vmatprep.subr.bf16.mxu0 %v10110_v38  ;;  %v267_v38 = vld [vmem:[#allocation5 + $0x550] sm:$0xff] }
  0xa8   :  { %1823 = vmatpush2.bf16.msra.mxu1 %v10245_v37  ;;  %v143_v37 = vld [vmem:[#allocation5 + $0x170] sm:$0xff] }
  0xa9   :  { %1824 = vmatprep.subr.bf16.mxu1 %v10238_v39  ;;  %v271_v39 = vld [vmem:[#allocation5 + $0x570] sm:$0xff]  ;;  %v10048_v42 = vcombine.high %v139_v36, %v143_v37  ;;  %v10047_v48 = vcombine.low %v139_v36, %v143_v37 }
  0xaa   :  { %1782 = vmatpush2.bf16.msra.mxu0 %v10109_v44  ;;  %v10176_v43 = vcombine.high %v267_v38, %v271_v39  ;;  %v131_v44 = vld [vmem:[#allocation5 + $0x110] sm:$0xff]  ;;  %v10175_v49 = vcombine.low %v267_v38, %v271_v39 }
  0xab   :  { %1783 = vmatprep.subr.bf16.mxu0 %v10102_v46  ;;  %v259_v46 = vld [vmem:[#allocation5 + $0x510] sm:$0xff] }
  0xac   :  { %1825 = vmatpush2.bf16.msra.mxu1 %v10237_v45  ;;  %v135_v45 = vld [vmem:[#allocation5 + $0x130] sm:$0xff] }
  0xad   :  { %1826 = vmatprep.subr.bf16.mxu1 %v10230_v47  ;;  %v263_v47 = vld [vmem:[#allocation5 + $0x530] sm:$0xff]  ;;  %v10040_v50 = vcombine.high %v131_v44, %v135_v45  ;;  %v10039_v56 = vcombine.low %v131_v44, %v135_v45 }
  0xae   :  { %1784 = vmatpush2.bf16.msra.mxu0 %v10101_v52  ;;  %v10168_v51 = vcombine.high %v259_v46, %v263_v47  ;;  %v123_v52 = vld [vmem:[#allocation5 + $0xd0] sm:$0xff]  ;;  %v10167_v57 = vcombine.low %v259_v46, %v263_v47 }
  0xaf   :  { %1785 = vmatprep.subr.bf16.mxu0 %v10094_v54  ;;  %v251_v54 = vld [vmem:[#allocation5 + $0x4d0] sm:$0xff] }
  0xb0   :  { %1827 = vmatpush2.bf16.msra.mxu1 %v10229_v53  ;;  %v127_v53 = vld [vmem:[#allocation5 + $0xf0] sm:$0xff] }
  0xb1   :  { %1828 = vmatprep.subr.bf16.mxu1 %v10222_v55  ;;  %v255_v55 = vld [vmem:[#allocation5 + $0x4f0] sm:$0xff]  ;;  %v10032_v59 = vcombine.high %v123_v52, %v127_v53  ;;  %v10031_v2 = vcombine.low %v123_v52, %v127_v53 }
  0xb2   :  { %1786 = vmatpush2.bf16.msra.mxu0 %v10093_v61  ;;  %v10160_v60 = vcombine.high %v251_v54, %v255_v55  ;;  %v115_v61 = vld [vmem:[#allocation5 + $0x90] sm:$0xff]  ;;  %v10159_v3 = vcombine.low %v251_v54, %v255_v55 }
  0xb3   :  { %1787 = vmatprep.subr.bf16.mxu0 %v10086_v0  ;;  %v243_v0 = vld [vmem:[#allocation5 + $0x490] sm:$0xff] }
  0xb4   :  { %1829 = vmatpush2.bf16.msra.mxu1 %v10221_v62  ;;  %v119_v62 = vld [vmem:[#allocation5 + $0xb0] sm:$0xff] }
  0xb5   :  { %1830 = vmatprep.subr.bf16.mxu1 %v10214_v1  ;;  %v247_v1 = vld [vmem:[#allocation5 + $0x4b0] sm:$0xff]  ;;  %v10024_v4 = vcombine.high %v115_v61, %v119_v62  ;;  %v10023_v10 = vcombine.low %v115_v61, %v119_v62 }
  0xb6   :  { %1788 = vmatpush2.bf16.msra.mxu0 %v10085_v6  ;;  %v10152_v5 = vcombine.high %v243_v0, %v247_v1  ;;  %v107_v6 = vld [vmem:[#allocation5 + $0x50] sm:$0xff]  ;;  %v10151_v11 = vcombine.low %v243_v0, %v247_v1 }
  0xb7   :  { %1789 = vmatprep.subr.bf16.mxu0 %v10078_v8  ;;  %v235_v8 = vld [vmem:[#allocation5 + $0x450] sm:$0xff] }
  0xb8   :  { %1831 = vmatpush2.bf16.msra.mxu1 %v10213_v7  ;;  %v111_v7 = vld [vmem:[#allocation5 + $0x70] sm:$0xff] }
  0xb9   :  { %1832 = vmatprep.subr.bf16.mxu1 %v10206_v9  ;;  %v239_v9 = vld [vmem:[#allocation5 + $0x470] sm:$0xff]  ;;  %v10016_v12 = vcombine.high %v107_v6, %v111_v7  ;;  %v10015_v18 = vcombine.low %v107_v6, %v111_v7 }
  0xba   :  { %1790 = vmatpush2.bf16.msra.mxu0 %v10077_v14  ;;  %v10144_v13 = vcombine.high %v235_v8, %v239_v9  ;;  %v99_v14 = vld [vmem:[#allocation5 + $0x10] sm:$0xff]  ;;  %v10143_v19 = vcombine.low %v235_v8, %v239_v9 }
  0xbb   :  { %1791 = vmatprep.subr.bf16.mxu0 %v10070_v16  ;;  %v227_v16 = vld [vmem:[#allocation5 + $0x410] sm:$0xff] }
  0xbc   :  { %1833 = vmatpush2.bf16.msra.mxu1 %v10205_v15  ;;  %v103_v15 = vld [vmem:[#allocation5 + $0x30] sm:$0xff] }
  0xbd   :  { %1834 = vmatprep.subr.bf16.mxu1 %v10198_v17  ;;  %v231_v17 = vld [vmem:[#allocation5 + $0x430] sm:$0xff]  ;;  %v10008_v21 = vcombine.high %v99_v14, %v103_v15  ;;  %v10007_v28 = vcombine.low %v99_v14, %v103_v15 }
  0xbe   :  { %1792 = vmatpush2.bf16.msra.mxu0 %v10069_v24  ;;  %v10136_v22 = vcombine.high %v227_v16, %v231_v17  ;;  %v219_v24 = vld [vmem:[#allocation5 + $0x3d0] sm:$0xff]  ;;  %v10135_v29 = vcombine.low %v227_v16, %v231_v17 }
  0xbf   :  { %1847 = vmatprep.subr.bf16.mxu0 %v10064_v26  ;;  %v347_v26 = vld [vmem:[#allocation5 + $0x7d0] sm:$0xff] }
  0xc0   :  { %1835 = vmatpush2.bf16.msra.mxu1 %v10197_v25  ;;  %v223_v25 = vld [vmem:[#allocation5 + $0x3f0] sm:$0xff] }
  0xc1   :  { %1890 = vmatprep.subr.bf16.mxu1 %v10192_v27  ;;  %1794 = vmatmul.mubr.bf16.vlgmr.msra.gmra.mxu0 %v11616_v20  ;;  %v351_v27 = vld [vmem:[#allocation5 + $0x7f0] sm:$0xff]  ;;  %v10128_v30 = vcombine.high %v219_v24, %v223_v25  ;;  %v10127_v36 = vcombine.low %v219_v24, %v223_v25 }
  0xc2   :  { %1848 = vmatpush1.bf16.msra.mxu0 %v10063_v32  ;;  %1879 = vmatprep.mubr.bf16.mxu0 %v11610_v58  ;;  %v10256_v31 = vcombine.high %v347_v26, %v351_v27  ;;  %v211_v32 = vld [vmem:[#allocation5 + $0x390] sm:$0xff]  ;;  %v10255_v37 = vcombine.low %v347_v26, %v351_v27 }
  0xc3   :  { %1837 = vmatmul.mubr.bf16.vlgmr.msra.gmra.mxu1 %v11618_v23  ;;  %1849 = vmatprep.subr.bf16.mxu0 %v10056_v34  ;;  %v339_v34 = vld [vmem:[#allocation5 + $0x790] sm:$0xff] }
  0xc4   :  { %1891 = vmatpush1.bf16.msra.mxu1 %v10191_v33  ;;  %1922 = vmatprep.mubr.bf16.mxu1 %v11612_v63  ;;  %v215_v33 = vld [vmem:[#allocation5 + $0x3b0] sm:$0xff] }
  0xc5   :  { %1892 = vmatprep.subr.bf16.mxu1 %v10184_v35  ;;  %v343_v35 = vld [vmem:[#allocation5 + $0x7b0] sm:$0xff]  ;;  %v10120_v38 = vcombine.high %v211_v32, %v215_v33  ;;  %v10119_v44 = vcombine.low %v211_v32, %v215_v33 }
  0xc6   :  { %1850 = vmatpush1.bf16.msra.mxu0 %v10055_v40  ;;  %v10248_v39 = vcombine.high %v339_v34, %v343_v35  ;;  %v203_v40 = vld [vmem:[#allocation5 + $0x350] sm:$0xff]  ;;  %v10247_v45 = vcombine.low %v339_v34, %v343_v35 }
  0xc7   :  { %1851 = vmatprep.subr.bf16.mxu0 %v10048_v42  ;;  %v331_v42 = vld [vmem:[#allocation5 + $0x750] sm:$0xff] }
  0xc8   :  { %1893 = vmatpush1.bf16.msra.mxu1 %v10183_v41  ;;  %v207_v41 = vld [vmem:[#allocation5 + $0x370] sm:$0xff] }
  0xc9   :  { %1894 = vmatprep.subr.bf16.mxu1 %v10176_v43  ;;  %v335_v43 = vld [vmem:[#allocation5 + $0x770] sm:$0xff]  ;;  %v10112_v46 = vcombine.high %v203_v40, %v207_v41  ;;  %v10111_v52 = vcombine.low %v203_v40, %v207_v41 }
  0xca   :  { %1852 = vmatpush1.bf16.msra.mxu0 %v10047_v48  ;;  %v10240_v47 = vcombine.high %v331_v42, %v335_v43  ;;  %v195_v48 = vld [vmem:[#allocation5 + $0x310] sm:$0xff]  ;;  %v10239_v53 = vcombine.low %v331_v42, %v335_v43 }
  0xcb   :  { %1853 = vmatprep.subr.bf16.mxu0 %v10040_v50  ;;  %v323_v50 = vld [vmem:[#allocation5 + $0x710] sm:$0xff] }
  0xcc   :  { %1895 = vmatpush1.bf16.msra.mxu1 %v10175_v49  ;;  %v199_v49 = vld [vmem:[#allocation5 + $0x330] sm:$0xff] }
  0xcd   :  { %1896 = vmatprep.subr.bf16.mxu1 %v10168_v51  ;;  %v327_v51 = vld [vmem:[#allocation5 + $0x730] sm:$0xff]  ;;  %v10104_v54 = vcombine.high %v195_v48, %v199_v49  ;;  %v10103_v61 = vcombine.low %v195_v48, %v199_v49 }
  0xce   :  { %1854 = vmatpush1.bf16.msra.mxu0 %v10039_v56  ;;  %v10232_v55 = vcombine.high %v323_v50, %v327_v51  ;;  %v187_v56 = vld [vmem:[#allocation5 + $0x2d0] sm:$0xff]  ;;  %v10231_v62 = vcombine.low %v323_v50, %v327_v51 }
  0xcf   :  { %1855 = vmatprep.subr.bf16.mxu0 %v10032_v59  ;;  %v315_v59 = vld [vmem:[#allocation5 + $0x6d0] sm:$0xff] }
  0xd0   :  { %1897 = vmatpush1.bf16.msra.mxu1 %v10167_v57  ;;  %v191_v57 = vld [vmem:[#allocation5 + $0x2f0] sm:$0xff] }
  0xd1   :  { %1898 = vmatprep.subr.bf16.mxu1 %v10160_v60  ;;  %v319_v60 = vld [vmem:[#allocation5 + $0x6f0] sm:$0xff]  ;;  %v10096_v0 = vcombine.high %v187_v56, %v191_v57  ;;  %v10095_v6 = vcombine.low %v187_v56, %v191_v57 }
  0xd2   :  { %1856 = vmatpush1.bf16.msra.mxu0 %v10031_v2  ;;  %v10224_v1 = vcombine.high %v315_v59, %v319_v60  ;;  %v179_v2 = vld [vmem:[#allocation5 + $0x290] sm:$0xff]  ;;  %v10223_v7 = vcombine.low %v315_v59, %v319_v60 }
  0xd3   :  { %1857 = vmatprep.subr.bf16.mxu0 %v10024_v4  ;;  %v307_v4 = vld [vmem:[#allocation5 + $0x690] sm:$0xff] }
  0xd4   :  { %1899 = vmatpush1.bf16.msra.mxu1 %v10159_v3  ;;  %v183_v3 = vld [vmem:[#allocation5 + $0x2b0] sm:$0xff] }
  0xd5   :  { %1900 = vmatprep.subr.bf16.mxu1 %v10152_v5  ;;  %v311_v5 = vld [vmem:[#allocation5 + $0x6b0] sm:$0xff]  ;;  %v10088_v8 = vcombine.high %v179_v2, %v183_v3  ;;  %v10087_v14 = vcombine.low %v179_v2, %v183_v3 }
  0xd6   :  { %1858 = vmatpush1.bf16.msra.mxu0 %v10023_v10  ;;  %v10216_v9 = vcombine.high %v307_v4, %v311_v5  ;;  %v171_v10 = vld [vmem:[#allocation5 + $0x250] sm:$0xff]  ;;  %v10215_v15 = vcombine.low %v307_v4, %v311_v5  ;;  %v116_v4 = vld [vmem:[#allocation5 + $0x98] sm:$0xff] }
  0xd7   :  { %1859 = vmatprep.subr.bf16.mxu0 %v10016_v12  ;;  %v299_v12 = vld [vmem:[#allocation5 + $0x650] sm:$0xff]  ;;  %v120_v5 = vld [vmem:[#allocation5 + $0xb8] sm:$0xff] }
  0xd8   :  { %1901 = vmatpush1.bf16.msra.mxu1 %v10151_v11  ;;  %v175_v11 = vld [vmem:[#allocation5 + $0x270] sm:$0xff] }
  0xd9   :  { %1902 = vmatprep.subr.bf16.mxu1 %v10144_v13  ;;  %v303_v13 = vld [vmem:[#allocation5 + $0x670] sm:$0xff]  ;;  %v10080_v16 = vcombine.high %v171_v10, %v175_v11  ;;  %v10079_v24 = vcombine.low %v171_v10, %v175_v11  ;;  %v10026_v10 = vcombine.high %v116_v4, %v120_v5 }
  0xda   :  { %1860 = vmatpush1.bf16.msra.mxu0 %v10015_v18  ;;  %v10208_v17 = vcombine.high %v299_v12, %v303_v13  ;;  %v163_v18 = vld [vmem:[#allocation5 + $0x210] sm:$0xff]  ;;  %v10207_v25 = vcombine.low %v299_v12, %v303_v13  ;;  %v108_v12 = vld [vmem:[#allocation5 + $0x58] sm:$0xff] }
  0xdb   :  { %1861 = vmatprep.subr.bf16.mxu0 %v10008_v21  ;;  %v291_v21 = vld [vmem:[#allocation5 + $0x610] sm:$0xff]  ;;  %v112_v13 = vld [vmem:[#allocation5 + $0x78] sm:$0xff] }
  0xdc   :  { %1903 = vmatpush1.bf16.msra.mxu1 %v10143_v19  ;;  %v167_v19 = vld [vmem:[#allocation5 + $0x230] sm:$0xff] }
  0xdd   :  { %1904 = vmatprep.subr.bf16.mxu1 %v10136_v22  ;;  %v295_v22 = vld [vmem:[#allocation5 + $0x630] sm:$0xff]  ;;  %v10072_v26 = vcombine.high %v163_v18, %v167_v19  ;;  %v10071_v32 = vcombine.low %v163_v18, %v167_v19  ;;  %v10018_v18 = vcombine.high %v108_v12, %v112_v13 }
  0xde   :  { %1862 = vmatpush1.bf16.msra.mxu0 %v10007_v28  ;;  %v10200_v27 = vcombine.high %v291_v21, %v295_v22  ;;  %v156_v28 = vld [vmem:[#allocation5 + $0x1d8] sm:$0xff]  ;;  %v10199_v33 = vcombine.low %v291_v21, %v295_v22 }
  0xdf   :  { %1863 = vmatprep.subr.bf16.mxu0 %v10128_v30  ;;  %v284_v30 = vld [vmem:[#allocation5 + $0x5d8] sm:$0xff] }
  0xe0   :  { %1905 = vmatpush1.bf16.msra.mxu1 %v10135_v29  ;;  %v160_v29 = vld [vmem:[#allocation5 + $0x1f8] sm:$0xff] }
  0xe1   :  { %1906 = vmatprep.subr.bf16.mxu1 %v10256_v31  ;;  %v288_v31 = vld [vmem:[#allocation5 + $0x5f8] sm:$0xff]  ;;  %v10066_v34 = vcombine.high %v156_v28, %v160_v29  ;;  %v10065_v40 = vcombine.low %v156_v28, %v160_v29 }
  0xe2   :  { %1864 = vmatpush2.bf16.msra.mxu0 %v10127_v36  ;;  %v10194_v35 = vcombine.high %v284_v30, %v288_v31  ;;  %v148_v36 = vld [vmem:[#allocation5 + $0x198] sm:$0xff]  ;;  %v10193_v41 = vcombine.low %v284_v30, %v288_v31 }
  0xe3   :  { %1865 = vmatprep.subr.bf16.mxu0 %v10120_v38  ;;  %v276_v38 = vld [vmem:[#allocation5 + $0x598] sm:$0xff] }
  0xe4   :  { %1907 = vmatpush2.bf16.msra.mxu1 %v10255_v37  ;;  %v152_v37 = vld [vmem:[#allocation5 + $0x1b8] sm:$0xff] }
  0xe5   :  { %1908 = vmatprep.subr.bf16.mxu1 %v10248_v39  ;;  %v280_v39 = vld [vmem:[#allocation5 + $0x5b8] sm:$0xff]  ;;  %v10058_v42 = vcombine.high %v148_v36, %v152_v37  ;;  %v10057_v48 = vcombine.low %v148_v36, %v152_v37 }
  0xe6   :  { %1866 = vmatpush2.bf16.msra.mxu0 %v10119_v44  ;;  %v10186_v43 = vcombine.high %v276_v38, %v280_v39  ;;  %v140_v44 = vld [vmem:[#allocation5 + $0x158] sm:$0xff]  ;;  %v10185_v49 = vcombine.low %v276_v38, %v280_v39 }
  0xe7   :  { %1867 = vmatprep.subr.bf16.mxu0 %v10112_v46  ;;  %v268_v46 = vld [vmem:[#allocation5 + $0x558] sm:$0xff] }
  0xe8   :  { %1909 = vmatpush2.bf16.msra.mxu1 %v10247_v45  ;;  %v144_v45 = vld [vmem:[#allocation5 + $0x178] sm:$0xff] }
  0xe9   :  { %1910 = vmatprep.subr.bf16.mxu1 %v10240_v47  ;;  %v272_v47 = vld [vmem:[#allocation5 + $0x578] sm:$0xff]  ;;  %v10050_v50 = vcombine.high %v140_v44, %v144_v45  ;;  %v10049_v56 = vcombine.low %v140_v44, %v144_v45 }
  0xea   :  { %1868 = vmatpush2.bf16.msra.mxu0 %v10111_v52  ;;  %v10178_v51 = vcombine.high %v268_v46, %v272_v47  ;;  %v132_v52 = vld [vmem:[#allocation5 + $0x118] sm:$0xff]  ;;  %v10177_v57 = vcombine.low %v268_v46, %v272_v47 }
  0xeb   :  { %1869 = vmatprep.subr.bf16.mxu0 %v10104_v54  ;;  %v260_v54 = vld [vmem:[#allocation5 + $0x518] sm:$0xff] }
  0xec   :  { %1911 = vmatpush2.bf16.msra.mxu1 %v10239_v53  ;;  %v136_v53 = vld [vmem:[#allocation5 + $0x138] sm:$0xff] }
  0xed   :  { %1912 = vmatprep.subr.bf16.mxu1 %v10232_v55  ;;  %v264_v55 = vld [vmem:[#allocation5 + $0x538] sm:$0xff]  ;;  %v10042_v59 = vcombine.high %v132_v52, %v136_v53  ;;  %v10041_v2 = vcombine.low %v132_v52, %v136_v53 }
  0xee   :  { %1870 = vmatpush2.bf16.msra.mxu0 %v10103_v61  ;;  %v10170_v60 = vcombine.high %v260_v54, %v264_v55  ;;  %v124_v61 = vld [vmem:[#allocation5 + $0xd8] sm:$0xff] }
  0xef   :  { %1871 = vmatprep.subr.bf16.mxu0 %v10096_v0  ;;  %v252_v0 = vld [vmem:[#allocation5 + $0x4d8] sm:$0xff] }
  0xf0   :  { %1913 = vmatpush2.bf16.msra.mxu1 %v10231_v62  ;;  %v128_v62 = vld [vmem:[#allocation5 + $0xf8] sm:$0xff] }
  0xf1   :  { %1914 = vmatprep.subr.bf16.mxu1 %v10224_v1  ;;  %v256_v1 = vld [vmem:[#allocation5 + $0x4f8] sm:$0xff]  ;;  %v10034_v3 = vcombine.high %v124_v61, %v128_v62 }
  0xf2   :  { %1872 = vmatpush2.bf16.msra.mxu0 %v10095_v6  ;;  %v244_v6 = vld [vmem:[#allocation5 + $0x498] sm:$0xff] }
  0xf3   :  { %1873 = vmatprep.subr.bf16.mxu0 %v10088_v8  ;;  %v10033_v8 = vcombine.low %v124_v61, %v128_v62  ;;  %v100_v21 = vld [vmem:[#allocation5 + $0x18] sm:$0xff] }
  0xf4   :  { %1915 = vmatpush2.bf16.msra.mxu1 %v10223_v7  ;;  %v248_v7 = vld [vmem:[#allocation5 + $0x4b8] sm:$0xff] }
  0xf5   :  { %1916 = vmatprep.subr.bf16.mxu1 %v10216_v9  ;;  %v10161_v9 = vcombine.low %v252_v0, %v256_v1  ;;  %v10154_v11 = vcombine.high %v244_v6, %v248_v7  ;;  %v104_v22 = vld [vmem:[#allocation5 + $0x38] sm:$0xff] }
  0xf6   :  { %1874 = vmatpush2.bf16.msra.mxu0 %v10087_v14  ;;  %v236_v14 = vld [vmem:[#allocation5 + $0x458] sm:$0xff]  ;;  %v10010_v28 = vcombine.high %v100_v21, %v104_v22 }
  0xf7   :  { %1875 = vmatprep.subr.bf16.mxu0 %v10080_v16  ;;  %v10025_v16 = vcombine.low %v116_v4, %v120_v5  ;;  %v220_v30 = vld [vmem:[#allocation5 + $0x3d8] sm:$0xff] }
  0xf8   :  { %1917 = vmatpush2.bf16.msra.mxu1 %v10215_v15  ;;  %v240_v15 = vld [vmem:[#allocation5 + $0x478] sm:$0xff] }
  0xf9   :  { %1918 = vmatprep.subr.bf16.mxu1 %v10208_v17  ;;  %v10153_v17 = vcombine.low %v244_v6, %v248_v7  ;;  %v10146_v19 = vcombine.high %v236_v14, %v240_v15  ;;  %v224_v31 = vld [vmem:[#allocation5 + $0x3f8] sm:$0xff] }
  0xfa   :  { %1876 = vmatpush2.bf16.msra.mxu0 %v10079_v24  ;;  %v228_v24 = vld [vmem:[#allocation5 + $0x418] sm:$0xff]  ;;  %v10130_v36 = vcombine.high %v220_v30, %v224_v31 }
  0xfb   :  { %1877 = vmatprep.subr.bf16.mxu0 %v10072_v26  ;;  %v10017_v26 = vcombine.low %v108_v12, %v112_v13  ;;  %v212_v38 = vld [vmem:[#allocation5 + $0x398] sm:$0xff] }
  0xfc   :  { %1919 = vmatpush2.bf16.msra.mxu1 %v10207_v25  ;;  %v232_v25 = vld [vmem:[#allocation5 + $0x438] sm:$0xff] }
  0xfd   :  { %1920 = vmatprep.subr.bf16.mxu1 %v10200_v27  ;;  %v10145_v27 = vcombine.low %v236_v14, %v240_v15  ;;  %v10138_v29 = vcombine.high %v228_v24, %v232_v25  ;;  %v216_v39 = vld [vmem:[#allocation5 + $0x3b8] sm:$0xff] }
  0xfe   :  { %1878 = vmatpush2.bf16.msra.mxu0 %v10071_v32  ;;  %v348_v32 = vld [vmem:[#allocation5 + $0x7d8] sm:$0xff]  ;;  %v10122_v44 = vcombine.high %v212_v38, %v216_v39 }
  0xff   :  { %1933 = vmatprep.subr.bf16.mxu0 %v10066_v34  ;;  %v10009_v34 = vcombine.low %v100_v21, %v104_v22  ;;  %v204_v46 = vld [vmem:[#allocation5 + $0x358] sm:$0xff] }
 0x100   :  { %1921 = vmatpush2.bf16.msra.mxu1 %v10199_v33  ;;  %v352_v33 = vld [vmem:[#allocation5 + $0x7f8] sm:$0xff] }
 0x101   :  { %1976 = vmatprep.subr.bf16.mxu1 %v10194_v35  ;;  %1880 = vmatmul.mubr.bf16.vlgmr.msra.gmra.mxu0 %v11616_v20  ;;  %v10137_v35 = vcombine.low %v228_v24, %v232_v25  ;;  %v10258_v37 = vcombine.high %v348_v32, %v352_v33  ;;  %v208_v47 = vld [vmem:[#allocation5 + $0x378] sm:$0xff] }
 0x102   :  { %1934 = vmatpush1.bf16.msra.mxu0 %v10065_v40  ;;  %1965 = vmatprep.mubr.bf16.mxu0 %v11610_v58  ;;  %v10169_v58 = vcombine.low %v260_v54, %v264_v55  ;;  %v340_v40 = vld [vmem:[#allocation5 + $0x798] sm:$0xff]  ;;  %v10114_v52 = vcombine.high %v204_v46, %v208_v47 }
 0x103   :  { %1923 = vmatmul.mubr.bf16.vlgmr.msra.gmra.mxu1 %v11618_v23  ;;  %1935 = vmatprep.subr.bf16.mxu0 %v10058_v42  ;;  %v10129_v42 = vcombine.low %v220_v30, %v224_v31  ;;  %v196_v54 = vld [vmem:[#allocation5 + $0x318] sm:$0xff] }
 0x104   :  { %1977 = vmatpush1.bf16.msra.mxu1 %v10193_v41  ;;  %2008 = vmatprep.mubr.bf16.mxu1 %v11612_v63  ;;  %v10162_v63 = vcombine.high %v252_v0, %v256_v1  ;;  %v344_v41 = vld [vmem:[#allocation5 + $0x7b8] sm:$0xff] }
 0x105   :  { %1978 = vmatprep.subr.bf16.mxu1 %v10186_v43  ;;  %v10257_v43 = vcombine.low %v348_v32, %v352_v33  ;;  %v10250_v45 = vcombine.high %v340_v40, %v344_v41  ;;  %v200_v55 = vld [vmem:[#allocation5 + $0x338] sm:$0xff]  ;;  %v2220_v33 = vld [vmem:[#allocation8 + $0x380] sm:$0xff] }
 0x106   :  { %1936 = vmatpush1.bf16.msra.mxu0 %v10057_v48  ;;  %v332_v48 = vld [vmem:[#allocation5 + $0x758] sm:$0xff]  ;;  %v10106_v61 = vcombine.high %v196_v54, %v200_v55 }
 0x107   :  { %1937 = vmatprep.subr.bf16.mxu0 %v10050_v50  ;;  %v10121_v50 = vcombine.low %v212_v38, %v216_v39  ;;  %v188_v0 = vld [vmem:[#allocation5 + $0x2d8] sm:$0xff] }
 0x108   :  { %1979 = vmatpush1.bf16.msra.mxu1 %v10185_v49  ;;  %v336_v49 = vld [vmem:[#allocation5 + $0x778] sm:$0xff] }
 0x109   :  { %1980 = vmatprep.subr.bf16.mxu1 %v10178_v51  ;;  %v10249_v51 = vcombine.low %v340_v40, %v344_v41  ;;  %v10242_v53 = vcombine.high %v332_v48, %v336_v49  ;;  %v192_v1 = vld [vmem:[#allocation5 + $0x2f8] sm:$0xff] }
 0x10a   :  { %1938 = vmatpush1.bf16.msra.mxu0 %v10049_v56  ;;  %v324_v56 = vld [vmem:[#allocation5 + $0x718] sm:$0xff]  ;;  %v10098_v4 = vcombine.high %v188_v0, %v192_v1 }
 0x10b   :  { %1939 = vmatprep.subr.bf16.mxu0 %v10042_v59  ;;  %v10113_v59 = vcombine.low %v204_v46, %v208_v47  ;;  %v180_v6 = vld [vmem:[#allocation5 + $0x298] sm:$0xff]  ;;  %v2468_v46 = vld [vmem:[#allocation8 + $0xb40] sm:$0xff] }
 0x10c   :  { %1981 = vmatpush1.bf16.msra.mxu1 %v10177_v57  ;;  %v328_v57 = vld [vmem:[#allocation5 + $0x738] sm:$0xff] }
 0x10d   :  { %1982 = vmatprep.subr.bf16.mxu1 %v10170_v60  ;;  %v10241_v60 = vcombine.low %v332_v48, %v336_v49  ;;  %v10234_v62 = vcombine.high %v324_v56, %v328_v57  ;;  %v184_v7 = vld [vmem:[#allocation5 + $0x2b8] sm:$0xff]  ;;  %v11637_v48 = vld [vmem:[#allocation7] sm:$0xff] }
 0x10e   :  { %1940 = vmatpush1.bf16.msra.mxu0 %v10041_v2  ;;  %v316_v2 = vld [vmem:[#allocation5 + $0x6d8] sm:$0xff]  ;;  %v10090_v12 = vcombine.high %v180_v6, %v184_v7 }
 0x10f   :  { %1941 = vmatprep.subr.bf16.mxu0 %v10034_v3  ;;  %v10105_v3 = vcombine.low %v196_v54, %v200_v55  ;;  %v172_v14 = vld [vmem:[#allocation5 + $0x258] sm:$0xff] }
 0x110   :  { %1983 = vmatpush1.bf16.msra.mxu1 %v10169_v58  ;;  %v320_v58 = vld [vmem:[#allocation5 + $0x6f8] sm:$0xff] }
 0x111   :  { %1984 = vmatprep.subr.bf16.mxu1 %v10162_v63  ;;  %v10233_v63 = vcombine.low %v324_v56, %v328_v57  ;;  %v10226_v5 = vcombine.high %v316_v2, %v320_v58  ;;  %v176_v15 = vld [vmem:[#allocation5 + $0x278] sm:$0xff]  ;;  %v2444_v56 = vld [vmem:[#allocation8 + $0xa80] sm:$0xff] }
 0x112   :  { %1942 = vmatpush1.bf16.msra.mxu0 %v10033_v8  ;;  %v308_v8 = vld [vmem:[#allocation5 + $0x698] sm:$0xff]  ;;  %v10082_v21 = vcombine.high %v172_v14, %v176_v15  ;;  %v2452_v57 = vld [vmem:[#allocation8 + $0xac0] sm:$0xff] }
 0x113   :  { %1943 = vmatprep.subr.bf16.mxu0 %v10026_v10  ;;  %v10097_v10 = vcombine.low %v188_v0, %v192_v1  ;;  %v164_v24 = vld [vmem:[#allocation5 + $0x218] sm:$0xff] }
 0x114   :  { %1985 = vmatpush1.bf16.msra.mxu1 %v10161_v9  ;;  %v312_v9 = vld [vmem:[#allocation5 + $0x6b8] sm:$0xff] }
 0x115   :  { %1986 = vmatprep.subr.bf16.mxu1 %v10154_v11  ;;  %v10225_v11 = vcombine.low %v316_v2, %v320_v58  ;;  %v10218_v13 = vcombine.high %v308_v8, %v312_v9  ;;  %v168_v25 = vld [vmem:[#allocation5 + $0x238] sm:$0xff]  ;;  %v2172_v58 = vld [vmem:[#allocation8 + $0x200] sm:$0xff] }
 0x116   :  { %1944 = vmatpush1.bf16.msra.mxu0 %v10025_v16  ;;  %v300_v16 = vld [vmem:[#allocation5 + $0x658] sm:$0xff]  ;;  %v10074_v31 = vcombine.high %v164_v24, %v168_v25 }
 0x117   :  { %1945 = vmatprep.subr.bf16.mxu0 %v10018_v18  ;;  %v10089_v18 = vcombine.low %v180_v6, %v184_v7 }
 0x118   :  { %1987 = vmatpush1.bf16.msra.mxu1 %v10153_v17  ;;  %v304_v17 = vld [vmem:[#allocation5 + $0x678] sm:$0xff] }
 0x119   :  { %1988 = vmatprep.subr.bf16.mxu1 %v10146_v19  ;;  %v10217_v19 = vcombine.low %v308_v8, %v312_v9  ;;  %v10210_v22 = vcombine.high %v300_v16, %v304_v17  ;;  %v10209_v30 = vcombine.low %v300_v16, %v304_v17  ;;  %v2412_v16 = vld [vmem:[#allocation8 + $0x980] sm:$0xff] }
 0x11a   :  { %1946 = vmatpush1.bf16.msra.mxu0 %v10017_v26  ;;  %v292_v26 = vld [vmem:[#allocation5 + $0x618] sm:$0xff]  ;;  %v2420_v17 = vld [vmem:[#allocation8 + $0x9c0] sm:$0xff] }
 0x11b   :  { %1947 = vmatprep.subr.bf16.mxu0 %v10010_v28  ;;  %v10081_v28 = vcombine.low %v172_v14, %v176_v15 }
 0x11c   :  { %1989 = vmatpush1.bf16.msra.mxu1 %v10145_v27  ;;  %v296_v27 = vld [vmem:[#allocation5 + $0x638] sm:$0xff] }
 0x11d   :  { %1990 = vmatprep.subr.bf16.mxu1 %v10138_v29  ;;  %v355_v29 = vlaneseq  ;;  %v10202_v32 = vcombine.high %v292_v26, %v296_v27  ;;  %v10201_v39 = vcombine.low %v292_v26, %v296_v27  ;;  %v2148_v26 = vld [vmem:[#allocation8 + $0x140] sm:$0xff]  ;;  %v10564_v27 = vcombine.high %v2412_v16, %v2420_v17 }
 0x11e   :  { %1948 = vmatpush1.bf16.msra.mxu0 %v10009_v34  ;;  %v2228_v34 = vld [vmem:[#allocation8 + $0x3c0] sm:$0xff] }
 0x11f   :  { %1949 = vmatprep.subr.bf16.mxu0 %v10130_v36  ;;  %v2484_v36 = vld [vmem:[#allocation8 + $0xbc0] sm:$0xff]  ;;  %v11632_v38 = vshrl.u32 %v355_v29, 7  ;;  %v10372_v40 = vcombine.high %v2220_v33, %v2228_v34  ;;  %v10371_v47 = vcombine.low %v2220_v33, %v2228_v34  ;;  %v10563_v33 = vcombine.low %v2412_v16, %v2420_v17 }
 0x120   :  { %1991 = vmatpush1.bf16.msra.mxu1 %v10137_v35  ;;  %v2476_v35 = vld [vmem:[#allocation8 + $0xb80] sm:$0xff] }
 0x121   :  { %1992 = vmatprep.subr.bf16.mxu1 %v10258_v37  ;;  %v10073_v37 = vcombine.low %v164_v24, %v168_v25  ;;  %v11635_v41 = vsub.s32 1, %v11632_v38  ;;  %v2140_v25 = vld [vmem:[#allocation8 + $0x100] sm:$0xff] }
 0x122   :  { %1950 = vmatpush2.bf16.msra.mxu0 %v10129_v42  ;;  %v2204_v42 = vld [vmem:[#allocation8 + $0x300] sm:$0xff] }
 0x123   :  { %1951 = vmatprep.subr.bf16.mxu0 %v10122_v44  ;;  %v10628_v44 = vcombine.high %v2476_v35, %v2484_v36  ;;  %v2396_v29 = vld [vmem:[#allocation8 + $0x900] sm:$0xff] }
 0x124   :  { %1993 = vmatpush2.bf16.msra.mxu1 %v10257_v43  ;;  %v2212_v43 = vld [vmem:[#allocation8 + $0x340] sm:$0xff] }
 0x125   :  { %1994 = vmatprep.subr.bf16.mxu1 %v10250_v45  ;;  %v2460_v45 = vld [vmem:[#allocation8 + $0xb00] sm:$0xff]  ;;  %v10356_v49 = vcombine.high %v2204_v42, %v2212_v43 }
 0x126   :  { %1952 = vmatpush2.bf16.msra.mxu0 %v10121_v50  ;;  %v10627_v50 = vcombine.low %v2476_v35, %v2484_v36  ;;  %v10612_v54 = vcombine.high %v2460_v45, %v2468_v46  ;;  %v10611_v0 = vcombine.low %v2460_v45, %v2468_v46  ;;  %v2124_v34 = vld [vmem:[#allocation8 + $0x80] sm:$0xff] }
 0x127   :  { %1953 = vmatprep.subr.bf16.mxu0 %v10114_v52  ;;  %v2188_v52 = vld [vmem:[#allocation8 + $0x280] sm:$0xff] }
 0x128   :  { %1995 = vmatpush2.bf16.msra.mxu1 %v10249_v51  ;;  %v362_v51 = vrot.slane %v11637_v48, %v11635_v41  ;;  %v2132_v35 = vld [vmem:[#allocation8 + $0xc0] sm:$0xff] }
 0x129   :  { %1996 = vmatprep.subr.bf16.mxu1 %v10242_v53  ;;  %v2196_v53 = vld [vmem:[#allocation8 + $0x2c0] sm:$0xff] }
 0x12a   :  { %1954 = vmatpush2.bf16.msra.mxu0 %v10113_v59  ;;  %v10339_v7 = vcombine.low %v2188_v52, %v2196_v53  ;;  %v2116_v45 = vld [vmem:[#allocation8 + $0x40] sm:$0xff] }
 0x12b   :  { %1955 = vmatprep.subr.bf16.mxu0 %v10106_v61 }
 0x12c   :  { %1997 = vmatpush2.bf16.msra.mxu1 %v10241_v60  ;;  %v10355_v60 = vcombine.low %v2204_v42, %v2212_v43  ;;  %v10276_v42 = vcombine.high %v2124_v34, %v2132_v35 }
 0x12d   :  { %1998 = vmatprep.subr.bf16.mxu1 %v10234_v62  ;;  %v10340_v62 = vcombine.high %v2188_v52, %v2196_v53 }
 0x12e   :  { %1956 = vmatpush2.bf16.msra.mxu0 %v10105_v3  ;;  %v2180_v3 = vld [vmem:[#allocation8 + $0x240] sm:$0xff] }
 0x12f   :  { %1957 = vmatprep.subr.bf16.mxu0 %v10098_v4  ;;  %v2428_v4 = vld [vmem:[#allocation8 + $0xa00] sm:$0xff]  ;;  %v10324_v9 = vcombine.high %v2172_v58, %v2180_v3 }
 0x130   :  { %1999 = vmatpush2.bf16.msra.mxu1 %v10233_v63  ;;  %v10596_v63 = vcombine.high %v2444_v56, %v2452_v57 }
 0x131   :  { %2000 = vmatprep.subr.bf16.mxu1 %v10226_v5  ;;  %v2436_v5 = vld [vmem:[#allocation8 + $0xa40] sm:$0xff] }
 0x132   :  { %1958 = vmatpush2.bf16.msra.mxu0 %v10097_v10  ;;  %v10595_v10 = vcombine.low %v2444_v56, %v2452_v57  ;;  %v10580_v14 = vcombine.high %v2428_v4, %v2436_v5  ;;  %v10579_v24 = vcombine.low %v2428_v4, %v2436_v5  ;;  %v2348_v56 = vld [vmem:[#allocation8 + $0x780] sm:$0xff] }
 0x133   :  { %1959 = vmatprep.subr.bf16.mxu0 %v10090_v12  ;;  %v2156_v12 = vld [vmem:[#allocation8 + $0x180] sm:$0xff] }
 0x134   :  { %2001 = vmatpush2.bf16.msra.mxu1 %v10225_v11  ;;  %v2356_v57 = vld [vmem:[#allocation8 + $0x7c0] sm:$0xff] }
 0x135   :  { %2002 = vmatprep.subr.bf16.mxu1 %v10218_v13  ;;  %v2164_v13 = vld [vmem:[#allocation8 + $0x1c0] sm:$0xff] }
 0x136   :  { %1960 = vmatpush2.bf16.msra.mxu0 %v10089_v18  ;;  %v2340_v4 = vld [vmem:[#allocation8 + $0x740] sm:$0xff] }
 0x137   :  { %1961 = vmatprep.subr.bf16.mxu0 %v10082_v21 }
 0x138   :  { %2003 = vmatpush2.bf16.msra.mxu1 %v10217_v19  ;;  %v10323_v19 = vcombine.low %v2172_v58, %v2180_v3  ;;  %v10500_v3 = vcombine.high %v2348_v56, %v2356_v57 }
 0x139   :  { %2004 = vmatprep.subr.bf16.mxu1 %v10210_v22  ;;  %v10308_v22 = vcombine.high %v2156_v12, %v2164_v13 }
 0x13a   :  { %1962 = vmatpush2.bf16.msra.mxu0 %v10081_v28 }
 0x13b   :  { %1963 = vmatprep.subr.bf16.mxu0 %v10074_v31  ;;  %v10307_v31 = vcombine.low %v2156_v12, %v2164_v13  ;;  %v10499_v13 = vcombine.low %v2348_v56, %v2356_v57  ;;  %v2532_v56 = vld [vmem:[#allocation8 + $0xd40] sm:$0xff] }
 0x13c   :  { %2005 = vmatpush2.bf16.msra.mxu1 %v10209_v30  ;;  %v2404_v30 = vld [vmem:[#allocation8 + $0x940] sm:$0xff] }
 0x13d   :  { %2006 = vmatprep.subr.bf16.mxu1 %v10202_v32  ;;  %v10292_v32 = vcombine.high %v2140_v25, %v2148_v26  ;;  %v10548_v36 = vcombine.high %v2396_v29, %v2404_v30  ;;  %v10547_v43 = vcombine.low %v2396_v29, %v2404_v30  ;;  %v2300_v29 = vld [vmem:[#allocation8 + $0x600] sm:$0xff] }
 0x13e   :  { %1964 = vmatpush2.bf16.msra.mxu0 %v10073_v37  ;;  %v2380_v37 = vld [vmem:[#allocation8 + $0x880] sm:$0xff] }
 0x13f   :  { %8336 = vmatprep.subr.bf16.mxu0 %v10372_v40  ;;  %v10291_v40 = vcombine.low %v2140_v25, %v2148_v26  ;;  %v2572_v26 = vld [vmem:[#allocation8 + $0xe80] sm:$0xff] }
 0x140   :  { %2007 = vmatpush2.bf16.msra.mxu1 %v10201_v39  ;;  %v2388_v39 = vld [vmem:[#allocation8 + $0x8c0] sm:$0xff] }
 0x141   :  { %8379 = vmatprep.subr.bf16.mxu1 %v10628_v44  ;;  %v11641_v55 = vpop.f32.mrf.mxu0  ;;  %1966 = vmatmul.mubr.bf16.vlgmr.msra.gmra.mxu0 %v11616_v20  ;;  %v2108_v44 = vld [vmem:[#allocation8] sm:$0xff]  ;;  %v10532_v46 = vcombine.high %v2380_v37, %v2388_v39  ;;  %v10531_v53 = vcombine.low %v2380_v37, %v2388_v39 }
 0x142   :  { %8337 = vmatpush1.bf16.msra.mxu0 %v10371_v47  ;;  %v11658_v47 = vsub.s32 0, %v11632_v38  ;;  %v10260_v52 = vcombine.high %v2108_v44, %v2116_v45  ;;  %v2308_v30 = vld [vmem:[#allocation8 + $0x640] sm:$0xff] }
 0x143   :  { %v11644_v59 = vpop.f32.mrf.mxu1  ;;  %2009 = vmatmul.mubr.bf16.vlgmr.msra.gmra.mxu1 %v11618_v23  ;;  %v1711_v61 = vpop.f32.mrf.mxu0  ;;  %8338 = vmatprep.subr.bf16.mxu0 %v10356_v49  ;;  %v2364_v49 = vld [vmem:[#allocation8 + $0x800] sm:$0xff] }
 0x144   :  { %8380 = vmatpush1.bf16.msra.mxu1 %v10627_v50  ;;  %v1712_v1 = vadd.f32 %v1711_v61, %v362_v51  ;;  %v2372_v50 = vld [vmem:[#allocation8 + $0x840] sm:$0xff]  ;;  %v358_v61 = vrot.slane %v11637_v48, %v11658_v47 }
 0x145   :  { %v1754_v2 = vpop.f32.mrf.mxu1  ;;  %8381 = vmatprep.subr.bf16.mxu1 %v10612_v54  ;;  %v11647_v20 = vpop.f32.mrf.mxu0  ;;  %v10515_v5 = vcombine.low %v2364_v49, %v2372_v50  ;;  %v2284_v37 = vld [vmem:[#allocation8 + $0x580] sm:$0xff] }
 0x146   :  { %v11649_v6 = vadd.f32 %v1754_v2, %v1712_v1  ;;  %8339 = vmatpush1.bf16.msra.mxu0 %v10355_v60  ;;  %v10516_v60 = vcombine.high %v2364_v49, %v2372_v50  ;;  %v10259_v1 = vcombine.low %v2108_v44, %v2116_v45  ;;  %v1714_v58 = vadd.f32 %v11647_v20, %v358_v61  ;;  %v2588_v20 = vld [vmem:[#allocation8 + $0xf00] sm:$0xff] }
 0x147   :  { %v11651_v23 = vpop.f32.mrf.mxu1  ;;  %v1715_v8 = vpop.f32.mrf.mxu0  ;;  %8340 = vmatprep.subr.bf16.mxu0 %v10340_v62  ;;  %v2604_v62 = vld [vmem:[#allocation8 + $0xf80] sm:$0xff] }
 0x148   :  { %8382 = vmatpush1.bf16.msra.mxu1 %v10611_v0  ;;  %v2037_v11 = vmul.f32 0.70710677, %v11649_v6  ;;  %v1716_v15 = vadd.f32 %v1715_v8, %v362_v51  ;;  %v10275_v51 = vcombine.low %v2124_v34, %v2132_v35  ;;  %v2612_v0 = vld [vmem:[#allocation8 + $0xfc0] sm:$0xff]  ;;  %v11667_v17 = vadd.f32 %v11651_v23, %v1714_v58 }
 0x149   :  { %8383 = vmatprep.subr.bf16.mxu1 %v10596_v63  ;;  %v1758_v18 = vpop.f32.mrf.mxu1  ;;  %v2332_v63 = vld [vmem:[#allocation8 + $0x700] sm:$0xff]  ;;  %v10756_v8 = vcombine.high %v2604_v62, %v2612_v0 }
 0x14a   :  { %8341 = vmatpush1.bf16.msra.mxu0 %v10339_v7  ;;  %11325 = verf.f32 %v2037_v11  ;;  %v11654_v21 = vadd.f32 %v1758_v18, %v1716_v15  ;;  %v2596_v15 = vld [vmem:[#allocation8 + $0xf40] sm:$0xff]  ;;  %v10483_v25 = vcombine.low %v2332_v63, %v2340_v4  ;;  %v2044_v23 = vmul.f32 0.70710677, %v11667_v17 }
 0x14b   :  { %8342 = vmatprep.subr.bf16.mxu0 %v10324_v9  ;;  %v1710_v9 = vadd.f32 %v11641_v55, %v358_v61  ;;  %v10755_v55 = vcombine.low %v2604_v62, %v2612_v0  ;;  %v2556_v34 = vld [vmem:[#allocation8 + $0xe00] sm:$0xff] }
 0x14c   :  { %8384 = vmatpush1.bf16.msra.mxu1 %v10595_v10  ;;  %v2045_v28 = vmul.f32 0.70710677, %v11654_v21  ;;  %v2020_v10 = vmul.f32 0.5, %v11649_v6  ;;  %v2028_v11 = vmul.f32 0.5, %v11654_v21  ;;  %v2564_v35 = vld [vmem:[#allocation8 + $0xe40] sm:$0xff] }
 0x14d   :  { %8385 = vmatprep.subr.bf16.mxu1 %v10580_v14  ;;  %v10484_v14 = vcombine.high %v2332_v63, %v2340_v4  ;;  %v11670_v6 = vadd.f32 %v11644_v59, %v1710_v9  ;;  %v2292_v39 = vld [vmem:[#allocation8 + $0x5c0] sm:$0xff] }
 0x14e   :  { %8343 = vmatpush1.bf16.msra.mxu0 %v10323_v19  ;;  %11327 = verf.f32 %v2045_v28  ;;  %v2316_v19 = vld [vmem:[#allocation8 + $0x680] sm:$0xff] }
 0x14f   :  { %8344 = vmatprep.subr.bf16.mxu0 %v10308_v22  ;;  %v2324_v22 = vld [vmem:[#allocation8 + $0x6c0] sm:$0xff]  ;;  %v2036_v59 = vmul.f32 0.70710677, %v11670_v6  ;;  %11329 = verf.f32 %v2044_v23 }
 0x150   :  { %8386 = vmatpush1.bf16.msra.mxu1 %v10579_v24  ;;  %v10740_v24 = vcombine.high %v2588_v20, %v2596_v15  ;;  %v10468_v28 = vcombine.high %v2316_v19, %v2324_v22  ;;  %v2540_v44 = vld [vmem:[#allocation8 + $0xd80] sm:$0xff] }
 0x151   :  { %8387 = vmatprep.subr.bf16.mxu1 %v10564_v27  ;;  %v2580_v27 = vld [vmem:[#allocation8 + $0xec0] sm:$0xff]  ;;  %11331 = verf.f32 %v2036_v59 }
 0x152   :  { %8345 = vmatpush1.bf16.msra.mxu0 %v10307_v31  ;;  %v10739_v31 = vcombine.low %v2588_v20, %v2596_v15  ;;  %v2548_v45 = vld [vmem:[#allocation8 + $0xdc0] sm:$0xff] }
 0x153   :  { %8346 = vmatprep.subr.bf16.mxu0 %v10292_v32  ;;  %v10724_v32 = vcombine.high %v2572_v26, %v2580_v27  ;;  %v2268_v49 = vld [vmem:[#allocation8 + $0x500] sm:$0xff]  ;;  %v10691_v62 = vcombine.low %v2540_v44, %v2548_v45 }
 0x154   :  { %8388 = vmatpush1.bf16.msra.mxu1 %v10563_v33  ;;  %v10467_v33 = vcombine.low %v2316_v19, %v2324_v22  ;;  %v2276_v50 = vld [vmem:[#allocation8 + $0x540] sm:$0xff]  ;;  %v2027_v19 = vmul.f32 0.5, %v11667_v17 }
 0x155   :  { %8389 = vmatprep.subr.bf16.mxu1 %v10548_v36  ;;  %v10452_v36 = vcombine.high %v2300_v29, %v2308_v30  ;;  %v10420_v57 = vcombine.high %v2268_v49, %v2276_v50  ;;  %v2260_v61 = vld [vmem:[#allocation8 + $0x4c0] sm:$0xff] }
 0x156   :  { %8347 = vmatpush1.bf16.msra.mxu0 %v10291_v40  ;;  %v10723_v40 = vcombine.low %v2572_v26, %v2580_v27  ;;  %v2516_v58 = vld [vmem:[#allocation8 + $0xcc0] sm:$0xff]  ;;  %v2019_v27 = vmul.f32 0.5, %v11670_v6 }
 0x157   :  { %8348 = vmatprep.subr.bf16.mxu0 %v10276_v42  ;;  %v11326_v54 = vpop.eup %11325  ;;  %v10708_v42 = vcombine.high %v2556_v34, %v2564_v35  ;;  %v2236_v4 = vld [vmem:[#allocation8 + $0x400] sm:$0xff] }
 0x158   :  { %8390 = vmatpush1.bf16.msra.mxu1 %v10547_v43  ;;  %v2069_v2 = vadd.f32 1.0, %v11326_v54  ;;  %v10451_v43 = vcombine.low %v2300_v29, %v2308_v30  ;;  %v2524_v54 = vld [vmem:[#allocation8 + $0xd00] sm:$0xff]  ;;  %v11687_v29 = vsub.s32 3, %v11632_v38 }
 0x159   :  { %8391 = vmatprep.subr.bf16.mxu1 %v10532_v46  ;;  %v10436_v46 = vcombine.high %v2284_v37, %v2292_v39  ;;  %v10676_v0 = vcombine.high %v2524_v54, %v2532_v56  ;;  %v2732_v15 = vld [vmem:[#allocation8 + $0x1380] sm:$0xff] }
 0x15a   :  { %8349 = vmatpush1.bf16.msra.mxu0 %v10275_v51  ;;  %v2085_v16 = vmul.f32 %v2069_v2, %v2020_v10  ;;  %v10707_v51 = vcombine.low %v2556_v34, %v2564_v35  ;;  %v2508_v2 = vld [vmem:[#allocation8 + $0xc80] sm:$0xff] }
 0x15b   :  { %8350 = vmatprep.subr.bf16.mxu0 %v10260_v52  ;;  %v11328_v7 = vpop.eup %11327  ;;  %v10692_v52 = vcombine.high %v2540_v44, %v2548_v45  ;;  %v10659_v20 = vcombine.low %v2508_v2, %v2516_v58  ;;  %v11683_v26 = vld [vmem:[#allocation8 + $0x1bc0] sm:$0xff] }
 0x15c   :  { %8392 = vmatpush1.bf16.msra.mxu1 %v10531_v53  ;;  %v2077_v12 = vadd.f32 1.0, %v11328_v7  ;;  %v10435_v53 = vcombine.low %v2284_v37, %v2292_v39  ;;  %v11330_v63 = vpop.eup %11329  ;;  %v10675_v7 = vcombine.low %v2524_v54, %v2532_v56  ;;  %v2716_v30 = vld [vmem:[#allocation8 + $0x1300] sm:$0xff] }
 0x15d   :  { %8393 = vmatprep.subr.bf16.mxu1 %v10516_v60  ;;  %v2252_v60 = vld [vmem:[#allocation8 + $0x480] sm:$0xff] }
 0x15e   :  { %8351 = vmatpush1.bf16.msra.mxu0 %v10259_v1  ;;  %v2093_v18 = vmul.f32 %v2077_v12, %v2028_v11  ;;  %v10419_v1 = vcombine.low %v2268_v49, %v2276_v50  ;;  %v11332_v9 = vpop.eup %11331  ;;  %v10403_v10 = vcombine.low %v2252_v60, %v2260_v61  ;;  %v2492_v11 = vld [vmem:[#allocation8 + $0xc00] sm:$0xff] }
 0x15f   :  { %8352 = vmatprep.subr.bf16.mxu0 %v10500_v3  ;;  %v10404_v3 = vcombine.high %v2252_v60, %v2260_v61  ;;  %v2500_v12 = vld [vmem:[#allocation8 + $0xc40] sm:$0xff] }
 0x160   :  { %8394 = vmatpush1.bf16.msra.mxu1 %v10515_v5  ;;  %v11672_v21 = vpack.c.bf16 %v2093_v18, %v2085_v16  ;;  %v2244_v5 = vld [vmem:[#allocation8 + $0x440] sm:$0xff]  ;;  %v2068_v18 = vadd.f32 1.0, %v11332_v9  ;;  %v10644_v22 = vcombine.high %v2492_v11, %v2500_v12  ;;  %v10643_v17 = vcombine.low %v2492_v11, %v2500_v12 }
 0x161   :  { %8395 = vmatprep.subr.bf16.mxu1 %v10756_v8  ;;  %v10660_v8 = vcombine.high %v2508_v2, %v2516_v58  ;;  %v2740_v16 = vld [vmem:[#allocation8 + $0x13c0] sm:$0xff] }
 0x162   :  { %8353 = vmatpush2.bf16.msra.mxu0 %v10499_v13  ;;  %8368 = vmatprep.mubr.bf16.mxu0 %v11672_v21  ;;  %v2076_v13 = vadd.f32 1.0, %v11330_v63  ;;  %v2084_v59 = vmul.f32 %v2068_v18, %v2019_v27  ;;  %v10883_v6 = vcombine.low %v2732_v15, %v2740_v16  ;;  %v2700_v37 = vld [vmem:[#allocation8 + $0x1280] sm:$0xff] }
 0x163   :  { %8354 = vmatprep.subr.bf16.mxu0 %v10484_v14  ;;  %v10388_v14 = vcombine.high %v2236_v4, %v2244_v5  ;;  %v2708_v39 = vld [vmem:[#allocation8 + $0x12c0] sm:$0xff] }
 0x164   :  { %8396 = vmatpush2.bf16.msra.mxu1 %v10755_v55  ;;  %v10387_v55 = vcombine.low %v2236_v4, %v2244_v5  ;;  %v2092_v23 = vmul.f32 %v2076_v13, %v2027_v19  ;;  %v2676_v63 = vld [vmem:[#allocation8 + $0x11c0] sm:$0xff] }
 0x165   :  { %8397 = vmatprep.subr.bf16.mxu1 %v10740_v24  ;;  %v11679_v24 = vsub.s32 2, %v11632_v38  ;;  %v2652_v11 = vld [vmem:[#allocation8 + $0x1100] sm:$0xff] }
 0x166   :  { %8355 = vmatpush2.bf16.msra.mxu0 %v10483_v25  ;;  %v11681_v25 = vld [vmem:[#allocation8 + $0x1b80] sm:$0xff]  ;;  %v11693_v34 = vpack.c.bf16 %v2092_v23, %v2084_v59 }
 0x167   :  { %8356 = vmatprep.subr.bf16.mxu0 %v10468_v28  ;;  %v10884_v28 = vcombine.high %v2732_v15, %v2740_v16  ;;  %v2660_v12 = vld [vmem:[#allocation8 + $0x1140] sm:$0xff] }
 0x168   :  { %8398 = vmatpush2.bf16.msra.mxu1 %v10739_v31  ;;  %v2724_v31 = vld [vmem:[#allocation8 + $0x1340] sm:$0xff]  ;;  %v10803_v18 = vcombine.low %v2652_v11, %v2660_v12 }
 0x169   :  { %8399 = vmatprep.subr.bf16.mxu1 %v10724_v32  ;;  %v11140_v32 = vcombine.high %v11681_v25, %v11683_v26  ;;  %v10868_v35 = vcombine.high %v2716_v30, %v2724_v31  ;;  %v10867_v44 = vcombine.low %v2716_v30, %v2724_v31  ;;  %v2636_v15 = vld [vmem:[#allocation8 + $0x1080] sm:$0xff] }
 0x16a   :  { %8357 = vmatpush2.bf16.msra.mxu0 %v10467_v33  ;;  %v366_v33 = vrot.slane %v11637_v48, %v11679_v24  ;;  %v2644_v16 = vld [vmem:[#allocation8 + $0x10c0] sm:$0xff] }
 0x16b   :  { %8358 = vmatprep.subr.bf16.mxu0 %v10452_v36  ;;  %v370_v36 = vrot.slane %v11637_v48, %v11687_v29  ;;  %v10788_v19 = vcombine.high %v2636_v15, %v2644_v16  ;;  %v10787_v27 = vcombine.low %v2636_v15, %v2644_v16  ;;  %v2860_v30 = vld [vmem:[#allocation8 + $0x1780] sm:$0xff] }
 0x16c   :  { %8400 = vmatpush2.bf16.msra.mxu1 %v10723_v40  ;;  %v2868_v31 = vld [vmem:[#allocation8 + $0x17c0] sm:$0xff] }
 0x16d   :  { %8401 = vmatprep.subr.bf16.mxu1 %v10708_v42  ;;  %v2804_v15 = vld [vmem:[#allocation8 + $0x15c0] sm:$0xff] }
 0x16e   :  { %8359 = vmatpush2.bf16.msra.mxu0 %v10451_v43 }
 0x16f   :  { %8360 = vmatprep.subr.bf16.mxu0 %v10436_v46  ;;  %v10852_v46 = vcombine.high %v2700_v37, %v2708_v39 }
 0x170   :  { %8402 = vmatpush2.bf16.msra.mxu1 %v10707_v51 }
 0x171   :  { %8403 = vmatprep.subr.bf16.mxu1 %v10692_v52  ;;  %v2684_v52 = vld [vmem:[#allocation8 + $0x1200] sm:$0xff] }
 0x172   :  { %8361 = vmatpush2.bf16.msra.mxu0 %v10435_v53  ;;  %v2692_v53 = vld [vmem:[#allocation8 + $0x1240] sm:$0xff] }
 0x173   :  { %8362 = vmatprep.subr.bf16.mxu0 %v10420_v57 }
 0x174   :  { %8404 = vmatpush2.bf16.msra.mxu1 %v10691_v62  ;;  %v10851_v62 = vcombine.low %v2700_v37, %v2708_v39 }
 0x175   :  { %8405 = vmatprep.subr.bf16.mxu1 %v10676_v0 }
 0x176   :  { %8363 = vmatpush2.bf16.msra.mxu0 %v10419_v1  ;;  %v10836_v1 = vcombine.high %v2684_v52, %v2692_v53 }
 0x177   :  { %8364 = vmatprep.subr.bf16.mxu0 %v10404_v3  ;;  %v2668_v3 = vld [vmem:[#allocation8 + $0x1180] sm:$0xff] }
 0x178   :  { %8406 = vmatpush2.bf16.msra.mxu1 %v10675_v7 }
 0x179   :  { %8407 = vmatprep.subr.bf16.mxu1 %v10660_v8  ;;  %v10835_v8 = vcombine.low %v2684_v52, %v2692_v53 }
 0x17a   :  { %8365 = vmatpush2.bf16.msra.mxu0 %v10403_v10  ;;  %v10820_v10 = vcombine.high %v2668_v3, %v2676_v63 }
 0x17b   :  { %8366 = vmatprep.subr.bf16.mxu0 %v10388_v14  ;;  %v10819_v14 = vcombine.low %v2668_v3, %v2676_v63 }
 0x17c   :  { %8408 = vmatpush2.bf16.msra.mxu1 %v10659_v20  ;;  %v10804_v20 = vcombine.high %v2652_v11, %v2660_v12 }
 0x17d   :  { %8409 = vmatprep.subr.bf16.mxu1 %v10644_v22  ;;  %v2620_v22 = vld [vmem:[#allocation8 + $0x1000] sm:$0xff] }
 0x17e   :  { %8367 = vmatpush2.bf16.msra.mxu0 %v10387_v55  ;;  %v2628_v55 = vld [vmem:[#allocation8 + $0x1040] sm:$0xff] }
 0x17f   :  { %8422 = vmatprep.subr.bf16.mxu0 %v10884_v28  ;;  %v10772_v28 = vcombine.high %v2620_v22, %v2628_v55 }
 0x180   :  { %8410 = vmatpush2.bf16.msra.mxu1 %v10643_v17 }
 0x181   :  { %v1795_v40 = vpop.f32.mrf.mxu0  ;;  %8369 = vmatmul.mubr.bf16.vlgmr.msra.gmra.mxu0 %v11693_v34  ;;  %8465 = vmatprep.subr.bf16.mxu1 %v11140_v32 }
 0x182   :  { %v1796_v42 = vadd.f32 %v1795_v40, %v366_v33  ;;  %8423 = vmatpush1.bf16.msra.mxu0 %v10883_v6  ;;  %v2844_v40 = vld [vmem:[#allocation8 + $0x1700] sm:$0xff] }
 0x183   :  { %v1838_v43 = vpop.f32.mrf.mxu1  ;;  %v1797_v45 = vpop.f32.mrf.mxu0  ;;  %8424 = vmatprep.subr.bf16.mxu0 %v10868_v35  ;;  %v11012_v35 = vcombine.high %v2860_v30, %v2868_v31 }
 0x184   :  { %v11698_v49 = vadd.f32 %v1838_v43, %v1796_v42  ;;  %v1798_v50 = vadd.f32 %v1797_v45, %v370_v36  ;;  %v2852_v42 = vld [vmem:[#allocation8 + $0x1740] sm:$0xff] }
 0x185   :  { %v1840_v51 = vpop.f32.mrf.mxu1  ;;  %v1799_v54 = vpop.f32.mrf.mxu0  ;;  %v10995_v3 = vcombine.low %v2844_v40, %v2852_v42 }
 0x186   :  { %v2038_v56 = vmul.f32 0.70710677, %v11698_v49  ;;  %v1841_v57 = vadd.f32 %v1840_v51, %v1798_v50  ;;  %v1800_v60 = vadd.f32 %v1799_v54, %v366_v33  ;;  %8425 = vmatpush1.bf16.msra.mxu0 %v10867_v44  ;;  %v10771_v33 = vcombine.low %v2620_v22, %v2628_v55  ;;  %v2924_v55 = vld [vmem:[#allocation8 + $0x1980] sm:$0xff] }
 0x187   :  { %v1842_v61 = vpop.f32.mrf.mxu1  ;;  %v1801_v0 = vpop.f32.mrf.mxu0  ;;  %8426 = vmatprep.subr.bf16.mxu0 %v10852_v46  ;;  %v2021_v46 = vmul.f32 0.5, %v11698_v49  ;;  %v11011_v51 = vcombine.low %v2860_v30, %v2868_v31  ;;  %v10996_v54 = vcombine.high %v2844_v40, %v2852_v42  ;;  %v11708_v49 = vld [vmem:[#allocation8 + $0xbc8] sm:$0xff]  ;;  %v2892_v42 = vld [vmem:[#allocation8 + $0x1880] sm:$0xff] }
 0x188   :  { %v2039_v2 = vmul.f32 0.70710677, %v1841_v57  ;;  %v1843_v58 = vadd.f32 %v1842_v61, %v1800_v60  ;;  %v1802_v4 = vadd.f32 %v1801_v0, %v370_v36  ;;  %11333 = verf.f32 %v2038_v56  ;;  %v2972_v56 = vld [vmem:[#allocation8 + $0x1b00] sm:$0xff] }
 0x189   :  { %v1844_v7 = vpop.f32.mrf.mxu1  ;;  %v2022_v43 = vmul.f32 0.5, %v1841_v57  ;;  %v2980_v60 = vld [vmem:[#allocation8 + $0x1b40] sm:$0xff]  ;;  %v11139_v57 = vcombine.low %v11681_v25, %v11683_v26 }
 0x18a   :  { %v2046_v5 = vmul.f32 0.70710677, %v1843_v58  ;;  %8427 = vmatpush1.bf16.msra.mxu0 %v10851_v62  ;;  %11335 = verf.f32 %v2039_v2  ;;  %v1845_v9 = vadd.f32 %v1844_v7, %v1802_v4  ;;  %v2029_v39 = vmul.f32 0.5, %v1843_v58  ;;  %v2828_v62 = vld [vmem:[#allocation8 + $0x1680] sm:$0xff]  ;;  %v11706_v2 = vld [vmem:[#allocation8 + $0xb88] sm:$0xff] }
 0x18b   :  { %8428 = vmatprep.subr.bf16.mxu0 %v10836_v1  ;;  %v2836_v0 = vld [vmem:[#allocation8 + $0x16c0] sm:$0xff]  ;;  %v11124_v63 = vcombine.high %v2972_v56, %v2980_v60 }
 0x18c   :  { %11337 = verf.f32 %v2046_v5  ;;  %v2047_v13 = vmul.f32 0.70710677, %v1845_v9  ;;  %v2030_v44 = vmul.f32 0.5, %v1845_v9  ;;  %v10980_v4 = vcombine.high %v2828_v62, %v2836_v0  ;;  %v2956_v5 = vld [vmem:[#allocation8 + $0x1a80] sm:$0xff] }
 0x18d   :  { %v2964_v7 = vld [vmem:[#allocation8 + $0x1ac0] sm:$0xff]  ;;  %v11123_v9 = vcombine.low %v2972_v56, %v2980_v60  ;;  %v11716_v56 = vld [vmem:[#allocation8 + $0x388] sm:$0xff] }
 0x18e   :  { %8429 = vmatpush1.bf16.msra.mxu0 %v10835_v8  ;;  %11339 = verf.f32 %v2047_v13  ;;  %v10629_v8 = vcombine.low %v11706_v2, %v11708_v49  ;;  %v2812_v25 = vld [vmem:[#allocation8 + $0x1600] sm:$0xff]  ;;  %v11108_v11 = vcombine.high %v2956_v5, %v2964_v7  ;;  %v11107_v16 = vcombine.low %v2956_v5, %v2964_v7  ;;  %v11718_v60 = vld [vmem:[#allocation8 + $0x3c8] sm:$0xff] }
 0x18f   :  { %8430 = vmatprep.subr.bf16.mxu0 %v10820_v10  ;;  %v2820_v26 = vld [vmem:[#allocation8 + $0x1640] sm:$0xff]  ;;  %v10979_v10 = vcombine.low %v2828_v62, %v2836_v0  ;;  %v11721_v62 = vsub.s32 4, %v11632_v38  ;;  %v11726_v5 = vsub.s32 5, %v11632_v38 }
 0x190   :  { %v10964_v12 = vcombine.high %v2812_v25, %v2820_v26  ;;  %v2940_v13 = vld [vmem:[#allocation8 + $0x1a00] sm:$0xff] }
 0x192   :  { %8431 = vmatpush1.bf16.msra.mxu0 %v10819_v14  ;;  %v2948_v14 = vld [vmem:[#allocation8 + $0x1a40] sm:$0xff] }
 0x193   :  { %8432 = vmatprep.subr.bf16.mxu0 %v10804_v20  ;;  %v2796_v20 = vld [vmem:[#allocation8 + $0x1580] sm:$0xff] }
 0x194   :  { %v10948_v22 = vcombine.high %v2796_v20, %v2804_v15  ;;  %v10947_v30 = vcombine.low %v2796_v20, %v2804_v15 }
 0x195   :  { %v11334_v23 = vpop.eup %11333 }
 0x196   :  { %8433 = vmatpush1.bf16.msra.mxu0 %v10803_v18  ;;  %v2070_v37 = vadd.f32 1.0, %v11334_v23  ;;  %v10963_v18 = vcombine.low %v2812_v25, %v2820_v26  ;;  %v2780_v23 = vld [vmem:[#allocation8 + $0x1500] sm:$0xff]  ;;  %v374_v25 = vrot.slane %v11637_v48, %v11721_v62 }
 0x197   :  { %8434 = vmatprep.subr.bf16.mxu0 %v10788_v19  ;;  %v11336_v17 = vpop.eup %11335  ;;  %v11092_v19 = vcombine.high %v2940_v13, %v2948_v14 }
 0x198   :  { %v2071_v6 = vadd.f32 1.0, %v11336_v17  ;;  %v2086_v61 = vmul.f32 %v2070_v37, %v2021_v46  ;;  %v11091_v17 = vcombine.low %v2940_v13, %v2948_v14 }
 0x199   :  { %v11338_v59 = vpop.eup %11337 }
 0x19a   :  { %v2078_v32 = vadd.f32 1.0, %v11338_v59  ;;  %8435 = vmatpush1.bf16.msra.mxu0 %v10787_v27  ;;  %v2087_v52 = vmul.f32 %v2071_v6, %v2022_v43  ;;  %v2932_v27 = vld [vmem:[#allocation8 + $0x19c0] sm:$0xff] }
 0x19b   :  { %8436 = vmatprep.subr.bf16.mxu0 %v10772_v28  ;;  %v11340_v36 = vpop.eup %11339  ;;  %v2788_v28 = vld [vmem:[#allocation8 + $0x1540] sm:$0xff]  ;;  %v11076_v31 = vcombine.high %v2924_v55, %v2932_v27 }
 0x19c   :  { %v2079_v45 = vadd.f32 1.0, %v11340_v36  ;;  %v2094_v50 = vmul.f32 %v2078_v32, %v2029_v39  ;;  %v10932_v59 = vcombine.high %v2780_v23, %v2788_v28  ;;  %v2908_v32 = vld [vmem:[#allocation8 + $0x1900] sm:$0xff]  ;;  %v11075_v36 = vcombine.low %v2924_v55, %v2932_v27 }
 0x19d   :  { %v2764_v6 = vld [vmem:[#allocation8 + $0x1480] sm:$0xff]  ;;  %v10931_v37 = vcombine.low %v2780_v23, %v2788_v28 }
 0x19e   :  { %8437 = vmatpush1.bf16.msra.mxu0 %v10771_v33  ;;  %v2095_v53 = vmul.f32 %v2079_v45, %v2030_v44  ;;  %v11710_v58 = vpack.c.bf16 %v2094_v50, %v2086_v61  ;;  %v2916_v33 = vld [vmem:[#allocation8 + $0x1940] sm:$0xff] }
 0x19f   :  { %8438 = vmatprep.subr.bf16.mxu0 %v11012_v35  ;;  %v2772_v35 = vld [vmem:[#allocation8 + $0x14c0] sm:$0xff]  ;;  %v11060_v39 = vcombine.high %v2908_v32, %v2916_v33  ;;  %v11059_v46 = vcombine.low %v2908_v32, %v2916_v33 }
 0x1a0   :  { %v11702_v1 = vpack.c.bf16 %v2095_v53, %v2087_v52  ;;  %v10916_v40 = vcombine.high %v2764_v6, %v2772_v35  ;;  %v2900_v43 = vld [vmem:[#allocation8 + $0x18c0] sm:$0xff]  ;;  %v10915_v50 = vcombine.low %v2764_v6, %v2772_v35 }
 0x1a1   :  { %v2748_v44 = vld [vmem:[#allocation8 + $0x1400] sm:$0xff]  ;;  %v11043_v61 = vcombine.low %v2892_v42, %v2900_v43 }
 0x1a2   :  { %8439 = vmatpush2.bf16.msra.mxu0 %v11011_v51  ;;  %8411 = vmatprep.mubr.bf16.mxu1 %v11702_v1  ;;  %v2756_v45 = vld [vmem:[#allocation8 + $0x1440] sm:$0xff]  ;;  %v11044_v51 = vcombine.high %v2892_v42, %v2900_v43 }
 0x1a3   :  { %8440 = vmatprep.subr.bf16.mxu0 %v10996_v54  ;;  %8412 = vmatmul.mubr.bf16.vlgmr.msra.gmra.mxu1 %v11710_v58  ;;  %v10900_v52 = vcombine.high %v2748_v44, %v2756_v45  ;;  %v2876_v53 = vld [vmem:[#allocation8 + $0x1800] sm:$0xff]  ;;  %v10899_v0 = vcombine.low %v2748_v44, %v2756_v45 }
 0x1a4   :  { %8466 = vmatpush1.bf16.msra.mxu1 %v11139_v57  ;;  %v2884_v54 = vld [vmem:[#allocation8 + $0x1840] sm:$0xff] }
 0x1a5   :  { %8467 = vmatprep.subr.bf16.mxu1 %v11124_v63  ;;  %v11028_v57 = vcombine.high %v2876_v53, %v2884_v54  ;;  %v3116_v63 = vld [vmem:[#allocation8 + $0x1f80] sm:$0xff]  ;;  %v11027_v7 = vcombine.low %v2876_v53, %v2884_v54 }
 0x1a6   :  { %8441 = vmatpush2.bf16.msra.mxu0 %v10995_v3  ;;  %v10374_v3 = vcombine.high %v11716_v56, %v11718_v60  ;;  %v3068_v33 = vld [vmem:[#allocation8 + $0x1e00] sm:$0xff] }
 0x1a7   :  { %8442 = vmatprep.subr.bf16.mxu0 %v10980_v4  ;;  %v3124_v4 = vld [vmem:[#allocation8 + $0x1fc0] sm:$0xff] }
 0x1a8   :  { %8468 = vmatpush1.bf16.msra.mxu1 %v11123_v9  ;;  %v11268_v26 = vcombine.high %v3116_v63, %v3124_v4  ;;  %v3100_v9 = vld [vmem:[#allocation8 + $0x1f00] sm:$0xff]  ;;  %v11267_v13 = vcombine.low %v3116_v63, %v3124_v4 }
 0x1a9   :  { %8469 = vmatprep.subr.bf16.mxu1 %v11108_v11  ;;  %v378_v11 = vrot.slane %v11637_v48, %v11726_v5  ;;  %v3076_v6 = vld [vmem:[#allocation8 + $0x1e40] sm:$0xff] }
 0x1aa   :  { %8443 = vmatpush2.bf16.msra.mxu0 %v10979_v10  ;;  %v3108_v10 = vld [vmem:[#allocation8 + $0x1f40] sm:$0xff]  ;;  %v11220_v43 = vcombine.high %v3068_v33, %v3076_v6 }
 0x1ab   :  { %8444 = vmatprep.subr.bf16.mxu0 %v10964_v12  ;;  %v11252_v15 = vcombine.high %v3100_v9, %v3108_v10  ;;  %v11251_v28 = vcombine.low %v3100_v9, %v3108_v10  ;;  %v3052_v45 = vld [vmem:[#allocation8 + $0x1d80] sm:$0xff] }
 0x1ac   :  { %8470 = vmatpush1.bf16.msra.mxu1 %v11107_v16  ;;  %v3036_v53 = vld [vmem:[#allocation8 + $0x1d00] sm:$0xff] }
 0x1ad   :  { %8471 = vmatprep.subr.bf16.mxu1 %v11092_v19  ;;  %v3092_v19 = vld [vmem:[#allocation8 + $0x1ec0] sm:$0xff] }
 0x1ae   :  { %8445 = vmatpush2.bf16.msra.mxu0 %v10963_v18  ;;  %v3084_v18 = vld [vmem:[#allocation8 + $0x1e80] sm:$0xff] }
 0x1af   :  { %8446 = vmatprep.subr.bf16.mxu0 %v10948_v22  ;;  %v3044_v54 = vld [vmem:[#allocation8 + $0x1d40] sm:$0xff] }
 0x1b0   :  { %8472 = vmatpush1.bf16.msra.mxu1 %v11091_v17  ;;  %v11187_v63 = vcombine.low %v3036_v53, %v3044_v54 }
 0x1b1   :  { %8473 = vmatprep.subr.bf16.mxu1 %v11076_v31 }
 0x1b2   :  { %8447 = vmatpush2.bf16.msra.mxu0 %v10947_v30 }
 0x1b3   :  { %8448 = vmatprep.subr.bf16.mxu0 %v10932_v59  ;;  %v11236_v59 = vcombine.high %v3084_v18, %v3092_v19 }
 0x1b4   :  { %8474 = vmatpush1.bf16.msra.mxu1 %v11075_v36 }
 0x1b5   :  { %8475 = vmatprep.subr.bf16.mxu1 %v11060_v39  ;;  %v11235_v39 = vcombine.low %v3084_v18, %v3092_v19 }
 0x1b6   :  { %8449 = vmatpush2.bf16.msra.mxu0 %v10931_v37 }
 0x1b7   :  { %8450 = vmatprep.subr.bf16.mxu0 %v10916_v40 }
 0x1b8   :  { %8476 = vmatpush1.bf16.msra.mxu1 %v11059_v46  ;;  %v3060_v46 = vld [vmem:[#allocation8 + $0x1dc0] sm:$0xff] }
 0x1b9   :  { %8477 = vmatprep.subr.bf16.mxu1 %v11044_v51  ;;  %v11219_v51 = vcombine.low %v3068_v33, %v3076_v6 }
 0x1ba   :  { %8451 = vmatpush2.bf16.msra.mxu0 %v10915_v50 }
 0x1bb   :  { %8452 = vmatprep.subr.bf16.mxu0 %v10900_v52  ;;  %v11204_v52 = vcombine.high %v3052_v45, %v3060_v46 }
 0x1bc   :  { %8478 = vmatpush1.bf16.msra.mxu1 %v11043_v61  ;;  %v11203_v61 = vcombine.low %v3052_v45, %v3060_v46  ;;  %v2165_v45 = vld [vmem:[#allocation8 + $0x1c8] sm:$0xff] }
 0x1bd   :  { %8479 = vmatprep.subr.bf16.mxu1 %v11028_v57  ;;  %v3020_v57 = vld [vmem:[#allocation8 + $0x1c80] sm:$0xff] }
 0x1be   :  { %8453 = vmatpush2.bf16.msra.mxu0 %v10899_v0  ;;  %v11188_v0 = vcombine.high %v3036_v53, %v3044_v54 }
 0x1bf   :  { %8508 = vmatprep.subr.bf16.mxu0 %v10374_v3  ;;  %v3028_v3 = vld [vmem:[#allocation8 + $0x1cc0] sm:$0xff] }
 0x1c0   :  { %8480 = vmatpush1.bf16.msra.mxu1 %v11027_v7  ;;  %v11172_v4 = vcombine.high %v3020_v57, %v3028_v3 }
 0x1c1   :  { %v1881_v12 = vpop.f32.mrf.mxu0  ;;  %8481 = vmatprep.subr.bf16.mxu1 %v11268_v26  ;;  %v3012_v26 = vld [vmem:[#allocation8 + $0x1c40] sm:$0xff] }
 0x1c2   :  { %v1882_v14 = vadd.f32 %v1881_v12, %v374_v25 }
 0x1c3   :  { %v1924_v20 = vpop.f32.mrf.mxu1  ;;  %v1883_v16 = vpop.f32.mrf.mxu0 }
 0x1c4   :  { %v11732_v22 = vadd.f32 %v1924_v20, %v1882_v14  ;;  %v1884_v55 = vadd.f32 %v1883_v16, %v378_v11  ;;  %8482 = vmatpush2.bf16.msra.mxu1 %v11267_v13 }
 0x1c5   :  { %v1926_v27 = vpop.f32.mrf.mxu1  ;;  %v1885_v23 = vpop.f32.mrf.mxu0  ;;  %8483 = vmatprep.subr.bf16.mxu1 %v11252_v15 }
 0x1c6   :  { %v2040_v17 = vmul.f32 0.70710677, %v11732_v22  ;;  %v1927_v48 = vadd.f32 %v1926_v27, %v1884_v55  ;;  %v1886_v30 = vadd.f32 %v1885_v23, %v374_v25  ;;  %v3004_v25 = vld [vmem:[#allocation8 + $0x1c00] sm:$0xff]  ;;  %v2023_v23 = vmul.f32 0.5, %v11732_v22  ;;  %v2189_v22 = vld [vmem:[#allocation8 + $0x288] sm:$0xff] }
 0x1c7   :  { %v1928_v31 = vpop.f32.mrf.mxu1  ;;  %v1887_v32 = vpop.f32.mrf.mxu0  ;;  %v11156_v13 = vcombine.high %v3004_v25, %v3012_v26  ;;  %v11155_v27 = vcombine.low %v3004_v25, %v3012_v26  ;;  %v11748_v26 = vsub.s32 6, %v11632_v38 }
 0x1c8   :  { %v2041_v35 = vmul.f32 0.70710677, %v1927_v48  ;;  %v1929_v36 = vadd.f32 %v1928_v31, %v1886_v30  ;;  %v1888_v37 = vadd.f32 %v1887_v32, %v378_v11  ;;  %8484 = vmatpush2.bf16.msra.mxu1 %v11251_v28  ;;  %11341 = verf.f32 %v2040_v17  ;;  %v2213_v32 = vld [vmem:[#allocation8 + $0x348] sm:$0xff] }
 0x1c9   :  { %v1930_v42 = vpop.f32.mrf.mxu1  ;;  %8485 = vmatprep.subr.bf16.mxu1 %v11236_v59  ;;  %v11171_v11 = vcombine.low %v3020_v57, %v3028_v3  ;;  %v2024_v18 = vmul.f32 0.5, %v1927_v48  ;;  %v10630_v17 = vcombine.high %v11706_v2, %v11708_v49  ;;  %v2205_v59 = vld [vmem:[#allocation8 + $0x308] sm:$0xff]  ;;  %v10373_v48 = vcombine.low %v11716_v56, %v11718_v60 }
 0x1ca   :  { %v2048_v40 = vmul.f32 0.70710677, %v1929_v36  ;;  %11343 = verf.f32 %v2041_v35  ;;  %v1931_v44 = vadd.f32 %v1930_v42, %v1888_v37  ;;  %v2031_v16 = vmul.f32 0.5, %v1929_v36  ;;  %v2197_v37 = vld [vmem:[#allocation8 + $0x2c8] sm:$0xff] }
 0x1cb   :  { %v10358_v36 = vcombine.high %v2205_v59, %v2213_v32  ;;  %v2173_v42 = vld [vmem:[#allocation8 + $0x208] sm:$0xff]  ;;  %v10341_v56 = vcombine.low %v2189_v22, %v2197_v37 }
 0x1cc   :  { %11345 = verf.f32 %v2048_v40  ;;  %v2049_v50 = vmul.f32 0.70710677, %v1931_v44  ;;  %8486 = vmatpush2.bf16.msra.mxu1 %v11235_v39  ;;  %v2032_v19 = vmul.f32 0.5, %v1931_v44  ;;  %v10357_v39 = vcombine.low %v2205_v59, %v2213_v32  ;;  %v2157_v44 = vld [vmem:[#allocation8 + $0x188] sm:$0xff] }
 0x1cd   :  { %8487 = vmatprep.subr.bf16.mxu1 %v11220_v43  ;;  %v10342_v40 = vcombine.high %v2189_v22, %v2197_v37  ;;  %v2181_v43 = vld [vmem:[#allocation8 + $0x248] sm:$0xff]  ;;  %v10309_v53 = vcombine.low %v2157_v44, %v2165_v45 }
 0x1ce   :  { %11347 = verf.f32 %v2049_v50  ;;  %v10326_v60 = vcombine.high %v2173_v42, %v2181_v43  ;;  %v10325_v46 = vcombine.low %v2173_v42, %v2181_v43  ;;  %v10310_v50 = vcombine.high %v2157_v44, %v2165_v45  ;;  %v2301_v43 = vld [vmem:[#allocation8 + $0x608] sm:$0xff] }
 0x1d0   :  { %8488 = vmatpush2.bf16.msra.mxu1 %v11219_v51  ;;  %v2141_v51 = vld [vmem:[#allocation8 + $0x108] sm:$0xff] }
 0x1d1   :  { %8489 = vmatprep.subr.bf16.mxu1 %v11204_v52  ;;  %v2149_v52 = vld [vmem:[#allocation8 + $0x148] sm:$0xff] }
 0x1d2   :  { %v10294_v54 = vcombine.high %v2141_v51, %v2149_v52  ;;  %v10293_v57 = vcombine.low %v2141_v51, %v2149_v52 }
 0x1d4   :  { %8490 = vmatpush2.bf16.msra.mxu1 %v11203_v61  ;;  %v2125_v61 = vld [vmem:[#allocation8 + $0x88] sm:$0xff] }
 0x1d5   :  { %8491 = vmatprep.subr.bf16.mxu1 %v11188_v0  ;;  %v11342_v7 = vpop.eup %11341  ;;  %v2133_v0 = vld [vmem:[#allocation8 + $0xc8] sm:$0xff] }
 0x1d6   :  { %v2072_v15 = vadd.f32 1.0, %v11342_v7  ;;  %v10278_v3 = vcombine.high %v2125_v61, %v2133_v0  ;;  %v10277_v7 = vcombine.low %v2125_v61, %v2133_v0  ;;  %v2293_v61 = vld [vmem:[#allocation8 + $0x5c8] sm:$0xff] }
 0x1d7   :  { %v11344_v9 = vpop.eup %11343 }
 0x1d8   :  { %8492 = vmatpush2.bf16.msra.mxu1 %v11187_v63  ;;  %v2073_v14 = vadd.f32 1.0, %v11344_v9  ;;  %v2088_v33 = vmul.f32 %v2072_v15, %v2023_v23  ;;  %v2109_v63 = vld [vmem:[#allocation8 + $0x8] sm:$0xff] }
 0x1d9   :  { %v11346_v10 = vpop.eup %11345  ;;  %8493 = vmatprep.subr.bf16.mxu1 %v11172_v4  ;;  %v2117_v4 = vld [vmem:[#allocation8 + $0x48] sm:$0xff] }
 0x1da   :  { %v2080_v12 = vadd.f32 1.0, %v11346_v10  ;;  %v2089_v30 = vmul.f32 %v2073_v14, %v2024_v18  ;;  %v10262_v25 = vcombine.high %v2109_v63, %v2117_v4  ;;  %v2349_v9 = vld [vmem:[#allocation8 + $0x788] sm:$0xff] }
 0x1db   :  { %v11348_v20 = vpop.eup %11347  ;;  %v2357_v10 = vld [vmem:[#allocation8 + $0x7c8] sm:$0xff] }
 0x1dc   :  { %v2081_v55 = vadd.f32 1.0, %v11348_v20  ;;  %8494 = vmatpush2.bf16.msra.mxu1 %v11171_v11  ;;  %v2096_v28 = vmul.f32 %v2080_v12, %v2031_v16  ;;  %v11751_v11 = vsub.s32 7, %v11632_v38  ;;  %v10261_v12 = vcombine.low %v2109_v63, %v2117_v4  ;;  %v2333_v15 = vld [vmem:[#allocation8 + $0x708] sm:$0xff] }
 0x1dd   :  { %8495 = vmatprep.subr.bf16.mxu1 %v11156_v13  ;;  %v11421_v13 = vld [vmem:[#allocation7] sm:$0xff]  ;;  %v10502_v20 = vcombine.high %v2349_v9, %v2357_v10  ;;  %v2341_v16 = vld [vmem:[#allocation8 + $0x748] sm:$0xff] }
 0x1de   :  { %v2097_v31 = vmul.f32 %v2081_v55, %v2032_v19  ;;  %v11742_v35 = vpack.c.bf16 %v2096_v28, %v2088_v33  ;;  %v382_v14 = vrot.slane %v11421_v13, %v11748_v26  ;;  %v386_v18 = vrot.slane %v11421_v13, %v11751_v11  ;;  %v2269_v63 = vld [vmem:[#allocation8 + $0x508] sm:$0xff] }
 0x1df   :  { %v10501_v55 = vcombine.low %v2349_v9, %v2357_v10  ;;  %v10486_v28 = vcombine.high %v2333_v15, %v2341_v16  ;;  %v2277_v4 = vld [vmem:[#allocation8 + $0x548] sm:$0xff] }
 0x1e0   :  { %v11738_v6 = vpack.c.bf16 %v2097_v31, %v2089_v30  ;;  %8496 = vmatpush2.bf16.msra.mxu1 %v11155_v27  ;;  %v2325_v30 = vld [vmem:[#allocation8 + $0x6c8] sm:$0xff] }
 0x1e1   :  { %8551 = vmatprep.subr.bf16.mxu1 %v10630_v17  ;;  %v2317_v17 = vld [vmem:[#allocation8 + $0x688] sm:$0xff] }
 0x1e2   :  { %8454 = vmatprep.mubr.bf16.mxu0 %v11738_v6  ;;  %v2253_v9 = vld [vmem:[#allocation8 + $0x488] sm:$0xff] }
 0x1e3   :  { %8455 = vmatmul.mubr.bf16.vlgmr.msra.gmra.mxu0 %v11742_v35  ;;  %v2261_v10 = vld [vmem:[#allocation8 + $0x4c8] sm:$0xff] }
 0x1e4   :  { %8509 = vmatpush1.bf16.msra.mxu0 %v10373_v48  ;;  %8540 = vmatprep.mubr.bf16.mxu0 %v11672_v21  ;;  %v10485_v48 = vcombine.low %v2333_v15, %v2341_v16  ;;  %v10406_v13 = vcombine.high %v2253_v9, %v2261_v10  ;;  %v2245_v15 = vld [vmem:[#allocation8 + $0x448] sm:$0xff] }
 0x1e5   :  { %8510 = vmatprep.subr.bf16.mxu0 %v10358_v36 }
 0x1e8   :  { %8511 = vmatpush1.bf16.msra.mxu0 %v10357_v39 }
 0x1e9   :  { %8512 = vmatprep.subr.bf16.mxu0 %v10342_v40  ;;  %v10470_v40 = vcombine.high %v2317_v17, %v2325_v30 }
 0x1ec   :  { %8513 = vmatpush1.bf16.msra.mxu0 %v10341_v56  ;;  %v2309_v56 = vld [vmem:[#allocation8 + $0x648] sm:$0xff] }
 0x1ed   :  { %8514 = vmatprep.subr.bf16.mxu0 %v10326_v60  ;;  %v10454_v52 = vcombine.high %v2301_v43, %v2309_v56 }
 0x1f0   :  { %8515 = vmatpush1.bf16.msra.mxu0 %v10325_v46  ;;  %v10469_v46 = vcombine.low %v2317_v17, %v2325_v30 }
 0x1f1   :  { %8516 = vmatprep.subr.bf16.mxu0 %v10310_v50 }
 0x1f4   :  { %8517 = vmatpush1.bf16.msra.mxu0 %v10309_v53 }
 0x1f5   :  { %8518 = vmatprep.subr.bf16.mxu0 %v10294_v54  ;;  %v2285_v54 = vld [vmem:[#allocation8 + $0x588] sm:$0xff] }
 0x1f8   :  { %8519 = vmatpush1.bf16.msra.mxu0 %v10293_v57  ;;  %v10453_v57 = vcombine.low %v2301_v43, %v2309_v56  ;;  %v2461_v56 = vld [vmem:[#allocation8 + $0xb08] sm:$0xff] }
 0x1f9   :  { %8520 = vmatprep.subr.bf16.mxu0 %v10278_v3  ;;  %v10438_v3 = vcombine.high %v2285_v54, %v2293_v61 }
 0x1fc   :  { %8521 = vmatpush1.bf16.msra.mxu0 %v10277_v7  ;;  %v10437_v7 = vcombine.low %v2285_v54, %v2293_v61  ;;  %v2453_v54 = vld [vmem:[#allocation8 + $0xac8] sm:$0xff] }
 0x1fd   :  { %8522 = vmatprep.subr.bf16.mxu0 %v10262_v25  ;;  %v10422_v25 = vcombine.high %v2269_v63, %v2277_v4  ;;  %v2701_v61 = vld [vmem:[#allocation8 + $0x1288] sm:$0xff] }
 0x200   :  { %8523 = vmatpush1.bf16.msra.mxu0 %v10261_v12  ;;  %v10421_v12 = vcombine.low %v2269_v63, %v2277_v4 }
 0x201   :  { %v1967_v19 = vpop.f32.mrf.mxu0  ;;  %8524 = vmatprep.subr.bf16.mxu0 %v10502_v20  ;;  %v2237_v20 = vld [vmem:[#allocation8 + $0x408] sm:$0xff] }
 0x202   :  { %v1968_v27 = vadd.f32 %v1967_v19, %v382_v14  ;;  %v10405_v19 = vcombine.low %v2253_v9, %v2261_v10  ;;  %v2685_v9 = vld [vmem:[#allocation8 + $0x1208] sm:$0xff] }
 0x203   :  { %v2010_v23 = vpop.f32.mrf.mxu1  ;;  %v1969_v38 = vpop.f32.mrf.mxu0  ;;  %v2693_v10 = vld [vmem:[#allocation8 + $0x1248] sm:$0xff] }
 0x204   :  { %v11755_v31 = vadd.f32 %v2010_v23, %v1968_v27  ;;  %v1970_v59 = vadd.f32 %v1969_v38, %v386_v18  ;;  %8525 = vmatpush2.bf16.msra.mxu0 %v10501_v55  ;;  %v10390_v27 = vcombine.high %v2237_v20, %v2245_v15  ;;  %v2741_v38 = vld [vmem:[#allocation8 + $0x13c8] sm:$0xff] }
 0x205   :  { %v2012_v32 = vpop.f32.mrf.mxu1  ;;  %v1971_v33 = vpop.f32.mrf.mxu0  ;;  %8526 = vmatprep.subr.bf16.mxu0 %v10486_v28  ;;  %v2733_v28 = vld [vmem:[#allocation8 + $0x1388] sm:$0xff] }
 0x206   :  { %v2042_v36 = vmul.f32 0.70710677, %v11755_v31  ;;  %v2013_v22 = vadd.f32 %v2012_v32, %v1970_v59  ;;  %v1972_v37 = vadd.f32 %v1971_v33, %v382_v14 }
 0x207   :  { %v2014_v39 = vpop.f32.mrf.mxu1  ;;  %v1973_v42 = vpop.f32.mrf.mxu0 }
 0x208   :  { %v2043_v60 = vmul.f32 0.70710677, %v2013_v22  ;;  %v2015_v44 = vadd.f32 %v2014_v39, %v1972_v37  ;;  %v1974_v45 = vadd.f32 %v1973_v42, %v386_v18  ;;  %8527 = vmatpush2.bf16.msra.mxu0 %v10485_v48  ;;  %11349 = verf.f32 %v2042_v36 }
 0x209   :  { %v2016_v51 = vpop.f32.mrf.mxu1  ;;  %8528 = vmatprep.subr.bf16.mxu0 %v10470_v40  ;;  %v2026_v32 = vmul.f32 0.5, %v2013_v22  ;;  %v10389_v36 = vcombine.low %v2237_v20, %v2245_v15  ;;  %v2025_v37 = vmul.f32 0.5, %v11755_v31  ;;  %v10886_v40 = vcombine.high %v2733_v28, %v2741_v38  ;;  %v2669_v20 = vld [vmem:[#allocation8 + $0x1188] sm:$0xff] }
 0x20a   :  { %v2050_v50 = vmul.f32 0.70710677, %v2015_v44  ;;  %11351 = verf.f32 %v2043_v60  ;;  %v2017_v53 = vadd.f32 %v2016_v51, %v1974_v45  ;;  %v2033_v59 = vmul.f32 0.5, %v2015_v44  ;;  %v2469_v45 = vld [vmem:[#allocation8 + $0xb48] sm:$0xff] }
 0x20b   :  { %v10885_v22 = vcombine.low %v2733_v28, %v2741_v38  ;;  %v10614_v31 = vcombine.high %v2461_v56, %v2469_v45  ;;  %v2677_v15 = vld [vmem:[#allocation8 + $0x11c8] sm:$0xff] }
 0x20c   :  { %11353 = verf.f32 %v2050_v50  ;;  %v2051_v0 = vmul.f32 0.70710677, %v2017_v53  ;;  %8529 = vmatpush2.bf16.msra.mxu0 %v10469_v46  ;;  %v2034_v33 = vmul.f32 0.5, %v2017_v53  ;;  %v2717_v46 = vld [vmem:[#allocation8 + $0x1308] sm:$0xff] }
 0x20d   :  { %8530 = vmatprep.subr.bf16.mxu0 %v10454_v52  ;;  %v2725_v50 = vld [vmem:[#allocation8 + $0x1348] sm:$0xff] }
 0x20e   :  { %11355 = verf.f32 %v2051_v0  ;;  %v2445_v52 = vld [vmem:[#allocation8 + $0xa88] sm:$0xff]  ;;  %v10870_v53 = vcombine.high %v2717_v46, %v2725_v50 }
 0x20f   :  { %v2709_v0 = vld [vmem:[#allocation8 + $0x12c8] sm:$0xff]  ;;  %v10598_v63 = vcombine.high %v2445_v52, %v2453_v54 }
 0x210   :  { %8531 = vmatpush2.bf16.msra.mxu0 %v10453_v57  ;;  %v10613_v57 = vcombine.low %v2461_v56, %v2469_v45  ;;  %v10854_v4 = vcombine.high %v2701_v61, %v2709_v0  ;;  %v10853_v2 = vcombine.low %v2701_v61, %v2709_v0  ;;  %v2653_v28 = vld [vmem:[#allocation8 + $0x1108] sm:$0xff] }
 0x211   :  { %8532 = vmatprep.subr.bf16.mxu0 %v10438_v3  ;;  %v10869_v3 = vcombine.low %v2717_v46, %v2725_v50  ;;  %v2661_v38 = vld [vmem:[#allocation8 + $0x1148] sm:$0xff] }
 0x212   :  { %v2365_v56 = vld [vmem:[#allocation8 + $0x808] sm:$0xff] }
 0x213   :  { %v2621_v45 = vld [vmem:[#allocation8 + $0x1008] sm:$0xff] }
 0x214   :  { %8533 = vmatpush2.bf16.msra.mxu0 %v10437_v7  ;;  %v2429_v7 = vld [vmem:[#allocation8 + $0xa08] sm:$0xff] }
 0x215   :  { %8534 = vmatprep.subr.bf16.mxu0 %v10422_v25  ;;  %v11350_v14 = vpop.eup %11349  ;;  %v2437_v25 = vld [vmem:[#allocation8 + $0xa48] sm:$0xff] }
 0x216   :  { %v2074_v30 = vadd.f32 1.0, %v11350_v14  ;;  %v10582_v49 = vcombine.high %v2429_v7, %v2437_v25  ;;  %v2421_v14 = vld [vmem:[#allocation8 + $0x9c8] sm:$0xff] }
 0x217   :  { %v11352_v16 = vpop.eup %11351  ;;  %v2629_v46 = vld [vmem:[#allocation8 + $0x1048] sm:$0xff] }
 0x218   :  { %8535 = vmatpush2.bf16.msra.mxu0 %v10421_v12  ;;  %v2075_v23 = vadd.f32 1.0, %v11352_v16  ;;  %v2090_v60 = vmul.f32 %v2074_v30, %v2025_v37  ;;  %v10597_v12 = vcombine.low %v2445_v52, %v2453_v54  ;;  %v10581_v16 = vcombine.low %v2429_v7, %v2437_v25  ;;  %v2645_v37 = vld [vmem:[#allocation8 + $0x10c8] sm:$0xff] }
 0x219   :  { %v11354_v18 = vpop.eup %11353  ;;  %8536 = vmatprep.subr.bf16.mxu0 %v10406_v13  ;;  %v2413_v13 = vld [vmem:[#allocation8 + $0x988] sm:$0xff]  ;;  %v10821_v30 = vcombine.low %v2669_v20, %v2677_v15 }
 0x21a   :  { %v2082_v55 = vadd.f32 1.0, %v11354_v18  ;;  %v2091_v42 = vmul.f32 %v2075_v23, %v2026_v32  ;;  %v10837_v18 = vcombine.low %v2685_v9, %v2693_v10  ;;  %v2405_v23 = vld [vmem:[#allocation8 + $0x948] sm:$0xff]  ;;  %v10806_v32 = vcombine.high %v2653_v28, %v2661_v38 }
 0x21b   :  { %v11356_v17 = vpop.eup %11355  ;;  %v2613_v54 = vld [vmem:[#allocation8 + $0xfc8] sm:$0xff] }
 0x21c   :  { %v2083_v48 = vadd.f32 1.0, %v11356_v17  ;;  %8537 = vmatpush2.bf16.msra.mxu0 %v10405_v19  ;;  %v2098_v39 = vmul.f32 %v2082_v55, %v2033_v59  ;;  %v10566_v19 = vcombine.high %v2413_v13, %v2421_v14  ;;  %v10822_v55 = vcombine.high %v2669_v20, %v2677_v15  ;;  %v2861_v61 = vld [vmem:[#allocation8 + $0x1788] sm:$0xff] }
 0x21d   :  { %8538 = vmatprep.subr.bf16.mxu0 %v10390_v27  ;;  %v2397_v27 = vld [vmem:[#allocation8 + $0x908] sm:$0xff]  ;;  %v10565_v17 = vcombine.low %v2413_v13, %v2421_v14 }
 0x21e   :  { %v2099_v43 = vmul.f32 %v2083_v48, %v2034_v33  ;;  %v11761_v44 = vpack.c.bf16 %v2098_v39, %v2090_v60  ;;  %v10550_v59 = vcombine.high %v2397_v27, %v2405_v23  ;;  %v2381_v33 = vld [vmem:[#allocation8 + $0x888] sm:$0xff]  ;;  %v10549_v39 = vcombine.low %v2397_v27, %v2405_v23 }
 0x21f   :  { %v2389_v48 = vld [vmem:[#allocation8 + $0x8c8] sm:$0xff] }
 0x220   :  { %v11759_v51 = vpack.c.bf16 %v2099_v43, %v2091_v42  ;;  %8539 = vmatpush2.bf16.msra.mxu0 %v10389_v36  ;;  %v2637_v36 = vld [vmem:[#allocation8 + $0x1088] sm:$0xff]  ;;  %v10534_v42 = vcombine.high %v2381_v33, %v2389_v48  ;;  %v10533_v50 = vcombine.low %v2381_v33, %v2389_v48 }
 0x221   :  { %8594 = vmatprep.subr.bf16.mxu0 %v10886_v40  ;;  %v10805_v40 = vcombine.low %v2653_v28, %v2661_v38  ;;  %v10790_v43 = vcombine.high %v2637_v36, %v2645_v37  ;;  %v2373_v60 = vld [vmem:[#allocation8 + $0x848] sm:$0xff] }
 0x222   :  { %8497 = vmatprep.mubr.bf16.mxu1 %v11759_v51  ;;  %v10518_v52 = vcombine.high %v2365_v56, %v2373_v60  ;;  %v2869_v0 = vld [vmem:[#allocation8 + $0x17c8] sm:$0xff] }
 0x223   :  { %8541 = vmatmul.mubr.bf16.vlgmr.msra.gmra.mxu0 %v11693_v34  ;;  %8498 = vmatmul.mubr.bf16.vlgmr.msra.gmra.mxu1 %v11761_v44  ;;  %v2589_v7 = vld [vmem:[#allocation8 + $0xf08] sm:$0xff] }
 0x224   :  { %8552 = vmatpush1.bf16.msra.mxu1 %v10629_v8  ;;  %8595 = vmatpush1.bf16.msra.mxu0 %v10885_v22  ;;  %v10838_v8 = vcombine.high %v2685_v9, %v2693_v10  ;;  %v10789_v22 = vcombine.low %v2637_v36, %v2645_v37  ;;  %v2597_v25 = vld [vmem:[#allocation8 + $0xf48] sm:$0xff] }
 0x225   :  { %8626 = vmatprep.mubr.bf16.mxu0 %v11738_v6  ;;  %8583 = vmatprep.mubr.bf16.mxu1 %v11702_v1  ;;  %v2845_v9 = vld [vmem:[#allocation8 + $0x1708] sm:$0xff] }
 0x226   :  { %8553 = vmatprep.subr.bf16.mxu1 %v10614_v31  ;;  %8596 = vmatprep.subr.bf16.mxu0 %v10870_v53  ;;  %v10774_v31 = vcombine.high %v2621_v45, %v2629_v46  ;;  %v2605_v53 = vld [vmem:[#allocation8 + $0xf88] sm:$0xff] }
 0x227   :  { %v2853_v10 = vld [vmem:[#allocation8 + $0x1748] sm:$0xff] }
 0x228   :  { %8554 = vmatpush1.bf16.msra.mxu1 %v10613_v57  ;;  %8597 = vmatpush1.bf16.msra.mxu0 %v10869_v3  ;;  %v10517_v57 = vcombine.low %v2365_v56, %v2373_v60  ;;  %v10773_v3 = vcombine.low %v2621_v45, %v2629_v46  ;;  %v2573_v13 = vld [vmem:[#allocation8 + $0xe88] sm:$0xff] }
 0x229   :  { %8555 = vmatprep.subr.bf16.mxu1 %v10598_v63  ;;  %8598 = vmatprep.subr.bf16.mxu0 %v10854_v4  ;;  %v10758_v63 = vcombine.high %v2605_v53, %v2613_v54  ;;  %v11014_v4 = vcombine.high %v2861_v61, %v2869_v0  ;;  %v2581_v14 = vld [vmem:[#allocation8 + $0xec8] sm:$0xff] }
 0x22a   :  { %v2829_v20 = vld [vmem:[#allocation8 + $0x1688] sm:$0xff] }
 0x22b   :  { %v2837_v15 = vld [vmem:[#allocation8 + $0x16c8] sm:$0xff] }
 0x22c   :  { %8556 = vmatpush1.bf16.msra.mxu1 %v10597_v12  ;;  %8599 = vmatpush1.bf16.msra.mxu0 %v10853_v2  ;;  %v10757_v12 = vcombine.low %v2605_v53, %v2613_v54  ;;  %v11013_v2 = vcombine.low %v2861_v61, %v2869_v0  ;;  %v2557_v27 = vld [vmem:[#allocation8 + $0xe08] sm:$0xff] }
 0x22d   :  { %8557 = vmatprep.subr.bf16.mxu1 %v10582_v49  ;;  %8600 = vmatprep.subr.bf16.mxu0 %v10838_v8  ;;  %v10742_v49 = vcombine.high %v2589_v7, %v2597_v25  ;;  %v10998_v8 = vcombine.high %v2845_v9, %v2853_v10  ;;  %v2565_v23 = vld [vmem:[#allocation8 + $0xe48] sm:$0xff] }
 0x22e   :  { %v2813_v28 = vld [vmem:[#allocation8 + $0x1608] sm:$0xff] }
 0x22f   :  { %v2821_v38 = vld [vmem:[#allocation8 + $0x1648] sm:$0xff] }
 0x230   :  { %8558 = vmatpush1.bf16.msra.mxu1 %v10581_v16  ;;  %8601 = vmatpush1.bf16.msra.mxu0 %v10837_v18  ;;  %v10741_v16 = vcombine.low %v2589_v7, %v2597_v25  ;;  %v10997_v18 = vcombine.low %v2845_v9, %v2853_v10  ;;  %v2541_v33 = vld [vmem:[#allocation8 + $0xd88] sm:$0xff] }
 0x231   :  { %8559 = vmatprep.subr.bf16.mxu1 %v10566_v19  ;;  %8602 = vmatprep.subr.bf16.mxu0 %v10822_v55  ;;  %v10726_v19 = vcombine.high %v2573_v13, %v2581_v14  ;;  %v10982_v55 = vcombine.high %v2829_v20, %v2837_v15  ;;  %v2549_v48 = vld [vmem:[#allocation8 + $0xdc8] sm:$0xff] }
 0x232   :  { %v2797_v36 = vld [vmem:[#allocation8 + $0x1588] sm:$0xff] }
 0x233   :  { %v2805_v37 = vld [vmem:[#allocation8 + $0x15c8] sm:$0xff] }
 0x234   :  { %8560 = vmatpush1.bf16.msra.mxu1 %v10565_v17  ;;  %8603 = vmatpush1.bf16.msra.mxu0 %v10821_v30  ;;  %v10725_v17 = vcombine.low %v2573_v13, %v2581_v14  ;;  %v10981_v30 = vcombine.low %v2829_v20, %v2837_v15  ;;  %v2525_v56 = vld [vmem:[#allocation8 + $0xd08] sm:$0xff]  ;;  %v2222_v20 = vld [vmem:[#allocation8 + $0x390] sm:$0xff] }
 0x235   :  { %8561 = vmatprep.subr.bf16.mxu1 %v10550_v59  ;;  %8604 = vmatprep.subr.bf16.mxu0 %v10806_v32  ;;  %v10710_v59 = vcombine.high %v2557_v27, %v2565_v23  ;;  %v10966_v32 = vcombine.high %v2813_v28, %v2821_v38  ;;  %v2533_v60 = vld [vmem:[#allocation8 + $0xd48] sm:$0xff]  ;;  %v2230_v15 = vld [vmem:[#allocation8 + $0x3d0] sm:$0xff] }
 0x236   :  { %v2781_v45 = vld [vmem:[#allocation8 + $0x1508] sm:$0xff] }
 0x237   :  { %v2789_v46 = vld [vmem:[#allocation8 + $0x1548] sm:$0xff] }
 0x238   :  { %8562 = vmatpush1.bf16.msra.mxu1 %v10549_v39  ;;  %8605 = vmatpush1.bf16.msra.mxu0 %v10805_v40  ;;  %v10709_v39 = vcombine.low %v2557_v27, %v2565_v23  ;;  %v10965_v40 = vcombine.low %v2813_v28, %v2821_v38  ;;  %v2509_v53 = vld [vmem:[#allocation8 + $0xc88] sm:$0xff]  ;;  %v2206_v28 = vld [vmem:[#allocation8 + $0x310] sm:$0xff] }
 0x239   :  { %8563 = vmatprep.subr.bf16.mxu1 %v10534_v42  ;;  %8606 = vmatprep.subr.bf16.mxu0 %v10790_v43  ;;  %v10694_v42 = vcombine.high %v2541_v33, %v2549_v48  ;;  %v10950_v43 = vcombine.high %v2797_v36, %v2805_v37  ;;  %v2517_v54 = vld [vmem:[#allocation8 + $0xcc8] sm:$0xff]  ;;  %v2214_v38 = vld [vmem:[#allocation8 + $0x350] sm:$0xff] }
 0x23a   :  { %v2765_v61 = vld [vmem:[#allocation8 + $0x1488] sm:$0xff] }
 0x23b   :  { %v2773_v0 = vld [vmem:[#allocation8 + $0x14c8] sm:$0xff] }
 0x23c   :  { %8564 = vmatpush1.bf16.msra.mxu1 %v10533_v50  ;;  %8607 = vmatpush1.bf16.msra.mxu0 %v10789_v22  ;;  %v10693_v50 = vcombine.low %v2541_v33, %v2549_v48  ;;  %v10949_v22 = vcombine.low %v2797_v36, %v2805_v37  ;;  %v2493_v7 = vld [vmem:[#allocation8 + $0xc08] sm:$0xff]  ;;  %v2190_v36 = vld [vmem:[#allocation8 + $0x290] sm:$0xff] }
 0x23d   :  { %8565 = vmatprep.subr.bf16.mxu1 %v10518_v52  ;;  %8608 = vmatprep.subr.bf16.mxu0 %v10774_v31  ;;  %v10678_v52 = vcombine.high %v2525_v56, %v2533_v60  ;;  %v10934_v31 = vcombine.high %v2781_v45, %v2789_v46  ;;  %v2501_v25 = vld [vmem:[#allocation8 + $0xc48] sm:$0xff]  ;;  %v2198_v37 = vld [vmem:[#allocation8 + $0x2d0] sm:$0xff] }
 0x23e   :  { %v2749_v9 = vld [vmem:[#allocation8 + $0x1408] sm:$0xff] }
 0x23f   :  { %v2757_v10 = vld [vmem:[#allocation8 + $0x1448] sm:$0xff] }
 0x240   :  { %8566 = vmatpush1.bf16.msra.mxu1 %v10517_v57  ;;  %8609 = vmatpush1.bf16.msra.mxu0 %v10773_v3  ;;  %v10677_v57 = vcombine.low %v2525_v56, %v2533_v60  ;;  %v10933_v3 = vcombine.low %v2781_v45, %v2789_v46  ;;  %v2989_v13 = vld [vmem:[#allocation8 + $0x1b88] sm:$0xff]  ;;  %v2174_v45 = vld [vmem:[#allocation8 + $0x210] sm:$0xff] }
 0x241   :  { %8567 = vmatprep.subr.bf16.mxu1 %v10758_v63  ;;  %8610 = vmatprep.subr.bf16.mxu0 %v11014_v4  ;;  %v10662_v63 = vcombine.high %v2509_v53, %v2517_v54  ;;  %v10918_v4 = vcombine.high %v2765_v61, %v2773_v0  ;;  %v2997_v14 = vld [vmem:[#allocation8 + $0x1bc8] sm:$0xff]  ;;  %v2182_v46 = vld [vmem:[#allocation8 + $0x250] sm:$0xff] }
 0x242   :  { %v2973_v27 = vld [vmem:[#allocation8 + $0x1b08] sm:$0xff] }
 0x243   :  { %v2981_v23 = vld [vmem:[#allocation8 + $0x1b48] sm:$0xff] }
 0x244   :  { %8568 = vmatpush2.bf16.msra.mxu1 %v10757_v12  ;;  %8611 = vmatpush2.bf16.msra.mxu0 %v11013_v2  ;;  %v10661_v12 = vcombine.low %v2509_v53, %v2517_v54  ;;  %v10917_v2 = vcombine.low %v2765_v61, %v2773_v0  ;;  %v2957_v33 = vld [vmem:[#allocation8 + $0x1a88] sm:$0xff]  ;;  %v2158_v61 = vld [vmem:[#allocation8 + $0x190] sm:$0xff] }
 0x245   :  { %8569 = vmatprep.subr.bf16.mxu1 %v10742_v49  ;;  %8612 = vmatprep.subr.bf16.mxu0 %v10998_v8  ;;  %v10646_v49 = vcombine.high %v2493_v7, %v2501_v25  ;;  %v10902_v8 = vcombine.high %v2749_v9, %v2757_v10  ;;  %v2965_v48 = vld [vmem:[#allocation8 + $0x1ac8] sm:$0xff]  ;;  %v2166_v0 = vld [vmem:[#allocation8 + $0x1d0] sm:$0xff] }
 0x246   :  { %v2941_v56 = vld [vmem:[#allocation8 + $0x1a08] sm:$0xff] }
 0x247   :  { %v2949_v60 = vld [vmem:[#allocation8 + $0x1a48] sm:$0xff] }
 0x248   :  { %8570 = vmatpush2.bf16.msra.mxu1 %v10741_v16  ;;  %8613 = vmatpush2.bf16.msra.mxu0 %v10997_v18  ;;  %v10645_v16 = vcombine.low %v2493_v7, %v2501_v25  ;;  %v10901_v18 = vcombine.low %v2749_v9, %v2757_v10  ;;  %v2925_v53 = vld [vmem:[#allocation8 + $0x1988] sm:$0xff]  ;;  %v2142_v9 = vld [vmem:[#allocation8 + $0x110] sm:$0xff] }
 0x249   :  { %8571 = vmatprep.subr.bf16.mxu1 %v10726_v19  ;;  %8614 = vmatprep.subr.bf16.mxu0 %v10982_v55  ;;  %v11142_v19 = vcombine.high %v2989_v13, %v2997_v14  ;;  %v10376_v55 = vcombine.high %v2222_v20, %v2230_v15  ;;  %v2933_v54 = vld [vmem:[#allocation8 + $0x19c8] sm:$0xff]  ;;  %v2150_v10 = vld [vmem:[#allocation8 + $0x150] sm:$0xff] }
 0x24a   :  { %v2909_v7 = vld [vmem:[#allocation8 + $0x1908] sm:$0xff] }
 0x24b   :  { %v2917_v25 = vld [vmem:[#allocation8 + $0x1948] sm:$0xff] }
 0x24c   :  { %8572 = vmatpush2.bf16.msra.mxu1 %v10725_v17  ;;  %8615 = vmatpush2.bf16.msra.mxu0 %v10981_v30  ;;  %v11141_v17 = vcombine.low %v2989_v13, %v2997_v14  ;;  %v10375_v30 = vcombine.low %v2222_v20, %v2230_v15  ;;  %v2893_v13 = vld [vmem:[#allocation8 + $0x1888] sm:$0xff]  ;;  %v2126_v20 = vld [vmem:[#allocation8 + $0x90] sm:$0xff] }
 0x24d   :  { %8573 = vmatprep.subr.bf16.mxu1 %v10710_v59  ;;  %8616 = vmatprep.subr.bf16.mxu0 %v10966_v32  ;;  %v11126_v59 = vcombine.high %v2973_v27, %v2981_v23  ;;  %v10360_v32 = vcombine.high %v2206_v28, %v2214_v38  ;;  %v2901_v14 = vld [vmem:[#allocation8 + $0x18c8] sm:$0xff]  ;;  %v2134_v15 = vld [vmem:[#allocation8 + $0xd0] sm:$0xff] }
 0x250   :  { %8574 = vmatpush2.bf16.msra.mxu1 %v10709_v39  ;;  %8617 = vmatpush2.bf16.msra.mxu0 %v10965_v40  ;;  %v11125_v39 = vcombine.low %v2973_v27, %v2981_v23  ;;  %v10359_v40 = vcombine.low %v2206_v28, %v2214_v38  ;;  %v2877_v27 = vld [vmem:[#allocation8 + $0x1808] sm:$0xff]  ;;  %v2110_v28 = vld [vmem:[#allocation8 + $0x10] sm:$0xff] }
 0x251   :  { %8575 = vmatprep.subr.bf16.mxu1 %v10694_v42  ;;  %8618 = vmatprep.subr.bf16.mxu0 %v10950_v43  ;;  %v11110_v42 = vcombine.high %v2957_v33, %v2965_v48  ;;  %v10344_v43 = vcombine.high %v2190_v36, %v2198_v37  ;;  %v2885_v23 = vld [vmem:[#allocation8 + $0x1848] sm:$0xff]  ;;  %v2118_v38 = vld [vmem:[#allocation8 + $0x50] sm:$0xff] }
 0x254   :  { %8576 = vmatpush2.bf16.msra.mxu1 %v10693_v50  ;;  %8619 = vmatpush2.bf16.msra.mxu0 %v10949_v22  ;;  %v11109_v50 = vcombine.low %v2957_v33, %v2965_v48  ;;  %v10343_v22 = vcombine.low %v2190_v36, %v2198_v37  ;;  %v3117_v33 = vld [vmem:[#allocation8 + $0x1f88] sm:$0xff]  ;;  %v2350_v36 = vld [vmem:[#allocation8 + $0x790] sm:$0xff] }
 0x255   :  { %8577 = vmatprep.subr.bf16.mxu1 %v10678_v52  ;;  %8620 = vmatprep.subr.bf16.mxu0 %v10934_v31  ;;  %v11094_v52 = vcombine.high %v2941_v56, %v2949_v60  ;;  %v10328_v31 = vcombine.high %v2174_v45, %v2182_v46  ;;  %v3125_v48 = vld [vmem:[#allocation8 + $0x1fc8] sm:$0xff]  ;;  %v2358_v37 = vld [vmem:[#allocation8 + $0x7d0] sm:$0xff] }
 0x258   :  { %8578 = vmatpush2.bf16.msra.mxu1 %v10677_v57  ;;  %8621 = vmatpush2.bf16.msra.mxu0 %v10933_v3  ;;  %v11093_v57 = vcombine.low %v2941_v56, %v2949_v60  ;;  %v10327_v3 = vcombine.low %v2174_v45, %v2182_v46  ;;  %v3101_v56 = vld [vmem:[#allocation8 + $0x1f08] sm:$0xff]  ;;  %v2334_v45 = vld [vmem:[#allocation8 + $0x710] sm:$0xff] }
 0x259   :  { %8579 = vmatprep.subr.bf16.mxu1 %v10662_v63  ;;  %8622 = vmatprep.subr.bf16.mxu0 %v10918_v4  ;;  %v11078_v63 = vcombine.high %v2925_v53, %v2933_v54  ;;  %v10312_v4 = vcombine.high %v2158_v61, %v2166_v0  ;;  %v3109_v60 = vld [vmem:[#allocation8 + $0x1f48] sm:$0xff]  ;;  %v2342_v46 = vld [vmem:[#allocation8 + $0x750] sm:$0xff] }
 0x25c   :  { %8580 = vmatpush2.bf16.msra.mxu1 %v10661_v12  ;;  %8623 = vmatpush2.bf16.msra.mxu0 %v10917_v2  ;;  %v11077_v12 = vcombine.low %v2925_v53, %v2933_v54  ;;  %v10311_v2 = vcombine.low %v2158_v61, %v2166_v0  ;;  %v3085_v53 = vld [vmem:[#allocation8 + $0x1e88] sm:$0xff]  ;;  %v2318_v61 = vld [vmem:[#allocation8 + $0x690] sm:$0xff] }
 0x25d   :  { %8581 = vmatprep.subr.bf16.mxu1 %v10646_v49  ;;  %8624 = vmatprep.subr.bf16.mxu0 %v10902_v8  ;;  %v11062_v49 = vcombine.high %v2909_v7, %v2917_v25  ;;  %v10296_v8 = vcombine.high %v2142_v9, %v2150_v10  ;;  %v3093_v54 = vld [vmem:[#allocation8 + $0x1ec8] sm:$0xff]  ;;  %v2326_v0 = vld [vmem:[#allocation8 + $0x6d0] sm:$0xff] }
 0x260   :  { %8582 = vmatpush2.bf16.msra.mxu1 %v10645_v16  ;;  %8625 = vmatpush2.bf16.msra.mxu0 %v10901_v18  ;;  %v11061_v16 = vcombine.low %v2909_v7, %v2917_v25  ;;  %v10295_v18 = vcombine.low %v2142_v9, %v2150_v10  ;;  %v3069_v7 = vld [vmem:[#allocation8 + $0x1e08] sm:$0xff]  ;;  %v2302_v9 = vld [vmem:[#allocation8 + $0x610] sm:$0xff] }
 0x261   :  { %8637 = vmatprep.subr.bf16.mxu1 %v11142_v19  ;;  %8680 = vmatprep.subr.bf16.mxu0 %v10376_v55  ;;  %v11046_v19 = vcombine.high %v2893_v13, %v2901_v14  ;;  %v10280_v55 = vcombine.high %v2126_v20, %v2134_v15  ;;  %v3077_v25 = vld [vmem:[#allocation8 + $0x1e48] sm:$0xff]  ;;  %v2310_v10 = vld [vmem:[#allocation8 + $0x650] sm:$0xff] }
 0x263   :  { %8584 = vmatmul.mubr.bf16.vlgmr.msra.gmra.mxu1 %v11710_v58  ;;  %8627 = vmatmul.mubr.bf16.vlgmr.msra.gmra.mxu0 %v11742_v35 }
 0x264   :  { %8638 = vmatpush1.bf16.msra.mxu1 %v11141_v17  ;;  %8669 = vmatprep.mubr.bf16.mxu1 %v11759_v51  ;;  %v11045_v17 = vcombine.low %v2893_v13, %v2901_v14  ;;  %v3053_v13 = vld [vmem:[#allocation8 + $0x1d88] sm:$0xff] }
 0x265   :  { %8681 = vmatpush1.bf16.msra.mxu0 %v10375_v30  ;;  %8712 = vmatprep.mubr.bf16.mxu0 %v11672_v21  ;;  %v10279_v30 = vcombine.low %v2126_v20, %v2134_v15  ;;  %v3061_v14 = vld [vmem:[#allocation8 + $0x1dc8] sm:$0xff]  ;;  %v2286_v20 = vld [vmem:[#allocation8 + $0x590] sm:$0xff] }
 0x266   :  { %8639 = vmatprep.subr.bf16.mxu1 %v11126_v59  ;;  %8682 = vmatprep.subr.bf16.mxu0 %v10360_v32  ;;  %v11030_v59 = vcombine.high %v2877_v27, %v2885_v23  ;;  %v10264_v32 = vcombine.high %v2110_v28, %v2118_v38  ;;  %v2294_v15 = vld [vmem:[#allocation8 + $0x5d0] sm:$0xff] }
 0x268   :  { %8640 = vmatpush1.bf16.msra.mxu1 %v11125_v39  ;;  %v11029_v39 = vcombine.low %v2877_v27, %v2885_v23  ;;  %v3037_v27 = vld [vmem:[#allocation8 + $0x1d08] sm:$0xff] }
 0x269   :  { %8683 = vmatpush1.bf16.msra.mxu0 %v10359_v40  ;;  %8641 = vmatprep.subr.bf16.mxu1 %v11110_v42  ;;  %v10263_v40 = vcombine.low %v2110_v28, %v2118_v38  ;;  %v11270_v42 = vcombine.high %v3117_v33, %v3125_v48  ;;  %v3045_v23 = vld [vmem:[#allocation8 + $0x1d48] sm:$0xff]  ;;  %v2270_v28 = vld [vmem:[#allocation8 + $0x510] sm:$0xff] }
 0x26a   :  { %8684 = vmatprep.subr.bf16.mxu0 %v10344_v43  ;;  %v10504_v43 = vcombine.high %v2350_v36, %v2358_v37  ;;  %v2278_v38 = vld [vmem:[#allocation8 + $0x550] sm:$0xff] }
 0x26c   :  { %8642 = vmatpush1.bf16.msra.mxu1 %v11109_v50  ;;  %v11269_v50 = vcombine.low %v3117_v33, %v3125_v48  ;;  %v3021_v33 = vld [vmem:[#allocation8 + $0x1c88] sm:$0xff] }
 0x26d   :  { %8685 = vmatpush1.bf16.msra.mxu0 %v10343_v22  ;;  %8643 = vmatprep.subr.bf16.mxu1 %v11094_v52  ;;  %v10503_v22 = vcombine.low %v2350_v36, %v2358_v37  ;;  %v11254_v52 = vcombine.high %v3101_v56, %v3109_v60  ;;  %v3029_v48 = vld [vmem:[#allocation8 + $0x1cc8] sm:$0xff]  ;;  %v2254_v36 = vld [vmem:[#allocation8 + $0x490] sm:$0xff] }
 0x26e   :  { %8686 = vmatprep.subr.bf16.mxu0 %v10328_v31  ;;  %v10488_v31 = vcombine.high %v2334_v45, %v2342_v46  ;;  %v2262_v37 = vld [vmem:[#allocation8 + $0x4d0] sm:$0xff] }
 0x270   :  { %8644 = vmatpush1.bf16.msra.mxu1 %v11093_v57  ;;  %v11253_v57 = vcombine.low %v3101_v56, %v3109_v60  ;;  %v3005_v56 = vld [vmem:[#allocation8 + $0x1c08] sm:$0xff] }
 0x271   :  { %8687 = vmatpush1.bf16.msra.mxu0 %v10327_v3  ;;  %8645 = vmatprep.subr.bf16.mxu1 %v11078_v63  ;;  %v10487_v3 = vcombine.low %v2334_v45, %v2342_v46  ;;  %v11238_v63 = vcombine.high %v3085_v53, %v3093_v54  ;;  %v3013_v60 = vld [vmem:[#allocation8 + $0x1c48] sm:$0xff]  ;;  %v2238_v45 = vld [vmem:[#allocation8 + $0x410] sm:$0xff] }
 0x272   :  { %8688 = vmatprep.subr.bf16.mxu0 %v10312_v4  ;;  %v10472_v4 = vcombine.high %v2318_v61, %v2326_v0  ;;  %v2246_v46 = vld [vmem:[#allocation8 + $0x450] sm:$0xff] }
 0x274   :  { %8646 = vmatpush1.bf16.msra.mxu1 %v11077_v12  ;;  %v11237_v12 = vcombine.low %v3085_v53, %v3093_v54  ;;  %v2478_v53 = vld [vmem:[#allocation8 + $0xb90] sm:$0xff] }
 0x275   :  { %8689 = vmatpush1.bf16.msra.mxu0 %v10311_v2  ;;  %8647 = vmatprep.subr.bf16.mxu1 %v11062_v49  ;;  %v10471_v2 = vcombine.low %v2318_v61, %v2326_v0  ;;  %v11222_v49 = vcombine.high %v3069_v7, %v3077_v25  ;;  %v2486_v54 = vld [vmem:[#allocation8 + $0xbd0] sm:$0xff] }
 0x276   :  { %8690 = vmatprep.subr.bf16.mxu0 %v10296_v8  ;;  %v10456_v8 = vcombine.high %v2302_v9, %v2310_v10  ;;  %v2734_v61 = vld [vmem:[#allocation8 + $0x1390] sm:$0xff] }
 0x277   :  { %v2742_v0 = vld [vmem:[#allocation8 + $0x13d0] sm:$0xff] }
 0x278   :  { %8648 = vmatpush1.bf16.msra.mxu1 %v11061_v16  ;;  %v11221_v16 = vcombine.low %v3069_v7, %v3077_v25  ;;  %v2462_v7 = vld [vmem:[#allocation8 + $0xb10] sm:$0xff] }
 0x279   :  { %8691 = vmatpush1.bf16.msra.mxu0 %v10295_v18  ;;  %8649 = vmatprep.subr.bf16.mxu1 %v11046_v19  ;;  %v10455_v18 = vcombine.low %v2302_v9, %v2310_v10  ;;  %v11206_v19 = vcombine.high %v3053_v13, %v3061_v14  ;;  %v2470_v25 = vld [vmem:[#allocation8 + $0xb50] sm:$0xff]  ;;  %v10631_v9 = vcombine.low %v2478_v53, %v2486_v54 }
 0x27a   :  { %8692 = vmatprep.subr.bf16.mxu0 %v10280_v55  ;;  %v10440_v55 = vcombine.high %v2286_v20, %v2294_v15  ;;  %v2718_v10 = vld [vmem:[#allocation8 + $0x1310] sm:$0xff] }
 0x27c   :  { %8650 = vmatpush1.bf16.msra.mxu1 %v11045_v17  ;;  %v11205_v17 = vcombine.low %v3053_v13, %v3061_v14  ;;  %v2454_v13 = vld [vmem:[#allocation8 + $0xad0] sm:$0xff] }
 0x27d   :  { %8693 = vmatpush1.bf16.msra.mxu0 %v10279_v30  ;;  %8651 = vmatprep.subr.bf16.mxu1 %v11030_v59  ;;  %v10439_v30 = vcombine.low %v2286_v20, %v2294_v15  ;;  %v11190_v59 = vcombine.high %v3037_v27, %v3045_v23  ;;  %v2702_v20 = vld [vmem:[#allocation8 + $0x1290] sm:$0xff] }
 0x27e   :  { %8694 = vmatprep.subr.bf16.mxu0 %v10264_v32  ;;  %v10424_v32 = vcombine.high %v2270_v28, %v2278_v38  ;;  %v2710_v15 = vld [vmem:[#allocation8 + $0x12d0] sm:$0xff] }
 0x280   :  { %8652 = vmatpush1.bf16.msra.mxu1 %v11029_v39  ;;  %v11189_v39 = vcombine.low %v3037_v27, %v3045_v23  ;;  %v2430_v27 = vld [vmem:[#allocation8 + $0xa10] sm:$0xff] }
 0x281   :  { %8695 = vmatpush1.bf16.msra.mxu0 %v10263_v40  ;;  %8653 = vmatprep.subr.bf16.mxu1 %v11270_v42  ;;  %v10423_v40 = vcombine.low %v2270_v28, %v2278_v38  ;;  %v11174_v42 = vcombine.high %v3021_v33, %v3029_v48  ;;  %v2438_v23 = vld [vmem:[#allocation8 + $0xa50] sm:$0xff] }
 0x282   :  { %8696 = vmatprep.subr.bf16.mxu0 %v10504_v43  ;;  %v10408_v43 = vcombine.high %v2254_v36, %v2262_v37  ;;  %v2686_v28 = vld [vmem:[#allocation8 + $0x1210] sm:$0xff] }
 0x283   :  { %v2694_v38 = vld [vmem:[#allocation8 + $0x1250] sm:$0xff] }
 0x284   :  { %8654 = vmatpush2.bf16.msra.mxu1 %v11269_v50  ;;  %v11173_v50 = vcombine.low %v3021_v33, %v3029_v48  ;;  %v2414_v33 = vld [vmem:[#allocation8 + $0x990] sm:$0xff] }
 0x285   :  { %8697 = vmatpush2.bf16.msra.mxu0 %v10503_v22  ;;  %8655 = vmatprep.subr.bf16.mxu1 %v11254_v52  ;;  %v10407_v22 = vcombine.low %v2254_v36, %v2262_v37  ;;  %v11158_v52 = vcombine.high %v3005_v56, %v3013_v60  ;;  %v2422_v48 = vld [vmem:[#allocation8 + $0x9d0] sm:$0xff] }
 0x286   :  { %8698 = vmatprep.subr.bf16.mxu0 %v10488_v31  ;;  %v10392_v31 = vcombine.high %v2238_v45, %v2246_v46  ;;  %v2670_v36 = vld [vmem:[#allocation8 + $0x1190] sm:$0xff] }
 0x287   :  { %v2678_v37 = vld [vmem:[#allocation8 + $0x11d0] sm:$0xff] }
 0x288   :  { %8656 = vmatpush2.bf16.msra.mxu1 %v11253_v57  ;;  %v11157_v57 = vcombine.low %v3005_v56, %v3013_v60  ;;  %v2398_v56 = vld [vmem:[#allocation8 + $0x910] sm:$0xff] }
 0x289   :  { %8699 = vmatpush2.bf16.msra.mxu0 %v10487_v3  ;;  %8657 = vmatprep.subr.bf16.mxu1 %v11238_v63  ;;  %v10391_v3 = vcombine.low %v2238_v45, %v2246_v46  ;;  %v10632_v63 = vcombine.high %v2478_v53, %v2486_v54  ;;  %v2406_v60 = vld [vmem:[#allocation8 + $0x950] sm:$0xff] }
 0x28a   :  { %8700 = vmatprep.subr.bf16.mxu0 %v10472_v4  ;;  %v10888_v4 = vcombine.high %v2734_v61, %v2742_v0  ;;  %v2654_v45 = vld [vmem:[#allocation8 + $0x1110] sm:$0xff] }
 0x28b   :  { %v2662_v46 = vld [vmem:[#allocation8 + $0x1150] sm:$0xff] }
 0x28c   :  { %8658 = vmatpush2.bf16.msra.mxu1 %v11237_v12  ;;  %v2726_v12 = vld [vmem:[#allocation8 + $0x1350] sm:$0xff] }
 0x28d   :  { %8701 = vmatpush2.bf16.msra.mxu0 %v10471_v2  ;;  %8659 = vmatprep.subr.bf16.mxu1 %v11222_v49  ;;  %v10887_v2 = vcombine.low %v2734_v61, %v2742_v0  ;;  %v10616_v49 = vcombine.high %v2462_v7, %v2470_v25  ;;  %v10872_v14 = vcombine.high %v2718_v10, %v2726_v12  ;;  %v2382_v53 = vld [vmem:[#allocation8 + $0x890] sm:$0xff] }
 0x28e   :  { %8702 = vmatprep.subr.bf16.mxu0 %v10456_v8  ;;  %v2446_v8 = vld [vmem:[#allocation8 + $0xa90] sm:$0xff] }
 0x28f   :  { %v2390_v54 = vld [vmem:[#allocation8 + $0x8d0] sm:$0xff] }
 0x290   :  { %8660 = vmatpush2.bf16.msra.mxu1 %v11221_v16  ;;  %v10615_v16 = vcombine.low %v2462_v7, %v2470_v25  ;;  %v2638_v61 = vld [vmem:[#allocation8 + $0x1090] sm:$0xff] }
 0x291   :  { %8703 = vmatpush2.bf16.msra.mxu0 %v10455_v18  ;;  %8661 = vmatprep.subr.bf16.mxu1 %v11206_v19  ;;  %v10871_v18 = vcombine.low %v2718_v10, %v2726_v12  ;;  %v10600_v19 = vcombine.high %v2446_v8, %v2454_v13  ;;  %v2646_v0 = vld [vmem:[#allocation8 + $0x10d0] sm:$0xff]  ;;  %v10535_v12 = vcombine.low %v2382_v53, %v2390_v54 }
 0x292   :  { %8704 = vmatprep.subr.bf16.mxu0 %v10440_v55  ;;  %v10856_v55 = vcombine.high %v2702_v20, %v2710_v15  ;;  %v2366_v7 = vld [vmem:[#allocation8 + $0x810] sm:$0xff] }
 0x293   :  { %v2374_v25 = vld [vmem:[#allocation8 + $0x850] sm:$0xff] }
 0x294   :  { %8662 = vmatpush2.bf16.msra.mxu1 %v11205_v17  ;;  %v10599_v17 = vcombine.low %v2446_v8, %v2454_v13  ;;  %v2630_v10 = vld [vmem:[#allocation8 + $0x1050] sm:$0xff] }
 0x295   :  { %8705 = vmatpush2.bf16.msra.mxu0 %v10439_v30  ;;  %8663 = vmatprep.subr.bf16.mxu1 %v11190_v59  ;;  %v10855_v30 = vcombine.low %v2702_v20, %v2710_v15  ;;  %v10584_v59 = vcombine.high %v2430_v27, %v2438_v23  ;;  %v2606_v13 = vld [vmem:[#allocation8 + $0xf90] sm:$0xff] }
 0x296   :  { %8706 = vmatprep.subr.bf16.mxu0 %v10424_v32  ;;  %v10840_v32 = vcombine.high %v2686_v28, %v2694_v38  ;;  %v2862_v20 = vld [vmem:[#allocation8 + $0x1790] sm:$0xff] }
 0x297   :  { %v2870_v15 = vld [vmem:[#allocation8 + $0x17d0] sm:$0xff] }
 0x298   :  { %8664 = vmatpush2.bf16.msra.mxu1 %v11189_v39  ;;  %v10583_v39 = vcombine.low %v2430_v27, %v2438_v23  ;;  %v2590_v27 = vld [vmem:[#allocation8 + $0xf10] sm:$0xff] }
 0x299   :  { %8707 = vmatpush2.bf16.msra.mxu0 %v10423_v40  ;;  %8665 = vmatprep.subr.bf16.mxu1 %v11174_v42  ;;  %v10839_v40 = vcombine.low %v2686_v28, %v2694_v38  ;;  %v10568_v42 = vcombine.high %v2414_v33, %v2422_v48  ;;  %v2598_v23 = vld [vmem:[#allocation8 + $0xf50] sm:$0xff] }
 0x29a   :  { %8708 = vmatprep.subr.bf16.mxu0 %v10408_v43  ;;  %v10824_v43 = vcombine.high %v2670_v36, %v2678_v37  ;;  %v2846_v28 = vld [vmem:[#allocation8 + $0x1710] sm:$0xff] }
 0x29b   :  { %v2854_v38 = vld [vmem:[#allocation8 + $0x1750] sm:$0xff] }
 0x29c   :  { %8666 = vmatpush2.bf16.msra.mxu1 %v11173_v50  ;;  %v10567_v50 = vcombine.low %v2414_v33, %v2422_v48  ;;  %v2574_v33 = vld [vmem:[#allocation8 + $0xe90] sm:$0xff] }
 0x29d   :  { %8709 = vmatpush2.bf16.msra.mxu0 %v10407_v22  ;;  %8667 = vmatprep.subr.bf16.mxu1 %v11158_v52  ;;  %v10823_v22 = vcombine.low %v2670_v36, %v2678_v37  ;;  %v10552_v52 = vcombine.high %v2398_v56, %v2406_v60  ;;  %v2582_v48 = vld [vmem:[#allocation8 + $0xed0] sm:$0xff] }
 0x29e   :  { %8710 = vmatprep.subr.bf16.mxu0 %v10392_v31  ;;  %v10808_v31 = vcombine.high %v2654_v45, %v2662_v46  ;;  %v2830_v36 = vld [vmem:[#allocation8 + $0x1690] sm:$0xff] }
 0x29f   :  { %v2838_v37 = vld [vmem:[#allocation8 + $0x16d0] sm:$0xff] }
 0x2a0   :  { %8668 = vmatpush2.bf16.msra.mxu1 %v11157_v57  ;;  %v10551_v57 = vcombine.low %v2398_v56, %v2406_v60  ;;  %v2558_v56 = vld [vmem:[#allocation8 + $0xe10] sm:$0xff] }
 0x2a1   :  { %8711 = vmatpush2.bf16.msra.mxu0 %v10391_v3  ;;  %8723 = vmatprep.subr.bf16.mxu1 %v10632_v63  ;;  %v10807_v3 = vcombine.low %v2654_v45, %v2662_v46  ;;  %v10536_v63 = vcombine.high %v2382_v53, %v2390_v54  ;;  %v2566_v60 = vld [vmem:[#allocation8 + $0xe50] sm:$0xff] }
 0x2a2   :  { %8766 = vmatprep.subr.bf16.mxu0 %v10888_v4  ;;  %v10792_v4 = vcombine.high %v2638_v61, %v2646_v0  ;;  %v2814_v45 = vld [vmem:[#allocation8 + $0x1610] sm:$0xff] }
 0x2a3   :  { %8670 = vmatmul.mubr.bf16.vlgmr.msra.gmra.mxu1 %v11761_v44  ;;  %v2822_v46 = vld [vmem:[#allocation8 + $0x1650] sm:$0xff] }
 0x2a4   :  { %8713 = vmatmul.mubr.bf16.vlgmr.msra.gmra.mxu0 %v11693_v34  ;;  %8724 = vmatpush1.bf16.msra.mxu1 %v10631_v9  ;;  %v2622_v9 = vld [vmem:[#allocation8 + $0x1010] sm:$0xff] }
 0x2a5   :  { %8755 = vmatprep.mubr.bf16.mxu1 %v11702_v1  ;;  %8767 = vmatpush1.bf16.msra.mxu0 %v10887_v2  ;;  %v10791_v2 = vcombine.low %v2638_v61, %v2646_v0  ;;  %v10776_v8 = vcombine.high %v2622_v9, %v2630_v10  ;;  %v2542_v53 = vld [vmem:[#allocation8 + $0xd90] sm:$0xff]  ;;  %v11779_v61 = vpop.f32.mrf.mxu0 }
 0x2a6   :  { %8798 = vmatprep.mubr.bf16.mxu0 %v11738_v6  ;;  %8725 = vmatprep.subr.bf16.mxu1 %v10616_v49  ;;  %v10520_v49 = vcombine.high %v2366_v7, %v2374_v25  ;;  %v2550_v54 = vld [vmem:[#allocation8 + $0xdd0] sm:$0xff] }
 0x2a7   :  { %8768 = vmatprep.subr.bf16.mxu0 %v10872_v14  ;;  %v2614_v14 = vld [vmem:[#allocation8 + $0xfd0] sm:$0xff] }
 0x2a8   :  { %8726 = vmatpush1.bf16.msra.mxu1 %v10615_v16  ;;  %v10519_v16 = vcombine.low %v2366_v7, %v2374_v25  ;;  %v2798_v0 = vld [vmem:[#allocation8 + $0x1590] sm:$0xff] }
 0x2a9   :  { %8769 = vmatpush1.bf16.msra.mxu0 %v10871_v18  ;;  %8727 = vmatprep.subr.bf16.mxu1 %v10600_v19  ;;  %v10775_v18 = vcombine.low %v2622_v9, %v2630_v10  ;;  %v10760_v19 = vcombine.high %v2606_v13, %v2614_v14  ;;  %v2526_v25 = vld [vmem:[#allocation8 + $0xd10] sm:$0xff]  ;;  %v8372_v10 = vpop.f32.mrf.mxu0 }
 0x2aa   :  { %8770 = vmatprep.subr.bf16.mxu0 %v10856_v55  ;;  %v11016_v55 = vcombine.high %v2862_v20, %v2870_v15  ;;  %v2534_v9 = vld [vmem:[#allocation8 + $0xd50] sm:$0xff] }
 0x2ac   :  { %8728 = vmatpush1.bf16.msra.mxu1 %v10599_v17  ;;  %v10759_v17 = vcombine.low %v2606_v13, %v2614_v14  ;;  %v10680_v13 = vcombine.high %v2526_v25, %v2534_v9 }
 0x2ad   :  { %8771 = vmatpush1.bf16.msra.mxu0 %v10855_v30  ;;  %8729 = vmatprep.subr.bf16.mxu1 %v10584_v59  ;;  %v11015_v30 = vcombine.low %v2862_v20, %v2870_v15  ;;  %v10744_v59 = vcombine.high %v2590_v27, %v2598_v23  ;;  %v2510_v20 = vld [vmem:[#allocation8 + $0xc90] sm:$0xff] }
 0x2ae   :  { %8772 = vmatprep.subr.bf16.mxu0 %v10840_v32  ;;  %v11000_v32 = vcombine.high %v2846_v28, %v2854_v38  ;;  %v2518_v15 = vld [vmem:[#allocation8 + $0xcd0] sm:$0xff] }
 0x2b0   :  { %8730 = vmatpush1.bf16.msra.mxu1 %v10583_v39  ;;  %v10743_v39 = vcombine.low %v2590_v27, %v2598_v23  ;;  %v8413_v27 = vpop.f32.mrf.mxu1 }
 0x2b1   :  { %8773 = vmatpush1.bf16.msra.mxu0 %v10839_v40  ;;  %8731 = vmatprep.subr.bf16.mxu1 %v10568_v42  ;;  %v10999_v40 = vcombine.low %v2846_v28, %v2854_v38  ;;  %v10728_v42 = vcombine.high %v2574_v33, %v2582_v48  ;;  %v10664_v28 = vcombine.high %v2510_v20, %v2518_v15 }
 0x2b2   :  { %8774 = vmatprep.subr.bf16.mxu0 %v10824_v43  ;;  %v10984_v43 = vcombine.high %v2830_v36, %v2838_v37 }
 0x2b4   :  { %8732 = vmatpush1.bf16.msra.mxu1 %v10567_v50  ;;  %v10727_v50 = vcombine.low %v2574_v33, %v2582_v48  ;;  %v2750_v33 = vld [vmem:[#allocation8 + $0x1410] sm:$0xff] }
 0x2b5   :  { %8775 = vmatpush1.bf16.msra.mxu0 %v10823_v22  ;;  %8733 = vmatprep.subr.bf16.mxu1 %v10552_v52  ;;  %v10983_v22 = vcombine.low %v2830_v36, %v2838_v37  ;;  %v10712_v52 = vcombine.high %v2558_v56, %v2566_v60  ;;  %v2758_v48 = vld [vmem:[#allocation8 + $0x1450] sm:$0xff]  ;;  %v10663_v36 = vcombine.low %v2510_v20, %v2518_v15  ;;  %v8415_v37 = vpop.f32.mrf.mxu1 }
 0x2b6   :  { %8776 = vmatprep.subr.bf16.mxu0 %v10808_v31  ;;  %v10968_v31 = vcombine.high %v2814_v45, %v2822_v46 }
 0x2b8   :  { %8734 = vmatpush1.bf16.msra.mxu1 %v10551_v57  ;;  %v2806_v57 = vld [vmem:[#allocation8 + $0x15d0] sm:$0xff] }
 0x2b9   :  { %8777 = vmatpush1.bf16.msra.mxu0 %v10807_v3  ;;  %8735 = vmatprep.subr.bf16.mxu1 %v10536_v63  ;;  %v10711_v3 = vcombine.low %v2558_v56, %v2566_v60  ;;  %v10967_v63 = vcombine.low %v2814_v45, %v2822_v46  ;;  %v10952_v7 = vcombine.high %v2798_v0, %v2806_v57  ;;  %v2990_v60 = vld [vmem:[#allocation8 + $0x1b90] sm:$0xff]  ;;  %v2223_v46 = vld [vmem:[#allocation8 + $0x398] sm:$0xff] }
 0x2ba   :  { %8778 = vmatprep.subr.bf16.mxu0 %v10792_v4  ;;  %v10696_v4 = vcombine.high %v2542_v53, %v2550_v54  ;;  %v10904_v56 = vcombine.high %v2750_v33, %v2758_v48  ;;  %v2998_v45 = vld [vmem:[#allocation8 + $0x1bd0] sm:$0xff] }
 0x2bc   :  { %8736 = vmatpush1.bf16.msra.mxu1 %v10535_v12  ;;  %v2782_v12 = vld [vmem:[#allocation8 + $0x1510] sm:$0xff] }
 0x2bd   :  { %8779 = vmatpush1.bf16.msra.mxu0 %v10791_v2  ;;  %8737 = vmatprep.subr.bf16.mxu1 %v10520_v49  ;;  %v2790_v2 = vld [vmem:[#allocation8 + $0x1550] sm:$0xff]  ;;  %v10695_v49 = vcombine.low %v2542_v53, %v2550_v54  ;;  %v10903_v54 = vcombine.low %v2750_v33, %v2758_v48 }
 0x2be   :  { %8780 = vmatprep.subr.bf16.mxu0 %v10776_v8  ;;  %v10951_v8 = vcombine.low %v2798_v0, %v2806_v57  ;;  %v10936_v14 = vcombine.high %v2782_v12, %v2790_v2  ;;  %v10935_v23 = vcombine.low %v2782_v12, %v2790_v2  ;;  %v11144_v0 = vcombine.high %v2990_v60, %v2998_v45  ;;  %v2207_v12 = vld [vmem:[#allocation8 + $0x318] sm:$0xff] }
 0x2bf   :  { %v2215_v2 = vld [vmem:[#allocation8 + $0x358] sm:$0xff] }
 0x2c0   :  { %8738 = vmatpush1.bf16.msra.mxu1 %v10519_v16  ;;  %v11781_v16 = vpop.f32.mrf.mxu0 }
 0x2c1   :  { %8781 = vmatpush1.bf16.msra.mxu0 %v10775_v18  ;;  %8739 = vmatprep.subr.bf16.mxu1 %v10760_v19  ;;  %v2766_v18 = vld [vmem:[#allocation8 + $0x1490] sm:$0xff] }
 0x2c2   :  { %8782 = vmatprep.subr.bf16.mxu0 %v11016_v55  ;;  %v2774_v19 = vld [vmem:[#allocation8 + $0x14d0] sm:$0xff]  ;;  %v10679_v55 = vcombine.low %v2526_v25, %v2534_v9  ;;  %v11143_v9 = vcombine.low %v2990_v60, %v2998_v45 }
 0x2c3   :  { %v10920_v38 = vcombine.high %v2766_v18, %v2774_v19 }
 0x2c4   :  { %8740 = vmatpush2.bf16.msra.mxu1 %v10759_v17  ;;  %v2494_v17 = vld [vmem:[#allocation8 + $0xc10] sm:$0xff] }
 0x2c5   :  { %8783 = vmatpush2.bf16.msra.mxu0 %v11015_v30  ;;  %8741 = vmatprep.subr.bf16.mxu1 %v10744_v59  ;;  %v2502_v30 = vld [vmem:[#allocation8 + $0xc50] sm:$0xff]  ;;  %v11783_v59 = vld [vmem:[#allocation10] sm:$0xff] }
 0x2c6   :  { %8784 = vmatprep.subr.bf16.mxu0 %v11000_v32  ;;  %v8376_v32 = vpop.f32.mrf.mxu0 }
 0x2c8   :  { %8742 = vmatpush2.bf16.msra.mxu1 %v10743_v39  ;;  %v8456_v39 = vpop.f32.mrf.mxu0 }
 0x2c9   :  { %8785 = vmatpush2.bf16.msra.mxu0 %v10999_v40  ;;  %8743 = vmatprep.subr.bf16.mxu1 %v10728_v42  ;;  %v10919_v40 = vcombine.low %v2766_v18, %v2774_v19  ;;  %v10648_v42 = vcombine.high %v2494_v17, %v2502_v30  ;;  %v2966_v18 = vld [vmem:[#allocation8 + $0x1ad0] sm:$0xff] }
 0x2ca   :  { %8786 = vmatprep.subr.bf16.mxu0 %v10984_v43  ;;  %v3139_v43 = vrot.slane %v11783_v59, %v11658_v47  ;;  %v8458_v53 = vpop.f32.mrf.mxu0 }
 0x2cc   :  { %8744 = vmatpush2.bf16.msra.mxu1 %v10727_v50  ;;  %v2231_v50 = vld [vmem:[#allocation8 + $0x3d8] sm:$0xff]  ;;  %v8371_v57 = vadd.f32 %v11779_v61, %v3139_v43  ;;  %v2958_v61 = vld [vmem:[#allocation8 + $0x1a90] sm:$0xff]  ;;  %v8375_v19 = vadd.f32 %v11781_v16, %v3139_v43 }
 0x2cd   :  { %8787 = vmatpush2.bf16.msra.mxu0 %v10983_v22  ;;  %8745 = vmatprep.subr.bf16.mxu1 %v10712_v52  ;;  %v3143_v22 = vrot.slane %v11783_v59, %v11635_v41  ;;  %v10647_v52 = vcombine.low %v2494_v17, %v2502_v30  ;;  %v2942_v43 = vld [vmem:[#allocation8 + $0x1a10] sm:$0xff] }
 0x2ce   :  { %8788 = vmatprep.subr.bf16.mxu0 %v10968_v31  ;;  %v8417_v31 = vpop.f32.mrf.mxu1  ;;  %v8414_v25 = vadd.f32 %v8413_v27, %v8371_v57  ;;  %v10362_v27 = vcombine.high %v2207_v12, %v2215_v2 }
 0x2cf   :  { %v8418_v33 = vadd.f32 %v8417_v31, %v8375_v19  ;;  %v11111_v31 = vcombine.low %v2958_v61, %v2966_v18 }
 0x2d0   :  { %8746 = vmatpush2.bf16.msra.mxu1 %v10711_v3  ;;  %v10378_v3 = vcombine.high %v2223_v46, %v2231_v50  ;;  %v8457_v20 = vadd.f32 %v8456_v39, %v8414_v25 }
 0x2d1   :  { %8789 = vmatpush2.bf16.msra.mxu0 %v10967_v63  ;;  %8747 = vmatprep.subr.bf16.mxu1 %v10696_v4  ;;  %v2974_v63 = vld [vmem:[#allocation8 + $0x1b10] sm:$0xff] }
 0x2d2   :  { %8790 = vmatprep.subr.bf16.mxu0 %v10952_v7  ;;  %v2982_v4 = vld [vmem:[#allocation8 + $0x1b50] sm:$0xff]  ;;  %v8373_v7 = vadd.f32 %v8372_v10, %v3143_v22 }
 0x2d3   :  { %v11128_v15 = vcombine.high %v2974_v63, %v2982_v4  ;;  %v11127_v30 = vcombine.low %v2974_v63, %v2982_v4  ;;  %v2926_v4 = vld [vmem:[#allocation8 + $0x1990] sm:$0xff] }
 0x2d4   :  { %8748 = vmatpush2.bf16.msra.mxu1 %v10695_v49  ;;  %v8419_v49 = vpop.f32.mrf.mxu1 }
 0x2d5   :  { %8791 = vmatpush2.bf16.msra.mxu0 %v10951_v8  ;;  %8749 = vmatprep.subr.bf16.mxu1 %v10680_v13  ;;  %v8460_v8 = vpop.f32.mrf.mxu0  ;;  %v10377_v13 = vcombine.low %v2223_v46, %v2231_v50  ;;  %v2175_v46 = vld [vmem:[#allocation8 + $0x218] sm:$0xff] }
 0x2d6   :  { %8792 = vmatprep.subr.bf16.mxu0 %v10936_v14  ;;  %v8416_v14 = vadd.f32 %v8415_v37, %v8373_v7  ;;  %v8461_v60 = vadd.f32 %v8460_v8, %v8418_v33  ;;  %v2183_v50 = vld [vmem:[#allocation8 + $0x258] sm:$0xff]  ;;  %v2934_v7 = vld [vmem:[#allocation8 + $0x19d0] sm:$0xff] }
 0x2d7   :  { %v8462_v48 = vpop.f32.mrf.mxu0  ;;  %v10330_v63 = vcombine.high %v2175_v46, %v2183_v50  ;;  %v10329_v8 = vcombine.low %v2175_v46, %v2183_v50  ;;  %v11079_v19 = vcombine.low %v2926_v4, %v2934_v7 }
 0x2d8   :  { %8750 = vmatpush2.bf16.msra.mxu1 %v10679_v55  ;;  %v8377_v55 = vadd.f32 %v8376_v32, %v3143_v22  ;;  %v10361_v32 = vcombine.low %v2207_v12, %v2215_v2  ;;  %v2167_v12 = vld [vmem:[#allocation8 + $0x1d8] sm:$0xff] }
 0x2d9   :  { %8793 = vmatpush2.bf16.msra.mxu0 %v10935_v23  ;;  %8751 = vmatprep.subr.bf16.mxu1 %v10664_v28  ;;  %v2191_v23 = vld [vmem:[#allocation8 + $0x298] sm:$0xff] }
 0x2da   :  { %8794 = vmatprep.subr.bf16.mxu0 %v10920_v38  ;;  %v2199_v28 = vld [vmem:[#allocation8 + $0x2d8] sm:$0xff]  ;;  %v8459_v38 = vadd.f32 %v8458_v53, %v8416_v14  ;;  %v8420_v37 = vadd.f32 %v8419_v49, %v8377_v55 }
 0x2dc   :  { %8752 = vmatpush2.bf16.msra.mxu1 %v10663_v36  ;;  %v11112_v36 = vcombine.high %v2958_v61, %v2966_v18  ;;  %v8463_v22 = vadd.f32 %v8462_v48, %v8420_v37  ;;  %v2143_v61 = vld [vmem:[#allocation8 + $0x118] sm:$0xff] }
 0x2dd   :  { %8795 = vmatpush2.bf16.msra.mxu0 %v10919_v40  ;;  %8753 = vmatprep.subr.bf16.mxu1 %v10648_v42  ;;  %v10346_v42 = vcombine.high %v2191_v23, %v2199_v28  ;;  %v2151_v18 = vld [vmem:[#allocation8 + $0x158] sm:$0xff] }
 0x2de   :  { %8796 = vmatprep.subr.bf16.mxu0 %v10904_v56  ;;  %v2950_v56 = vld [vmem:[#allocation8 + $0x1a50] sm:$0xff] }
 0x2df   :  { %v11096_v57 = vcombine.high %v2942_v43, %v2950_v56  ;;  %v11095_v49 = vcombine.low %v2942_v43, %v2950_v56  ;;  %v2111_v56 = vld [vmem:[#allocation8 + $0x18] sm:$0xff] }
 0x2e0   :  { %8754 = vmatpush2.bf16.msra.mxu1 %v10647_v52 }
 0x2e1   :  { %8797 = vmatpush2.bf16.msra.mxu0 %v10903_v54  ;;  %8809 = vmatprep.subr.bf16.mxu1 %v11144_v0  ;;  %v10345_v0 = vcombine.low %v2191_v23, %v2199_v28  ;;  %v2894_v23 = vld [vmem:[#allocation8 + $0x1890] sm:$0xff] }
 0x2e2   :  { %8852 = vmatprep.subr.bf16.mxu0 %v10378_v3  ;;  %v2902_v28 = vld [vmem:[#allocation8 + $0x18d0] sm:$0xff] }
 0x2e3   :  { %8756 = vmatmul.mubr.bf16.vlgmr.msra.gmra.mxu1 %v11710_v58  ;;  %v8499_v10 = vpop.f32.mrf.mxu1 }
 0x2e4   :  { %8799 = vmatmul.mubr.bf16.vlgmr.msra.gmra.mxu0 %v11742_v35  ;;  %v11793_v17 = vadd.f32 %v8499_v10, %v8457_v20  ;;  %8810 = vmatpush1.bf16.msra.mxu1 %v11143_v9  ;;  %v2159_v9 = vld [vmem:[#allocation8 + $0x198] sm:$0xff]  ;;  %v2910_v20 = vld [vmem:[#allocation8 + $0x1910] sm:$0xff] }
 0x2e5   :  { %8841 = vmatprep.mubr.bf16.mxu1 %v11759_v51  ;;  %8853 = vmatpush1.bf16.msra.mxu0 %v10377_v13  ;;  %v8501_v16 = vpop.f32.mrf.mxu1  ;;  %v11080_v13 = vcombine.high %v2926_v4, %v2934_v7  ;;  %v10314_v14 = vcombine.high %v2159_v9, %v2167_v12  ;;  %v10313_v55 = vcombine.low %v2159_v9, %v2167_v12  ;;  %v3118_v4 = vld [vmem:[#allocation8 + $0x1f90] sm:$0xff] }
 0x2e6   :  { %v9744_v39 = vmul.f32 0.70710677, %v11793_v17  ;;  %8884 = vmatprep.mubr.bf16.mxu0 %v11672_v21  ;;  %v11798_v40 = vadd.f32 %v8501_v16, %v8459_v38  ;;  %8811 = vmatprep.subr.bf16.mxu1 %v11128_v15  ;;  %v2918_v15 = vld [vmem:[#allocation8 + $0x1950] sm:$0xff]  ;;  %v2127_v38 = vld [vmem:[#allocation8 + $0x98] sm:$0xff]  ;;  %v10297_v16 = vcombine.low %v2143_v61, %v2151_v18 }
 0x2e7   :  { %8854 = vmatprep.subr.bf16.mxu0 %v10362_v27  ;;  %v8503_v45 = vpop.f32.mrf.mxu1  ;;  %v11064_v10 = vcombine.high %v2910_v20, %v2918_v15  ;;  %v10298_v27 = vcombine.high %v2143_v61, %v2151_v18  ;;  %v11063_v33 = vcombine.low %v2910_v20, %v2918_v15  ;;  %v3126_v7 = vld [vmem:[#allocation8 + $0x1fd0] sm:$0xff] }
 0x2e8   :  { %11357 = verf.f32 %v9744_v39  ;;  %v9745_v52 = vmul.f32 0.70710677, %v11798_v40  ;;  %8812 = vmatpush1.bf16.msra.mxu1 %v11127_v30  ;;  %v11801_v53 = vadd.f32 %v8503_v45, %v8461_v60  ;;  %v2135_v30 = vld [vmem:[#allocation8 + $0xd8] sm:$0xff]  ;;  %v2878_v39 = vld [vmem:[#allocation8 + $0x1810] sm:$0xff]  ;;  %v9712_v45 = vmul.f32 0.5, %v11793_v17 }
 0x2e9   :  { %8855 = vmatpush1.bf16.msra.mxu0 %v10361_v32  ;;  %v8505_v54 = vpop.f32.mrf.mxu1  ;;  %8813 = vmatprep.subr.bf16.mxu1 %v11112_v36  ;;  %v11048_v32 = vcombine.high %v2894_v23, %v2902_v28  ;;  %v10282_v37 = vcombine.high %v2127_v38, %v2135_v30  ;;  %v2119_v60 = vld [vmem:[#allocation8 + $0x58] sm:$0xff]  ;;  %v9713_v46 = vmul.f32 0.5, %v11798_v40  ;;  %v11272_v20 = vcombine.high %v3118_v4, %v3126_v7 }
 0x2ea   :  { %11359 = verf.f32 %v9745_v52  ;;  %v11803_v3 = vadd.f32 %v8505_v54, %v8463_v22  ;;  %8856 = vmatprep.subr.bf16.mxu0 %v10346_v42  ;;  %v9760_v25 = vmul.f32 0.70710677, %v11801_v53  ;;  %v2886_v42 = vld [vmem:[#allocation8 + $0x1850] sm:$0xff]  ;;  %v11047_v22 = vcombine.low %v2894_v23, %v2902_v28  ;;  %v2351_v17 = vld [vmem:[#allocation8 + $0x798] sm:$0xff] }
 0x2eb   :  { %v10281_v52 = vcombine.low %v2127_v38, %v2135_v30  ;;  %v11031_v12 = vcombine.low %v2878_v39, %v2886_v42  ;;  %v3086_v30 = vld [vmem:[#allocation8 + $0x1e90] sm:$0xff] }
 0x2ec   :  { %v9761_v2 = vmul.f32 0.70710677, %v11803_v3  ;;  %8814 = vmatpush1.bf16.msra.mxu1 %v11111_v31  ;;  %11361 = verf.f32 %v9760_v25  ;;  %v11032_v31 = vcombine.high %v2878_v39, %v2886_v42  ;;  %v3070_v42 = vld [vmem:[#allocation8 + $0x1e10] sm:$0xff] }
 0x2ed   :  { %8857 = vmatpush1.bf16.msra.mxu0 %v10345_v0  ;;  %8815 = vmatprep.subr.bf16.mxu1 %v11096_v57 }
 0x2ee   :  { %11363 = verf.f32 %v9761_v2  ;;  %8858 = vmatprep.subr.bf16.mxu0 %v10330_v63  ;;  %v10266_v63 = vcombine.high %v2111_v56, %v2119_v60  ;;  %v2359_v2 = vld [vmem:[#allocation8 + $0x7d8] sm:$0xff] }
 0x2ef   :  { %v10506_v18 = vcombine.high %v2351_v17, %v2359_v2 }
 0x2f0   :  { %8816 = vmatpush1.bf16.msra.mxu1 %v11095_v49  ;;  %v9728_v49 = vmul.f32 0.5, %v11801_v53  ;;  %v11271_v53 = vcombine.low %v3118_v4, %v3126_v7 }
 0x2f1   :  { %8859 = vmatpush1.bf16.msra.mxu0 %v10329_v8  ;;  %8817 = vmatprep.subr.bf16.mxu1 %v11080_v13  ;;  %v9729_v8 = vmul.f32 0.5, %v11803_v3  ;;  %v10505_v3 = vcombine.low %v2351_v17, %v2359_v2  ;;  %v2279_v17 = vld [vmem:[#allocation8 + $0x558] sm:$0xff] }
 0x2f2   :  { %8860 = vmatprep.subr.bf16.mxu0 %v10314_v14  ;;  %v10265_v14 = vcombine.low %v2111_v56, %v2119_v60  ;;  %v2303_v56 = vld [vmem:[#allocation8 + $0x618] sm:$0xff] }
 0x2f3   :  { %v2311_v60 = vld [vmem:[#allocation8 + $0x658] sm:$0xff] }
 0x2f4   :  { %8818 = vmatpush1.bf16.msra.mxu1 %v11079_v19  ;;  %v3102_v19 = vld [vmem:[#allocation8 + $0x1f10] sm:$0xff] }
 0x2f5   :  { %v11358_v48 = vpop.eup %11357  ;;  %8861 = vmatpush1.bf16.msra.mxu0 %v10313_v55  ;;  %8819 = vmatprep.subr.bf16.mxu1 %v11064_v10  ;;  %v3110_v55 = vld [vmem:[#allocation8 + $0x1f50] sm:$0xff]  ;;  %v2335_v10 = vld [vmem:[#allocation8 + $0x718] sm:$0xff] }
 0x2f6   :  { %v9808_v36 = vadd.f32 1.0, %v11358_v48  ;;  %8862 = vmatprep.subr.bf16.mxu0 %v10298_v27  ;;  %v2343_v27 = vld [vmem:[#allocation8 + $0x758] sm:$0xff]  ;;  %v11256_v28 = vcombine.high %v3102_v19, %v3110_v55 }
 0x2f7   :  { %v11360_v43 = vpop.eup %11359  ;;  %v10490_v38 = vcombine.high %v2335_v10, %v2343_v27  ;;  %v2319_v48 = vld [vmem:[#allocation8 + $0x698] sm:$0xff] }
 0x2f8   :  { %v9809_v50 = vadd.f32 1.0, %v11360_v43  ;;  %8820 = vmatpush1.bf16.msra.mxu1 %v11063_v33  ;;  %v9840_v0 = vmul.f32 %v9808_v36, %v9712_v45  ;;  %v3094_v33 = vld [vmem:[#allocation8 + $0x1ed0] sm:$0xff]  ;;  %v10489_v36 = vcombine.low %v2335_v10, %v2343_v27 }
 0x2f9   :  { %8863 = vmatpush1.bf16.msra.mxu0 %v10297_v16  ;;  %8821 = vmatprep.subr.bf16.mxu1 %v11048_v32  ;;  %v11362_v54 = vpop.eup %11361  ;;  %v2327_v16 = vld [vmem:[#allocation8 + $0x6d8] sm:$0xff]  ;;  %v11255_v32 = vcombine.low %v3102_v19, %v3110_v55  ;;  %v3078_v43 = vld [vmem:[#allocation8 + $0x1e50] sm:$0xff]  ;;  %v11239_v45 = vcombine.low %v3086_v30, %v3094_v33 }
 0x2fa   :  { %v9841_v57 = vmul.f32 %v9809_v50, %v9713_v46  ;;  %8864 = vmatprep.subr.bf16.mxu0 %v10282_v37  ;;  %v9824_v9 = vadd.f32 1.0, %v11362_v54  ;;  %v11240_v37 = vcombine.high %v3086_v30, %v3094_v33  ;;  %v10474_v39 = vcombine.high %v2319_v48, %v2327_v16  ;;  %v2287_v54 = vld [vmem:[#allocation8 + $0x598] sm:$0xff]  ;;  %v3006_v10 = vld [vmem:[#allocation8 + $0x1c10] sm:$0xff] }
 0x2fb   :  { %v11364_v25 = vpop.eup %11363  ;;  %v10473_v46 = vcombine.low %v2319_v48, %v2327_v16  ;;  %v11224_v50 = vcombine.high %v3070_v42, %v3078_v43  ;;  %v3014_v27 = vld [vmem:[#allocation8 + $0x1c50] sm:$0xff]  ;;  %v2479_v33 = vld [vmem:[#allocation8 + $0xb98] sm:$0xff] }
 0x2fc   :  { %v11299_v40 = vpack.c.bf16 %v9841_v57, %v9840_v0  ;;  %v9825_v13 = vadd.f32 1.0, %v11364_v25  ;;  %8822 = vmatpush1.bf16.msra.mxu1 %v11047_v22  ;;  %v9856_v15 = vmul.f32 %v9824_v9, %v9728_v49  ;;  %v10458_v22 = vcombine.high %v2303_v56, %v2311_v60  ;;  %v2295_v0 = vld [vmem:[#allocation8 + $0x5d8] sm:$0xff]  ;;  %v3038_v25 = vld [vmem:[#allocation8 + $0x1d10] sm:$0xff] }
 0x2fd   :  { %8865 = vmatpush1.bf16.msra.mxu0 %v10281_v52  ;;  %8823 = vmatprep.subr.bf16.mxu1 %v11032_v31  ;;  %v3054_v52 = vld [vmem:[#allocation8 + $0x1d90] sm:$0xff]  ;;  %v11223_v57 = vcombine.low %v3070_v42, %v3078_v43  ;;  %v10442_v7 = vcombine.high %v2287_v54, %v2295_v0  ;;  %v2487_v48 = vld [vmem:[#allocation8 + $0xbd8] sm:$0xff] }
 0x2fe   :  { %9968 = vst [vmem:[#allocation11] sm:$0xff] %v11299_v40  ;;  %v9857_v61 = vmul.f32 %v9825_v13, %v9729_v8  ;;  %8866 = vmatprep.subr.bf16.mxu0 %v10266_v63  ;;  %v3062_v31 = vld [vmem:[#allocation8 + $0x1dd0] sm:$0xff]  ;;  %v10457_v63 = vcombine.low %v2303_v56, %v2311_v60  ;;  %v10441_v40 = vcombine.low %v2287_v54, %v2295_v0  ;;  %v2735_v16 = vld [vmem:[#allocation8 + $0x1398] sm:$0xff] }
 0x2ff   :  { %v11208_v4 = vcombine.high %v3054_v52, %v3062_v31  ;;  %v3046_v9 = vld [vmem:[#allocation8 + $0x1d50] sm:$0xff]  ;;  %v11207_v2 = vcombine.low %v3054_v52, %v3062_v31  ;;  %v2463_v43 = vld [vmem:[#allocation8 + $0xb18] sm:$0xff]  ;;  %v10633_v60 = vcombine.low %v2479_v33, %v2487_v48 }
 0x300   :  { %v11307_v23 = vpack.c.bf16 %v9857_v61, %v9856_v15  ;;  %8824 = vmatpush1.bf16.msra.mxu1 %v11031_v12  ;;  %v2271_v12 = vld [vmem:[#allocation8 + $0x518] sm:$0xff]  ;;  %v11192_v49 = vcombine.high %v3038_v25, %v3046_v9  ;;  %v3022_v13 = vld [vmem:[#allocation8 + $0x1c90] sm:$0xff]  ;;  %v11191_v61 = vcombine.low %v3038_v25, %v3046_v9 }
 0x301   :  { %8867 = vmatpush1.bf16.msra.mxu0 %v10265_v14  ;;  %8825 = vmatprep.subr.bf16.mxu1 %v11272_v20  ;;  %v10426_v8 = vcombine.high %v2271_v12, %v2279_v17  ;;  %v3030_v14 = vld [vmem:[#allocation8 + $0x1cd0] sm:$0xff]  ;;  %v2255_v20 = vld [vmem:[#allocation8 + $0x498] sm:$0xff] }
 0x302   :  { %9976 = vst [vmem:[#allocation11 + $0x40] sm:$0xff] %v11307_v23  ;;  %8868 = vmatprep.subr.bf16.mxu0 %v10506_v18  ;;  %v2263_v15 = vld [vmem:[#allocation8 + $0x4d8] sm:$0xff]  ;;  %v10425_v18 = vcombine.low %v2271_v12, %v2279_v17  ;;  %v11176_v19 = vcombine.high %v3022_v13, %v3030_v14 }
 0x303   :  { %v10410_v55 = vcombine.high %v2255_v20, %v2263_v15  ;;  %v2239_v23 = vld [vmem:[#allocation8 + $0x418] sm:$0xff] }
 0x304   :  { %8826 = vmatpush2.bf16.msra.mxu1 %v11271_v53  ;;  %v2247_v53 = vld [vmem:[#allocation8 + $0x458] sm:$0xff] }
 0x305   :  { %8869 = vmatpush2.bf16.msra.mxu0 %v10505_v3  ;;  %8827 = vmatprep.subr.bf16.mxu1 %v11256_v28  ;;  %v11175_v3 = vcombine.low %v3022_v13, %v3030_v14  ;;  %v10409_v28 = vcombine.low %v2255_v20, %v2263_v15  ;;  %v10394_v30 = vcombine.high %v2239_v23, %v2247_v53  ;;  %v2471_v56 = vld [vmem:[#allocation8 + $0xb58] sm:$0xff] }
 0x306   :  { %8870 = vmatprep.subr.bf16.mxu0 %v10490_v38  ;;  %v11160_v38 = vcombine.high %v3006_v10, %v3014_v27  ;;  %v2447_v52 = vld [vmem:[#allocation8 + $0xa98] sm:$0xff] }
 0x307   :  { %v2455_v31 = vld [vmem:[#allocation8 + $0xad8] sm:$0xff] }
 0x308   :  { %8828 = vmatpush2.bf16.msra.mxu1 %v11255_v32  ;;  %v2743_v32 = vld [vmem:[#allocation8 + $0x13d8] sm:$0xff] }
 0x309   :  { %8871 = vmatpush2.bf16.msra.mxu0 %v10489_v36  ;;  %8829 = vmatprep.subr.bf16.mxu1 %v11240_v37  ;;  %v11159_v36 = vcombine.low %v3006_v10, %v3014_v27  ;;  %v10393_v37 = vcombine.low %v2239_v23, %v2247_v53  ;;  %v10890_v42 = vcombine.high %v2735_v16, %v2743_v32  ;;  %v2703_v0 = vld [vmem:[#allocation8 + $0x1298] sm:$0xff] }
 0x30a   :  { %8872 = vmatprep.subr.bf16.mxu0 %v10474_v39  ;;  %v10634_v39 = vcombine.high %v2479_v33, %v2487_v48  ;;  %v2431_v9 = vld [vmem:[#allocation8 + $0xa18] sm:$0xff] }
 0x30b   :  { %v2439_v12 = vld [vmem:[#allocation8 + $0xa58] sm:$0xff] }
 0x30c   :  { %8830 = vmatpush2.bf16.msra.mxu1 %v11239_v45  ;;  %v2719_v45 = vld [vmem:[#allocation8 + $0x1318] sm:$0xff] }
 0x30d   :  { %8873 = vmatpush2.bf16.msra.mxu0 %v10473_v46  ;;  %8831 = vmatprep.subr.bf16.mxu1 %v11224_v50  ;;  %v2727_v46 = vld [vmem:[#allocation8 + $0x1358] sm:$0xff]  ;;  %v10889_v50 = vcombine.low %v2735_v16, %v2743_v32 }
 0x30e   :  { %8874 = vmatprep.subr.bf16.mxu0 %v10458_v22  ;;  %v10618_v22 = vcombine.high %v2463_v43, %v2471_v56  ;;  %v10874_v54 = vcombine.high %v2719_v45, %v2727_v46  ;;  %v2687_v17 = vld [vmem:[#allocation8 + $0x1218] sm:$0xff] }
 0x30f   :  { %v2415_v14 = vld [vmem:[#allocation8 + $0x998] sm:$0xff] }
 0x310   :  { %8832 = vmatpush2.bf16.msra.mxu1 %v11223_v57  ;;  %v2711_v57 = vld [vmem:[#allocation8 + $0x12d8] sm:$0xff] }
 0x311   :  { %8875 = vmatpush2.bf16.msra.mxu0 %v10457_v63  ;;  %8833 = vmatprep.subr.bf16.mxu1 %v11208_v4  ;;  %v10617_v63 = vcombine.low %v2463_v43, %v2471_v56  ;;  %v10873_v4 = vcombine.low %v2719_v45, %v2727_v46  ;;  %v10858_v25 = vcombine.high %v2703_v0, %v2711_v57  ;;  %v2423_v20 = vld [vmem:[#allocation8 + $0x9d8] sm:$0xff] }
 0x312   :  { %8876 = vmatprep.subr.bf16.mxu0 %v10442_v7  ;;  %v10602_v7 = vcombine.high %v2447_v52, %v2455_v31  ;;  %v2671_v15 = vld [vmem:[#allocation8 + $0x1198] sm:$0xff] }
 0x313   :  { %v2399_v27 = vld [vmem:[#allocation8 + $0x918] sm:$0xff] }
 0x314   :  { %8834 = vmatpush2.bf16.msra.mxu1 %v11207_v2  ;;  %v2695_v2 = vld [vmem:[#allocation8 + $0x1258] sm:$0xff] }
 0x315   :  { %8877 = vmatpush2.bf16.msra.mxu0 %v10441_v40  ;;  %8835 = vmatprep.subr.bf16.mxu1 %v11192_v49  ;;  %v10601_v40 = vcombine.low %v2447_v52, %v2455_v31  ;;  %v10857_v49 = vcombine.low %v2703_v0, %v2711_v57  ;;  %v10842_v13 = vcombine.high %v2687_v17, %v2695_v2  ;;  %v2407_v23 = vld [vmem:[#allocation8 + $0x958] sm:$0xff] }
 0x316   :  { %8878 = vmatprep.subr.bf16.mxu0 %v10426_v8  ;;  %v10586_v8 = vcombine.high %v2431_v9, %v2439_v12  ;;  %v2655_v53 = vld [vmem:[#allocation8 + $0x1118] sm:$0xff] }
 0x317   :  { %v2383_v48 = vld [vmem:[#allocation8 + $0x898] sm:$0xff] }
 0x318   :  { %8836 = vmatpush2.bf16.msra.mxu1 %v11191_v61  ;;  %v2679_v61 = vld [vmem:[#allocation8 + $0x11d8] sm:$0xff] }
 0x319   :  { %8879 = vmatpush2.bf16.msra.mxu0 %v10425_v18  ;;  %8837 = vmatprep.subr.bf16.mxu1 %v11176_v19  ;;  %v10585_v18 = vcombine.low %v2431_v9, %v2439_v12  ;;  %v10841_v19 = vcombine.low %v2687_v17, %v2695_v2  ;;  %v10826_v10 = vcombine.high %v2671_v15, %v2679_v61  ;;  %v2391_v16 = vld [vmem:[#allocation8 + $0x8d8] sm:$0xff] }
 0x31a   :  { %8880 = vmatprep.subr.bf16.mxu0 %v10410_v55  ;;  %v10570_v55 = vcombine.high %v2415_v14, %v2423_v20  ;;  %v2639_v32 = vld [vmem:[#allocation8 + $0x1098] sm:$0xff] }
 0x31b   :  { %v2367_v56 = vld [vmem:[#allocation8 + $0x818] sm:$0xff] }
 0x31c   :  { %8838 = vmatpush2.bf16.msra.mxu1 %v11175_v3  ;;  %v2663_v3 = vld [vmem:[#allocation8 + $0x1158] sm:$0xff] }
 0x31d   :  { %8881 = vmatpush2.bf16.msra.mxu0 %v10409_v28  ;;  %8839 = vmatprep.subr.bf16.mxu1 %v11160_v38  ;;  %v10569_v28 = vcombine.low %v2415_v14, %v2423_v20  ;;  %v10825_v38 = vcombine.low %v2671_v15, %v2679_v61  ;;  %v10810_v33 = vcombine.high %v2655_v53, %v2663_v3  ;;  %v2623_v45 = vld [vmem:[#allocation8 + $0x1018] sm:$0xff] }
 0x31e   :  { %8882 = vmatprep.subr.bf16.mxu0 %v10394_v30  ;;  %v10554_v30 = vcombine.high %v2399_v27, %v2407_v23  ;;  %v2631_v46 = vld [vmem:[#allocation8 + $0x1058] sm:$0xff] }
 0x31f   :  { %v10778_v31 = vcombine.high %v2623_v45, %v2631_v46  ;;  %v2615_v0 = vld [vmem:[#allocation8 + $0xfd8] sm:$0xff] }
 0x320   :  { %8840 = vmatpush2.bf16.msra.mxu1 %v11159_v36  ;;  %v2647_v36 = vld [vmem:[#allocation8 + $0x10d8] sm:$0xff] }
 0x321   :  { %8883 = vmatpush2.bf16.msra.mxu0 %v10393_v37  ;;  %8895 = vmatprep.subr.bf16.mxu1 %v10634_v39  ;;  %v10553_v37 = vcombine.low %v2399_v27, %v2407_v23  ;;  %v10809_v39 = vcombine.low %v2655_v53, %v2663_v3  ;;  %v10794_v43 = vcombine.high %v2639_v32, %v2647_v36  ;;  %v2863_v57 = vld [vmem:[#allocation8 + $0x1798] sm:$0xff] }
 0x322   :  { %8938 = vmatprep.subr.bf16.mxu0 %v10890_v42  ;;  %v10538_v42 = vcombine.high %v2383_v48, %v2391_v16  ;;  %v2591_v12 = vld [vmem:[#allocation8 + $0xf18] sm:$0xff] }
 0x323   :  { %8842 = vmatmul.mubr.bf16.vlgmr.msra.gmra.mxu1 %v11761_v44  ;;  %v2599_v17 = vld [vmem:[#allocation8 + $0xf58] sm:$0xff] }
 0x324   :  { %8885 = vmatmul.mubr.bf16.vlgmr.msra.gmra.mxu0 %v11693_v34  ;;  %8896 = vmatpush1.bf16.msra.mxu1 %v10633_v60  ;;  %v2375_v60 = vld [vmem:[#allocation8 + $0x858] sm:$0xff] }
 0x325   :  { %8927 = vmatprep.mubr.bf16.mxu1 %v11702_v1  ;;  %8939 = vmatpush1.bf16.msra.mxu0 %v10889_v50  ;;  %v10537_v50 = vcombine.low %v2383_v48, %v2391_v16  ;;  %v10522_v52 = vcombine.high %v2367_v56, %v2375_v60  ;;  %v2847_v2 = vld [vmem:[#allocation8 + $0x1718] sm:$0xff] }
 0x326   :  { %8970 = vmatprep.mubr.bf16.mxu0 %v11738_v6  ;;  %8897 = vmatprep.subr.bf16.mxu1 %v10618_v22  ;;  %v10793_v22 = vcombine.low %v2639_v32, %v2647_v36  ;;  %v2575_v20 = vld [vmem:[#allocation8 + $0xe98] sm:$0xff] }
 0x327   :  { %8940 = vmatprep.subr.bf16.mxu0 %v10874_v54  ;;  %v2607_v54 = vld [vmem:[#allocation8 + $0xf98] sm:$0xff] }
 0x328   :  { %8898 = vmatpush1.bf16.msra.mxu1 %v10617_v63  ;;  %v2871_v63 = vld [vmem:[#allocation8 + $0x17d8] sm:$0xff] }
 0x329   :  { %8941 = vmatpush1.bf16.msra.mxu0 %v10873_v4  ;;  %8899 = vmatprep.subr.bf16.mxu1 %v10602_v7  ;;  %v10521_v4 = vcombine.low %v2367_v56, %v2375_v60  ;;  %v10777_v7 = vcombine.low %v2623_v45, %v2631_v46  ;;  %v11018_v9 = vcombine.high %v2863_v57, %v2871_v63  ;;  %v2583_v15 = vld [vmem:[#allocation8 + $0xed8] sm:$0xff] }
 0x32a   :  { %8942 = vmatprep.subr.bf16.mxu0 %v10858_v25  ;;  %v10762_v25 = vcombine.high %v2607_v54, %v2615_v0  ;;  %v2831_v61 = vld [vmem:[#allocation8 + $0x1698] sm:$0xff] }
 0x32b   :  { %v2559_v23 = vld [vmem:[#allocation8 + $0xe18] sm:$0xff] }
 0x32c   :  { %8900 = vmatpush1.bf16.msra.mxu1 %v10601_v40  ;;  %v2855_v40 = vld [vmem:[#allocation8 + $0x1758] sm:$0xff] }
 0x32d   :  { %8943 = vmatpush1.bf16.msra.mxu0 %v10857_v49  ;;  %8901 = vmatprep.subr.bf16.mxu1 %v10586_v8  ;;  %v10761_v49 = vcombine.low %v2607_v54, %v2615_v0  ;;  %v11017_v8 = vcombine.low %v2863_v57, %v2871_v63  ;;  %v11002_v14 = vcombine.high %v2847_v2, %v2855_v40  ;;  %v2567_v53 = vld [vmem:[#allocation8 + $0xe58] sm:$0xff] }
 0x32e   :  { %8944 = vmatprep.subr.bf16.mxu0 %v10842_v13  ;;  %v10746_v13 = vcombine.high %v2591_v12, %v2599_v17  ;;  %v2815_v3 = vld [vmem:[#allocation8 + $0x1618] sm:$0xff] }
 0x32f   :  { %v2543_v16 = vld [vmem:[#allocation8 + $0xd98] sm:$0xff] }
 0x330   :  { %8902 = vmatpush1.bf16.msra.mxu1 %v10585_v18  ;;  %v2839_v18 = vld [vmem:[#allocation8 + $0x16d8] sm:$0xff] }
 0x331   :  { %8945 = vmatpush1.bf16.msra.mxu0 %v10841_v19  ;;  %8903 = vmatprep.subr.bf16.mxu1 %v10570_v55  ;;  %v10745_v19 = vcombine.low %v2591_v12, %v2599_v17  ;;  %v11001_v55 = vcombine.low %v2847_v2, %v2855_v40  ;;  %v10986_v27 = vcombine.high %v2831_v61, %v2839_v18  ;;  %v2551_v32 = vld [vmem:[#allocation8 + $0xdd8] sm:$0xff]  ;;  %v8585_v17 = vpop.f32.mrf.mxu1 }
 0x332   :  { %8946 = vmatprep.subr.bf16.mxu0 %v10826_v10  ;;  %v10730_v10 = vcombine.high %v2575_v20, %v2583_v15  ;;  %v2799_v36 = vld [vmem:[#allocation8 + $0x1598] sm:$0xff]  ;;  %v10698_v56 = vcombine.high %v2543_v16, %v2551_v32 }
 0x333   :  { %v2527_v45 = vld [vmem:[#allocation8 + $0xd18] sm:$0xff] }
 0x334   :  { %8904 = vmatpush1.bf16.msra.mxu1 %v10569_v28  ;;  %v2823_v28 = vld [vmem:[#allocation8 + $0x1658] sm:$0xff] }
 0x335   :  { %8947 = vmatpush1.bf16.msra.mxu0 %v10825_v38  ;;  %8905 = vmatprep.subr.bf16.mxu1 %v10554_v30  ;;  %v10729_v38 = vcombine.low %v2575_v20, %v2583_v15  ;;  %v10985_v30 = vcombine.low %v2831_v61, %v2839_v18  ;;  %v10970_v48 = vcombine.high %v2815_v3, %v2823_v28  ;;  %v2535_v46 = vld [vmem:[#allocation8 + $0xd58] sm:$0xff] }
 0x336   :  { %8948 = vmatprep.subr.bf16.mxu0 %v10810_v33  ;;  %v10714_v33 = vcombine.high %v2559_v23, %v2567_v53  ;;  %v10682_v0 = vcombine.high %v2527_v45, %v2535_v46  ;;  %v2511_v63 = vld [vmem:[#allocation8 + $0xc98] sm:$0xff]  ;;  %v3147_v15 = vrot.slane %v11783_v59, %v11679_v24 }
 0x337   :  { %v2759_v20 = vld [vmem:[#allocation8 + $0x1458] sm:$0xff] }
 0x338   :  { %8906 = vmatpush1.bf16.msra.mxu1 %v10553_v37  ;;  %v2807_v37 = vld [vmem:[#allocation8 + $0x15d8] sm:$0xff] }
 0x339   :  { %8949 = vmatpush1.bf16.msra.mxu0 %v10809_v39  ;;  %8907 = vmatprep.subr.bf16.mxu1 %v10538_v42  ;;  %v10713_v39 = vcombine.low %v2559_v23, %v2567_v53  ;;  %v8542_v42 = vpop.f32.mrf.mxu0  ;;  %v10954_v60 = vcombine.high %v2799_v36, %v2807_v37  ;;  %v10953_v54 = vcombine.low %v2799_v36, %v2807_v37  ;;  %v2991_v53 = vld [vmem:[#allocation8 + $0x1b98] sm:$0xff] }
 0x33a   :  { %8950 = vmatprep.subr.bf16.mxu0 %v10794_v43  ;;  %v10969_v43 = vcombine.low %v2815_v3, %v2823_v28  ;;  %v2999_v3 = vld [vmem:[#allocation8 + $0x1bd8] sm:$0xff] }
 0x33b   :  { %v11146_v36 = vcombine.high %v2991_v53, %v2999_v3 }
 0x33c   :  { %8908 = vmatpush1.bf16.msra.mxu1 %v10537_v50  ;;  %v2783_v50 = vld [vmem:[#allocation8 + $0x1518] sm:$0xff] }
 0x33d   :  { %8951 = vmatpush1.bf16.msra.mxu0 %v10793_v22  ;;  %8909 = vmatprep.subr.bf16.mxu1 %v10522_v52  ;;  %v2791_v22 = vld [vmem:[#allocation8 + $0x1558] sm:$0xff]  ;;  %v10697_v52 = vcombine.low %v2543_v16, %v2551_v32 }
 0x33e   :  { %8952 = vmatprep.subr.bf16.mxu0 %v10778_v31  ;;  %v8544_v31 = vpop.f32.mrf.mxu0  ;;  %v10938_v57 = vcombine.high %v2783_v50, %v2791_v22  ;;  %v10937_v2 = vcombine.low %v2783_v50, %v2791_v22  ;;  %v11145_v50 = vcombine.low %v2991_v53, %v2999_v3  ;;  %v2208_v22 = vld [vmem:[#allocation8 + $0x320] sm:$0xff] }
 0x340   :  { %8910 = vmatpush1.bf16.msra.mxu1 %v10521_v4  ;;  %v2519_v4 = vld [vmem:[#allocation8 + $0xcd8] sm:$0xff]  ;;  %v8546_v12 = vpop.f32.mrf.mxu0 }
 0x341   :  { %8953 = vmatpush1.bf16.msra.mxu0 %v10777_v7  ;;  %8911 = vmatprep.subr.bf16.mxu1 %v10762_v25  ;;  %v2767_v7 = vld [vmem:[#allocation8 + $0x1498] sm:$0xff]  ;;  %v10666_v40 = vcombine.high %v2511_v63, %v2519_v4  ;;  %v10665_v61 = vcombine.low %v2511_v63, %v2519_v4 }
 0x342   :  { %8954 = vmatprep.subr.bf16.mxu0 %v11018_v9  ;;  %v2775_v25 = vld [vmem:[#allocation8 + $0x14d8] sm:$0xff]  ;;  %v10681_v9 = vcombine.low %v2527_v45, %v2535_v46  ;;  %v8548_v18 = vpop.f32.mrf.mxu0  ;;  %v8547_v45 = vadd.f32 %v8546_v12, %v3147_v15 }
 0x343   :  { %v2959_v4 = vld [vmem:[#allocation8 + $0x1a98] sm:$0xff] }
 0x344   :  { %8912 = vmatpush2.bf16.msra.mxu1 %v10761_v49  ;;  %v10922_v49 = vcombine.high %v2767_v7, %v2775_v25  ;;  %v8628_v28 = vpop.f32.mrf.mxu0 }
 0x345   :  { %8955 = vmatpush2.bf16.msra.mxu0 %v11017_v8  ;;  %8913 = vmatprep.subr.bf16.mxu1 %v10746_v13  ;;  %v2495_v8 = vld [vmem:[#allocation8 + $0xc18] sm:$0xff] }
 0x346   :  { %8956 = vmatprep.subr.bf16.mxu0 %v11002_v14  ;;  %v2503_v13 = vld [vmem:[#allocation8 + $0xc58] sm:$0xff] }
 0x347   :  { %v2751_v14 = vld [vmem:[#allocation8 + $0x1418] sm:$0xff] }
 0x348   :  { %8914 = vmatpush2.bf16.msra.mxu1 %v10745_v19  ;;  %v8587_v19 = vpop.f32.mrf.mxu1  ;;  %v10906_v23 = vcombine.high %v2751_v14, %v2759_v20  ;;  %v10905_v32 = vcombine.low %v2751_v14, %v2759_v20 }
 0x349   :  { %8957 = vmatpush2.bf16.msra.mxu0 %v11001_v55  ;;  %8915 = vmatprep.subr.bf16.mxu1 %v10730_v10  ;;  %v10921_v55 = vcombine.low %v2767_v7, %v2775_v25  ;;  %v10650_v10 = vcombine.high %v2495_v8, %v2503_v13  ;;  %v2967_v7 = vld [vmem:[#allocation8 + $0x1ad8] sm:$0xff] }
 0x34a   :  { %8958 = vmatprep.subr.bf16.mxu0 %v10986_v27  ;;  %v3151_v27 = vrot.slane %v11783_v59, %v11687_v29  ;;  %v8589_v16 = vpop.f32.mrf.mxu1  ;;  %v8630_v59 = vpop.f32.mrf.mxu0  ;;  %v11113_v3 = vcombine.low %v2959_v4, %v2967_v7 }
 0x34b   :  { %v8590_v63 = vadd.f32 %v8589_v16, %v8547_v45  ;;  %v2168_v45 = vld [vmem:[#allocation8 + $0x1e0] sm:$0xff] }
 0x34c   :  { %8916 = vmatpush2.bf16.msra.mxu1 %v10729_v38  ;;  %v2224_v38 = vld [vmem:[#allocation8 + $0x3a0] sm:$0xff]  ;;  %v8545_v37 = vadd.f32 %v8544_v31, %v3151_v27  ;;  %v8632_v25 = vpop.f32.mrf.mxu0 }
 0x34d   :  { %8959 = vmatpush2.bf16.msra.mxu0 %v10985_v30  ;;  %8917 = vmatprep.subr.bf16.mxu1 %v10714_v33  ;;  %v2232_v30 = vld [vmem:[#allocation8 + $0x3e0] sm:$0xff]  ;;  %v8543_v33 = vadd.f32 %v8542_v42, %v3147_v15  ;;  %v11114_v15 = vcombine.high %v2959_v4, %v2967_v7 }
 0x34e   :  { %8960 = vmatprep.subr.bf16.mxu0 %v10970_v48  ;;  %v10649_v48 = vcombine.low %v2495_v8, %v2503_v13  ;;  %v8588_v46 = vadd.f32 %v8587_v19, %v8545_v37  ;;  %v2216_v42 = vld [vmem:[#allocation8 + $0x360] sm:$0xff] }
 0x34f   :  { %v10363_v20 = vcombine.low %v2208_v22, %v2216_v42 }
 0x350   :  { %8918 = vmatpush2.bf16.msra.mxu1 %v10713_v39  ;;  %v8586_v39 = vadd.f32 %v8585_v17, %v8543_v33  ;;  %v10364_v17 = vcombine.high %v2208_v22, %v2216_v42 }
 0x351   :  { %8961 = vmatpush2.bf16.msra.mxu0 %v10969_v43  ;;  %8919 = vmatprep.subr.bf16.mxu1 %v10698_v56  ;;  %v10380_v43 = vcombine.high %v2224_v38, %v2232_v30  ;;  %v2975_v56 = vld [vmem:[#allocation8 + $0x1b18] sm:$0xff] }
 0x352   :  { %8962 = vmatprep.subr.bf16.mxu0 %v10954_v60  ;;  %v2983_v60 = vld [vmem:[#allocation8 + $0x1b58] sm:$0xff] }
 0x353   :  { %v11130_v31 = vcombine.high %v2975_v56, %v2983_v60  ;;  %v11129_v12 = vcombine.low %v2975_v56, %v2983_v60  ;;  %v2935_v56 = vld [vmem:[#allocation8 + $0x19d8] sm:$0xff]  ;;  %v2160_v60 = vld [vmem:[#allocation8 + $0x1a0] sm:$0xff] }
 0x354   :  { %8920 = vmatpush2.bf16.msra.mxu1 %v10697_v52  ;;  %v8591_v52 = vpop.f32.mrf.mxu1  ;;  %v10315_v4 = vcombine.low %v2160_v60, %v2168_v45 }
 0x355   :  { %8963 = vmatpush2.bf16.msra.mxu0 %v10953_v54  ;;  %8921 = vmatprep.subr.bf16.mxu1 %v10682_v0  ;;  %v10379_v54 = vcombine.low %v2224_v38, %v2232_v30  ;;  %v8549_v0 = vadd.f32 %v8548_v18, %v3151_v27  ;;  %v2951_v27 = vld [vmem:[#allocation8 + $0x1a58] sm:$0xff]  ;;  %v2184_v38 = vld [vmem:[#allocation8 + $0x260] sm:$0xff] }
 0x356   :  { %8964 = vmatprep.subr.bf16.mxu0 %v10938_v57  ;;  %v8629_v57 = vadd.f32 %v8628_v28, %v8586_v39  ;;  %v2176_v28 = vld [vmem:[#allocation8 + $0x220] sm:$0xff] }
 0x357   :  { %v8592_v8 = vadd.f32 %v8591_v52, %v8549_v0  ;;  %v10331_v22 = vcombine.low %v2176_v28, %v2184_v38  ;;  %v10316_v52 = vcombine.high %v2160_v60, %v2168_v45  ;;  %v2919_v0 = vld [vmem:[#allocation8 + $0x1958] sm:$0xff]  ;;  %v2360_v45 = vld [vmem:[#allocation8 + $0x7e0] sm:$0xff] }
 0x358   :  { %8922 = vmatpush2.bf16.msra.mxu1 %v10681_v9 }
 0x359   :  { %8965 = vmatpush2.bf16.msra.mxu0 %v10937_v2  ;;  %8923 = vmatprep.subr.bf16.mxu1 %v10666_v40  ;;  %v2192_v2 = vld [vmem:[#allocation8 + $0x2a0] sm:$0xff] }
 0x35a   :  { %8966 = vmatprep.subr.bf16.mxu0 %v10922_v49  ;;  %v2200_v40 = vld [vmem:[#allocation8 + $0x2e0] sm:$0xff]  ;;  %v8631_v49 = vadd.f32 %v8630_v59, %v8588_v46  ;;  %v2927_v59 = vld [vmem:[#allocation8 + $0x1998] sm:$0xff] }
 0x35b   :  { %v11082_v42 = vcombine.high %v2927_v59, %v2935_v56 }
 0x35c   :  { %8924 = vmatpush2.bf16.msra.mxu1 %v10665_v61  ;;  %v8633_v61 = vadd.f32 %v8632_v25, %v8590_v63  ;;  %v2152_v63 = vld [vmem:[#allocation8 + $0x160] sm:$0xff] }
 0x35d   :  { %8967 = vmatpush2.bf16.msra.mxu0 %v10921_v55  ;;  %8925 = vmatprep.subr.bf16.mxu1 %v10650_v10  ;;  %v10348_v55 = vcombine.high %v2192_v2, %v2200_v40  ;;  %v2943_v10 = vld [vmem:[#allocation8 + $0x1a18] sm:$0xff] }
 0x35e   :  { %8968 = vmatprep.subr.bf16.mxu0 %v10906_v23  ;;  %v8634_v23 = vpop.f32.mrf.mxu0 }
 0x35f   :  { %v8635_v30 = vadd.f32 %v8634_v23, %v8592_v8 }
 0x360   :  { %8926 = vmatpush2.bf16.msra.mxu1 %v10649_v48 }
 0x361   :  { %8969 = vmatpush2.bf16.msra.mxu0 %v10905_v32  ;;  %8981 = vmatprep.subr.bf16.mxu1 %v11146_v36  ;;  %v10347_v32 = vcombine.low %v2192_v2, %v2200_v40  ;;  %v11098_v36 = vcombine.high %v2943_v10, %v2951_v27  ;;  %v2136_v2 = vld [vmem:[#allocation8 + $0xe0] sm:$0xff] }
 0x362   :  { %9024 = vmatprep.subr.bf16.mxu0 %v10380_v43  ;;  %v10332_v43 = vcombine.high %v2176_v28, %v2184_v38 }
 0x363   :  { %v8671_v9 = vpop.f32.mrf.mxu1  ;;  %8928 = vmatmul.mubr.bf16.vlgmr.msra.gmra.mxu1 %v11710_v58 }
 0x364   :  { %v11820_v13 = vadd.f32 %v8671_v9, %v8629_v57  ;;  %8971 = vmatmul.mubr.bf16.vlgmr.msra.gmra.mxu0 %v11742_v35  ;;  %8982 = vmatpush1.bf16.msra.mxu1 %v11145_v50  ;;  %v11097_v50 = vcombine.low %v2943_v10, %v2951_v27  ;;  %v2144_v57 = vld [vmem:[#allocation8 + $0x120] sm:$0xff]  ;;  %v2895_v9 = vld [vmem:[#allocation8 + $0x1898] sm:$0xff] }
 0x365   :  { %9013 = vmatprep.mubr.bf16.mxu1 %v11759_v51  ;;  %9025 = vmatpush1.bf16.msra.mxu0 %v10379_v54  ;;  %v8673_v14 = vpop.f32.mrf.mxu1  ;;  %v2911_v54 = vld [vmem:[#allocation8 + $0x1918] sm:$0xff]  ;;  %v10300_v25 = vcombine.high %v2144_v57, %v2152_v63  ;;  %v10299_v8 = vcombine.low %v2144_v57, %v2152_v63  ;;  %v2112_v10 = vld [vmem:[#allocation8 + $0x20] sm:$0xff] }
 0x366   :  { %v9746_v18 = vmul.f32 0.70710677, %v11820_v13  ;;  %9056 = vmatprep.mubr.bf16.mxu0 %v11672_v21  ;;  %v11826_v19 = vadd.f32 %v8673_v14, %v8631_v49  ;;  %8983 = vmatprep.subr.bf16.mxu1 %v11130_v31  ;;  %v11081_v31 = vcombine.low %v2927_v59, %v2935_v56  ;;  %v11066_v7 = vcombine.high %v2911_v54, %v2919_v0  ;;  %v2120_v27 = vld [vmem:[#allocation8 + $0x60] sm:$0xff]  ;;  %v3127_v59 = vld [vmem:[#allocation8 + $0x1fd8] sm:$0xff] }
 0x367   :  { %v8675_v53 = vpop.f32.mrf.mxu1  ;;  %9026 = vmatprep.subr.bf16.mxu0 %v10364_v17  ;;  %v2128_v17 = vld [vmem:[#allocation8 + $0xa0] sm:$0xff]  ;;  %v11065_v40 = vcombine.low %v2911_v54, %v2919_v0  ;;  %v9714_v23 = vmul.f32 0.5, %v11820_v13  ;;  %v3103_v63 = vld [vmem:[#allocation8 + $0x1f18] sm:$0xff] }
 0x368   :  { %11365 = verf.f32 %v9746_v18  ;;  %v9747_v33 = vmul.f32 0.70710677, %v11826_v19  ;;  %v11829_v48 = vadd.f32 %v8675_v53, %v8633_v61  ;;  %8984 = vmatpush1.bf16.msra.mxu1 %v11129_v12  ;;  %v2903_v12 = vld [vmem:[#allocation8 + $0x18d8] sm:$0xff]  ;;  %v9715_v53 = vmul.f32 0.5, %v11826_v19  ;;  %v2352_v13 = vld [vmem:[#allocation8 + $0x7a0] sm:$0xff] }
 0x369   :  { %9027 = vmatpush1.bf16.msra.mxu0 %v10363_v20  ;;  %v8677_v16 = vpop.f32.mrf.mxu1  ;;  %8985 = vmatprep.subr.bf16.mxu1 %v11114_v15  ;;  %v11050_v14 = vcombine.high %v2895_v9, %v2903_v12  ;;  %v10284_v15 = vcombine.high %v2128_v17, %v2136_v2  ;;  %v2879_v61 = vld [vmem:[#allocation8 + $0x1818] sm:$0xff]  ;;  %v11049_v28 = vcombine.low %v2895_v9, %v2903_v12 }
 0x36a   :  { %11367 = verf.f32 %v9747_v33  ;;  %v9762_v37 = vmul.f32 0.70710677, %v11829_v48  ;;  %v11832_v39 = vadd.f32 %v8677_v16, %v8635_v30  ;;  %9028 = vmatprep.subr.bf16.mxu0 %v10348_v55  ;;  %v2887_v18 = vld [vmem:[#allocation8 + $0x1858] sm:$0xff]  ;;  %v10283_v30 = vcombine.low %v2128_v17, %v2136_v2 }
 0x36b   :  { %v11034_v33 = vcombine.high %v2879_v61, %v2887_v18  ;;  %v11033_v60 = vcombine.low %v2879_v61, %v2887_v18  ;;  %v10508_v57 = vcombine.high %v2352_v13, %v2360_v45  ;;  %v3087_v17 = vld [vmem:[#allocation8 + $0x1e98] sm:$0xff] }
 0x36c   :  { %11369 = verf.f32 %v9762_v37  ;;  %v9763_v46 = vmul.f32 0.70710677, %v11832_v39  ;;  %8986 = vmatpush1.bf16.msra.mxu1 %v11113_v3  ;;  %v10268_v37 = vcombine.high %v2112_v10, %v2120_v27  ;;  %v3095_v2 = vld [vmem:[#allocation8 + $0x1ed8] sm:$0xff] }
 0x36d   :  { %9029 = vmatpush1.bf16.msra.mxu0 %v10347_v32  ;;  %8987 = vmatprep.subr.bf16.mxu1 %v11098_v36  ;;  %v3071_v61 = vld [vmem:[#allocation8 + $0x1e18] sm:$0xff] }
 0x36e   :  { %11371 = verf.f32 %v9763_v46  ;;  %9030 = vmatprep.subr.bf16.mxu0 %v10332_v43  ;;  %v3119_v43 = vld [vmem:[#allocation8 + $0x1f98] sm:$0xff]  ;;  %v9730_v46 = vmul.f32 0.5, %v11829_v48 }
 0x36f   :  { %v11273_v48 = vcombine.low %v3119_v43, %v3127_v59  ;;  %v3079_v18 = vld [vmem:[#allocation8 + $0x1e58] sm:$0xff] }
 0x370   :  { %8988 = vmatpush1.bf16.msra.mxu1 %v11097_v50  ;;  %v9731_v50 = vmul.f32 0.5, %v11832_v39  ;;  %v10507_v39 = vcombine.low %v2352_v13, %v2360_v45 }
 0x371   :  { %9031 = vmatpush1.bf16.msra.mxu0 %v10331_v22  ;;  %8989 = vmatprep.subr.bf16.mxu1 %v11082_v42  ;;  %v10267_v42 = vcombine.low %v2112_v10, %v2120_v27  ;;  %v2312_v10 = vld [vmem:[#allocation8 + $0x660] sm:$0xff]  ;;  %v11241_v27 = vcombine.low %v3087_v17, %v3095_v2 }
 0x372   :  { %9032 = vmatprep.subr.bf16.mxu0 %v10316_v52  ;;  %v11274_v52 = vcombine.high %v3119_v43, %v3127_v59  ;;  %v3039_v43 = vld [vmem:[#allocation8 + $0x1d18] sm:$0xff] }
 0x373   :  { %v3047_v59 = vld [vmem:[#allocation8 + $0x1d58] sm:$0xff] }
 0x374   :  { %8990 = vmatpush1.bf16.msra.mxu1 %v11081_v31  ;;  %v3111_v31 = vld [vmem:[#allocation8 + $0x1f58] sm:$0xff] }
 0x375   :  { %v11366_v49 = vpop.eup %11365  ;;  %9033 = vmatpush1.bf16.msra.mxu0 %v10315_v4  ;;  %8991 = vmatprep.subr.bf16.mxu1 %v11066_v7  ;;  %v2336_v4 = vld [vmem:[#allocation8 + $0x720] sm:$0xff]  ;;  %v11258_v9 = vcombine.high %v3103_v63, %v3111_v31 }
 0x376   :  { %v9810_v20 = vadd.f32 1.0, %v11366_v49  ;;  %9034 = vmatprep.subr.bf16.mxu0 %v10300_v25  ;;  %v2344_v7 = vld [vmem:[#allocation8 + $0x760] sm:$0xff] }
 0x377   :  { %v11368_v55 = vpop.eup %11367  ;;  %v10492_v12 = vcombine.high %v2336_v4, %v2344_v7  ;;  %v2328_v49 = vld [vmem:[#allocation8 + $0x6e0] sm:$0xff] }
 0x378   :  { %v9811_v3 = vadd.f32 1.0, %v11368_v55  ;;  %8992 = vmatpush1.bf16.msra.mxu1 %v11065_v40  ;;  %v9842_v16 = vmul.f32 %v9810_v20, %v9714_v23  ;;  %v2320_v40 = vld [vmem:[#allocation8 + $0x6a0] sm:$0xff]  ;;  %v11242_v20 = vcombine.high %v3087_v17, %v3095_v2 }
 0x379   :  { %v11370_v38 = vpop.eup %11369  ;;  %9035 = vmatpush1.bf16.msra.mxu0 %v10299_v8  ;;  %8993 = vmatprep.subr.bf16.mxu1 %v11050_v14  ;;  %v11257_v8 = vcombine.low %v3103_v63, %v3111_v31  ;;  %v10491_v14 = vcombine.low %v2336_v4, %v2344_v7  ;;  %v2304_v55 = vld [vmem:[#allocation8 + $0x620] sm:$0xff]  ;;  %v10475_v23 = vcombine.low %v2320_v40, %v2328_v49  ;;  %v3007_v31 = vld [vmem:[#allocation8 + $0x1c18] sm:$0xff] }
 0x37a   :  { %v9843_v32 = vmul.f32 %v9811_v3, %v9715_v53  ;;  %v9826_v36 = vadd.f32 1.0, %v11370_v38  ;;  %9036 = vmatprep.subr.bf16.mxu0 %v10284_v15  ;;  %v10476_v15 = vcombine.high %v2320_v40, %v2328_v49  ;;  %v11226_v53 = vcombine.high %v3071_v61, %v3079_v18  ;;  %v3063_v38 = vld [vmem:[#allocation8 + $0x1dd8] sm:$0xff]  ;;  %v2240_v7 = vld [vmem:[#allocation8 + $0x420] sm:$0xff] }
 0x37b   :  { %v11372_v56 = vpop.eup %11371  ;;  %v10460_v3 = vcombine.high %v2304_v55, %v2312_v10  ;;  %v3015_v4 = vld [vmem:[#allocation8 + $0x1c58] sm:$0xff]  ;;  %v2480_v17 = vld [vmem:[#allocation8 + $0xba0] sm:$0xff] }
 0x37c   :  { %v11300_v19 = vpack.c.bf16 %v9843_v32, %v9842_v16  ;;  %v9827_v22 = vadd.f32 1.0, %v11372_v56  ;;  %8994 = vmatpush1.bf16.msra.mxu1 %v11049_v28  ;;  %v9858_v54 = vmul.f32 %v9826_v36, %v9730_v46  ;;  %v3055_v28 = vld [vmem:[#allocation8 + $0x1d98] sm:$0xff]  ;;  %v11225_v16 = vcombine.low %v3071_v61, %v3079_v18  ;;  %v2272_v56 = vld [vmem:[#allocation8 + $0x520] sm:$0xff] }
 0x37d   :  { %9037 = vmatpush1.bf16.msra.mxu0 %v10283_v30  ;;  %8995 = vmatprep.subr.bf16.mxu1 %v11034_v33  ;;  %v2288_v30 = vld [vmem:[#allocation8 + $0x5a0] sm:$0xff]  ;;  %v10459_v32 = vcombine.low %v2304_v55, %v2312_v10  ;;  %v11210_v36 = vcombine.high %v3055_v28, %v3063_v38  ;;  %v11209_v13 = vcombine.low %v3055_v28, %v3063_v38 }
 0x37e   :  { %9969 = vst [vmem:[#allocation11 + $0x8] sm:$0xff] %v11300_v19  ;;  %v9859_v0 = vmul.f32 %v9827_v22, %v9731_v50  ;;  %9038 = vmatprep.subr.bf16.mxu0 %v10268_v37  ;;  %v2296_v33 = vld [vmem:[#allocation8 + $0x5e0] sm:$0xff]  ;;  %v11194_v19 = vcombine.high %v3039_v43, %v3047_v59  ;;  %v3023_v50 = vld [vmem:[#allocation8 + $0x1c98] sm:$0xff] }
 0x37f   :  { %v10444_v37 = vcombine.high %v2288_v30, %v2296_v33  ;;  %v10443_v45 = vcombine.low %v2288_v30, %v2296_v33  ;;  %v3031_v22 = vld [vmem:[#allocation8 + $0x1cd8] sm:$0xff]  ;;  %v2488_v2 = vld [vmem:[#allocation8 + $0xbe0] sm:$0xff] }
 0x380   :  { %v11308_v25 = vpack.c.bf16 %v9859_v0, %v9858_v54  ;;  %8996 = vmatpush1.bf16.msra.mxu1 %v11033_v60  ;;  %v2280_v60 = vld [vmem:[#allocation8 + $0x560] sm:$0xff]  ;;  %v11193_v54 = vcombine.low %v3039_v43, %v3047_v59  ;;  %v10635_v55 = vcombine.low %v2480_v17, %v2488_v2 }
 0x381   :  { %9039 = vmatpush1.bf16.msra.mxu0 %v10267_v42  ;;  %8997 = vmatprep.subr.bf16.mxu1 %v11274_v52  ;;  %v10428_v46 = vcombine.high %v2272_v56, %v2280_v60  ;;  %v2256_v42 = vld [vmem:[#allocation8 + $0x4a0] sm:$0xff]  ;;  %v10427_v0 = vcombine.low %v2272_v56, %v2280_v60 }
 0x382   :  { %9977 = vst [vmem:[#allocation11 + $0x48] sm:$0xff] %v11308_v25  ;;  %9040 = vmatprep.subr.bf16.mxu0 %v10508_v57  ;;  %v2264_v52 = vld [vmem:[#allocation8 + $0x4e0] sm:$0xff]  ;;  %v11178_v57 = vcombine.high %v3023_v50, %v3031_v22 }
 0x383   :  { %v10412_v63 = vcombine.high %v2256_v42, %v2264_v52  ;;  %v2248_v25 = vld [vmem:[#allocation8 + $0x460] sm:$0xff] }
 0x384   :  { %8998 = vmatpush2.bf16.msra.mxu1 %v11273_v48  ;;  %v11177_v48 = vcombine.low %v3023_v50, %v3031_v22  ;;  %v2736_v40 = vld [vmem:[#allocation8 + $0x13a0] sm:$0xff] }
 0x385   :  { %9041 = vmatpush2.bf16.msra.mxu0 %v10507_v39  ;;  %8999 = vmatprep.subr.bf16.mxu1 %v11258_v9  ;;  %v10411_v39 = vcombine.low %v2256_v42, %v2264_v52  ;;  %v11162_v9 = vcombine.high %v3007_v31, %v3015_v4  ;;  %v2744_v49 = vld [vmem:[#allocation8 + $0x13e0] sm:$0xff] }
 0x386   :  { %9042 = vmatprep.subr.bf16.mxu0 %v10492_v12  ;;  %v10396_v12 = vcombine.high %v2240_v7, %v2248_v25  ;;  %v2464_v61 = vld [vmem:[#allocation8 + $0xb20] sm:$0xff] }
 0x387   :  { %v2472_v18 = vld [vmem:[#allocation8 + $0xb60] sm:$0xff] }
 0x388   :  { %9000 = vmatpush2.bf16.msra.mxu1 %v11257_v8  ;;  %v11161_v8 = vcombine.low %v3007_v31, %v3015_v4  ;;  %v2720_v10 = vld [vmem:[#allocation8 + $0x1320] sm:$0xff] }
 0x389   :  { %9043 = vmatpush2.bf16.msra.mxu0 %v10491_v14  ;;  %9001 = vmatprep.subr.bf16.mxu1 %v11242_v20  ;;  %v10395_v14 = vcombine.low %v2240_v7, %v2248_v25  ;;  %v10636_v20 = vcombine.high %v2480_v17, %v2488_v2  ;;  %v2456_v28 = vld [vmem:[#allocation8 + $0xae0] sm:$0xff] }
 0x38a   :  { %9044 = vmatprep.subr.bf16.mxu0 %v10476_v15  ;;  %v10892_v15 = vcombine.high %v2736_v40, %v2744_v49  ;;  %v2704_v30 = vld [vmem:[#allocation8 + $0x12a0] sm:$0xff] }
 0x38b   :  { %v2712_v33 = vld [vmem:[#allocation8 + $0x12e0] sm:$0xff] }
 0x38c   :  { %9002 = vmatpush2.bf16.msra.mxu1 %v11241_v27  ;;  %v2728_v27 = vld [vmem:[#allocation8 + $0x1360] sm:$0xff] }
 0x38d   :  { %9045 = vmatpush2.bf16.msra.mxu0 %v10475_v23  ;;  %9003 = vmatprep.subr.bf16.mxu1 %v11226_v53  ;;  %v10891_v23 = vcombine.low %v2736_v40, %v2744_v49  ;;  %v10620_v53 = vcombine.high %v2464_v61, %v2472_v18  ;;  %v10876_v38 = vcombine.high %v2720_v10, %v2728_v27  ;;  %v2432_v43 = vld [vmem:[#allocation8 + $0xa20] sm:$0xff] }
 0x38e   :  { %9046 = vmatprep.subr.bf16.mxu0 %v10460_v3  ;;  %v2448_v3 = vld [vmem:[#allocation8 + $0xaa0] sm:$0xff] }
 0x38f   :  { %v2440_v59 = vld [vmem:[#allocation8 + $0xa60] sm:$0xff] }
 0x390   :  { %9004 = vmatpush2.bf16.msra.mxu1 %v11225_v16  ;;  %v10619_v16 = vcombine.low %v2464_v61, %v2472_v18  ;;  %v2688_v56 = vld [vmem:[#allocation8 + $0x1220] sm:$0xff] }
 0x391   :  { %9047 = vmatpush2.bf16.msra.mxu0 %v10459_v32  ;;  %9005 = vmatprep.subr.bf16.mxu1 %v11210_v36  ;;  %v10875_v32 = vcombine.low %v2720_v10, %v2728_v27  ;;  %v10604_v36 = vcombine.high %v2448_v3, %v2456_v28  ;;  %v2696_v60 = vld [vmem:[#allocation8 + $0x1260] sm:$0xff] }
 0x392   :  { %9048 = vmatprep.subr.bf16.mxu0 %v10444_v37  ;;  %v10860_v37 = vcombine.high %v2704_v30, %v2712_v33  ;;  %v2416_v50 = vld [vmem:[#allocation8 + $0x9a0] sm:$0xff] }
 0x393   :  { %v2424_v22 = vld [vmem:[#allocation8 + $0x9e0] sm:$0xff] }
 0x394   :  { %9006 = vmatpush2.bf16.msra.mxu1 %v11209_v13  ;;  %v10603_v13 = vcombine.low %v2448_v3, %v2456_v28  ;;  %v2672_v42 = vld [vmem:[#allocation8 + $0x11a0] sm:$0xff] }
 0x395   :  { %9049 = vmatpush2.bf16.msra.mxu0 %v10443_v45  ;;  %9007 = vmatprep.subr.bf16.mxu1 %v11194_v19  ;;  %v10859_v45 = vcombine.low %v2704_v30, %v2712_v33  ;;  %v10588_v19 = vcombine.high %v2432_v43, %v2440_v59  ;;  %v2680_v52 = vld [vmem:[#allocation8 + $0x11e0] sm:$0xff] }
 0x396   :  { %9050 = vmatprep.subr.bf16.mxu0 %v10428_v46  ;;  %v10844_v46 = vcombine.high %v2688_v56, %v2696_v60  ;;  %v2400_v31 = vld [vmem:[#allocation8 + $0x920] sm:$0xff] }
 0x397   :  { %v2408_v4 = vld [vmem:[#allocation8 + $0x960] sm:$0xff] }
 0x398   :  { %9008 = vmatpush2.bf16.msra.mxu1 %v11193_v54  ;;  %v10587_v54 = vcombine.low %v2432_v43, %v2440_v59  ;;  %v2656_v7 = vld [vmem:[#allocation8 + $0x1120] sm:$0xff] }
 0x399   :  { %9051 = vmatpush2.bf16.msra.mxu0 %v10427_v0  ;;  %9009 = vmatprep.subr.bf16.mxu1 %v11178_v57  ;;  %v10843_v0 = vcombine.low %v2688_v56, %v2696_v60  ;;  %v10572_v57 = vcombine.high %v2416_v50, %v2424_v22  ;;  %v2664_v25 = vld [vmem:[#allocation8 + $0x1160] sm:$0xff] }
 0x39a   :  { %9052 = vmatprep.subr.bf16.mxu0 %v10412_v63  ;;  %v10828_v63 = vcombine.high %v2672_v42, %v2680_v52  ;;  %v2384_v17 = vld [vmem:[#allocation8 + $0x8a0] sm:$0xff] }
 0x39b   :  { %v2392_v2 = vld [vmem:[#allocation8 + $0x8e0] sm:$0xff] }
 0x39c   :  { %9010 = vmatpush2.bf16.msra.mxu1 %v11177_v48  ;;  %v10571_v48 = vcombine.low %v2416_v50, %v2424_v22  ;;  %v2640_v40 = vld [vmem:[#allocation8 + $0x10a0] sm:$0xff]  ;;  %v10539_v27 = vcombine.low %v2384_v17, %v2392_v2 }
 0x39d   :  { %9053 = vmatpush2.bf16.msra.mxu0 %v10411_v39  ;;  %9011 = vmatprep.subr.bf16.mxu1 %v11162_v9  ;;  %v10827_v39 = vcombine.low %v2672_v42, %v2680_v52  ;;  %v10556_v9 = vcombine.high %v2400_v31, %v2408_v4  ;;  %v2648_v49 = vld [vmem:[#allocation8 + $0x10e0] sm:$0xff] }
 0x39e   :  { %9054 = vmatprep.subr.bf16.mxu0 %v10396_v12  ;;  %v10812_v12 = vcombine.high %v2656_v7, %v2664_v25  ;;  %v2368_v61 = vld [vmem:[#allocation8 + $0x820] sm:$0xff] }
 0x39f   :  { %v2376_v18 = vld [vmem:[#allocation8 + $0x860] sm:$0xff] }
 0x3a0   :  { %9012 = vmatpush2.bf16.msra.mxu1 %v11161_v8  ;;  %v10555_v8 = vcombine.low %v2400_v31, %v2408_v4  ;;  %v2632_v10 = vld [vmem:[#allocation8 + $0x1060] sm:$0xff] }
 0x3a1   :  { %9055 = vmatpush2.bf16.msra.mxu0 %v10395_v14  ;;  %9067 = vmatprep.subr.bf16.mxu1 %v10636_v20  ;;  %v10811_v14 = vcombine.low %v2656_v7, %v2664_v25  ;;  %v10540_v20 = vcombine.high %v2384_v17, %v2392_v2  ;;  %v2608_v28 = vld [vmem:[#allocation8 + $0xfa0] sm:$0xff] }
 0x3a2   :  { %9110 = vmatprep.subr.bf16.mxu0 %v10892_v15  ;;  %v10796_v15 = vcombine.high %v2640_v40, %v2648_v49  ;;  %v2864_v30 = vld [vmem:[#allocation8 + $0x17a0] sm:$0xff] }
 0x3a3   :  { %9014 = vmatmul.mubr.bf16.vlgmr.msra.gmra.mxu1 %v11761_v44  ;;  %v2872_v33 = vld [vmem:[#allocation8 + $0x17e0] sm:$0xff] }
 0x3a4   :  { %9057 = vmatmul.mubr.bf16.vlgmr.msra.gmra.mxu0 %v11693_v34  ;;  %9068 = vmatpush1.bf16.msra.mxu1 %v10635_v55  ;;  %v2624_v55 = vld [vmem:[#allocation8 + $0x1020] sm:$0xff] }
 0x3a5   :  { %9099 = vmatprep.mubr.bf16.mxu1 %v11702_v1  ;;  %9111 = vmatpush1.bf16.msra.mxu0 %v10891_v23  ;;  %v10795_v23 = vcombine.low %v2640_v40, %v2648_v49  ;;  %v10780_v3 = vcombine.high %v2624_v55, %v2632_v10  ;;  %v2592_v43 = vld [vmem:[#allocation8 + $0xf20] sm:$0xff] }
 0x3a6   :  { %9142 = vmatprep.mubr.bf16.mxu0 %v11738_v6  ;;  %9069 = vmatprep.subr.bf16.mxu1 %v10620_v53  ;;  %v10524_v53 = vcombine.high %v2368_v61, %v2376_v18  ;;  %v2600_v59 = vld [vmem:[#allocation8 + $0xf60] sm:$0xff] }
 0x3a7   :  { %9112 = vmatprep.subr.bf16.mxu0 %v10876_v38  ;;  %v2616_v38 = vld [vmem:[#allocation8 + $0xfe0] sm:$0xff] }
 0x3a8   :  { %9070 = vmatpush1.bf16.msra.mxu1 %v10619_v16  ;;  %v10523_v16 = vcombine.low %v2368_v61, %v2376_v18  ;;  %v2848_v56 = vld [vmem:[#allocation8 + $0x1720] sm:$0xff] }
 0x3a9   :  { %9113 = vmatpush1.bf16.msra.mxu0 %v10875_v32  ;;  %9071 = vmatprep.subr.bf16.mxu1 %v10604_v36  ;;  %v10779_v32 = vcombine.low %v2624_v55, %v2632_v10  ;;  %v10764_v36 = vcombine.high %v2608_v28, %v2616_v38  ;;  %v2856_v60 = vld [vmem:[#allocation8 + $0x1760] sm:$0xff] }
 0x3aa   :  { %9114 = vmatprep.subr.bf16.mxu0 %v10860_v37  ;;  %v11020_v37 = vcombine.high %v2864_v30, %v2872_v33  ;;  %v2576_v50 = vld [vmem:[#allocation8 + $0xea0] sm:$0xff] }
 0x3ab   :  { %v2584_v22 = vld [vmem:[#allocation8 + $0xee0] sm:$0xff] }
 0x3ac   :  { %9072 = vmatpush1.bf16.msra.mxu1 %v10603_v13  ;;  %v10763_v13 = vcombine.low %v2608_v28, %v2616_v38  ;;  %v2832_v42 = vld [vmem:[#allocation8 + $0x16a0] sm:$0xff] }
 0x3ad   :  { %9115 = vmatpush1.bf16.msra.mxu0 %v10859_v45  ;;  %9073 = vmatprep.subr.bf16.mxu1 %v10588_v19  ;;  %v11019_v45 = vcombine.low %v2864_v30, %v2872_v33  ;;  %v10748_v19 = vcombine.high %v2592_v43, %v2600_v59  ;;  %v2840_v52 = vld [vmem:[#allocation8 + $0x16e0] sm:$0xff] }
 0x3ae   :  { %9116 = vmatprep.subr.bf16.mxu0 %v10844_v46  ;;  %v11004_v46 = vcombine.high %v2848_v56, %v2856_v60  ;;  %v2560_v31 = vld [vmem:[#allocation8 + $0xe20] sm:$0xff] }
 0x3af   :  { %v2568_v4 = vld [vmem:[#allocation8 + $0xe60] sm:$0xff] }
 0x3b0   :  { %9074 = vmatpush1.bf16.msra.mxu1 %v10587_v54  ;;  %v10747_v54 = vcombine.low %v2592_v43, %v2600_v59  ;;  %v2816_v7 = vld [vmem:[#allocation8 + $0x1620] sm:$0xff]  ;;  %v8757_v43 = vpop.f32.mrf.mxu1 }
 0x3b1   :  { %9117 = vmatpush1.bf16.msra.mxu0 %v10843_v0  ;;  %9075 = vmatprep.subr.bf16.mxu1 %v10572_v57  ;;  %v11003_v0 = vcombine.low %v2848_v56, %v2856_v60  ;;  %v10732_v57 = vcombine.high %v2576_v50, %v2584_v22  ;;  %v2824_v25 = vld [vmem:[#allocation8 + $0x1660] sm:$0xff] }
 0x3b2   :  { %9118 = vmatprep.subr.bf16.mxu0 %v10828_v63  ;;  %v10988_v63 = vcombine.high %v2832_v42, %v2840_v52  ;;  %v2544_v17 = vld [vmem:[#allocation8 + $0xda0] sm:$0xff] }
 0x3b3   :  { %v2552_v2 = vld [vmem:[#allocation8 + $0xde0] sm:$0xff] }
 0x3b4   :  { %9076 = vmatpush1.bf16.msra.mxu1 %v10571_v48  ;;  %v10731_v48 = vcombine.low %v2576_v50, %v2584_v22  ;;  %v2800_v40 = vld [vmem:[#allocation8 + $0x15a0] sm:$0xff] }
 0x3b5   :  { %9119 = vmatpush1.bf16.msra.mxu0 %v10827_v39  ;;  %9077 = vmatprep.subr.bf16.mxu1 %v10556_v9  ;;  %v10987_v39 = vcombine.low %v2832_v42, %v2840_v52  ;;  %v10716_v9 = vcombine.high %v2560_v31, %v2568_v4  ;;  %v2808_v49 = vld [vmem:[#allocation8 + $0x15e0] sm:$0xff] }
 0x3b6   :  { %9120 = vmatprep.subr.bf16.mxu0 %v10812_v12  ;;  %v10972_v12 = vcombine.high %v2816_v7, %v2824_v25  ;;  %v10956_v61 = vcombine.high %v2800_v40, %v2808_v49  ;;  %v2528_v18 = vld [vmem:[#allocation8 + $0xd20] sm:$0xff] }
 0x3b7   :  { %v2536_v55 = vld [vmem:[#allocation8 + $0xd60] sm:$0xff] }
 0x3b8   :  { %9078 = vmatpush1.bf16.msra.mxu1 %v10555_v8  ;;  %v10715_v8 = vcombine.low %v2560_v31, %v2568_v4  ;;  %v2784_v10 = vld [vmem:[#allocation8 + $0x1520] sm:$0xff]  ;;  %v10684_v28 = vcombine.high %v2528_v18, %v2536_v55 }
 0x3b9   :  { %9121 = vmatpush1.bf16.msra.mxu0 %v10811_v14  ;;  %9079 = vmatprep.subr.bf16.mxu1 %v10540_v20  ;;  %v8714_v14 = vpop.f32.mrf.mxu0  ;;  %v10971_v20 = vcombine.low %v2816_v7, %v2824_v25  ;;  %v2512_v30 = vld [vmem:[#allocation8 + $0xca0] sm:$0xff] }
 0x3ba   :  { %9122 = vmatprep.subr.bf16.mxu0 %v10796_v15  ;;  %v10700_v15 = vcombine.high %v2544_v17, %v2552_v2  ;;  %v2520_v33 = vld [vmem:[#allocation8 + $0xce0] sm:$0xff] }
 0x3bb   :  { %v10668_v56 = vcombine.high %v2512_v30, %v2520_v33  ;;  %v11843_v50 = vld [vmem:[#allocation10] sm:$0xff]  ;;  %v10667_v42 = vcombine.low %v2512_v30, %v2520_v33 }
 0x3bc   :  { %9080 = vmatpush1.bf16.msra.mxu1 %v10539_v27  ;;  %v2792_v27 = vld [vmem:[#allocation8 + $0x1560] sm:$0xff]  ;;  %v3155_v22 = vrot.slane %v11843_v50, %v11721_v62 }
 0x3bd   :  { %9123 = vmatpush1.bf16.msra.mxu0 %v10795_v23  ;;  %9081 = vmatprep.subr.bf16.mxu1 %v10524_v53  ;;  %v10699_v23 = vcombine.low %v2544_v17, %v2552_v2  ;;  %v8716_v53 = vpop.f32.mrf.mxu0  ;;  %v10940_v38 = vcombine.high %v2784_v10, %v2792_v27  ;;  %v10939_v59 = vcombine.low %v2784_v10, %v2792_v27  ;;  %v2992_v4 = vld [vmem:[#allocation8 + $0x1ba0] sm:$0xff] }
 0x3be   :  { %9124 = vmatprep.subr.bf16.mxu0 %v10780_v3  ;;  %v10955_v3 = vcombine.low %v2800_v40, %v2808_v49  ;;  %v3000_v7 = vld [vmem:[#allocation8 + $0x1be0] sm:$0xff] }
 0x3bf   :  { %v11148_v40 = vcombine.high %v2992_v4, %v3000_v7  ;;  %v11147_v27 = vcombine.low %v2992_v4, %v3000_v7 }
 0x3c0   :  { %9082 = vmatpush1.bf16.msra.mxu1 %v10523_v16  ;;  %v2768_v16 = vld [vmem:[#allocation8 + $0x14a0] sm:$0xff] }
 0x3c1   :  { %9125 = vmatpush1.bf16.msra.mxu0 %v10779_v32  ;;  %9083 = vmatprep.subr.bf16.mxu1 %v10764_v36  ;;  %v2776_v32 = vld [vmem:[#allocation8 + $0x14e0] sm:$0xff]  ;;  %v10683_v36 = vcombine.low %v2528_v18, %v2536_v55 }
 0x3c2   :  { %9126 = vmatprep.subr.bf16.mxu0 %v11020_v37  ;;  %v8718_v37 = vpop.f32.mrf.mxu0  ;;  %v10924_v60 = vcombine.high %v2768_v16, %v2776_v32  ;;  %v2984_v18 = vld [vmem:[#allocation8 + $0x1b60] sm:$0xff] }
 0x3c3   :  { %v8719_v55 = vadd.f32 %v8718_v37, %v3155_v22 }
 0x3c4   :  { %9084 = vmatpush2.bf16.msra.mxu1 %v10763_v13  ;;  %v2496_v13 = vld [vmem:[#allocation8 + $0xc20] sm:$0xff]  ;;  %v8720_v52 = vpop.f32.mrf.mxu0 }
 0x3c5   :  { %9127 = vmatpush2.bf16.msra.mxu0 %v11019_v45  ;;  %9085 = vmatprep.subr.bf16.mxu1 %v10748_v19  ;;  %v2504_v45 = vld [vmem:[#allocation8 + $0xc60] sm:$0xff] }
 0x3c6   :  { %9128 = vmatprep.subr.bf16.mxu0 %v11004_v46  ;;  %v2752_v19 = vld [vmem:[#allocation8 + $0x1420] sm:$0xff]  ;;  %v8800_v25 = vpop.f32.mrf.mxu0 }
 0x3c7   :  { %v2760_v46 = vld [vmem:[#allocation8 + $0x1460] sm:$0xff] }
 0x3c8   :  { %9086 = vmatpush2.bf16.msra.mxu1 %v10747_v54  ;;  %v8759_v54 = vpop.f32.mrf.mxu1  ;;  %v10908_v31 = vcombine.high %v2752_v19, %v2760_v46  ;;  %v10907_v2 = vcombine.low %v2752_v19, %v2760_v46 }
 0x3c9   :  { %9129 = vmatpush2.bf16.msra.mxu0 %v11003_v0  ;;  %9087 = vmatprep.subr.bf16.mxu1 %v10732_v57  ;;  %v10923_v0 = vcombine.low %v2768_v16, %v2776_v32  ;;  %v10652_v57 = vcombine.high %v2496_v13, %v2504_v45  ;;  %v2960_v16 = vld [vmem:[#allocation8 + $0x1aa0] sm:$0xff] }
 0x3ca   :  { %9130 = vmatprep.subr.bf16.mxu0 %v10988_v63  ;;  %v3159_v63 = vrot.slane %v11843_v50, %v11726_v5  ;;  %v8761_v17 = vpop.f32.mrf.mxu1  ;;  %v2968_v32 = vld [vmem:[#allocation8 + $0x1ae0] sm:$0xff] }
 0x3cb   :  { %v8762_v33 = vadd.f32 %v8761_v17, %v8719_v55  ;;  %v2161_v55 = vld [vmem:[#allocation8 + $0x1a8] sm:$0xff] }
 0x3cc   :  { %9088 = vmatpush2.bf16.msra.mxu1 %v10731_v48  ;;  %v2225_v48 = vld [vmem:[#allocation8 + $0x3a8] sm:$0xff]  ;;  %v8717_v49 = vadd.f32 %v8716_v53, %v3159_v63 }
 0x3cd   :  { %9131 = vmatpush2.bf16.msra.mxu0 %v10987_v39  ;;  %9089 = vmatprep.subr.bf16.mxu1 %v10716_v9  ;;  %v2233_v39 = vld [vmem:[#allocation8 + $0x3e8] sm:$0xff]  ;;  %v8715_v9 = vadd.f32 %v8714_v14, %v3155_v22 }
 0x3ce   :  { %9132 = vmatprep.subr.bf16.mxu0 %v10972_v12  ;;  %v10651_v12 = vcombine.low %v2496_v13, %v2504_v45  ;;  %v8760_v10 = vadd.f32 %v8759_v54, %v8717_v49  ;;  %v2217_v14 = vld [vmem:[#allocation8 + $0x368] sm:$0xff] }
 0x3d0   :  { %9090 = vmatpush2.bf16.msra.mxu1 %v10715_v8  ;;  %v8758_v8 = vadd.f32 %v8757_v43, %v8715_v9 }
 0x3d1   :  { %9133 = vmatpush2.bf16.msra.mxu0 %v10971_v20  ;;  %9091 = vmatprep.subr.bf16.mxu1 %v10700_v15  ;;  %v10382_v20 = vcombine.high %v2225_v48, %v2233_v39  ;;  %v8802_v15 = vpop.f32.mrf.mxu0 }
 0x3d2   :  { %9134 = vmatprep.subr.bf16.mxu0 %v10956_v61  ;;  %v2976_v61 = vld [vmem:[#allocation8 + $0x1b20] sm:$0xff]  ;;  %v8801_v30 = vadd.f32 %v8800_v25, %v8758_v8  ;;  %v8803_v13 = vadd.f32 %v8802_v15, %v8760_v10  ;;  %v11115_v25 = vcombine.low %v2960_v16, %v2968_v32  ;;  %v2169_v10 = vld [vmem:[#allocation8 + $0x1e8] sm:$0xff] }
 0x3d3   :  { %v11132_v53 = vcombine.high %v2976_v61, %v2984_v18  ;;  %v11131_v37 = vcombine.low %v2976_v61, %v2984_v18  ;;  %v2928_v61 = vld [vmem:[#allocation8 + $0x19a0] sm:$0xff] }
 0x3d4   :  { %9092 = vmatpush2.bf16.msra.mxu1 %v10699_v23  ;;  %v2209_v23 = vld [vmem:[#allocation8 + $0x328] sm:$0xff]  ;;  %v2936_v18 = vld [vmem:[#allocation8 + $0x19e0] sm:$0xff] }
 0x3d5   :  { %9135 = vmatpush2.bf16.msra.mxu0 %v10955_v3  ;;  %9093 = vmatprep.subr.bf16.mxu1 %v10684_v28  ;;  %v8763_v3 = vpop.f32.mrf.mxu1  ;;  %v10381_v28 = vcombine.low %v2225_v48, %v2233_v39  ;;  %v10365_v22 = vcombine.low %v2209_v23, %v2217_v14  ;;  %v2177_v48 = vld [vmem:[#allocation8 + $0x228] sm:$0xff] }
 0x3d6   :  { %9136 = vmatprep.subr.bf16.mxu0 %v10940_v38  ;;  %v8721_v38 = vadd.f32 %v8720_v52, %v3159_v63  ;;  %v2944_v63 = vld [vmem:[#allocation8 + $0x1a20] sm:$0xff]  ;;  %v2185_v39 = vld [vmem:[#allocation8 + $0x268] sm:$0xff] }
 0x3d7   :  { %v10334_v15 = vcombine.high %v2177_v48, %v2185_v39 }
 0x3d8   :  { %9094 = vmatpush2.bf16.msra.mxu1 %v10683_v36  ;;  %v8804_v36 = vpop.f32.mrf.mxu0  ;;  %v8764_v45 = vadd.f32 %v8763_v3, %v8721_v38  ;;  %v11084_v3 = vcombine.high %v2928_v61, %v2936_v18  ;;  %v2912_v38 = vld [vmem:[#allocation8 + $0x1920] sm:$0xff] }
 0x3d9   :  { %9137 = vmatpush2.bf16.msra.mxu0 %v10939_v59  ;;  %9095 = vmatprep.subr.bf16.mxu1 %v10668_v56  ;;  %v10366_v59 = vcombine.high %v2209_v23, %v2217_v14  ;;  %v2193_v56 = vld [vmem:[#allocation8 + $0x2a8] sm:$0xff]  ;;  %v8805_v52 = vadd.f32 %v8804_v36, %v8762_v33  ;;  %v10333_v14 = vcombine.low %v2177_v48, %v2185_v39 }
 0x3da   :  { %9138 = vmatprep.subr.bf16.mxu0 %v10924_v60  ;;  %v2201_v60 = vld [vmem:[#allocation8 + $0x2e8] sm:$0xff]  ;;  %v8806_v4 = vpop.f32.mrf.mxu0 }
 0x3db   :  { %v8807_v9 = vadd.f32 %v8806_v4, %v8764_v45  ;;  %v2145_v33 = vld [vmem:[#allocation8 + $0x128] sm:$0xff] }
 0x3dc   :  { %9096 = vmatpush2.bf16.msra.mxu1 %v10667_v42  ;;  %v11116_v42 = vcombine.high %v2960_v16, %v2968_v32  ;;  %v11083_v16 = vcombine.low %v2928_v61, %v2936_v18  ;;  %v10317_v32 = vcombine.low %v2161_v55, %v2169_v10  ;;  %v2121_v4 = vld [vmem:[#allocation8 + $0x68] sm:$0xff]  ;;  %v3120_v61 = vld [vmem:[#allocation8 + $0x1fa0] sm:$0xff] }
 0x3dd   :  { %9139 = vmatpush2.bf16.msra.mxu0 %v10923_v0  ;;  %9097 = vmatprep.subr.bf16.mxu1 %v10652_v57  ;;  %v10350_v57 = vcombine.high %v2193_v56, %v2201_v60  ;;  %v3128_v18 = vld [vmem:[#allocation8 + $0x1fe0] sm:$0xff] }
 0x3de   :  { %9140 = vmatprep.subr.bf16.mxu0 %v10908_v31  ;;  %v2952_v31 = vld [vmem:[#allocation8 + $0x1a60] sm:$0xff] }
 0x3df   :  { %v11100_v49 = vcombine.high %v2944_v63, %v2952_v31  ;;  %v11099_v23 = vcombine.low %v2944_v63, %v2952_v31  ;;  %v2113_v31 = vld [vmem:[#allocation8 + $0x28] sm:$0xff] }
 0x3e0   :  { %9098 = vmatpush2.bf16.msra.mxu1 %v10651_v12 }
 0x3e1   :  { %9141 = vmatpush2.bf16.msra.mxu0 %v10907_v2  ;;  %9153 = vmatprep.subr.bf16.mxu1 %v11148_v40  ;;  %v10349_v40 = vcombine.low %v2193_v56, %v2201_v60  ;;  %v2129_v56 = vld [vmem:[#allocation8 + $0xa8] sm:$0xff] }
 0x3e2   :  { %9196 = vmatprep.subr.bf16.mxu0 %v10382_v20  ;;  %v2137_v60 = vld [vmem:[#allocation8 + $0xe8] sm:$0xff] }
 0x3e3   :  { %v8843_v43 = vpop.f32.mrf.mxu1  ;;  %9100 = vmatmul.mubr.bf16.vlgmr.msra.gmra.mxu1 %v11710_v58 }
 0x3e4   :  { %v11850_v19 = vadd.f32 %v8843_v43, %v8801_v30  ;;  %9143 = vmatmul.mubr.bf16.vlgmr.msra.gmra.mxu0 %v11742_v35  ;;  %9154 = vmatpush1.bf16.msra.mxu1 %v11147_v27  ;;  %v2920_v30 = vld [vmem:[#allocation8 + $0x1960] sm:$0xff] }
 0x3e5   :  { %9185 = vmatprep.mubr.bf16.mxu1 %v11759_v51  ;;  %9197 = vmatpush1.bf16.msra.mxu0 %v10381_v28  ;;  %v8845_v46 = vpop.f32.mrf.mxu1  ;;  %v10318_v28 = vcombine.high %v2161_v55, %v2169_v10  ;;  %v11068_v36 = vcombine.high %v2912_v38, %v2920_v30 }
 0x3e6   :  { %v9748_v54 = vmul.f32 0.70710677, %v11850_v19  ;;  %9228 = vmatprep.mubr.bf16.mxu0 %v11672_v21  ;;  %v11856_v0 = vadd.f32 %v8845_v46, %v8803_v13  ;;  %9155 = vmatprep.subr.bf16.mxu1 %v11132_v53  ;;  %v2153_v53 = vld [vmem:[#allocation8 + $0x168] sm:$0xff]  ;;  %v11067_v13 = vcombine.low %v2912_v38, %v2920_v30  ;;  %v11276_v38 = vcombine.high %v3120_v61, %v3128_v18 }
 0x3e7   :  { %v8847_v7 = vpop.f32.mrf.mxu1  ;;  %9198 = vmatprep.subr.bf16.mxu0 %v10366_v59  ;;  %v10302_v43 = vcombine.high %v2145_v33, %v2153_v53  ;;  %v2904_v59 = vld [vmem:[#allocation8 + $0x18e0] sm:$0xff]  ;;  %v10301_v46 = vcombine.low %v2145_v33, %v2153_v53 }
 0x3e8   :  { %11373 = verf.f32 %v9748_v54  ;;  %v9749_v12 = vmul.f32 0.70710677, %v11856_v0  ;;  %v11859_v17 = vadd.f32 %v8847_v7, %v8805_v52  ;;  %9156 = vmatpush1.bf16.msra.mxu1 %v11131_v37  ;;  %v2896_v37 = vld [vmem:[#allocation8 + $0x18a0] sm:$0xff]  ;;  %v10286_v52 = vcombine.high %v2129_v56, %v2137_v60 }
 0x3e9   :  { %9199 = vmatpush1.bf16.msra.mxu0 %v10365_v22  ;;  %v8849_v2 = vpop.f32.mrf.mxu1  ;;  %9157 = vmatprep.subr.bf16.mxu1 %v11116_v42  ;;  %v11052_v22 = vcombine.high %v2896_v37, %v2904_v59  ;;  %v2880_v54 = vld [vmem:[#allocation8 + $0x1820] sm:$0xff]  ;;  %v9716_v7 = vmul.f32 0.5, %v11850_v19  ;;  %v11051_v39 = vcombine.low %v2896_v37, %v2904_v59  ;;  %v2353_v19 = vld [vmem:[#allocation8 + $0x7a8] sm:$0xff] }
 0x3ea   :  { %11375 = verf.f32 %v9749_v12  ;;  %v9764_v8 = vmul.f32 0.70710677, %v11859_v17  ;;  %v11862_v20 = vadd.f32 %v8849_v2, %v8807_v9  ;;  %9200 = vmatprep.subr.bf16.mxu0 %v10350_v57  ;;  %v2888_v57 = vld [vmem:[#allocation8 + $0x1860] sm:$0xff]  ;;  %v10285_v12 = vcombine.low %v2129_v56, %v2137_v60 }
 0x3eb   :  { %v11036_v2 = vcombine.high %v2880_v54, %v2888_v57  ;;  %v11035_v10 = vcombine.low %v2880_v54, %v2888_v57  ;;  %v3088_v60 = vld [vmem:[#allocation8 + $0x1ea0] sm:$0xff] }
 0x3ec   :  { %11377 = verf.f32 %v9764_v8  ;;  %v9765_v27 = vmul.f32 0.70710677, %v11862_v20  ;;  %9158 = vmatpush1.bf16.msra.mxu1 %v11115_v25  ;;  %v9717_v25 = vmul.f32 0.5, %v11856_v0  ;;  %v3072_v57 = vld [vmem:[#allocation8 + $0x1e20] sm:$0xff] }
 0x3ed   :  { %9201 = vmatpush1.bf16.msra.mxu0 %v10349_v40  ;;  %9159 = vmatprep.subr.bf16.mxu1 %v11100_v49 }
 0x3ee   :  { %11379 = verf.f32 %v9765_v27  ;;  %9202 = vmatprep.subr.bf16.mxu0 %v10334_v15  ;;  %v10270_v15 = vcombine.high %v2113_v31, %v2121_v4  ;;  %v2361_v27 = vld [vmem:[#allocation8 + $0x7e8] sm:$0xff] }
 0x3ef   :  { %v10510_v53 = vcombine.high %v2353_v19, %v2361_v27 }
 0x3f0   :  { %9160 = vmatpush1.bf16.msra.mxu1 %v11099_v23  ;;  %v9732_v23 = vmul.f32 0.5, %v11859_v17  ;;  %v11275_v17 = vcombine.low %v3120_v61, %v3128_v18  ;;  %v3040_v18 = vld [vmem:[#allocation8 + $0x1d20] sm:$0xff] }
 0x3f1   :  { %9203 = vmatpush1.bf16.msra.mxu0 %v10333_v14  ;;  %9161 = vmatprep.subr.bf16.mxu1 %v11084_v3  ;;  %v9733_v14 = vmul.f32 0.5, %v11862_v20  ;;  %v10509_v20 = vcombine.low %v2353_v19, %v2361_v27  ;;  %v2281_v19 = vld [vmem:[#allocation8 + $0x568] sm:$0xff] }
 0x3f2   :  { %9204 = vmatprep.subr.bf16.mxu0 %v10318_v28  ;;  %v10269_v28 = vcombine.low %v2113_v31, %v2121_v4  ;;  %v2305_v31 = vld [vmem:[#allocation8 + $0x628] sm:$0xff] }
 0x3f3   :  { %v2313_v4 = vld [vmem:[#allocation8 + $0x668] sm:$0xff] }
 0x3f4   :  { %9162 = vmatpush1.bf16.msra.mxu1 %v11083_v16  ;;  %v3104_v16 = vld [vmem:[#allocation8 + $0x1f20] sm:$0xff] }
 0x3f5   :  { %v11374_v45 = vpop.eup %11373  ;;  %9205 = vmatpush1.bf16.msra.mxu0 %v10317_v32  ;;  %9163 = vmatprep.subr.bf16.mxu1 %v11068_v36  ;;  %v3112_v32 = vld [vmem:[#allocation8 + $0x1f60] sm:$0xff]  ;;  %v2337_v36 = vld [vmem:[#allocation8 + $0x728] sm:$0xff] }
 0x3f6   :  { %v9812_v42 = vadd.f32 1.0, %v11374_v45  ;;  %9206 = vmatprep.subr.bf16.mxu0 %v10302_v43  ;;  %v2345_v43 = vld [vmem:[#allocation8 + $0x768] sm:$0xff]  ;;  %v11260_v59 = vcombine.high %v3104_v16, %v3112_v32 }
 0x3f7   :  { %v11376_v63 = vpop.eup %11375  ;;  %v10494_v56 = vcombine.high %v2337_v36, %v2345_v43  ;;  %v2321_v45 = vld [vmem:[#allocation8 + $0x6a8] sm:$0xff] }
 0x3f8   :  { %v9813_v48 = vadd.f32 1.0, %v11376_v63  ;;  %9164 = vmatpush1.bf16.msra.mxu1 %v11067_v13  ;;  %v9844_v40 = vmul.f32 %v9812_v42, %v9716_v7  ;;  %v3096_v13 = vld [vmem:[#allocation8 + $0x1ee0] sm:$0xff]  ;;  %v10493_v42 = vcombine.low %v2337_v36, %v2345_v43 }
 0x3f9   :  { %v11378_v9 = vpop.eup %11377  ;;  %9207 = vmatpush1.bf16.msra.mxu0 %v10301_v46  ;;  %9165 = vmatprep.subr.bf16.mxu1 %v11052_v22  ;;  %v2329_v46 = vld [vmem:[#allocation8 + $0x6e8] sm:$0xff]  ;;  %v11259_v22 = vcombine.low %v3104_v16, %v3112_v32  ;;  %v3080_v63 = vld [vmem:[#allocation8 + $0x1e60] sm:$0xff]  ;;  %v11243_v7 = vcombine.low %v3088_v60, %v3096_v13 }
 0x3fa   :  { %v9845_v49 = vmul.f32 %v9813_v48, %v9717_v25  ;;  %v9828_v8 = vadd.f32 1.0, %v11378_v9  ;;  %9208 = vmatprep.subr.bf16.mxu0 %v10286_v52  ;;  %v11244_v52 = vcombine.high %v3088_v60, %v3096_v13  ;;  %v10478_v54 = vcombine.high %v2321_v45, %v2329_v46  ;;  %v3056_v9 = vld [vmem:[#allocation8 + $0x1da0] sm:$0xff]  ;;  %v2481_v13 = vld [vmem:[#allocation8 + $0xba8] sm:$0xff] }
 0x3fb   :  { %v11380_v55 = vpop.eup %11379  ;;  %v10477_v25 = vcombine.low %v2321_v45, %v2329_v46  ;;  %v11228_v48 = vcombine.high %v3072_v57, %v3080_v63  ;;  %v3008_v36 = vld [vmem:[#allocation8 + $0x1c20] sm:$0xff]  ;;  %v2489_v45 = vld [vmem:[#allocation8 + $0xbe8] sm:$0xff] }
 0x3fc   :  { %v11301_v0 = vpack.c.bf16 %v9845_v49, %v9844_v40  ;;  %v9829_v3 = vadd.f32 1.0, %v11380_v55  ;;  %9166 = vmatpush1.bf16.msra.mxu1 %v11051_v39  ;;  %v9860_v30 = vmul.f32 %v9828_v8, %v9732_v23  ;;  %v10462_v39 = vcombine.high %v2305_v31, %v2313_v4  ;;  %v2297_v40 = vld [vmem:[#allocation8 + $0x5e8] sm:$0xff]  ;;  %v3048_v55 = vld [vmem:[#allocation8 + $0x1d60] sm:$0xff] }
 0x3fd   :  { %9209 = vmatpush1.bf16.msra.mxu0 %v10285_v12  ;;  %9167 = vmatprep.subr.bf16.mxu1 %v11036_v2  ;;  %v3064_v12 = vld [vmem:[#allocation8 + $0x1de0] sm:$0xff]  ;;  %v2289_v2 = vld [vmem:[#allocation8 + $0x5a8] sm:$0xff]  ;;  %v11227_v49 = vcombine.low %v3072_v57, %v3080_v63  ;;  %v10461_v8 = vcombine.low %v2305_v31, %v2313_v4  ;;  %v11196_v23 = vcombine.high %v3040_v18, %v3048_v55 }
 0x3fe   :  { %9970 = vst [vmem:[#allocation11 + $0x10] sm:$0xff] %v11301_v0  ;;  %v9861_v33 = vmul.f32 %v9829_v3, %v9733_v14  ;;  %9210 = vmatprep.subr.bf16.mxu0 %v10270_v15  ;;  %v11212_v15 = vcombine.high %v3056_v9, %v3064_v12  ;;  %v10446_v61 = vcombine.high %v2289_v2, %v2297_v40  ;;  %v3024_v3 = vld [vmem:[#allocation8 + $0x1ca0] sm:$0xff]  ;;  %v2737_v46 = vld [vmem:[#allocation8 + $0x13a8] sm:$0xff] }
 0x3ff   :  { %v11211_v27 = vcombine.low %v3056_v9, %v3064_v12  ;;  %v10445_v0 = vcombine.low %v2289_v2, %v2297_v40  ;;  %v3016_v43 = vld [vmem:[#allocation8 + $0x1c60] sm:$0xff]  ;;  %v2465_v63 = vld [vmem:[#allocation8 + $0xb28] sm:$0xff]  ;;  %v10637_v4 = vcombine.low %v2481_v13, %v2489_v45 }
 0x400   :  { %v11309_v37 = vpack.c.bf16 %v9861_v33, %v9860_v30  ;;  %9168 = vmatpush1.bf16.msra.mxu1 %v11035_v10  ;;  %v2273_v10 = vld [vmem:[#allocation8 + $0x528] sm:$0xff]  ;;  %v11195_v33 = vcombine.low %v3040_v18, %v3048_v55 }
 0x401   :  { %9211 = vmatpush1.bf16.msra.mxu0 %v10269_v28  ;;  %9169 = vmatprep.subr.bf16.mxu1 %v11276_v38  ;;  %v10430_v14 = vcombine.high %v2273_v10, %v2281_v19  ;;  %v3032_v28 = vld [vmem:[#allocation8 + $0x1ce0] sm:$0xff]  ;;  %v2257_v38 = vld [vmem:[#allocation8 + $0x4a8] sm:$0xff] }
 0x402   :  { %9978 = vst [vmem:[#allocation11 + $0x50] sm:$0xff] %v11309_v37  ;;  %9212 = vmatprep.subr.bf16.mxu0 %v10510_v53  ;;  %v2265_v30 = vld [vmem:[#allocation8 + $0x4e8] sm:$0xff]  ;;  %v10429_v53 = vcombine.low %v2273_v10, %v2281_v19  ;;  %v11180_v16 = vcombine.high %v3024_v3, %v3032_v28 }
 0x403   :  { %v10414_v32 = vcombine.high %v2257_v38, %v2265_v30  ;;  %v2241_v37 = vld [vmem:[#allocation8 + $0x428] sm:$0xff] }
 0x404   :  { %9170 = vmatpush2.bf16.msra.mxu1 %v11275_v17  ;;  %v2249_v17 = vld [vmem:[#allocation8 + $0x468] sm:$0xff] }
 0x405   :  { %9213 = vmatpush2.bf16.msra.mxu0 %v10509_v20  ;;  %9171 = vmatprep.subr.bf16.mxu1 %v11260_v59  ;;  %v11179_v20 = vcombine.low %v3024_v3, %v3032_v28  ;;  %v10413_v59 = vcombine.low %v2257_v38, %v2265_v30  ;;  %v10398_v60 = vcombine.high %v2241_v37, %v2249_v17  ;;  %v2473_v31 = vld [vmem:[#allocation8 + $0xb68] sm:$0xff] }
 0x406   :  { %9214 = vmatprep.subr.bf16.mxu0 %v10494_v56  ;;  %v11164_v56 = vcombine.high %v3008_v36, %v3016_v43  ;;  %v2449_v9 = vld [vmem:[#allocation8 + $0xaa8] sm:$0xff] }
 0x407   :  { %v2457_v12 = vld [vmem:[#allocation8 + $0xae8] sm:$0xff] }
 0x408   :  { %9172 = vmatpush2.bf16.msra.mxu1 %v11259_v22  ;;  %v2745_v22 = vld [vmem:[#allocation8 + $0x13e8] sm:$0xff] }
 0x409   :  { %9215 = vmatpush2.bf16.msra.mxu0 %v10493_v42  ;;  %9173 = vmatprep.subr.bf16.mxu1 %v11244_v52  ;;  %v11163_v42 = vcombine.low %v3008_v36, %v3016_v43  ;;  %v10397_v52 = vcombine.low %v2241_v37, %v2249_v17  ;;  %v10894_v57 = vcombine.high %v2737_v46, %v2745_v22  ;;  %v2705_v40 = vld [vmem:[#allocation8 + $0x12a8] sm:$0xff] }
 0x40a   :  { %9216 = vmatprep.subr.bf16.mxu0 %v10478_v54  ;;  %v10638_v54 = vcombine.high %v2481_v13, %v2489_v45  ;;  %v2433_v55 = vld [vmem:[#allocation8 + $0xa28] sm:$0xff] }
 0x40b   :  { %v2441_v10 = vld [vmem:[#allocation8 + $0xa68] sm:$0xff] }
 0x40c   :  { %9174 = vmatpush2.bf16.msra.mxu1 %v11243_v7  ;;  %v2721_v7 = vld [vmem:[#allocation8 + $0x1328] sm:$0xff] }
 0x40d   :  { %9217 = vmatpush2.bf16.msra.mxu0 %v10477_v25  ;;  %9175 = vmatprep.subr.bf16.mxu1 %v11228_v48  ;;  %v2729_v25 = vld [vmem:[#allocation8 + $0x1368] sm:$0xff]  ;;  %v10893_v48 = vcombine.low %v2737_v46, %v2745_v22 }
 0x40e   :  { %9218 = vmatprep.subr.bf16.mxu0 %v10462_v39  ;;  %v10622_v39 = vcombine.high %v2465_v63, %v2473_v31  ;;  %v10878_v2 = vcombine.high %v2721_v7, %v2729_v25  ;;  %v2689_v19 = vld [vmem:[#allocation8 + $0x1228] sm:$0xff] }
 0x40f   :  { %v2417_v28 = vld [vmem:[#allocation8 + $0x9a8] sm:$0xff] }
 0x410   :  { %9176 = vmatpush2.bf16.msra.mxu1 %v11227_v49  ;;  %v2713_v49 = vld [vmem:[#allocation8 + $0x12e8] sm:$0xff] }
 0x411   :  { %9219 = vmatpush2.bf16.msra.mxu0 %v10461_v8  ;;  %9177 = vmatprep.subr.bf16.mxu1 %v11212_v15  ;;  %v10621_v8 = vcombine.low %v2465_v63, %v2473_v31  ;;  %v10877_v15 = vcombine.low %v2721_v7, %v2729_v25  ;;  %v10862_v18 = vcombine.high %v2705_v40, %v2713_v49  ;;  %v2425_v38 = vld [vmem:[#allocation8 + $0x9e8] sm:$0xff] }
 0x412   :  { %9220 = vmatprep.subr.bf16.mxu0 %v10446_v61  ;;  %v10606_v61 = vcombine.high %v2449_v9, %v2457_v12  ;;  %v2673_v30 = vld [vmem:[#allocation8 + $0x11a8] sm:$0xff] }
 0x413   :  { %v2401_v43 = vld [vmem:[#allocation8 + $0x928] sm:$0xff] }
 0x414   :  { %9178 = vmatpush2.bf16.msra.mxu1 %v11211_v27  ;;  %v2697_v27 = vld [vmem:[#allocation8 + $0x1268] sm:$0xff] }
 0x415   :  { %9221 = vmatpush2.bf16.msra.mxu0 %v10445_v0  ;;  %9179 = vmatprep.subr.bf16.mxu1 %v11196_v23  ;;  %v10605_v0 = vcombine.low %v2449_v9, %v2457_v12  ;;  %v10861_v23 = vcombine.low %v2705_v40, %v2713_v49  ;;  %v10846_v3 = vcombine.high %v2689_v19, %v2697_v27  ;;  %v2409_v37 = vld [vmem:[#allocation8 + $0x968] sm:$0xff] }
 0x416   :  { %9222 = vmatprep.subr.bf16.mxu0 %v10430_v14  ;;  %v10590_v14 = vcombine.high %v2433_v55, %v2441_v10  ;;  %v2657_v17 = vld [vmem:[#allocation8 + $0x1128] sm:$0xff] }
 0x417   :  { %v2385_v45 = vld [vmem:[#allocation8 + $0x8a8] sm:$0xff] }
 0x418   :  { %9180 = vmatpush2.bf16.msra.mxu1 %v11195_v33  ;;  %v2681_v33 = vld [vmem:[#allocation8 + $0x11e8] sm:$0xff] }
 0x419   :  { %9223 = vmatpush2.bf16.msra.mxu0 %v10429_v53  ;;  %9181 = vmatprep.subr.bf16.mxu1 %v11180_v16  ;;  %v10589_v53 = vcombine.low %v2433_v55, %v2441_v10  ;;  %v10845_v16 = vcombine.low %v2689_v19, %v2697_v27  ;;  %v10830_v36 = vcombine.high %v2673_v30, %v2681_v33  ;;  %v2393_v46 = vld [vmem:[#allocation8 + $0x8e8] sm:$0xff] }
 0x41a   :  { %9224 = vmatprep.subr.bf16.mxu0 %v10414_v32  ;;  %v10574_v32 = vcombine.high %v2417_v28, %v2425_v38  ;;  %v2641_v22 = vld [vmem:[#allocation8 + $0x10a8] sm:$0xff] }
 0x41b   :  { %v2369_v31 = vld [vmem:[#allocation8 + $0x828] sm:$0xff] }
 0x41c   :  { %9182 = vmatpush2.bf16.msra.mxu1 %v11179_v20  ;;  %v2665_v20 = vld [vmem:[#allocation8 + $0x1168] sm:$0xff] }
 0x41d   :  { %9225 = vmatpush2.bf16.msra.mxu0 %v10413_v59  ;;  %9183 = vmatprep.subr.bf16.mxu1 %v11164_v56  ;;  %v10573_v59 = vcombine.low %v2417_v28, %v2425_v38  ;;  %v10829_v56 = vcombine.low %v2673_v30, %v2681_v33  ;;  %v10814_v13 = vcombine.high %v2657_v17, %v2665_v20  ;;  %v2625_v7 = vld [vmem:[#allocation8 + $0x1028] sm:$0xff] }
 0x41e   :  { %9226 = vmatprep.subr.bf16.mxu0 %v10398_v60  ;;  %v10558_v60 = vcombine.high %v2401_v43, %v2409_v37  ;;  %v2633_v25 = vld [vmem:[#allocation8 + $0x1068] sm:$0xff] }
 0x41f   :  { %v10782_v12 = vcombine.high %v2625_v7, %v2633_v25  ;;  %v2617_v40 = vld [vmem:[#allocation8 + $0xfe8] sm:$0xff] }
 0x420   :  { %9184 = vmatpush2.bf16.msra.mxu1 %v11163_v42  ;;  %v2649_v42 = vld [vmem:[#allocation8 + $0x10e8] sm:$0xff] }
 0x421   :  { %9227 = vmatpush2.bf16.msra.mxu0 %v10397_v52  ;;  %9239 = vmatprep.subr.bf16.mxu1 %v10638_v54  ;;  %v10557_v52 = vcombine.low %v2401_v43, %v2409_v37  ;;  %v10813_v54 = vcombine.low %v2657_v17, %v2665_v20  ;;  %v10798_v63 = vcombine.high %v2641_v22, %v2649_v42  ;;  %v2865_v49 = vld [vmem:[#allocation8 + $0x17a8] sm:$0xff] }
 0x422   :  { %9282 = vmatprep.subr.bf16.mxu0 %v10894_v57  ;;  %v10542_v57 = vcombine.high %v2385_v45, %v2393_v46  ;;  %v2593_v10 = vld [vmem:[#allocation8 + $0xf28] sm:$0xff] }
 0x423   :  { %9186 = vmatmul.mubr.bf16.vlgmr.msra.gmra.mxu1 %v11761_v44  ;;  %v2601_v19 = vld [vmem:[#allocation8 + $0xf68] sm:$0xff] }
 0x424   :  { %9229 = vmatmul.mubr.bf16.vlgmr.msra.gmra.mxu0 %v11693_v34  ;;  %9240 = vmatpush1.bf16.msra.mxu1 %v10637_v4  ;;  %v2377_v4 = vld [vmem:[#allocation8 + $0x868] sm:$0xff] }
 0x425   :  { %9271 = vmatprep.mubr.bf16.mxu1 %v11702_v1  ;;  %9283 = vmatpush1.bf16.msra.mxu0 %v10893_v48  ;;  %v10541_v48 = vcombine.low %v2385_v45, %v2393_v46  ;;  %v10526_v9 = vcombine.high %v2369_v31, %v2377_v4  ;;  %v2849_v27 = vld [vmem:[#allocation8 + $0x1728] sm:$0xff] }
 0x426   :  { %9314 = vmatprep.mubr.bf16.mxu0 %v11738_v6  ;;  %9241 = vmatprep.subr.bf16.mxu1 %v10622_v39  ;;  %v10797_v39 = vcombine.low %v2641_v22, %v2649_v42  ;;  %v2577_v38 = vld [vmem:[#allocation8 + $0xea8] sm:$0xff] }
 0x427   :  { %9284 = vmatprep.subr.bf16.mxu0 %v10878_v2  ;;  %v2609_v2 = vld [vmem:[#allocation8 + $0xfa8] sm:$0xff] }
 0x428   :  { %9242 = vmatpush1.bf16.msra.mxu1 %v10621_v8  ;;  %v2873_v8 = vld [vmem:[#allocation8 + $0x17e8] sm:$0xff] }
 0x429   :  { %9285 = vmatpush1.bf16.msra.mxu0 %v10877_v15  ;;  %9243 = vmatprep.subr.bf16.mxu1 %v10606_v61  ;;  %v10525_v15 = vcombine.low %v2369_v31, %v2377_v4  ;;  %v10781_v61 = vcombine.low %v2625_v7, %v2633_v25  ;;  %v11022_v55 = vcombine.high %v2865_v49, %v2873_v8  ;;  %v2585_v30 = vld [vmem:[#allocation8 + $0xee8] sm:$0xff] }
 0x42a   :  { %9286 = vmatprep.subr.bf16.mxu0 %v10862_v18  ;;  %v10766_v18 = vcombine.high %v2609_v2, %v2617_v40  ;;  %v2833_v33 = vld [vmem:[#allocation8 + $0x16a8] sm:$0xff] }
 0x42b   :  { %v2561_v37 = vld [vmem:[#allocation8 + $0xe28] sm:$0xff] }
 0x42c   :  { %9244 = vmatpush1.bf16.msra.mxu1 %v10605_v0  ;;  %v2857_v0 = vld [vmem:[#allocation8 + $0x1768] sm:$0xff] }
 0x42d   :  { %9287 = vmatpush1.bf16.msra.mxu0 %v10861_v23  ;;  %9245 = vmatprep.subr.bf16.mxu1 %v10590_v14  ;;  %v10765_v23 = vcombine.low %v2609_v2, %v2617_v40  ;;  %v11021_v14 = vcombine.low %v2865_v49, %v2873_v8  ;;  %v11006_v28 = vcombine.high %v2849_v27, %v2857_v0  ;;  %v2569_v17 = vld [vmem:[#allocation8 + $0xe68] sm:$0xff] }
 0x42e   :  { %9288 = vmatprep.subr.bf16.mxu0 %v10846_v3  ;;  %v10750_v3 = vcombine.high %v2593_v10, %v2601_v19  ;;  %v2817_v20 = vld [vmem:[#allocation8 + $0x1628] sm:$0xff] }
 0x42f   :  { %v2545_v46 = vld [vmem:[#allocation8 + $0xda8] sm:$0xff] }
 0x430   :  { %9246 = vmatpush1.bf16.msra.mxu1 %v10589_v53  ;;  %v2841_v53 = vld [vmem:[#allocation8 + $0x16e8] sm:$0xff] }
 0x431   :  { %9289 = vmatpush1.bf16.msra.mxu0 %v10845_v16  ;;  %9247 = vmatprep.subr.bf16.mxu1 %v10574_v32  ;;  %v10749_v16 = vcombine.low %v2593_v10, %v2601_v19  ;;  %v11005_v32 = vcombine.low %v2849_v27, %v2857_v0  ;;  %v10990_v43 = vcombine.high %v2833_v33, %v2841_v53  ;;  %v2553_v22 = vld [vmem:[#allocation8 + $0xde8] sm:$0xff]  ;;  %v8929_v19 = vpop.f32.mrf.mxu1 }
 0x432   :  { %9290 = vmatprep.subr.bf16.mxu0 %v10830_v36  ;;  %v10734_v36 = vcombine.high %v2577_v38, %v2585_v30  ;;  %v2801_v42 = vld [vmem:[#allocation8 + $0x15a8] sm:$0xff]  ;;  %v10702_v31 = vcombine.high %v2545_v46, %v2553_v22 }
 0x433   :  { %v2529_v7 = vld [vmem:[#allocation8 + $0xd28] sm:$0xff] }
 0x434   :  { %9248 = vmatpush1.bf16.msra.mxu1 %v10573_v59  ;;  %v2825_v59 = vld [vmem:[#allocation8 + $0x1668] sm:$0xff] }
 0x435   :  { %9291 = vmatpush1.bf16.msra.mxu0 %v10829_v56  ;;  %9249 = vmatprep.subr.bf16.mxu1 %v10558_v60  ;;  %v10733_v56 = vcombine.low %v2577_v38, %v2585_v30  ;;  %v10989_v60 = vcombine.low %v2833_v33, %v2841_v53  ;;  %v10974_v45 = vcombine.high %v2817_v20, %v2825_v59  ;;  %v2537_v25 = vld [vmem:[#allocation8 + $0xd68] sm:$0xff] }
 0x436   :  { %9292 = vmatprep.subr.bf16.mxu0 %v10814_v13  ;;  %v10718_v13 = vcombine.high %v2561_v37, %v2569_v17  ;;  %v10686_v40 = vcombine.high %v2529_v7, %v2537_v25  ;;  %v2513_v8 = vld [vmem:[#allocation8 + $0xca8] sm:$0xff]  ;;  %v3163_v30 = vrot.slane %v11843_v50, %v11748_v26 }
 0x437   :  { %v2761_v38 = vld [vmem:[#allocation8 + $0x1468] sm:$0xff] }
 0x438   :  { %9250 = vmatpush1.bf16.msra.mxu1 %v10557_v52  ;;  %v2809_v52 = vld [vmem:[#allocation8 + $0x15e8] sm:$0xff] }
 0x439   :  { %9293 = vmatpush1.bf16.msra.mxu0 %v10813_v54  ;;  %9251 = vmatprep.subr.bf16.mxu1 %v10542_v57  ;;  %v10717_v54 = vcombine.low %v2561_v37, %v2569_v17  ;;  %v8886_v57 = vpop.f32.mrf.mxu0  ;;  %v10958_v4 = vcombine.high %v2801_v42, %v2809_v52  ;;  %v10957_v2 = vcombine.low %v2801_v42, %v2809_v52  ;;  %v2993_v17 = vld [vmem:[#allocation8 + $0x1ba8] sm:$0xff] }
 0x43a   :  { %9294 = vmatprep.subr.bf16.mxu0 %v10798_v63  ;;  %v10973_v63 = vcombine.low %v2817_v20, %v2825_v59  ;;  %v3001_v20 = vld [vmem:[#allocation8 + $0x1be8] sm:$0xff] }
 0x43b   :  { %v11150_v42 = vcombine.high %v2993_v17, %v3001_v20 }
 0x43c   :  { %9252 = vmatpush1.bf16.msra.mxu1 %v10541_v48  ;;  %v2785_v48 = vld [vmem:[#allocation8 + $0x1528] sm:$0xff] }
 0x43d   :  { %9295 = vmatpush1.bf16.msra.mxu0 %v10797_v39  ;;  %9253 = vmatprep.subr.bf16.mxu1 %v10526_v9  ;;  %v2793_v39 = vld [vmem:[#allocation8 + $0x1568] sm:$0xff]  ;;  %v10701_v9 = vcombine.low %v2545_v46, %v2553_v22 }
 0x43e   :  { %9296 = vmatprep.subr.bf16.mxu0 %v10782_v12  ;;  %v8888_v12 = vpop.f32.mrf.mxu0  ;;  %v10942_v49 = vcombine.high %v2785_v48, %v2793_v39  ;;  %v10941_v27 = vcombine.low %v2785_v48, %v2793_v39  ;;  %v11149_v48 = vcombine.low %v2993_v17, %v3001_v20  ;;  %v2210_v39 = vld [vmem:[#allocation8 + $0x330] sm:$0xff] }
 0x440   :  { %9254 = vmatpush1.bf16.msra.mxu1 %v10525_v15  ;;  %v2521_v15 = vld [vmem:[#allocation8 + $0xce8] sm:$0xff]  ;;  %v8890_v10 = vpop.f32.mrf.mxu0 }
 0x441   :  { %9297 = vmatpush1.bf16.msra.mxu0 %v10781_v61  ;;  %9255 = vmatprep.subr.bf16.mxu1 %v10766_v18  ;;  %v2769_v61 = vld [vmem:[#allocation8 + $0x14a8] sm:$0xff]  ;;  %v10670_v0 = vcombine.high %v2513_v8, %v2521_v15  ;;  %v10669_v33 = vcombine.low %v2513_v8, %v2521_v15 }
 0x442   :  { %9298 = vmatprep.subr.bf16.mxu0 %v11022_v55  ;;  %v2777_v18 = vld [vmem:[#allocation8 + $0x14e8] sm:$0xff]  ;;  %v10685_v55 = vcombine.low %v2529_v7, %v2537_v25  ;;  %v8892_v53 = vpop.f32.mrf.mxu0  ;;  %v8891_v7 = vadd.f32 %v8890_v10, %v3163_v30 }
 0x443   :  { %v2961_v15 = vld [vmem:[#allocation8 + $0x1aa8] sm:$0xff] }
 0x444   :  { %9256 = vmatpush2.bf16.msra.mxu1 %v10765_v23  ;;  %v10926_v23 = vcombine.high %v2769_v61, %v2777_v18  ;;  %v8972_v59 = vpop.f32.mrf.mxu0 }
 0x445   :  { %9299 = vmatpush2.bf16.msra.mxu0 %v11021_v14  ;;  %9257 = vmatprep.subr.bf16.mxu1 %v10750_v3  ;;  %v2497_v14 = vld [vmem:[#allocation8 + $0xc28] sm:$0xff] }
 0x446   :  { %9300 = vmatprep.subr.bf16.mxu0 %v11006_v28  ;;  %v2505_v3 = vld [vmem:[#allocation8 + $0xc68] sm:$0xff] }
 0x447   :  { %v2753_v28 = vld [vmem:[#allocation8 + $0x1428] sm:$0xff] }
 0x448   :  { %9258 = vmatpush2.bf16.msra.mxu1 %v10749_v16  ;;  %v8931_v16 = vpop.f32.mrf.mxu1  ;;  %v10910_v37 = vcombine.high %v2753_v28, %v2761_v38  ;;  %v10909_v22 = vcombine.low %v2753_v28, %v2761_v38 }
 0x449   :  { %9301 = vmatpush2.bf16.msra.mxu0 %v11005_v32  ;;  %9259 = vmatprep.subr.bf16.mxu1 %v10734_v36  ;;  %v10925_v32 = vcombine.low %v2769_v61, %v2777_v18  ;;  %v10654_v36 = vcombine.high %v2497_v14, %v2505_v3  ;;  %v2969_v61 = vld [vmem:[#allocation8 + $0x1ae8] sm:$0xff] }
 0x44a   :  { %9302 = vmatprep.subr.bf16.mxu0 %v10990_v43  ;;  %v3167_v43 = vrot.slane %v11843_v50, %v11751_v11  ;;  %v8933_v46 = vpop.f32.mrf.mxu1  ;;  %v8974_v50 = vpop.f32.mrf.mxu0  ;;  %v11117_v20 = vcombine.low %v2961_v15, %v2969_v61 }
 0x44b   :  { %v8934_v8 = vadd.f32 %v8933_v46, %v8891_v7  ;;  %v2170_v7 = vld [vmem:[#allocation8 + $0x1f0] sm:$0xff] }
 0x44c   :  { %9260 = vmatpush2.bf16.msra.mxu1 %v10733_v56  ;;  %v2226_v56 = vld [vmem:[#allocation8 + $0x3b0] sm:$0xff]  ;;  %v8889_v52 = vadd.f32 %v8888_v12, %v3167_v43  ;;  %v8976_v18 = vpop.f32.mrf.mxu0 }
 0x44d   :  { %9303 = vmatpush2.bf16.msra.mxu0 %v10989_v60  ;;  %9261 = vmatprep.subr.bf16.mxu1 %v10718_v13  ;;  %v2234_v60 = vld [vmem:[#allocation8 + $0x3f0] sm:$0xff]  ;;  %v8887_v13 = vadd.f32 %v8886_v57, %v3163_v30  ;;  %v11118_v30 = vcombine.high %v2961_v15, %v2969_v61 }
 0x44e   :  { %9304 = vmatprep.subr.bf16.mxu0 %v10974_v45  ;;  %v10653_v45 = vcombine.low %v2497_v14, %v2505_v3  ;;  %v8932_v25 = vadd.f32 %v8931_v16, %v8889_v52  ;;  %v2218_v57 = vld [vmem:[#allocation8 + $0x370] sm:$0xff] }
 0x44f   :  { %v10367_v38 = vcombine.low %v2210_v39, %v2218_v57 }
 0x450   :  { %9262 = vmatpush2.bf16.msra.mxu1 %v10717_v54  ;;  %v8930_v54 = vadd.f32 %v8929_v19, %v8887_v13  ;;  %v10368_v19 = vcombine.high %v2210_v39, %v2218_v57 }
 0x451   :  { %9305 = vmatpush2.bf16.msra.mxu0 %v10973_v63  ;;  %9263 = vmatprep.subr.bf16.mxu1 %v10702_v31  ;;  %v10384_v63 = vcombine.high %v2226_v56, %v2234_v60  ;;  %v2977_v31 = vld [vmem:[#allocation8 + $0x1b28] sm:$0xff] }
 0x452   :  { %9306 = vmatprep.subr.bf16.mxu0 %v10958_v4  ;;  %v2985_v4 = vld [vmem:[#allocation8 + $0x1b68] sm:$0xff] }
 0x453   :  { %v11134_v12 = vcombine.high %v2977_v31, %v2985_v4  ;;  %v11133_v10 = vcombine.low %v2977_v31, %v2985_v4  ;;  %v2937_v31 = vld [vmem:[#allocation8 + $0x19e8] sm:$0xff]  ;;  %v2162_v4 = vld [vmem:[#allocation8 + $0x1b0] sm:$0xff] }
 0x454   :  { %9264 = vmatpush2.bf16.msra.mxu1 %v10701_v9  ;;  %v8935_v9 = vpop.f32.mrf.mxu1  ;;  %v10319_v15 = vcombine.low %v2162_v4, %v2170_v7 }
 0x455   :  { %9307 = vmatpush2.bf16.msra.mxu0 %v10957_v2  ;;  %9265 = vmatprep.subr.bf16.mxu1 %v10686_v40  ;;  %v10383_v2 = vcombine.low %v2226_v56, %v2234_v60  ;;  %v8893_v40 = vadd.f32 %v8892_v53, %v3167_v43  ;;  %v2953_v43 = vld [vmem:[#allocation8 + $0x1a68] sm:$0xff]  ;;  %v2186_v56 = vld [vmem:[#allocation8 + $0x270] sm:$0xff] }
 0x456   :  { %9308 = vmatprep.subr.bf16.mxu0 %v10942_v49  ;;  %v8973_v49 = vadd.f32 %v8972_v59, %v8930_v54  ;;  %v2178_v59 = vld [vmem:[#allocation8 + $0x230] sm:$0xff] }
 0x457   :  { %v8936_v14 = vadd.f32 %v8935_v9, %v8893_v40  ;;  %v10335_v39 = vcombine.low %v2178_v59, %v2186_v56  ;;  %v10320_v9 = vcombine.high %v2162_v4, %v2170_v7  ;;  %v2921_v40 = vld [vmem:[#allocation8 + $0x1968] sm:$0xff]  ;;  %v2362_v7 = vld [vmem:[#allocation8 + $0x7f0] sm:$0xff] }
 0x458   :  { %9266 = vmatpush2.bf16.msra.mxu1 %v10685_v55 }
 0x459   :  { %9309 = vmatpush2.bf16.msra.mxu0 %v10941_v27  ;;  %9267 = vmatprep.subr.bf16.mxu1 %v10670_v0  ;;  %v2194_v27 = vld [vmem:[#allocation8 + $0x2b0] sm:$0xff] }
 0x45a   :  { %9310 = vmatprep.subr.bf16.mxu0 %v10926_v23  ;;  %v2202_v0 = vld [vmem:[#allocation8 + $0x2f0] sm:$0xff]  ;;  %v8975_v23 = vadd.f32 %v8974_v50, %v8932_v25  ;;  %v2929_v50 = vld [vmem:[#allocation8 + $0x19a8] sm:$0xff] }
 0x45b   :  { %v11086_v57 = vcombine.high %v2929_v50, %v2937_v31 }
 0x45c   :  { %9268 = vmatpush2.bf16.msra.mxu1 %v10669_v33  ;;  %v8977_v33 = vadd.f32 %v8976_v18, %v8934_v8  ;;  %v2154_v8 = vld [vmem:[#allocation8 + $0x170] sm:$0xff] }
 0x45d   :  { %9311 = vmatpush2.bf16.msra.mxu0 %v10925_v32  ;;  %9269 = vmatprep.subr.bf16.mxu1 %v10654_v36  ;;  %v10352_v32 = vcombine.high %v2194_v27, %v2202_v0  ;;  %v2945_v36 = vld [vmem:[#allocation8 + $0x1a28] sm:$0xff] }
 0x45e   :  { %9312 = vmatprep.subr.bf16.mxu0 %v10910_v37  ;;  %v8978_v37 = vpop.f32.mrf.mxu0 }
 0x45f   :  { %v8979_v60 = vadd.f32 %v8978_v37, %v8936_v14 }
 0x460   :  { %9270 = vmatpush2.bf16.msra.mxu1 %v10653_v45 }
 0x461   :  { %9313 = vmatpush2.bf16.msra.mxu0 %v10909_v22  ;;  %9325 = vmatprep.subr.bf16.mxu1 %v11150_v42  ;;  %v10351_v22 = vcombine.low %v2194_v27, %v2202_v0  ;;  %v11102_v42 = vcombine.high %v2945_v36, %v2953_v43  ;;  %v2138_v27 = vld [vmem:[#allocation8 + $0xf0] sm:$0xff] }
 0x462   :  { %9368 = vmatprep.subr.bf16.mxu0 %v10384_v63  ;;  %v10336_v63 = vcombine.high %v2178_v59, %v2186_v56 }
 0x463   :  { %v9015_v55 = vpop.f32.mrf.mxu1  ;;  %9272 = vmatmul.mubr.bf16.vlgmr.msra.gmra.mxu1 %v11710_v58 }
 0x464   :  { %v11878_v3 = vadd.f32 %v9015_v55, %v8973_v49  ;;  %9315 = vmatmul.mubr.bf16.vlgmr.msra.gmra.mxu0 %v11742_v35  ;;  %9326 = vmatpush1.bf16.msra.mxu1 %v11149_v48  ;;  %v11101_v48 = vcombine.low %v2945_v36, %v2953_v43  ;;  %v2146_v49 = vld [vmem:[#allocation8 + $0x130] sm:$0xff]  ;;  %v2897_v55 = vld [vmem:[#allocation8 + $0x18a8] sm:$0xff] }
 0x465   :  { %9357 = vmatprep.mubr.bf16.mxu1 %v11759_v51  ;;  %9369 = vmatpush1.bf16.msra.mxu0 %v10383_v2  ;;  %v9017_v28 = vpop.f32.mrf.mxu1  ;;  %v2913_v2 = vld [vmem:[#allocation8 + $0x1928] sm:$0xff]  ;;  %v10304_v18 = vcombine.high %v2146_v49, %v2154_v8  ;;  %v10303_v14 = vcombine.low %v2146_v49, %v2154_v8  ;;  %v2114_v36 = vld [vmem:[#allocation8 + $0x30] sm:$0xff] }
 0x466   :  { %v9750_v53 = vmul.f32 0.70710677, %v11878_v3  ;;  %9400 = vmatprep.mubr.bf16.mxu0 %v11672_v21  ;;  %v11884_v16 = vadd.f32 %v9017_v28, %v8975_v23  ;;  %9327 = vmatprep.subr.bf16.mxu1 %v11134_v12  ;;  %v11085_v12 = vcombine.low %v2929_v50, %v2937_v31  ;;  %v11070_v61 = vcombine.high %v2913_v2, %v2921_v40  ;;  %v2122_v43 = vld [vmem:[#allocation8 + $0x70] sm:$0xff]  ;;  %v3129_v50 = vld [vmem:[#allocation8 + $0x1fe8] sm:$0xff] }
 0x467   :  { %v9019_v17 = vpop.f32.mrf.mxu1  ;;  %9370 = vmatprep.subr.bf16.mxu0 %v10368_v19  ;;  %v2130_v19 = vld [vmem:[#allocation8 + $0xb0] sm:$0xff]  ;;  %v11069_v0 = vcombine.low %v2913_v2, %v2921_v40  ;;  %v9718_v37 = vmul.f32 0.5, %v11878_v3  ;;  %v3105_v8 = vld [vmem:[#allocation8 + $0x1f28] sm:$0xff] }
 0x468   :  { %11381 = verf.f32 %v9750_v53  ;;  %v9751_v13 = vmul.f32 0.70710677, %v11884_v16  ;;  %v11887_v45 = vadd.f32 %v9019_v17, %v8977_v33  ;;  %9328 = vmatpush1.bf16.msra.mxu1 %v11133_v10  ;;  %v2905_v10 = vld [vmem:[#allocation8 + $0x18e8] sm:$0xff]  ;;  %v9719_v17 = vmul.f32 0.5, %v11884_v16  ;;  %v2354_v3 = vld [vmem:[#allocation8 + $0x7b0] sm:$0xff] }
 0x469   :  { %9371 = vmatpush1.bf16.msra.mxu0 %v10367_v38  ;;  %v9021_v46 = vpop.f32.mrf.mxu1  ;;  %9329 = vmatprep.subr.bf16.mxu1 %v11118_v30  ;;  %v11054_v28 = vcombine.high %v2897_v55, %v2905_v10  ;;  %v10288_v30 = vcombine.high %v2130_v19, %v2138_v27  ;;  %v2881_v33 = vld [vmem:[#allocation8 + $0x1828] sm:$0xff]  ;;  %v11053_v59 = vcombine.low %v2897_v55, %v2905_v10 }
 0x46a   :  { %11383 = verf.f32 %v9751_v13  ;;  %v9766_v52 = vmul.f32 0.70710677, %v11887_v45  ;;  %v11890_v54 = vadd.f32 %v9021_v46, %v8979_v60  ;;  %9372 = vmatprep.subr.bf16.mxu0 %v10352_v32  ;;  %v2889_v53 = vld [vmem:[#allocation8 + $0x1868] sm:$0xff]  ;;  %v10287_v60 = vcombine.low %v2130_v19, %v2138_v27 }
 0x46b   :  { %v11038_v13 = vcombine.high %v2881_v33, %v2889_v53  ;;  %v11037_v4 = vcombine.low %v2881_v33, %v2889_v53  ;;  %v10512_v49 = vcombine.high %v2354_v3, %v2362_v7  ;;  %v3089_v19 = vld [vmem:[#allocation8 + $0x1ea8] sm:$0xff] }
 0x46c   :  { %11385 = verf.f32 %v9766_v52  ;;  %v9767_v25 = vmul.f32 0.70710677, %v11890_v54  ;;  %9330 = vmatpush1.bf16.msra.mxu1 %v11117_v20  ;;  %v10272_v52 = vcombine.high %v2114_v36, %v2122_v43  ;;  %v3097_v27 = vld [vmem:[#allocation8 + $0x1ee8] sm:$0xff] }
 0x46d   :  { %9373 = vmatpush1.bf16.msra.mxu0 %v10351_v22  ;;  %9331 = vmatprep.subr.bf16.mxu1 %v11102_v42  ;;  %v3073_v33 = vld [vmem:[#allocation8 + $0x1e28] sm:$0xff] }
 0x46e   :  { %11387 = verf.f32 %v9767_v25  ;;  %9374 = vmatprep.subr.bf16.mxu0 %v10336_v63  ;;  %v3121_v63 = vld [vmem:[#allocation8 + $0x1fa8] sm:$0xff]  ;;  %v9734_v25 = vmul.f32 0.5, %v11887_v45 }
 0x46f   :  { %v11277_v45 = vcombine.low %v3121_v63, %v3129_v50  ;;  %v3081_v53 = vld [vmem:[#allocation8 + $0x1e68] sm:$0xff] }
 0x470   :  { %9332 = vmatpush1.bf16.msra.mxu1 %v11101_v48  ;;  %v9735_v48 = vmul.f32 0.5, %v11890_v54  ;;  %v10511_v54 = vcombine.low %v2354_v3, %v2362_v7 }
 0x471   :  { %9375 = vmatpush1.bf16.msra.mxu0 %v10335_v39  ;;  %9333 = vmatprep.subr.bf16.mxu1 %v11086_v57  ;;  %v10271_v57 = vcombine.low %v2114_v36, %v2122_v43  ;;  %v2314_v36 = vld [vmem:[#allocation8 + $0x670] sm:$0xff]  ;;  %v11245_v43 = vcombine.low %v3089_v19, %v3097_v27 }
 0x472   :  { %9376 = vmatprep.subr.bf16.mxu0 %v10320_v9  ;;  %v11278_v9 = vcombine.high %v3121_v63, %v3129_v50  ;;  %v3041_v63 = vld [vmem:[#allocation8 + $0x1d28] sm:$0xff] }
 0x473   :  { %v3049_v50 = vld [vmem:[#allocation8 + $0x1d68] sm:$0xff] }
 0x474   :  { %9334 = vmatpush1.bf16.msra.mxu1 %v11085_v12  ;;  %v3113_v12 = vld [vmem:[#allocation8 + $0x1f68] sm:$0xff] }
 0x475   :  { %v11382_v23 = vpop.eup %11381  ;;  %9377 = vmatpush1.bf16.msra.mxu0 %v10319_v15  ;;  %9335 = vmatprep.subr.bf16.mxu1 %v11070_v61  ;;  %v2338_v15 = vld [vmem:[#allocation8 + $0x730] sm:$0xff]  ;;  %v11262_v55 = vcombine.high %v3105_v8, %v3113_v12 }
 0x476   :  { %v9814_v38 = vadd.f32 1.0, %v11382_v23  ;;  %9378 = vmatprep.subr.bf16.mxu0 %v10304_v18  ;;  %v2346_v61 = vld [vmem:[#allocation8 + $0x770] sm:$0xff] }
 0x477   :  { %v11384_v32 = vpop.eup %11383  ;;  %v10496_v10 = vcombine.high %v2338_v15, %v2346_v61  ;;  %v2330_v23 = vld [vmem:[#allocation8 + $0x6f0] sm:$0xff] }
 0x478   :  { %v9815_v20 = vadd.f32 1.0, %v11384_v32  ;;  %9336 = vmatpush1.bf16.msra.mxu1 %v11069_v0  ;;  %v9846_v46 = vmul.f32 %v9814_v38, %v9718_v37  ;;  %v2322_v0 = vld [vmem:[#allocation8 + $0x6b0] sm:$0xff]  ;;  %v11246_v38 = vcombine.high %v3089_v19, %v3097_v27 }
 0x479   :  { %v11386_v56 = vpop.eup %11385  ;;  %9379 = vmatpush1.bf16.msra.mxu0 %v10303_v14  ;;  %9337 = vmatprep.subr.bf16.mxu1 %v11054_v28  ;;  %v11261_v14 = vcombine.low %v3105_v8, %v3113_v12  ;;  %v10495_v28 = vcombine.low %v2338_v15, %v2346_v61  ;;  %v2306_v32 = vld [vmem:[#allocation8 + $0x630] sm:$0xff]  ;;  %v10479_v37 = vcombine.low %v2322_v0, %v2330_v23  ;;  %v3009_v12 = vld [vmem:[#allocation8 + $0x1c28] sm:$0xff] }
 0x47a   :  { %v9847_v22 = vmul.f32 %v9815_v20, %v9719_v17  ;;  %v9830_v42 = vadd.f32 1.0, %v11386_v56  ;;  %9380 = vmatprep.subr.bf16.mxu0 %v10288_v30  ;;  %v10480_v30 = vcombine.high %v2322_v0, %v2330_v23  ;;  %v11230_v17 = vcombine.high %v3073_v33, %v3081_v53  ;;  %v3065_v56 = vld [vmem:[#allocation8 + $0x1de8] sm:$0xff]  ;;  %v2242_v61 = vld [vmem:[#allocation8 + $0x430] sm:$0xff] }
 0x47b   :  { %v11388_v31 = vpop.eup %11387  ;;  %v10464_v20 = vcombine.high %v2306_v32, %v2314_v36  ;;  %v3017_v15 = vld [vmem:[#allocation8 + $0x1c68] sm:$0xff]  ;;  %v2482_v19 = vld [vmem:[#allocation8 + $0xbb0] sm:$0xff] }
 0x47c   :  { %v11302_v16 = vpack.c.bf16 %v9847_v22, %v9846_v46  ;;  %v9831_v39 = vadd.f32 1.0, %v11388_v31  ;;  %9338 = vmatpush1.bf16.msra.mxu1 %v11053_v59  ;;  %v9862_v2 = vmul.f32 %v9830_v42, %v9734_v25  ;;  %v3057_v59 = vld [vmem:[#allocation8 + $0x1da8] sm:$0xff]  ;;  %v11229_v46 = vcombine.low %v3073_v33, %v3081_v53  ;;  %v2274_v31 = vld [vmem:[#allocation8 + $0x530] sm:$0xff] }
 0x47d   :  { %9381 = vmatpush1.bf16.msra.mxu0 %v10287_v60  ;;  %9339 = vmatprep.subr.bf16.mxu1 %v11038_v13  ;;  %v2290_v60 = vld [vmem:[#allocation8 + $0x5b0] sm:$0xff]  ;;  %v10463_v22 = vcombine.low %v2306_v32, %v2314_v36  ;;  %v11214_v42 = vcombine.high %v3057_v59, %v3065_v56  ;;  %v11213_v3 = vcombine.low %v3057_v59, %v3065_v56 }
 0x47e   :  { %9971 = vst [vmem:[#allocation11 + $0x18] sm:$0xff] %v11302_v16  ;;  %v9863_v40 = vmul.f32 %v9831_v39, %v9735_v48  ;;  %9382 = vmatprep.subr.bf16.mxu0 %v10272_v52  ;;  %v2298_v13 = vld [vmem:[#allocation8 + $0x5f0] sm:$0xff]  ;;  %v11198_v16 = vcombine.high %v3041_v63, %v3049_v50  ;;  %v3025_v48 = vld [vmem:[#allocation8 + $0x1ca8] sm:$0xff] }
 0x47f   :  { %v10448_v52 = vcombine.high %v2290_v60, %v2298_v13  ;;  %v10447_v7 = vcombine.low %v2290_v60, %v2298_v13  ;;  %v3033_v39 = vld [vmem:[#allocation8 + $0x1ce8] sm:$0xff]  ;;  %v2490_v27 = vld [vmem:[#allocation8 + $0xbf0] sm:$0xff] }
 0x480   :  { %v11310_v18 = vpack.c.bf16 %v9863_v40, %v9862_v2  ;;  %9340 = vmatpush1.bf16.msra.mxu1 %v11037_v4  ;;  %v2282_v4 = vld [vmem:[#allocation8 + $0x570] sm:$0xff]  ;;  %v11197_v2 = vcombine.low %v3041_v63, %v3049_v50  ;;  %v10639_v32 = vcombine.low %v2482_v19, %v2490_v27 }
 0x481   :  { %9383 = vmatpush1.bf16.msra.mxu0 %v10271_v57  ;;  %9341 = vmatprep.subr.bf16.mxu1 %v11278_v9  ;;  %v10432_v25 = vcombine.high %v2274_v31, %v2282_v4  ;;  %v2258_v57 = vld [vmem:[#allocation8 + $0x4b0] sm:$0xff]  ;;  %v10431_v40 = vcombine.low %v2274_v31, %v2282_v4 }
 0x482   :  { %9979 = vst [vmem:[#allocation11 + $0x58] sm:$0xff] %v11310_v18  ;;  %9384 = vmatprep.subr.bf16.mxu0 %v10512_v49  ;;  %v2266_v9 = vld [vmem:[#allocation8 + $0x4f0] sm:$0xff]  ;;  %v11182_v49 = vcombine.high %v3025_v48, %v3033_v39 }
 0x483   :  { %v10416_v8 = vcombine.high %v2258_v57, %v2266_v9  ;;  %v2250_v18 = vld [vmem:[#allocation8 + $0x470] sm:$0xff] }
 0x484   :  { %9342 = vmatpush2.bf16.msra.mxu1 %v11277_v45  ;;  %v11181_v45 = vcombine.low %v3025_v48, %v3033_v39  ;;  %v2738_v0 = vld [vmem:[#allocation8 + $0x13b0] sm:$0xff] }
 0x485   :  { %9385 = vmatpush2.bf16.msra.mxu0 %v10511_v54  ;;  %9343 = vmatprep.subr.bf16.mxu1 %v11262_v55  ;;  %v10415_v54 = vcombine.low %v2258_v57, %v2266_v9  ;;  %v11166_v55 = vcombine.high %v3009_v12, %v3017_v15  ;;  %v2746_v23 = vld [vmem:[#allocation8 + $0x13f0] sm:$0xff] }
 0x486   :  { %9386 = vmatprep.subr.bf16.mxu0 %v10496_v10  ;;  %v10400_v10 = vcombine.high %v2242_v61, %v2250_v18  ;;  %v2466_v33 = vld [vmem:[#allocation8 + $0xb30] sm:$0xff] }
 0x487   :  { %v2474_v53 = vld [vmem:[#allocation8 + $0xb70] sm:$0xff] }
 0x488   :  { %9344 = vmatpush2.bf16.msra.mxu1 %v11261_v14  ;;  %v11165_v14 = vcombine.low %v3009_v12, %v3017_v15  ;;  %v2722_v36 = vld [vmem:[#allocation8 + $0x1330] sm:$0xff] }
 0x489   :  { %9387 = vmatpush2.bf16.msra.mxu0 %v10495_v28  ;;  %9345 = vmatprep.subr.bf16.mxu1 %v11246_v38  ;;  %v10399_v28 = vcombine.low %v2242_v61, %v2250_v18  ;;  %v10640_v38 = vcombine.high %v2482_v19, %v2490_v27  ;;  %v2458_v59 = vld [vmem:[#allocation8 + $0xaf0] sm:$0xff] }
 0x48a   :  { %9388 = vmatprep.subr.bf16.mxu0 %v10480_v30  ;;  %v10896_v30 = vcombine.high %v2738_v0, %v2746_v23  ;;  %v2706_v60 = vld [vmem:[#allocation8 + $0x12b0] sm:$0xff] }
 0x48b   :  { %v2714_v13 = vld [vmem:[#allocation8 + $0x12f0] sm:$0xff] }
 0x48c   :  { %9346 = vmatpush2.bf16.msra.mxu1 %v11245_v43  ;;  %v2730_v43 = vld [vmem:[#allocation8 + $0x1370] sm:$0xff] }
 0x48d   :  { %9389 = vmatpush2.bf16.msra.mxu0 %v10479_v37  ;;  %9347 = vmatprep.subr.bf16.mxu1 %v11230_v17  ;;  %v10895_v37 = vcombine.low %v2738_v0, %v2746_v23  ;;  %v10624_v17 = vcombine.high %v2466_v33, %v2474_v53  ;;  %v10880_v56 = vcombine.high %v2722_v36, %v2730_v43  ;;  %v2434_v63 = vld [vmem:[#allocation8 + $0xa30] sm:$0xff] }
 0x48e   :  { %9390 = vmatprep.subr.bf16.mxu0 %v10464_v20  ;;  %v2450_v20 = vld [vmem:[#allocation8 + $0xab0] sm:$0xff] }
 0x48f   :  { %v2442_v50 = vld [vmem:[#allocation8 + $0xa70] sm:$0xff] }
 0x490   :  { %9348 = vmatpush2.bf16.msra.mxu1 %v11229_v46  ;;  %v10623_v46 = vcombine.low %v2466_v33, %v2474_v53  ;;  %v2690_v31 = vld [vmem:[#allocation8 + $0x1230] sm:$0xff] }
 0x491   :  { %9391 = vmatpush2.bf16.msra.mxu0 %v10463_v22  ;;  %9349 = vmatprep.subr.bf16.mxu1 %v11214_v42  ;;  %v10879_v22 = vcombine.low %v2722_v36, %v2730_v43  ;;  %v10608_v42 = vcombine.high %v2450_v20, %v2458_v59  ;;  %v2698_v4 = vld [vmem:[#allocation8 + $0x1270] sm:$0xff] }
 0x492   :  { %9392 = vmatprep.subr.bf16.mxu0 %v10448_v52  ;;  %v10864_v52 = vcombine.high %v2706_v60, %v2714_v13  ;;  %v2418_v48 = vld [vmem:[#allocation8 + $0x9b0] sm:$0xff] }
 0x493   :  { %v2426_v39 = vld [vmem:[#allocation8 + $0x9f0] sm:$0xff] }
 0x494   :  { %9350 = vmatpush2.bf16.msra.mxu1 %v11213_v3  ;;  %v10607_v3 = vcombine.low %v2450_v20, %v2458_v59  ;;  %v2674_v57 = vld [vmem:[#allocation8 + $0x11b0] sm:$0xff] }
 0x495   :  { %9393 = vmatpush2.bf16.msra.mxu0 %v10447_v7  ;;  %9351 = vmatprep.subr.bf16.mxu1 %v11198_v16  ;;  %v10863_v7 = vcombine.low %v2706_v60, %v2714_v13  ;;  %v10592_v16 = vcombine.high %v2434_v63, %v2442_v50  ;;  %v2682_v9 = vld [vmem:[#allocation8 + $0x11f0] sm:$0xff] }
 0x496   :  { %9394 = vmatprep.subr.bf16.mxu0 %v10432_v25  ;;  %v10848_v25 = vcombine.high %v2690_v31, %v2698_v4  ;;  %v2402_v12 = vld [vmem:[#allocation8 + $0x930] sm:$0xff] }
 0x497   :  { %v2410_v15 = vld [vmem:[#allocation8 + $0x970] sm:$0xff] }
 0x498   :  { %9352 = vmatpush2.bf16.msra.mxu1 %v11197_v2  ;;  %v10591_v2 = vcombine.low %v2434_v63, %v2442_v50  ;;  %v2658_v61 = vld [vmem:[#allocation8 + $0x1130] sm:$0xff] }
 0x499   :  { %9395 = vmatpush2.bf16.msra.mxu0 %v10431_v40  ;;  %9353 = vmatprep.subr.bf16.mxu1 %v11182_v49  ;;  %v10847_v40 = vcombine.low %v2690_v31, %v2698_v4  ;;  %v10576_v49 = vcombine.high %v2418_v48, %v2426_v39  ;;  %v2666_v18 = vld [vmem:[#allocation8 + $0x1170] sm:$0xff] }
 0x49a   :  { %9396 = vmatprep.subr.bf16.mxu0 %v10416_v8  ;;  %v10832_v8 = vcombine.high %v2674_v57, %v2682_v9  ;;  %v2386_v19 = vld [vmem:[#allocation8 + $0x8b0] sm:$0xff] }
 0x49b   :  { %v2394_v27 = vld [vmem:[#allocation8 + $0x8f0] sm:$0xff] }
 0x49c   :  { %9354 = vmatpush2.bf16.msra.mxu1 %v11181_v45  ;;  %v10575_v45 = vcombine.low %v2418_v48, %v2426_v39  ;;  %v2642_v0 = vld [vmem:[#allocation8 + $0x10b0] sm:$0xff]  ;;  %v10543_v43 = vcombine.low %v2386_v19, %v2394_v27 }
 0x49d   :  { %9397 = vmatpush2.bf16.msra.mxu0 %v10415_v54  ;;  %9355 = vmatprep.subr.bf16.mxu1 %v11166_v55  ;;  %v10831_v54 = vcombine.low %v2674_v57, %v2682_v9  ;;  %v10560_v55 = vcombine.high %v2402_v12, %v2410_v15  ;;  %v2650_v23 = vld [vmem:[#allocation8 + $0x10f0] sm:$0xff] }
 0x49e   :  { %9398 = vmatprep.subr.bf16.mxu0 %v10400_v10  ;;  %v10816_v10 = vcombine.high %v2658_v61, %v2666_v18  ;;  %v2370_v33 = vld [vmem:[#allocation8 + $0x830] sm:$0xff] }
 0x49f   :  { %v2378_v53 = vld [vmem:[#allocation8 + $0x870] sm:$0xff] }
 0x4a0   :  { %9356 = vmatpush2.bf16.msra.mxu1 %v11165_v14  ;;  %v10559_v14 = vcombine.low %v2402_v12, %v2410_v15  ;;  %v2634_v36 = vld [vmem:[#allocation8 + $0x1070] sm:$0xff] }
 0x4a1   :  { %9399 = vmatpush2.bf16.msra.mxu0 %v10399_v28  ;;  %9411 = vmatprep.subr.bf16.mxu1 %v10640_v38  ;;  %v10815_v28 = vcombine.low %v2658_v61, %v2666_v18  ;;  %v10544_v38 = vcombine.high %v2386_v19, %v2394_v27  ;;  %v2610_v59 = vld [vmem:[#allocation8 + $0xfb0] sm:$0xff] }
 0x4a2   :  { %9454 = vmatprep.subr.bf16.mxu0 %v10896_v30  ;;  %v10800_v30 = vcombine.high %v2642_v0, %v2650_v23  ;;  %v2866_v60 = vld [vmem:[#allocation8 + $0x17b0] sm:$0xff] }
 0x4a3   :  { %9358 = vmatmul.mubr.bf16.vlgmr.msra.gmra.mxu1 %v11761_v44  ;;  %v2874_v13 = vld [vmem:[#allocation8 + $0x17f0] sm:$0xff] }
 0x4a4   :  { %9401 = vmatmul.mubr.bf16.vlgmr.msra.gmra.mxu0 %v11693_v34  ;;  %9412 = vmatpush1.bf16.msra.mxu1 %v10639_v32  ;;  %v2626_v32 = vld [vmem:[#allocation8 + $0x1030] sm:$0xff] }
 0x4a5   :  { %9443 = vmatprep.mubr.bf16.mxu1 %v11702_v1  ;;  %9455 = vmatpush1.bf16.msra.mxu0 %v10895_v37  ;;  %v10799_v37 = vcombine.low %v2642_v0, %v2650_v23  ;;  %v10784_v20 = vcombine.high %v2626_v32, %v2634_v36  ;;  %v2594_v63 = vld [vmem:[#allocation8 + $0xf30] sm:$0xff] }
 0x4a6   :  { %9486 = vmatprep.mubr.bf16.mxu0 %v11738_v6  ;;  %9413 = vmatprep.subr.bf16.mxu1 %v10624_v17  ;;  %v10528_v17 = vcombine.high %v2370_v33, %v2378_v53  ;;  %v2602_v50 = vld [vmem:[#allocation8 + $0xf70] sm:$0xff] }
 0x4a7   :  { %9456 = vmatprep.subr.bf16.mxu0 %v10880_v56  ;;  %v2618_v56 = vld [vmem:[#allocation8 + $0xff0] sm:$0xff] }
 0x4a8   :  { %9414 = vmatpush1.bf16.msra.mxu1 %v10623_v46  ;;  %v10527_v46 = vcombine.low %v2370_v33, %v2378_v53  ;;  %v2850_v31 = vld [vmem:[#allocation8 + $0x1730] sm:$0xff] }
 0x4a9   :  { %9457 = vmatpush1.bf16.msra.mxu0 %v10879_v22  ;;  %9415 = vmatprep.subr.bf16.mxu1 %v10608_v42  ;;  %v10783_v22 = vcombine.low %v2626_v32, %v2634_v36  ;;  %v10768_v42 = vcombine.high %v2610_v59, %v2618_v56  ;;  %v2858_v4 = vld [vmem:[#allocation8 + $0x1770] sm:$0xff] }
 0x4aa   :  { %9458 = vmatprep.subr.bf16.mxu0 %v10864_v52  ;;  %v11024_v52 = vcombine.high %v2866_v60, %v2874_v13  ;;  %v2578_v48 = vld [vmem:[#allocation8 + $0xeb0] sm:$0xff] }
 0x4ab   :  { %v2586_v39 = vld [vmem:[#allocation8 + $0xef0] sm:$0xff] }
 0x4ac   :  { %9416 = vmatpush1.bf16.msra.mxu1 %v10607_v3  ;;  %v10767_v3 = vcombine.low %v2610_v59, %v2618_v56  ;;  %v2834_v57 = vld [vmem:[#allocation8 + $0x16b0] sm:$0xff] }
 0x4ad   :  { %9459 = vmatpush1.bf16.msra.mxu0 %v10863_v7  ;;  %9417 = vmatprep.subr.bf16.mxu1 %v10592_v16  ;;  %v11023_v7 = vcombine.low %v2866_v60, %v2874_v13  ;;  %v10752_v16 = vcombine.high %v2594_v63, %v2602_v50  ;;  %v2842_v9 = vld [vmem:[#allocation8 + $0x16f0] sm:$0xff] }
 0x4ae   :  { %9460 = vmatprep.subr.bf16.mxu0 %v10848_v25  ;;  %v11008_v25 = vcombine.high %v2850_v31, %v2858_v4  ;;  %v2562_v12 = vld [vmem:[#allocation8 + $0xe30] sm:$0xff] }
 0x4af   :  { %v2570_v15 = vld [vmem:[#allocation8 + $0xe70] sm:$0xff] }
 0x4b0   :  { %9418 = vmatpush1.bf16.msra.mxu1 %v10591_v2  ;;  %v10751_v2 = vcombine.low %v2594_v63, %v2602_v50  ;;  %v2818_v61 = vld [vmem:[#allocation8 + $0x1630] sm:$0xff]  ;;  %v9101_v50 = vpop.f32.mrf.mxu1 }
 0x4b1   :  { %9461 = vmatpush1.bf16.msra.mxu0 %v10847_v40  ;;  %9419 = vmatprep.subr.bf16.mxu1 %v10576_v49  ;;  %v11007_v40 = vcombine.low %v2850_v31, %v2858_v4  ;;  %v10736_v49 = vcombine.high %v2578_v48, %v2586_v39  ;;  %v2826_v18 = vld [vmem:[#allocation8 + $0x1670] sm:$0xff] }
 0x4b2   :  { %9462 = vmatprep.subr.bf16.mxu0 %v10832_v8  ;;  %v10992_v8 = vcombine.high %v2834_v57, %v2842_v9  ;;  %v2546_v19 = vld [vmem:[#allocation8 + $0xdb0] sm:$0xff] }
 0x4b3   :  { %v2554_v27 = vld [vmem:[#allocation8 + $0xdf0] sm:$0xff] }
 0x4b4   :  { %9420 = vmatpush1.bf16.msra.mxu1 %v10575_v45  ;;  %v10735_v45 = vcombine.low %v2578_v48, %v2586_v39  ;;  %v2802_v0 = vld [vmem:[#allocation8 + $0x15b0] sm:$0xff] }
 0x4b5   :  { %9463 = vmatpush1.bf16.msra.mxu0 %v10831_v54  ;;  %9421 = vmatprep.subr.bf16.mxu1 %v10560_v55  ;;  %v10991_v54 = vcombine.low %v2834_v57, %v2842_v9  ;;  %v10720_v55 = vcombine.high %v2562_v12, %v2570_v15  ;;  %v2810_v23 = vld [vmem:[#allocation8 + $0x15f0] sm:$0xff] }
 0x4b6   :  { %9464 = vmatprep.subr.bf16.mxu0 %v10816_v10  ;;  %v10976_v10 = vcombine.high %v2818_v61, %v2826_v18  ;;  %v10960_v33 = vcombine.high %v2802_v0, %v2810_v23  ;;  %v2530_v53 = vld [vmem:[#allocation8 + $0xd30] sm:$0xff] }
 0x4b7   :  { %v2538_v32 = vld [vmem:[#allocation8 + $0xd70] sm:$0xff] }
 0x4b8   :  { %9422 = vmatpush1.bf16.msra.mxu1 %v10559_v14  ;;  %v10719_v14 = vcombine.low %v2562_v12, %v2570_v15  ;;  %v2786_v36 = vld [vmem:[#allocation8 + $0x1530] sm:$0xff]  ;;  %v10688_v59 = vcombine.high %v2530_v53, %v2538_v32 }
 0x4b9   :  { %9465 = vmatpush1.bf16.msra.mxu0 %v10815_v28  ;;  %9423 = vmatprep.subr.bf16.mxu1 %v10544_v38  ;;  %v9058_v28 = vpop.f32.mrf.mxu0  ;;  %v10975_v38 = vcombine.low %v2818_v61, %v2826_v18  ;;  %v2514_v60 = vld [vmem:[#allocation8 + $0xcb0] sm:$0xff] }
 0x4ba   :  { %9466 = vmatprep.subr.bf16.mxu0 %v10800_v30  ;;  %v10704_v30 = vcombine.high %v2546_v19, %v2554_v27  ;;  %v2522_v13 = vld [vmem:[#allocation8 + $0xcf0] sm:$0xff] }
 0x4bb   :  { %v10672_v4 = vcombine.high %v2514_v60, %v2522_v13  ;;  %v2762_v48 = vld [vmem:[#allocation8 + $0x1470] sm:$0xff]  ;;  %v10671_v57 = vcombine.low %v2514_v60, %v2522_v13 }
 0x4bc   :  { %9424 = vmatpush1.bf16.msra.mxu1 %v10543_v43  ;;  %v2794_v43 = vld [vmem:[#allocation8 + $0x1570] sm:$0xff] }
 0x4bd   :  { %9467 = vmatpush1.bf16.msra.mxu0 %v10799_v37  ;;  %9425 = vmatprep.subr.bf16.mxu1 %v10528_v17  ;;  %v10703_v37 = vcombine.low %v2546_v19, %v2554_v27  ;;  %v9060_v17 = vpop.f32.mrf.mxu0  ;;  %v10944_v56 = vcombine.high %v2786_v36, %v2794_v43  ;;  %v10943_v31 = vcombine.low %v2786_v36, %v2794_v43  ;;  %v2994_v15 = vld [vmem:[#allocation8 + $0x1bb0] sm:$0xff]  ;;  %v2211_v36 = vld [vmem:[#allocation8 + $0x338] sm:$0xff] }
 0x4be   :  { %9468 = vmatprep.subr.bf16.mxu0 %v10784_v20  ;;  %v10959_v20 = vcombine.low %v2802_v0, %v2810_v23  ;;  %v3002_v61 = vld [vmem:[#allocation8 + $0x1bf0] sm:$0xff] }
 0x4bf   :  { %v9062_v63 = vpop.f32.mrf.mxu0  ;;  %v11152_v27 = vcombine.high %v2994_v15, %v3002_v61  ;;  %v2962_v60 = vld [vmem:[#allocation8 + $0x1ab0] sm:$0xff] }
 0x4c0   :  { %9426 = vmatpush1.bf16.msra.mxu1 %v10527_v46  ;;  %v2770_v46 = vld [vmem:[#allocation8 + $0x14b0] sm:$0xff] }
 0x4c1   :  { %9469 = vmatpush1.bf16.msra.mxu0 %v10783_v22  ;;  %9427 = vmatprep.subr.bf16.mxu1 %v10768_v42  ;;  %v2778_v22 = vld [vmem:[#allocation8 + $0x14f0] sm:$0xff]  ;;  %v10687_v42 = vcombine.low %v2530_v53, %v2538_v32  ;;  %v9064_v9 = vpop.f32.mrf.mxu0  ;;  %v11151_v32 = vcombine.low %v2994_v15, %v3002_v61  ;;  %v2179_v61 = vld [vmem:[#allocation8 + $0x238] sm:$0xff] }
 0x4c2   :  { %9470 = vmatprep.subr.bf16.mxu0 %v11024_v52  ;;  %v11901_v52 = vld [vmem:[#allocation10 + $0x8] sm:$0xff]  ;;  %v2970_v13 = vld [vmem:[#allocation8 + $0x1af0] sm:$0xff] }
 0x4c3   :  { %v3171_v39 = vrot.slane %v11901_v52, %v11658_v47  ;;  %v9144_v18 = vpop.f32.mrf.mxu0  ;;  %v11119_v15 = vcombine.low %v2962_v60, %v2970_v13 }
 0x4c4   :  { %9428 = vmatpush2.bf16.msra.mxu1 %v10767_v3  ;;  %v10928_v3 = vcombine.high %v2770_v46, %v2778_v22 }
 0x4c5   :  { %9471 = vmatpush2.bf16.msra.mxu0 %v11023_v7  ;;  %9429 = vmatprep.subr.bf16.mxu1 %v10752_v16  ;;  %v2498_v7 = vld [vmem:[#allocation8 + $0xc30] sm:$0xff] }
 0x4c6   :  { %9472 = vmatprep.subr.bf16.mxu0 %v11008_v25  ;;  %v2506_v16 = vld [vmem:[#allocation8 + $0xc70] sm:$0xff] }
 0x4c7   :  { %v2754_v25 = vld [vmem:[#allocation8 + $0x1430] sm:$0xff]  ;;  %v10655_v47 = vcombine.low %v2498_v7, %v2506_v16 }
 0x4c8   :  { %9430 = vmatpush2.bf16.msra.mxu1 %v10751_v2  ;;  %v9103_v2 = vpop.f32.mrf.mxu1  ;;  %v10912_v12 = vcombine.high %v2754_v25, %v2762_v48  ;;  %v10911_v19 = vcombine.low %v2754_v25, %v2762_v48  ;;  %v11120_v48 = vcombine.high %v2962_v60, %v2970_v13  ;;  %v2898_v13 = vld [vmem:[#allocation8 + $0x18b0] sm:$0xff] }
 0x4c9   :  { %9473 = vmatpush2.bf16.msra.mxu0 %v11007_v40  ;;  %9431 = vmatprep.subr.bf16.mxu1 %v10736_v49  ;;  %v10927_v40 = vcombine.low %v2770_v46, %v2778_v22  ;;  %v10656_v49 = vcombine.high %v2498_v7, %v2506_v16 }
 0x4ca   :  { %9474 = vmatprep.subr.bf16.mxu0 %v10992_v8  ;;  %v3175_v8 = vrot.slane %v11901_v52, %v11635_v41  ;;  %v9146_v41 = vpop.f32.mrf.mxu0 }
 0x4cc   :  { %9432 = vmatpush2.bf16.msra.mxu1 %v10735_v45  ;;  %v2227_v45 = vld [vmem:[#allocation8 + $0x3b8] sm:$0xff]  ;;  %v9061_v0 = vadd.f32 %v9060_v17, %v3175_v8  ;;  %v9148_v46 = vpop.f32.mrf.mxu0 }
 0x4cd   :  { %9475 = vmatpush2.bf16.msra.mxu0 %v10991_v54  ;;  %9433 = vmatprep.subr.bf16.mxu1 %v10720_v55  ;;  %v2235_v54 = vld [vmem:[#allocation8 + $0x3f8] sm:$0xff]  ;;  %v9059_v55 = vadd.f32 %v9058_v28, %v3171_v39 }
 0x4ce   :  { %9476 = vmatprep.subr.bf16.mxu0 %v10976_v10  ;;  %v9105_v10 = vpop.f32.mrf.mxu1  ;;  %v9104_v53 = vadd.f32 %v9103_v2, %v9061_v0  ;;  %v2219_v28 = vld [vmem:[#allocation8 + $0x378] sm:$0xff] }
 0x4cf   :  { %v9102_v23 = vadd.f32 %v9101_v50, %v9059_v55  ;;  %v2195_v50 = vld [vmem:[#allocation8 + $0x2b8] sm:$0xff]  ;;  %v10369_v25 = vcombine.low %v2211_v36, %v2219_v28 }
 0x4d0   :  { %9434 = vmatpush2.bf16.msra.mxu1 %v10719_v14  ;;  %v10386_v14 = vcombine.high %v2227_v45, %v2235_v54  ;;  %v9107_v43 = vpop.f32.mrf.mxu1 }
 0x4d1   :  { %9477 = vmatpush2.bf16.msra.mxu0 %v10975_v38  ;;  %9435 = vmatprep.subr.bf16.mxu1 %v10704_v30  ;;  %v2978_v38 = vld [vmem:[#allocation8 + $0x1b30] sm:$0xff] }
 0x4d2   :  { %9478 = vmatprep.subr.bf16.mxu0 %v10960_v33  ;;  %v2986_v30 = vld [vmem:[#allocation8 + $0x1b70] sm:$0xff]  ;;  %v9063_v33 = vadd.f32 %v9062_v63, %v3171_v39  ;;  %v10370_v63 = vcombine.high %v2211_v36, %v2219_v28 }
 0x4d3   :  { %v11136_v17 = vcombine.high %v2978_v38, %v2986_v30  ;;  %v2914_v28 = vld [vmem:[#allocation8 + $0x1930] sm:$0xff] }
 0x4d4   :  { %9436 = vmatpush2.bf16.msra.mxu1 %v10703_v37  ;;  %v10385_v37 = vcombine.low %v2227_v45, %v2235_v54 }
 0x4d5   :  { %9479 = vmatpush2.bf16.msra.mxu0 %v10959_v20  ;;  %9437 = vmatprep.subr.bf16.mxu1 %v10688_v59  ;;  %v9065_v20 = vadd.f32 %v9064_v9, %v3175_v8  ;;  %v9145_v59 = vadd.f32 %v9144_v18, %v9102_v23  ;;  %v9150_v8 = vpop.f32.mrf.mxu0  ;;  %v2187_v18 = vld [vmem:[#allocation8 + $0x278] sm:$0xff]  ;;  %v2930_v23 = vld [vmem:[#allocation8 + $0x19b0] sm:$0xff] }
 0x4d6   :  { %9480 = vmatprep.subr.bf16.mxu0 %v10944_v56  ;;  %v9106_v56 = vadd.f32 %v9105_v10, %v9063_v33  ;;  %v10338_v0 = vcombine.high %v2179_v61, %v2187_v18 }
 0x4d8   :  { %9438 = vmatpush2.bf16.msra.mxu1 %v10687_v42  ;;  %v11135_v42 = vcombine.low %v2978_v38, %v2986_v30  ;;  %v9149_v39 = vadd.f32 %v9148_v46, %v9106_v56  ;;  %v2171_v38 = vld [vmem:[#allocation8 + $0x1f8] sm:$0xff]  ;;  %v2906_v46 = vld [vmem:[#allocation8 + $0x18f0] sm:$0xff] }
 0x4d9   :  { %9481 = vmatpush2.bf16.msra.mxu0 %v10943_v31  ;;  %9439 = vmatprep.subr.bf16.mxu1 %v10672_v4  ;;  %v2203_v31 = vld [vmem:[#allocation8 + $0x2f8] sm:$0xff]  ;;  %v9147_v4 = vadd.f32 %v9146_v41, %v9104_v53  ;;  %v10337_v53 = vcombine.low %v2179_v61, %v2187_v18 }
 0x4da   :  { %9482 = vmatprep.subr.bf16.mxu0 %v10928_v3  ;;  %v9108_v3 = vadd.f32 %v9107_v43, %v9065_v20  ;;  %v10354_v2 = vcombine.high %v2195_v50, %v2203_v31  ;;  %v2163_v41 = vld [vmem:[#allocation8 + $0x1b8] sm:$0xff]  ;;  %v2922_v43 = vld [vmem:[#allocation8 + $0x1970] sm:$0xff] }
 0x4db   :  { %v10322_v36 = vcombine.high %v2163_v41, %v2171_v38  ;;  %v2155_v20 = vld [vmem:[#allocation8 + $0x178] sm:$0xff]  ;;  %v10321_v56 = vcombine.low %v2163_v41, %v2171_v38 }
 0x4dc   :  { %9440 = vmatpush2.bf16.msra.mxu1 %v10671_v57  ;;  %v9151_v45 = vadd.f32 %v9150_v8, %v9108_v3 }
 0x4dd   :  { %9483 = vmatpush2.bf16.msra.mxu0 %v10927_v40  ;;  %9441 = vmatprep.subr.bf16.mxu1 %v10656_v49  ;;  %v2946_v40 = vld [vmem:[#allocation8 + $0x1a30] sm:$0xff] }
 0x4de   :  { %9484 = vmatprep.subr.bf16.mxu0 %v10912_v12  ;;  %v2954_v49 = vld [vmem:[#allocation8 + $0x1a70] sm:$0xff] }
 0x4df   :  { %v11104_v10 = vcombine.high %v2946_v40, %v2954_v49  ;;  %v11103_v33 = vcombine.low %v2946_v40, %v2954_v49 }
 0x4e0   :  { %9442 = vmatpush2.bf16.msra.mxu1 %v10655_v47  ;;  %v10353_v47 = vcombine.low %v2195_v50, %v2203_v31 }
 0x4e1   :  { %9485 = vmatpush2.bf16.msra.mxu0 %v10911_v19  ;;  %9497 = vmatprep.subr.bf16.mxu1 %v11152_v27 }
 0x4e2   :  { %9540 = vmatprep.subr.bf16.mxu0 %v10386_v14  ;;  %v2938_v14 = vld [vmem:[#allocation8 + $0x19f0] sm:$0xff] }
 0x4e3   :  { %v9187_v22 = vpop.f32.mrf.mxu1  ;;  %9444 = vmatmul.mubr.bf16.vlgmr.msra.gmra.mxu1 %v11710_v58 }
 0x4e4   :  { %v11908_v7 = vadd.f32 %v9187_v22, %v9145_v59  ;;  %9487 = vmatmul.mubr.bf16.vlgmr.msra.gmra.mxu0 %v11742_v35  ;;  %9498 = vmatpush1.bf16.msra.mxu1 %v11151_v32  ;;  %v11088_v32 = vcombine.high %v2930_v23, %v2938_v14  ;;  %v11087_v59 = vcombine.low %v2930_v23, %v2938_v14  ;;  %v2131_v22 = vld [vmem:[#allocation8 + $0xb8] sm:$0xff] }
 0x4e5   :  { %9529 = vmatprep.mubr.bf16.mxu1 %v11759_v51  ;;  %9541 = vmatpush1.bf16.msra.mxu0 %v10385_v37  ;;  %v9189_v16 = vpop.f32.mrf.mxu1  ;;  %v2147_v37 = vld [vmem:[#allocation8 + $0x138] sm:$0xff] }
 0x4e6   :  { %v9752_v57 = vmul.f32 0.70710677, %v11908_v7  ;;  %9572 = vmatprep.mubr.bf16.mxu0 %v11672_v21  ;;  %v11914_v9 = vadd.f32 %v9189_v16, %v9147_v4  ;;  %9499 = vmatprep.subr.bf16.mxu1 %v11136_v17  ;;  %v11072_v17 = vcombine.high %v2914_v28, %v2922_v43  ;;  %v10306_v60 = vcombine.high %v2147_v37, %v2155_v20  ;;  %v2363_v14 = vld [vmem:[#allocation8 + $0x7f8] sm:$0xff] }
 0x4e7   :  { %v9191_v12 = vpop.f32.mrf.mxu1  ;;  %9542 = vmatprep.subr.bf16.mxu0 %v10370_v63  ;;  %v11071_v63 = vcombine.low %v2914_v28, %v2922_v43  ;;  %v10305_v31 = vcombine.low %v2147_v37, %v2155_v20  ;;  %v11056_v4 = vcombine.high %v2898_v13, %v2906_v46  ;;  %v9720_v40 = vmul.f32 0.5, %v11908_v7  ;;  %v2355_v7 = vld [vmem:[#allocation8 + $0x7b8] sm:$0xff]  ;;  %v3106_v43 = vld [vmem:[#allocation8 + $0x1f30] sm:$0xff] }
 0x4e8   :  { %11389 = verf.f32 %v9752_v57  ;;  %v9753_v54 = vmul.f32 0.70710677, %v11914_v9  ;;  %v11917_v55 = vadd.f32 %v9191_v12, %v9149_v39  ;;  %9500 = vmatpush1.bf16.msra.mxu1 %v11135_v42  ;;  %v2139_v42 = vld [vmem:[#allocation8 + $0xf8] sm:$0xff]  ;;  %v9721_v49 = vmul.f32 0.5, %v11914_v9  ;;  %v3114_v37 = vld [vmem:[#allocation8 + $0x1f70] sm:$0xff] }
 0x4e9   :  { %9543 = vmatpush1.bf16.msra.mxu0 %v10369_v25  ;;  %v9193_v21 = vpop.f32.mrf.mxu1  ;;  %9501 = vmatprep.subr.bf16.mxu1 %v11120_v48  ;;  %v10290_v16 = vcombine.high %v2131_v22, %v2139_v42  ;;  %v2882_v25 = vld [vmem:[#allocation8 + $0x1830] sm:$0xff]  ;;  %v2115_v57 = vld [vmem:[#allocation8 + $0x38] sm:$0xff]  ;;  %v11055_v12 = vcombine.low %v2898_v13, %v2906_v46  ;;  %v10289_v61 = vcombine.low %v2131_v22, %v2139_v42 }
 0x4ea   :  { %11391 = verf.f32 %v9753_v54  ;;  %v9768_v19 = vmul.f32 0.70710677, %v11917_v55  ;;  %v11920_v27 = vadd.f32 %v9193_v21, %v9151_v45  ;;  %9544 = vmatprep.subr.bf16.mxu0 %v10354_v2  ;;  %v2890_v48 = vld [vmem:[#allocation8 + $0x1870] sm:$0xff]  ;;  %v2123_v2 = vld [vmem:[#allocation8 + $0x78] sm:$0xff]  ;;  %v9736_v41 = vmul.f32 0.5, %v11917_v55 }
 0x4eb   :  { %v11040_v18 = vcombine.high %v2882_v25, %v2890_v48  ;;  %v11039_v23 = vcombine.low %v2882_v25, %v2890_v48  ;;  %v10514_v28 = vcombine.high %v2355_v7, %v2363_v14  ;;  %v2339_v20 = vld [vmem:[#allocation8 + $0x738] sm:$0xff]  ;;  %v3090_v13 = vld [vmem:[#allocation8 + $0x1eb0] sm:$0xff] }
 0x4ec   :  { %11393 = verf.f32 %v9768_v19  ;;  %v9769_v30 = vmul.f32 0.70710677, %v11920_v27  ;;  %9502 = vmatpush1.bf16.msra.mxu1 %v11119_v15  ;;  %v3130_v19 = vld [vmem:[#allocation8 + $0x1ff0] sm:$0xff]  ;;  %v9737_v38 = vmul.f32 0.5, %v11920_v27  ;;  %v10513_v27 = vcombine.low %v2355_v7, %v2363_v14  ;;  %v2323_v22 = vld [vmem:[#allocation8 + $0x6b8] sm:$0xff] }
 0x4ed   :  { %9545 = vmatpush1.bf16.msra.mxu0 %v10353_v47  ;;  %9503 = vmatprep.subr.bf16.mxu1 %v11104_v10  ;;  %v10274_v47 = vcombine.high %v2115_v57, %v2123_v2  ;;  %v3122_v10 = vld [vmem:[#allocation8 + $0x1fb0] sm:$0xff]  ;;  %v2331_v42 = vld [vmem:[#allocation8 + $0x6f8] sm:$0xff] }
 0x4ee   :  { %11395 = verf.f32 %v9769_v30  ;;  %9546 = vmatprep.subr.bf16.mxu0 %v10338_v0  ;;  %v11279_v55 = vcombine.low %v3122_v10, %v3130_v19  ;;  %v3098_v46 = vld [vmem:[#allocation8 + $0x1ef0] sm:$0xff]  ;;  %v2307_v25 = vld [vmem:[#allocation8 + $0x638] sm:$0xff] }
 0x4ef   :  { %v2315_v48 = vld [vmem:[#allocation8 + $0x678] sm:$0xff] }
 0x4f0   :  { %9504 = vmatpush1.bf16.msra.mxu1 %v11103_v33  ;;  %v10273_v33 = vcombine.low %v2115_v57, %v2123_v2  ;;  %v10481_v57 = vcombine.low %v2323_v22, %v2331_v42 }
 0x4f1   :  { %9547 = vmatpush1.bf16.msra.mxu0 %v10337_v53  ;;  %9505 = vmatprep.subr.bf16.mxu1 %v11088_v32  ;;  %v11280_v53 = vcombine.high %v3122_v10, %v3130_v19  ;;  %v2275_v10 = vld [vmem:[#allocation8 + $0x538] sm:$0xff] }
 0x4f2   :  { %9548 = vmatprep.subr.bf16.mxu0 %v10322_v36  ;;  %v2283_v19 = vld [vmem:[#allocation8 + $0x578] sm:$0xff] }
 0x4f3   :  { %v10434_v14 = vcombine.high %v2275_v10, %v2283_v19 }
 0x4f4   :  { %9506 = vmatpush1.bf16.msra.mxu1 %v11087_v59  ;;  %v2347_v59 = vld [vmem:[#allocation8 + $0x778] sm:$0xff] }
 0x4f5   :  { %v11390_v50 = vpop.eup %11389  ;;  %9549 = vmatpush1.bf16.msra.mxu0 %v10321_v56  ;;  %9507 = vmatprep.subr.bf16.mxu1 %v11072_v17  ;;  %v11264_v17 = vcombine.high %v3106_v43, %v3114_v37 }
 0x4f6   :  { %v9816_v3 = vadd.f32 1.0, %v11390_v50  ;;  %9550 = vmatprep.subr.bf16.mxu0 %v10306_v60  ;;  %v10498_v60 = vcombine.high %v2339_v20, %v2347_v59  ;;  %v10497_v50 = vcombine.low %v2339_v20, %v2347_v59  ;;  %v2251_v20 = vld [vmem:[#allocation8 + $0x478] sm:$0xff] }
 0x4f7   :  { %v11392_v39 = vpop.eup %11391 }
 0x4f8   :  { %v9817_v8 = vadd.f32 1.0, %v11392_v39  ;;  %9508 = vmatpush1.bf16.msra.mxu1 %v11071_v63  ;;  %v9848_v45 = vmul.f32 %v9816_v3, %v9720_v40  ;;  %v11263_v63 = vcombine.low %v3106_v43, %v3114_v37  ;;  %v3074_v3 = vld [vmem:[#allocation8 + $0x1e30] sm:$0xff]  ;;  %v11247_v39 = vcombine.low %v3090_v13, %v3098_v46  ;;  %v2243_v37 = vld [vmem:[#allocation8 + $0x438] sm:$0xff] }
 0x4f9   :  { %v11394_v15 = vpop.eup %11393  ;;  %9551 = vmatpush1.bf16.msra.mxu0 %v10305_v31  ;;  %9509 = vmatprep.subr.bf16.mxu1 %v11056_v4  ;;  %v11248_v31 = vcombine.high %v3090_v13, %v3098_v46  ;;  %v10482_v4 = vcombine.high %v2323_v22, %v2331_v42  ;;  %v10466_v40 = vcombine.high %v2307_v25, %v2315_v48  ;;  %v3018_v43 = vld [vmem:[#allocation8 + $0x1c70] sm:$0xff]  ;;  %v2739_v13 = vld [vmem:[#allocation8 + $0x13b8] sm:$0xff] }
 0x4fa   :  { %v9849_v54 = vmul.f32 %v9817_v8, %v9721_v49  ;;  %v9832_v21 = vadd.f32 1.0, %v11394_v15  ;;  %9552 = vmatprep.subr.bf16.mxu0 %v10290_v16  ;;  %v3082_v16 = vld [vmem:[#allocation8 + $0x1e70] sm:$0xff]  ;;  %v2299_v15 = vld [vmem:[#allocation8 + $0x5f8] sm:$0xff]  ;;  %v10401_v42 = vcombine.low %v2243_v37, %v2251_v20 }
 0x4fb   :  { %v11396_v0 = vpop.eup %11395  ;;  %v11232_v2 = vcombine.high %v3074_v3, %v3082_v16  ;;  %v3058_v49 = vld [vmem:[#allocation8 + $0x1db0] sm:$0xff]  ;;  %v2747_v46 = vld [vmem:[#allocation8 + $0x13f8] sm:$0xff] }
 0x4fc   :  { %v11303_v9 = vpack.c.bf16 %v9849_v54, %v9848_v45  ;;  %v9833_v30 = vadd.f32 1.0, %v11396_v0  ;;  %9510 = vmatpush1.bf16.msra.mxu1 %v11055_v12  ;;  %v9864_v32 = vmul.f32 %v9832_v21, %v9736_v41  ;;  %v3066_v8 = vld [vmem:[#allocation8 + $0x1df0] sm:$0xff]  ;;  %v2291_v12 = vld [vmem:[#allocation8 + $0x5b8] sm:$0xff] }
 0x4fd   :  { %9553 = vmatpush1.bf16.msra.mxu0 %v10289_v61  ;;  %9511 = vmatprep.subr.bf16.mxu1 %v11040_v18  ;;  %v11231_v61 = vcombine.low %v3074_v3, %v3082_v16  ;;  %v10465_v18 = vcombine.low %v2307_v25, %v2315_v48  ;;  %v11216_v45 = vcombine.high %v3058_v49, %v3066_v8  ;;  %v3042_v21 = vld [vmem:[#allocation8 + $0x1d30] sm:$0xff]  ;;  %v2723_v16 = vld [vmem:[#allocation8 + $0x1338] sm:$0xff] }
 0x4fe   :  { %9972 = vst [vmem:[#allocation11 + $0x20] sm:$0xff] %v11303_v9  ;;  %v9865_v36 = vmul.f32 %v9833_v30, %v9737_v38  ;;  %9554 = vmatprep.subr.bf16.mxu0 %v10274_v47  ;;  %v10450_v54 = vcombine.high %v2291_v12, %v2299_v15  ;;  %v3050_v47 = vld [vmem:[#allocation8 + $0x1d70] sm:$0xff]  ;;  %v11215_v0 = vcombine.low %v3058_v49, %v3066_v8  ;;  %v2259_v38 = vld [vmem:[#allocation8 + $0x4b8] sm:$0xff] }
 0x4ff   :  { %v11200_v7 = vcombine.high %v3042_v21, %v3050_v47  ;;  %v3026_v9 = vld [vmem:[#allocation8 + $0x1cb0] sm:$0xff]  ;;  %v2267_v30 = vld [vmem:[#allocation8 + $0x4f8] sm:$0xff]  ;;  %v10897_v48 = vcombine.low %v2739_v13, %v2747_v46 }
 0x500   :  { %v11311_v56 = vpack.c.bf16 %v9865_v36, %v9864_v32  ;;  %9512 = vmatpush1.bf16.msra.mxu1 %v11039_v23  ;;  %v10449_v23 = vcombine.low %v2291_v12, %v2299_v15  ;;  %v3034_v41 = vld [vmem:[#allocation8 + $0x1cf0] sm:$0xff]  ;;  %v10418_v36 = vcombine.high %v2259_v38, %v2267_v30  ;;  %v2731_v25 = vld [vmem:[#allocation8 + $0x1378] sm:$0xff] }
 0x501   :  { %9555 = vmatpush1.bf16.msra.mxu0 %v10273_v33  ;;  %9513 = vmatprep.subr.bf16.mxu1 %v11280_v53  ;;  %v11199_v33 = vcombine.low %v3042_v21, %v3050_v47  ;;  %v10433_v53 = vcombine.low %v2275_v10, %v2283_v19  ;;  %v11184_v32 = vcombine.high %v3026_v9, %v3034_v41  ;;  %v2707_v49 = vld [vmem:[#allocation8 + $0x12b8] sm:$0xff] }
 0x502   :  { %9980 = vst [vmem:[#allocation11 + $0x60] sm:$0xff] %v11311_v56  ;;  %9556 = vmatprep.subr.bf16.mxu0 %v10514_v28  ;;  %v3010_v28 = vld [vmem:[#allocation8 + $0x1c30] sm:$0xff]  ;;  %v11183_v59 = vcombine.low %v3026_v9, %v3034_v41  ;;  %v10417_v56 = vcombine.low %v2259_v38, %v2267_v30  ;;  %v2715_v8 = vld [vmem:[#allocation8 + $0x12f8] sm:$0xff]  ;;  %v10881_v15 = vcombine.low %v2723_v16, %v2731_v25 }
 0x503   :  { %v11167_v22 = vcombine.low %v3010_v28, %v3018_v43  ;;  %v2691_v21 = vld [vmem:[#allocation8 + $0x1238] sm:$0xff] }
 0x504   :  { %9514 = vmatpush2.bf16.msra.mxu1 %v11279_v55  ;;  %v11168_v55 = vcombine.high %v3010_v28, %v3018_v43  ;;  %v2699_v47 = vld [vmem:[#allocation8 + $0x1278] sm:$0xff] }
 0x505   :  { %9557 = vmatpush2.bf16.msra.mxu0 %v10513_v27  ;;  %9515 = vmatprep.subr.bf16.mxu1 %v11264_v17  ;;  %v10402_v27 = vcombine.high %v2243_v37, %v2251_v20  ;;  %v2483_v17 = vld [vmem:[#allocation8 + $0xbb8] sm:$0xff]  ;;  %v10849_v9 = vcombine.low %v2691_v21, %v2699_v47 }
 0x506   :  { %9558 = vmatprep.subr.bf16.mxu0 %v10498_v60  ;;  %v2491_v60 = vld [vmem:[#allocation8 + $0xbf8] sm:$0xff] }
 0x507   :  { %v10641_v3 = vcombine.low %v2483_v17, %v2491_v60  ;;  %v2403_v30 = vld [vmem:[#allocation8 + $0x938] sm:$0xff] }
 0x508   :  { %9516 = vmatpush2.bf16.msra.mxu1 %v11263_v63  ;;  %v10642_v63 = vcombine.high %v2483_v17, %v2491_v60  ;;  %v2387_v20 = vld [vmem:[#allocation8 + $0x8b8] sm:$0xff] }
 0x509   :  { %9559 = vmatpush2.bf16.msra.mxu0 %v10497_v50  ;;  %9517 = vmatprep.subr.bf16.mxu1 %v11248_v31  ;;  %v10898_v50 = vcombine.high %v2739_v13, %v2747_v46  ;;  %v2467_v31 = vld [vmem:[#allocation8 + $0xb38] sm:$0xff] }
 0x50a   :  { %9560 = vmatprep.subr.bf16.mxu0 %v10482_v4  ;;  %v2475_v4 = vld [vmem:[#allocation8 + $0xb78] sm:$0xff] }
 0x50b   :  { %v10625_v12 = vcombine.low %v2467_v31, %v2475_v4  ;;  %v2371_v46 = vld [vmem:[#allocation8 + $0x838] sm:$0xff] }
 0x50c   :  { %9518 = vmatpush2.bf16.msra.mxu1 %v11247_v39  ;;  %v10626_v39 = vcombine.high %v2467_v31, %v2475_v4 }
 0x50d   :  { %9561 = vmatpush2.bf16.msra.mxu0 %v10481_v57  ;;  %9519 = vmatprep.subr.bf16.mxu1 %v11232_v2  ;;  %v2451_v57 = vld [vmem:[#allocation8 + $0xab8] sm:$0xff] }
 0x50e   :  { %9562 = vmatprep.subr.bf16.mxu0 %v10466_v40  ;;  %v2459_v2 = vld [vmem:[#allocation8 + $0xaf8] sm:$0xff]  ;;  %v10882_v40 = vcombine.high %v2723_v16, %v2731_v25 }
 0x50f   :  { %v10609_v10 = vcombine.low %v2451_v57, %v2459_v2  ;;  %v2611_v16 = vld [vmem:[#allocation8 + $0xfb8] sm:$0xff] }
 0x510   :  { %9520 = vmatpush2.bf16.msra.mxu1 %v11231_v61  ;;  %v10610_v61 = vcombine.high %v2451_v57, %v2459_v2  ;;  %v2619_v25 = vld [vmem:[#allocation8 + $0xff8] sm:$0xff] }
 0x511   :  { %9563 = vmatpush2.bf16.msra.mxu0 %v10465_v18  ;;  %9521 = vmatprep.subr.bf16.mxu1 %v11216_v45  ;;  %v10866_v18 = vcombine.high %v2707_v49, %v2715_v8  ;;  %v2435_v45 = vld [vmem:[#allocation8 + $0xa38] sm:$0xff] }
 0x512   :  { %9564 = vmatprep.subr.bf16.mxu0 %v10450_v54  ;;  %v2443_v54 = vld [vmem:[#allocation8 + $0xa78] sm:$0xff] }
 0x513   :  { %v10594_v19 = vcombine.high %v2435_v45, %v2443_v54 }
 0x514   :  { %9522 = vmatpush2.bf16.msra.mxu1 %v11215_v0  ;;  %v2419_v0 = vld [vmem:[#allocation8 + $0x9b8] sm:$0xff] }
 0x515   :  { %9565 = vmatpush2.bf16.msra.mxu0 %v10449_v23  ;;  %9523 = vmatprep.subr.bf16.mxu1 %v11200_v7  ;;  %v2427_v23 = vld [vmem:[#allocation8 + $0x9f8] sm:$0xff] }
 0x516   :  { %9566 = vmatprep.subr.bf16.mxu0 %v10434_v14  ;;  %v2675_v7 = vld [vmem:[#allocation8 + $0x11b8] sm:$0xff]  ;;  %v10578_v41 = vcombine.high %v2419_v0, %v2427_v23 }
 0x517   :  { %v2683_v14 = vld [vmem:[#allocation8 + $0x11f8] sm:$0xff] }
 0x518   :  { %9524 = vmatpush2.bf16.msra.mxu1 %v11199_v33  ;;  %v10834_v38 = vcombine.high %v2675_v7, %v2683_v14  ;;  %v2411_v33 = vld [vmem:[#allocation8 + $0x978] sm:$0xff]  ;;  %v10833_v28 = vcombine.low %v2675_v7, %v2683_v14 }
 0x519   :  { %9567 = vmatpush2.bf16.msra.mxu0 %v10433_v53  ;;  %9525 = vmatprep.subr.bf16.mxu1 %v11184_v32  ;;  %v2659_v53 = vld [vmem:[#allocation8 + $0x1138] sm:$0xff]  ;;  %v10562_v43 = vcombine.high %v2403_v30, %v2411_v33 }
 0x51a   :  { %9568 = vmatprep.subr.bf16.mxu0 %v10418_v36  ;;  %v2667_v32 = vld [vmem:[#allocation8 + $0x1178] sm:$0xff]  ;;  %v10577_v36 = vcombine.low %v2419_v0, %v2427_v23 }
 0x51b   :  { %v10818_v37 = vcombine.high %v2659_v53, %v2667_v32  ;;  %v10817_v17 = vcombine.low %v2659_v53, %v2667_v32  ;;  %v2563_v14 = vld [vmem:[#allocation8 + $0xe38] sm:$0xff] }
 0x51c   :  { %9526 = vmatpush2.bf16.msra.mxu1 %v11183_v59  ;;  %v2395_v59 = vld [vmem:[#allocation8 + $0x8f8] sm:$0xff] }
 0x51d   :  { %9569 = vmatpush2.bf16.msra.mxu0 %v10417_v56  ;;  %9527 = vmatprep.subr.bf16.mxu1 %v11168_v55  ;;  %v2643_v56 = vld [vmem:[#allocation8 + $0x10b8] sm:$0xff]  ;;  %v10546_v60 = vcombine.high %v2387_v20, %v2395_v59 }
 0x51e   :  { %9570 = vmatprep.subr.bf16.mxu0 %v10402_v27  ;;  %v2651_v55 = vld [vmem:[#allocation8 + $0x10f8] sm:$0xff]  ;;  %v10561_v27 = vcombine.low %v2403_v30, %v2411_v33 }
 0x51f   :  { %v10802_v13 = vcombine.high %v2643_v56, %v2651_v55  ;;  %v10801_v31 = vcombine.low %v2643_v56, %v2651_v55  ;;  %v2547_v32 = vld [vmem:[#allocation8 + $0xdb8] sm:$0xff] }
 0x520   :  { %9528 = vmatpush2.bf16.msra.mxu1 %v11167_v22  ;;  %v2379_v22 = vld [vmem:[#allocation8 + $0x878] sm:$0xff] }
 0x521   :  { %9571 = vmatpush2.bf16.msra.mxu0 %v10401_v42  ;;  %9583 = vmatprep.subr.bf16.mxu1 %v10642_v63  ;;  %v2627_v42 = vld [vmem:[#allocation8 + $0x1038] sm:$0xff]  ;;  %v10530_v4 = vcombine.high %v2371_v46, %v2379_v22  ;;  %v10529_v57 = vcombine.low %v2371_v46, %v2379_v22 }
 0x522   :  { %9626 = vmatprep.subr.bf16.mxu0 %v10898_v50  ;;  %v2635_v63 = vld [vmem:[#allocation8 + $0x1078] sm:$0xff]  ;;  %v10545_v50 = vcombine.low %v2387_v20, %v2395_v59  ;;  %v9230_v20 = vpop.f32.mrf.mxu0 }
 0x523   :  { %9530 = vmatmul.mubr.bf16.vlgmr.msra.gmra.mxu1 %v11761_v44  ;;  %v10785_v2 = vcombine.low %v2627_v42, %v2635_v63 }
 0x524   :  { %9573 = vmatmul.mubr.bf16.vlgmr.msra.gmra.mxu0 %v11693_v34  ;;  %9584 = vmatpush1.bf16.msra.mxu1 %v10641_v3  ;;  %v10865_v34 = vcombine.low %v2707_v49, %v2715_v8  ;;  %v10786_v3 = vcombine.high %v2627_v42, %v2635_v63  ;;  %v2595_v8 = vld [vmem:[#allocation8 + $0xf38] sm:$0xff]  ;;  %v9232_v22 = vpop.f32.mrf.mxu0 }
 0x525   :  { %9615 = vmatprep.mubr.bf16.mxu1 %v11702_v1  ;;  %9627 = vmatpush1.bf16.msra.mxu0 %v10897_v48  ;;  %v10850_v1 = vcombine.high %v2691_v21, %v2699_v47  ;;  %v2867_v48 = vld [vmem:[#allocation8 + $0x17b8] sm:$0xff] }
 0x526   :  { %9658 = vmatprep.mubr.bf16.mxu0 %v11738_v6  ;;  %9585 = vmatprep.subr.bf16.mxu1 %v10626_v39  ;;  %v10593_v6 = vcombine.low %v2435_v45, %v2443_v54  ;;  %v2875_v39 = vld [vmem:[#allocation8 + $0x17f8] sm:$0xff] }
 0x527   :  { %9628 = vmatprep.subr.bf16.mxu0 %v10882_v40  ;;  %v10770_v40 = vcombine.high %v2611_v16, %v2619_v25  ;;  %v11026_v49 = vcombine.high %v2867_v48, %v2875_v39  ;;  %v11025_v45 = vcombine.low %v2867_v48, %v2875_v39  ;;  %v2579_v47 = vld [vmem:[#allocation8 + $0xeb8] sm:$0xff]  ;;  %v9234_v48 = vpop.f32.mrf.mxu0  ;;  %v9273_v39 = vpop.f32.mrf.mxu1 }
 0x528   :  { %9586 = vmatpush1.bf16.msra.mxu1 %v10625_v12  ;;  %v2603_v12 = vld [vmem:[#allocation8 + $0xf78] sm:$0xff] }
 0x529   :  { %9629 = vmatpush1.bf16.msra.mxu0 %v10881_v15  ;;  %9587 = vmatprep.subr.bf16.mxu1 %v10610_v61  ;;  %v2851_v15 = vld [vmem:[#allocation8 + $0x1738] sm:$0xff]  ;;  %v10754_v54 = vcombine.high %v2595_v8, %v2603_v12 }
 0x52a   :  { %9630 = vmatprep.subr.bf16.mxu0 %v10866_v18  ;;  %v2859_v61 = vld [vmem:[#allocation8 + $0x1778] sm:$0xff]  ;;  %v10769_v18 = vcombine.low %v2611_v16, %v2619_v25 }
 0x52b   :  { %v11010_v21 = vcombine.high %v2851_v15, %v2859_v61  ;;  %v11009_v0 = vcombine.low %v2851_v15, %v2859_v61  ;;  %v2779_v16 = vld [vmem:[#allocation8 + $0x14f8] sm:$0xff]  ;;  %v3179_v61 = vrot.slane %v11901_v52, %v11679_v24 }
 0x52c   :  { %9588 = vmatpush1.bf16.msra.mxu1 %v10609_v10  ;;  %v2587_v10 = vld [vmem:[#allocation8 + $0xef8] sm:$0xff] }
 0x52d   :  { %9631 = vmatpush1.bf16.msra.mxu0 %v10865_v34  ;;  %9589 = vmatprep.subr.bf16.mxu1 %v10594_v19  ;;  %v2835_v34 = vld [vmem:[#allocation8 + $0x16b8] sm:$0xff]  ;;  %v10738_v23 = vcombine.high %v2579_v47, %v2587_v10 }
 0x52e   :  { %9632 = vmatprep.subr.bf16.mxu0 %v10850_v1  ;;  %v2843_v19 = vld [vmem:[#allocation8 + $0x16f8] sm:$0xff]  ;;  %v10753_v1 = vcombine.low %v2595_v8, %v2603_v12 }
 0x52f   :  { %v10994_v7 = vcombine.high %v2835_v34, %v2843_v19  ;;  %v10993_v30 = vcombine.low %v2835_v34, %v2843_v19  ;;  %v2507_v8 = vld [vmem:[#allocation8 + $0xc78] sm:$0xff] }
 0x530   :  { %9590 = vmatpush1.bf16.msra.mxu1 %v10593_v6  ;;  %v2571_v6 = vld [vmem:[#allocation8 + $0xe78] sm:$0xff] }
 0x531   :  { %9633 = vmatpush1.bf16.msra.mxu0 %v10849_v9  ;;  %9591 = vmatprep.subr.bf16.mxu1 %v10578_v41  ;;  %v2819_v9 = vld [vmem:[#allocation8 + $0x1638] sm:$0xff]  ;;  %v10722_v33 = vcombine.high %v2563_v14, %v2571_v6 }
 0x532   :  { %9634 = vmatprep.subr.bf16.mxu0 %v10834_v38  ;;  %v2827_v41 = vld [vmem:[#allocation8 + $0x1678] sm:$0xff]  ;;  %v10737_v38 = vcombine.low %v2579_v47, %v2587_v10  ;;  %v3183_v10 = vrot.slane %v11901_v52, %v11687_v29  ;;  %v9235_v29 = vadd.f32 %v9234_v48, %v3179_v61 }
 0x533   :  { %v10978_v53 = vcombine.high %v2819_v9, %v2827_v41  ;;  %v10977_v59 = vcombine.low %v2819_v9, %v2827_v41  ;;  %v2755_v12 = vld [vmem:[#allocation8 + $0x1438] sm:$0xff] }
 0x534   :  { %9592 = vmatpush1.bf16.msra.mxu1 %v10577_v36  ;;  %v2555_v36 = vld [vmem:[#allocation8 + $0xdf8] sm:$0xff]  ;;  %v9233_v9 = vadd.f32 %v9232_v22, %v3183_v10 }
 0x535   :  { %9635 = vmatpush1.bf16.msra.mxu0 %v10833_v28  ;;  %9593 = vmatprep.subr.bf16.mxu1 %v10562_v43  ;;  %v2803_v28 = vld [vmem:[#allocation8 + $0x15b8] sm:$0xff]  ;;  %v10706_v56 = vcombine.high %v2547_v32, %v2555_v36  ;;  %v10705_v46 = vcombine.low %v2547_v32, %v2555_v36 }
 0x536   :  { %9636 = vmatprep.subr.bf16.mxu0 %v10818_v37  ;;  %v2811_v43 = vld [vmem:[#allocation8 + $0x15f8] sm:$0xff]  ;;  %v10721_v37 = vcombine.low %v2563_v14, %v2571_v6 }
 0x537   :  { %v10962_v55 = vcombine.high %v2803_v28, %v2811_v43  ;;  %v10961_v42 = vcombine.low %v2803_v28, %v2811_v43  ;;  %v2763_v15 = vld [vmem:[#allocation8 + $0x1478] sm:$0xff] }
 0x538   :  { %9594 = vmatpush1.bf16.msra.mxu1 %v10561_v27  ;;  %v2531_v27 = vld [vmem:[#allocation8 + $0xd38] sm:$0xff]  ;;  %v10914_v34 = vcombine.high %v2755_v12, %v2763_v15  ;;  %v10913_v14 = vcombine.low %v2755_v12, %v2763_v15 }
 0x539   :  { %9637 = vmatpush1.bf16.msra.mxu0 %v10817_v17  ;;  %9595 = vmatprep.subr.bf16.mxu1 %v10546_v60  ;;  %v2539_v17 = vld [vmem:[#allocation8 + $0xd78] sm:$0xff] }
 0x53a   :  { %9638 = vmatprep.subr.bf16.mxu0 %v10802_v13  ;;  %v2787_v60 = vld [vmem:[#allocation8 + $0x1538] sm:$0xff]  ;;  %v10690_v63 = vcombine.high %v2531_v27, %v2539_v17  ;;  %v10689_v25 = vcombine.low %v2531_v27, %v2539_v17 }
 0x53b   :  { %v2795_v13 = vld [vmem:[#allocation8 + $0x1578] sm:$0xff] }
 0x53c   :  { %9596 = vmatpush1.bf16.msra.mxu1 %v10545_v50  ;;  %v10946_v50 = vcombine.high %v2787_v60, %v2795_v13  ;;  %v2995_v19 = vld [vmem:[#allocation8 + $0x1bb8] sm:$0xff] }
 0x53d   :  { %9639 = vmatpush1.bf16.msra.mxu0 %v10801_v31  ;;  %9597 = vmatprep.subr.bf16.mxu1 %v10530_v4  ;;  %v2515_v31 = vld [vmem:[#allocation8 + $0xcb8] sm:$0xff] }
 0x53e   :  { %9640 = vmatprep.subr.bf16.mxu0 %v10786_v3  ;;  %v2523_v4 = vld [vmem:[#allocation8 + $0xcf8] sm:$0xff] }
 0x53f   :  { %v2771_v3 = vld [vmem:[#allocation8 + $0x14b8] sm:$0xff] }
 0x540   :  { %9598 = vmatpush1.bf16.msra.mxu1 %v10529_v57  ;;  %v10945_v57 = vcombine.low %v2787_v60, %v2795_v13 }
 0x541   :  { %9641 = vmatpush1.bf16.msra.mxu0 %v10785_v2  ;;  %9599 = vmatprep.subr.bf16.mxu1 %v10770_v40  ;;  %v10674_v2 = vcombine.high %v2515_v31, %v2523_v4  ;;  %v10930_v40 = vcombine.high %v2771_v3, %v2779_v16 }
 0x542   :  { %9642 = vmatprep.subr.bf16.mxu0 %v11026_v49  ;;  %v2499_v49 = vld [vmem:[#allocation8 + $0xc38] sm:$0xff] }
 0x543   :  { %v10658_v47 = vcombine.high %v2499_v49, %v2507_v8 }
 0x544   :  { %9600 = vmatpush2.bf16.msra.mxu1 %v10769_v18  ;;  %v10673_v18 = vcombine.low %v2515_v31, %v2523_v4  ;;  %v2947_v31 = vld [vmem:[#allocation8 + $0x1a38] sm:$0xff] }
 0x545   :  { %9643 = vmatpush2.bf16.msra.mxu0 %v11025_v45  ;;  %9601 = vmatprep.subr.bf16.mxu1 %v10754_v54  ;;  %v9236_v45 = vpop.f32.mrf.mxu0  ;;  %v9275_v54 = vpop.f32.mrf.mxu1  ;;  %v2955_v4 = vld [vmem:[#allocation8 + $0x1a78] sm:$0xff] }
 0x546   :  { %9644 = vmatprep.subr.bf16.mxu0 %v11010_v21  ;;  %v10929_v21 = vcombine.low %v2771_v3, %v2779_v16  ;;  %v9276_v52 = vadd.f32 %v9275_v54, %v9233_v9  ;;  %v9237_v28 = vadd.f32 %v9236_v45, %v3183_v10  ;;  %v11105_v12 = vcombine.low %v2947_v31, %v2955_v4 }
 0x547   :  { %v9277_v24 = vpop.f32.mrf.mxu1 }
 0x548   :  { %9602 = vmatpush2.bf16.msra.mxu1 %v10753_v1  ;;  %v3003_v1 = vld [vmem:[#allocation8 + $0x1bf8] sm:$0xff] }
 0x549   :  { %9645 = vmatpush2.bf16.msra.mxu0 %v11009_v0  ;;  %9603 = vmatprep.subr.bf16.mxu1 %v10738_v23  ;;  %v9316_v0 = vpop.f32.mrf.mxu0  ;;  %v9231_v23 = vadd.f32 %v9230_v20, %v3179_v61  ;;  %v11154_v6 = vcombine.high %v2995_v19, %v3003_v1  ;;  %v9279_v32 = vpop.f32.mrf.mxu1  ;;  %v2963_v20 = vld [vmem:[#allocation8 + $0x1ab8] sm:$0xff] }
 0x54a   :  { %9646 = vmatprep.subr.bf16.mxu0 %v10994_v7  ;;  %v10657_v7 = vcombine.low %v2499_v49, %v2507_v8  ;;  %v9280_v60 = vadd.f32 %v9279_v32, %v9237_v28  ;;  %v2939_v49 = vld [vmem:[#allocation8 + $0x19f8] sm:$0xff] }
 0x54b   :  { %v9274_v41 = vadd.f32 %v9273_v39, %v9231_v23  ;;  %v2915_v61 = vld [vmem:[#allocation8 + $0x1938] sm:$0xff] }
 0x54c   :  { %9604 = vmatpush2.bf16.msra.mxu1 %v10737_v38  ;;  %v2979_v38 = vld [vmem:[#allocation8 + $0x1b38] sm:$0xff] }
 0x54d   :  { %9647 = vmatpush2.bf16.msra.mxu0 %v10993_v30  ;;  %9605 = vmatprep.subr.bf16.mxu1 %v10722_v33  ;;  %v2987_v30 = vld [vmem:[#allocation8 + $0x1b78] sm:$0xff]  ;;  %v9318_v33 = vpop.f32.mrf.mxu0  ;;  %v9317_v43 = vadd.f32 %v9316_v0, %v9274_v41 }
 0x54e   :  { %9648 = vmatprep.subr.bf16.mxu0 %v10978_v53  ;;  %v11153_v53 = vcombine.low %v2995_v19, %v3003_v1  ;;  %v11138_v36 = vcombine.high %v2979_v38, %v2987_v30  ;;  %v11137_v27 = vcombine.low %v2979_v38, %v2987_v30  ;;  %v9319_v17 = vadd.f32 %v9318_v33, %v9276_v52  ;;  %v2883_v0 = vld [vmem:[#allocation8 + $0x1838] sm:$0xff] }
 0x54f   :  { %v2891_v23 = vld [vmem:[#allocation8 + $0x1878] sm:$0xff] }
 0x550   :  { %9606 = vmatpush2.bf16.msra.mxu1 %v10721_v37  ;;  %v9278_v37 = vadd.f32 %v9277_v24, %v9235_v29  ;;  %v11042_v38 = vcombine.high %v2883_v0, %v2891_v23  ;;  %v3123_v52 = vld [vmem:[#allocation8 + $0x1fb8] sm:$0xff] }
 0x551   :  { %9649 = vmatpush2.bf16.msra.mxu0 %v10977_v59  ;;  %9607 = vmatprep.subr.bf16.mxu1 %v10706_v56  ;;  %v2971_v59 = vld [vmem:[#allocation8 + $0x1af8] sm:$0xff]  ;;  %v9320_v56 = vpop.f32.mrf.mxu0 }
 0x552   :  { %9650 = vmatprep.subr.bf16.mxu0 %v10962_v55  ;;  %v11122_v22 = vcombine.high %v2963_v20, %v2971_v59 }
 0x553   :  { %v9322_v3 = vpop.f32.mrf.mxu0 }
 0x554   :  { %9608 = vmatpush2.bf16.msra.mxu1 %v10705_v46 }
 0x555   :  { %9651 = vmatpush2.bf16.msra.mxu0 %v10961_v42  ;;  %9609 = vmatprep.subr.bf16.mxu1 %v10690_v63  ;;  %v9321_v42 = vadd.f32 %v9320_v56, %v9278_v37 }
 0x556   :  { %9652 = vmatprep.subr.bf16.mxu0 %v10946_v50 }
 0x558   :  { %9610 = vmatpush2.bf16.msra.mxu1 %v10689_v25  ;;  %v9323_v25 = vadd.f32 %v9322_v3, %v9280_v60 }
 0x559   :  { %9653 = vmatpush2.bf16.msra.mxu0 %v10945_v57  ;;  %9611 = vmatprep.subr.bf16.mxu1 %v10674_v2  ;;  %v11106_v57 = vcombine.high %v2947_v31, %v2955_v4  ;;  %v3075_v31 = vld [vmem:[#allocation8 + $0x1e38] sm:$0xff] }
 0x55a   :  { %9654 = vmatprep.subr.bf16.mxu0 %v10930_v40  ;;  %v2931_v40 = vld [vmem:[#allocation8 + $0x19b8] sm:$0xff] }
 0x55b   :  { %v11090_v15 = vcombine.high %v2931_v40, %v2939_v49  ;;  %v11089_v45 = vcombine.low %v2931_v40, %v2939_v49  ;;  %v3083_v4 = vld [vmem:[#allocation8 + $0x1e78] sm:$0xff] }
 0x55c   :  { %9612 = vmatpush2.bf16.msra.mxu1 %v10673_v18  ;;  %v2923_v18 = vld [vmem:[#allocation8 + $0x1978] sm:$0xff] }
 0x55d   :  { %9655 = vmatpush2.bf16.msra.mxu0 %v10929_v21  ;;  %9613 = vmatprep.subr.bf16.mxu1 %v10658_v47  ;;  %v11074_v54 = vcombine.high %v2915_v61, %v2923_v18  ;;  %v2899_v21 = vld [vmem:[#allocation8 + $0x18b8] sm:$0xff]  ;;  %v11073_v10 = vcombine.low %v2915_v61, %v2923_v18 }
 0x55e   :  { %9656 = vmatprep.subr.bf16.mxu0 %v10914_v34  ;;  %v2907_v47 = vld [vmem:[#allocation8 + $0x18f8] sm:$0xff] }
 0x55f   :  { %v11058_v19 = vcombine.high %v2899_v21, %v2907_v47  ;;  %v11057_v9 = vcombine.low %v2899_v21, %v2907_v47  ;;  %v3027_v40 = vld [vmem:[#allocation8 + $0x1cb8] sm:$0xff] }
 0x560   :  { %9614 = vmatpush2.bf16.msra.mxu1 %v10657_v7  ;;  %v3035_v49 = vld [vmem:[#allocation8 + $0x1cf8] sm:$0xff] }
 0x561   :  { %9657 = vmatpush2.bf16.msra.mxu0 %v10913_v14  ;;  %9669 = vmatprep.subr.bf16.mxu1 %v11154_v6  ;;  %v3019_v61 = vld [vmem:[#allocation8 + $0x1c78] sm:$0xff]  ;;  %v11185_v18 = vcombine.low %v3027_v40, %v3035_v49 }
 0x563   :  { %v9359_v55 = vpop.f32.mrf.mxu1  ;;  %9616 = vmatmul.mubr.bf16.vlgmr.msra.gmra.mxu1 %v11710_v58  ;;  %v11121_v58 = vcombine.low %v2963_v20, %v2971_v59 }
 0x564   :  { %v9360_v13 = vadd.f32 %v9359_v55, %v9317_v43  ;;  %9659 = vmatmul.mubr.bf16.vlgmr.msra.gmra.mxu0 %v11742_v35  ;;  %9670 = vmatpush1.bf16.msra.mxu1 %v11153_v53  ;;  %v3131_v53 = vld [vmem:[#allocation8 + $0x1ff8] sm:$0xff]  ;;  %v9402_v21 = vpop.f32.mrf.mxu0 }
 0x565   :  { %9701 = vmatprep.mubr.bf16.mxu1 %v11759_v51  ;;  %v9361_v46 = vpop.f32.mrf.mxu1  ;;  %9671 = vmatprep.subr.bf16.mxu1 %v11138_v36  ;;  %v11041_v36 = vcombine.low %v2883_v0, %v2891_v23  ;;  %v11282_v59 = vcombine.high %v3123_v52, %v3131_v53 }
 0x566   :  { %v9754_v63 = vmul.f32 0.70710677, %v9360_v13  ;;  %v9362_v50 = vadd.f32 %v9361_v46, %v9319_v17  ;;  %v9722_v24 = vmul.f32 0.5, %v9360_v13  ;;  %v3115_v17 = vld [vmem:[#allocation8 + $0x1f78] sm:$0xff]  ;;  %v11281_v13 = vcombine.low %v3123_v52, %v3131_v53  ;;  %v9404_v47 = vpop.f32.mrf.mxu0 }
 0x567   :  { %v9363_v16 = vpop.f32.mrf.mxu1 }
 0x568   :  { %11397 = verf.f32 %v9754_v63  ;;  %v9755_v48 = vmul.f32 0.70710677, %v9362_v50  ;;  %v9364_v39 = vadd.f32 %v9363_v16, %v9321_v42  ;;  %9672 = vmatpush1.bf16.msra.mxu1 %v11137_v27  ;;  %v9723_v14 = vmul.f32 0.5, %v9362_v50  ;;  %v3107_v27 = vld [vmem:[#allocation8 + $0x1f38] sm:$0xff] }
 0x569   :  { %v9365_v35 = vpop.f32.mrf.mxu1  ;;  %9673 = vmatprep.subr.bf16.mxu1 %v11122_v22  ;;  %v11266_v46 = vcombine.high %v3107_v27, %v3115_v17  ;;  %v3091_v22 = vld [vmem:[#allocation8 + $0x1eb8] sm:$0xff]  ;;  %v11265_v63 = vcombine.low %v3107_v27, %v3115_v17  ;;  %v11234_v16 = vcombine.high %v3075_v31, %v3083_v4 }
 0x56a   :  { %11399 = verf.f32 %v9755_v48  ;;  %v9770_v51 = vmul.f32 0.70710677, %v9364_v39  ;;  %v9366_v2 = vadd.f32 %v9365_v35, %v9323_v25  ;;  %v9738_v43 = vmul.f32 0.5, %v9364_v39  ;;  %v3099_v42 = vld [vmem:[#allocation8 + $0x1ef8] sm:$0xff] }
 0x56b   :  { %v11250_v50 = vcombine.high %v3091_v22, %v3099_v42  ;;  %v11249_v3 = vcombine.low %v3091_v22, %v3099_v42  ;;  %v3067_v25 = vld [vmem:[#allocation8 + $0x1df8] sm:$0xff]  ;;  %v11233_v48 = vcombine.low %v3075_v31, %v3083_v4 }
 0x56c   :  { %11401 = verf.f32 %v9770_v51  ;;  %v9771_v8 = vmul.f32 0.70710677, %v9366_v2  ;;  %9674 = vmatpush1.bf16.msra.mxu1 %v11121_v58  ;;  %v9739_v37 = vmul.f32 0.5, %v9366_v2  ;;  %v3059_v58 = vld [vmem:[#allocation8 + $0x1db8] sm:$0xff] }
 0x56d   :  { %9675 = vmatprep.subr.bf16.mxu1 %v11106_v57  ;;  %v11218_v39 = vcombine.high %v3059_v58, %v3067_v25  ;;  %v3043_v35 = vld [vmem:[#allocation8 + $0x1d38] sm:$0xff]  ;;  %v11217_v51 = vcombine.low %v3059_v58, %v3067_v25 }
 0x56e   :  { %11403 = verf.f32 %v9771_v8  ;;  %v3051_v57 = vld [vmem:[#allocation8 + $0x1d78] sm:$0xff] }
 0x56f   :  { %v11202_v2 = vcombine.high %v3043_v35, %v3051_v57  ;;  %v11201_v8 = vcombine.low %v3043_v35, %v3051_v57 }
 0x570   :  { %9676 = vmatpush1.bf16.msra.mxu1 %v11105_v12  ;;  %v11186_v12 = vcombine.high %v3027_v40, %v3035_v49 }
 0x571   :  { %9677 = vmatprep.subr.bf16.mxu1 %v11090_v15  ;;  %v3011_v15 = vld [vmem:[#allocation8 + $0x1c38] sm:$0xff] }
 0x574   :  { %9678 = vmatpush1.bf16.msra.mxu1 %v11089_v45  ;;  %v11170_v45 = vcombine.high %v3011_v15, %v3019_v61 }
 0x575   :  { %v11398_v34 = vpop.eup %11397  ;;  %9679 = vmatprep.subr.bf16.mxu1 %v11074_v54  ;;  %v11169_v54 = vcombine.low %v3011_v15, %v3019_v61 }
 0x576   :  { %v9818_v1 = vadd.f32 1.0, %v11398_v34 }
 0x577   :  { %v11400_v7 = vpop.eup %11399 }
 0x578   :  { %v9819_v6 = vadd.f32 1.0, %v11400_v7  ;;  %9680 = vmatpush1.bf16.msra.mxu1 %v11073_v10  ;;  %v9850_v30 = vmul.f32 %v9818_v1, %v9722_v24  ;;  %v9406_v10 = vpop.f32.mrf.mxu0 }
 0x579   :  { %v11402_v41 = vpop.eup %11401  ;;  %9681 = vmatprep.subr.bf16.mxu1 %v11058_v19  ;;  %v11939_v19 = vld [vmem:[#allocation10 + $0x8] sm:$0xff] }
 0x57a   :  { %v9851_v33 = vmul.f32 %v9819_v6, %v9723_v14  ;;  %v9834_v29 = vadd.f32 1.0, %v11402_v41  ;;  %v3187_v1 = vrot.slane %v11939_v19, %v11721_v62  ;;  %v9408_v0 = vpop.f32.mrf.mxu0  ;;  %v3191_v7 = vrot.slane %v11939_v19, %v11726_v5 }
 0x57b   :  { %v11404_v32 = vpop.eup %11403 }
 0x57c   :  { %v11304_v28 = vpack.c.bf16 %v9851_v33, %v9850_v30  ;;  %v9835_v20 = vadd.f32 1.0, %v11404_v32  ;;  %9682 = vmatpush1.bf16.msra.mxu1 %v11057_v9  ;;  %v9866_v56 = vmul.f32 %v9834_v29, %v9738_v43  ;;  %v9403_v14 = vadd.f32 %v9402_v21, %v3187_v1 }
 0x57d   :  { %9683 = vmatprep.subr.bf16.mxu1 %v11042_v38  ;;  %v9405_v9 = vadd.f32 %v9404_v47, %v3191_v7  ;;  %v9407_v38 = vadd.f32 %v9406_v10, %v3187_v1  ;;  %v9409_v29 = vadd.f32 %v9408_v0, %v3191_v7  ;;  %v3199_v10 = vrot.slane %v11939_v19, %v11751_v11 }
 0x57e   :  { %9973 = vst [vmem:[#allocation11 + $0x28] sm:$0xff] %v11304_v28  ;;  %v9867_v55 = vmul.f32 %v9835_v20, %v9739_v37 }
 0x580   :  { %v11312_v60 = vpack.c.bf16 %v9867_v55, %v9866_v56  ;;  %9684 = vmatpush1.bf16.msra.mxu1 %v11041_v36 }
 0x581   :  { %9685 = vmatprep.subr.bf16.mxu1 %v11282_v59 }
 0x582   :  { %9981 = vst [vmem:[#allocation11 + $0x68] sm:$0xff] %v11312_v60 }
 0x584   :  { %9686 = vmatpush2.bf16.msra.mxu1 %v11281_v13 }
 0x585   :  { %9687 = vmatprep.subr.bf16.mxu1 %v11266_v46 }
 0x588   :  { %9688 = vmatpush2.bf16.msra.mxu1 %v11265_v63 }
 0x589   :  { %9689 = vmatprep.subr.bf16.mxu1 %v11250_v50 }
 0x58c   :  { %9690 = vmatpush2.bf16.msra.mxu1 %v11249_v3 }
 0x58d   :  { %9691 = vmatprep.subr.bf16.mxu1 %v11234_v16 }
 0x590   :  { %9692 = vmatpush2.bf16.msra.mxu1 %v11233_v48 }
 0x591   :  { %9693 = vmatprep.subr.bf16.mxu1 %v11218_v39 }
 0x594   :  { %9694 = vmatpush2.bf16.msra.mxu1 %v11217_v51 }
 0x595   :  { %9695 = vmatprep.subr.bf16.mxu1 %v11202_v2 }
 0x598   :  { %9696 = vmatpush2.bf16.msra.mxu1 %v11201_v8 }
 0x599   :  { %9697 = vmatprep.subr.bf16.mxu1 %v11186_v12 }
 0x59c   :  { %9698 = vmatpush2.bf16.msra.mxu1 %v11185_v18 }
 0x59d   :  { %9699 = vmatprep.subr.bf16.mxu1 %v11170_v45 }
 0x5a0   :  { %9700 = vmatpush2.bf16.msra.mxu1 %v11169_v54  ;;  %v3195_v54 = vrot.slane %v11939_v19, %v11748_v26 }
 0x5a3   :  { %9702 = vmatmul.mubr.bf16.vlgmr.msra.gmra.mxu1 %v11761_v44  ;;  %v9445_v34 = vpop.f32.mrf.mxu1 }
 0x5a4   :  { %v9488_v24 = vpop.f32.mrf.mxu0  ;;  %v9446_v41 = vadd.f32 %v9445_v34, %v9403_v14 }
 0x5a5   :  { %v9447_v23 = vpop.f32.mrf.mxu1 }
 0x5a6   :  { %v9490_v44 = vpop.f32.mrf.mxu0  ;;  %v9448_v30 = vadd.f32 %v9447_v23, %v9405_v9  ;;  %v9489_v52 = vadd.f32 %v9488_v24, %v9446_v41 }
 0x5a7   :  { %v9449_v6 = vpop.f32.mrf.mxu1 }
 0x5a8   :  { %v9450_v53 = vadd.f32 %v9449_v6, %v9407_v38  ;;  %v9492_v32 = vpop.f32.mrf.mxu0  ;;  %v9491_v62 = vadd.f32 %v9490_v44, %v9448_v30 }
 0x5a9   :  { %v9451_v33 = vpop.f32.mrf.mxu1 }
 0x5aa   :  { %v9452_v28 = vadd.f32 %v9451_v33, %v9409_v29  ;;  %v9493_v20 = vadd.f32 %v9492_v32, %v9450_v53  ;;  %v9494_v56 = vpop.f32.mrf.mxu0 }
 0x5ac   :  { %v9495_v27 = vadd.f32 %v9494_v56, %v9452_v28 }
 0x5e3   :  { %v9531_v36 = vpop.f32.mrf.mxu1 }
 0x5e4   :  { %v9532_v43 = vadd.f32 %v9531_v36, %v9489_v52  ;;  %v9574_v15 = vpop.f32.mrf.mxu0 }
 0x5e5   :  { %v9533_v37 = vpop.f32.mrf.mxu1  ;;  %v9575_v1 = vadd.f32 %v9574_v15, %v3195_v54 }
 0x5e6   :  { %v9756_v5 = vmul.f32 0.70710677, %v9532_v43  ;;  %v9534_v59 = vadd.f32 %v9533_v37, %v9491_v62  ;;  %v9724_v4 = vmul.f32 0.5, %v9532_v43  ;;  %v9576_v61 = vpop.f32.mrf.mxu0 }
 0x5e7   :  { %v9535_v55 = vpop.f32.mrf.mxu1  ;;  %v9577_v23 = vadd.f32 %v9576_v61, %v3199_v10 }
 0x5e8   :  { %11405 = verf.f32 %v9756_v5  ;;  %v9757_v17 = vmul.f32 0.70710677, %v9534_v59  ;;  %v9536_v60 = vadd.f32 %v9535_v55, %v9493_v20  ;;  %v9725_v3 = vmul.f32 0.5, %v9534_v59  ;;  %v9578_v18 = vpop.f32.mrf.mxu0 }
 0x5e9   :  { %v9537_v13 = vpop.f32.mrf.mxu1  ;;  %v9579_v14 = vadd.f32 %v9578_v18, %v3195_v54 }
 0x5ea   :  { %11407 = verf.f32 %v9757_v17  ;;  %v9772_v46 = vmul.f32 0.70710677, %v9536_v60  ;;  %v9538_v22 = vadd.f32 %v9537_v13, %v9495_v27  ;;  %v9740_v51 = vmul.f32 0.5, %v9536_v60  ;;  %v9580_v21 = vpop.f32.mrf.mxu0 }
 0x5eb   :  { %v9581_v41 = vadd.f32 %v9580_v21, %v3199_v10 }
 0x5ec   :  { %11409 = verf.f32 %v9772_v46  ;;  %v9773_v42 = vmul.f32 0.70710677, %v9538_v22  ;;  %v9741_v2 = vmul.f32 0.5, %v9538_v22 }
 0x5ee   :  { %11411 = verf.f32 %v9773_v42 }
 0x5f5   :  { %v11406_v63 = vpop.eup %11405 }
 0x5f6   :  { %v9820_v50 = vadd.f32 1.0, %v11406_v63 }
 0x5f7   :  { %v11408_v31 = vpop.eup %11407 }
 0x5f8   :  { %v9821_v16 = vadd.f32 1.0, %v11408_v31  ;;  %v9852_v25 = vmul.f32 %v9820_v50, %v9724_v4 }
 0x5f9   :  { %v11410_v58 = vpop.eup %11409 }
 0x5fa   :  { %v9853_v48 = vmul.f32 %v9821_v16, %v9725_v3  ;;  %v9836_v39 = vadd.f32 1.0, %v11410_v58 }
 0x5fb   :  { %v11412_v35 = vpop.eup %11411 }
 0x5fc   :  { %v11305_v57 = vpack.c.bf16 %v9853_v48, %v9852_v25  ;;  %v9837_v40 = vadd.f32 1.0, %v11412_v35  ;;  %v9868_v49 = vmul.f32 %v9836_v39, %v9740_v51 }
 0x5fe   :  { %9974 = vst [vmem:[#allocation11 + $0x30] sm:$0xff] %v11305_v57  ;;  %v9869_v8 = vmul.f32 %v9837_v40, %v9741_v2 }
 0x600   :  { %v11313_v12 = vpack.c.bf16 %v9869_v8, %v9868_v49 }
 0x602   :  { %9982 = vst [vmem:[#allocation11 + $0x70] sm:$0xff] %v11313_v12 }
 0x623   :  { %v9617_v45 = vpop.f32.mrf.mxu1 }
 0x624   :  { %v9660_v34 = vpop.f32.mrf.mxu0  ;;  %v9618_v7 = vadd.f32 %v9617_v45, %v9575_v1 }
 0x625   :  { %v9619_v47 = vpop.f32.mrf.mxu1 }
 0x626   :  { %v9662_v24 = vpop.f32.mrf.mxu0  ;;  %v9620_v6 = vadd.f32 %v9619_v47, %v9577_v23  ;;  %v9661_v44 = vadd.f32 %v9660_v34, %v9618_v7 }
 0x627   :  { %v9621_v0 = vpop.f32.mrf.mxu1 }
 0x628   :  { %v9622_v38 = vadd.f32 %v9621_v0, %v9579_v14  ;;  %v9664_v30 = vpop.f32.mrf.mxu0  ;;  %v9663_v26 = vadd.f32 %v9662_v24, %v9620_v6 }
 0x629   :  { %v9623_v9 = vpop.f32.mrf.mxu1 }
 0x62a   :  { %v9624_v29 = vadd.f32 %v9623_v9, %v9581_v41  ;;  %v9665_v32 = vadd.f32 %v9664_v30, %v9622_v38  ;;  %v9666_v36 = vpop.f32.mrf.mxu0 }
 0x62c   :  { %v9667_v28 = vadd.f32 %v9666_v36, %v9624_v29 }
 0x663   :  { %v9703_v33 = vpop.f32.mrf.mxu1 }
 0x664   :  { %v9704_v52 = vadd.f32 %v9703_v33, %v9661_v44 }
 0x665   :  { %v9705_v53 = vpop.f32.mrf.mxu1 }
 0x666   :  { %v9758_v11 = vmul.f32 0.70710677, %v9704_v52  ;;  %v9706_v19 = vadd.f32 %v9705_v53, %v9663_v26  ;;  %v9726_v60 = vmul.f32 0.5, %v9704_v52 }
 0x667   :  { %v9707_v62 = vpop.f32.mrf.mxu1 }
 0x668   :  { %11413 = verf.f32 %v9758_v11  ;;  %v9759_v43 = vmul.f32 0.70710677, %v9706_v19  ;;  %v9708_v37 = vadd.f32 %v9707_v62, %v9665_v32  ;;  %v9727_v13 = vmul.f32 0.5, %v9706_v19 }
 0x669   :  { %v9709_v20 = vpop.f32.mrf.mxu1 }
 0x66a   :  { %11415 = verf.f32 %v9759_v43  ;;  %v9774_v5 = vmul.f32 0.70710677, %v9708_v37  ;;  %v9710_v59 = vadd.f32 %v9709_v20, %v9667_v28  ;;  %v9742_v3 = vmul.f32 0.5, %v9708_v37 }
 0x66c   :  { %11417 = verf.f32 %v9774_v5  ;;  %v9775_v56 = vmul.f32 0.70710677, %v9710_v59  ;;  %v9743_v16 = vmul.f32 0.5, %v9710_v59 }
 0x66e   :  { %11419 = verf.f32 %v9775_v56 }
 0x675   :  { %v11414_v55 = vpop.eup %11413 }
 0x676   :  { %v9822_v27 = vadd.f32 1.0, %v11414_v55 }
 0x677   :  { %v11416_v17 = vpop.eup %11415 }
 0x678   :  { %v9823_v46 = vadd.f32 1.0, %v11416_v17  ;;  %v9854_v42 = vmul.f32 %v9822_v27, %v9726_v60 }
 0x679   :  { %v11418_v22 = vpop.eup %11417 }
 0x67a   :  { %v9855_v63 = vmul.f32 %v9823_v46, %v9727_v13  ;;  %v9838_v50 = vadd.f32 1.0, %v11418_v22 }
 0x67b   :  { %v11420_v31 = vpop.eup %11419 }
 0x67c   :  { %v11306_v4 = vpack.c.bf16 %v9855_v63, %v9854_v42  ;;  %v9839_v58 = vadd.f32 1.0, %v11420_v31  ;;  %v9870_v25 = vmul.f32 %v9838_v50, %v9742_v3 }
 0x67e   :  { %9975 = vst [vmem:[#allocation11 + $0x38] sm:$0xff] %v11306_v4  ;;  %v9871_v48 = vmul.f32 %v9839_v58, %v9743_v16 }
 0x680   :  { %v11314_v39 = vpack.c.bf16 %v9871_v48, %v9870_v25 }
 0x682   :  { %9983 = vst [vmem:[#allocation11 + $0x78] sm:$0xff] %v11314_v39 }
 0x683   :  { %11535 = shalt.err (!%p11532_p1)
}
 0x684   :  { %9995 = dma.vmem_to_hbm [thread:$0]  %s9990_s4, 2048, %s11960_s5, [#allocation4], %s11556_s28, %s11556_s28, %s11557_s29  }
 0x685   :  { %11550 = dma.done.wait [#allocation4], 2048  }
 0x686   :  { %11551 = vsyncadd [#allocation4], 4294965248 }
 0x687   :  { %9999 = vsyncpa [#allocation3], 1 }
 0x688   :  { %10000 = vsyncpa [#allocation6], 1 }
 0x689   :  { %10001 = vsyncpa [#allocation9], 1 }
 0x68a   :  { %10002 = vsyncpa [#allocation4], 1 }

</bundles_post_ra>
